<compile_context>
chip_gen: v7x
topology: tpu7x:2x2x1
jax: 0.10.0
libtpu: 0.0.40
codegen_flags: <defaults>
</compile_context>

<pallas_src>
import functools

import jax
import jax.numpy as jnp
from jax.experimental import pallas as pl
from jax.experimental.pallas import tpu as pltpu  # noqa: F401  (TPU backend)


# ----------------------------------------------------------------------------
# Fused encoder-stack kernel (pos add + input linear + 5 encoder blocks)
# ----------------------------------------------------------------------------

def _encoder_stack_kernel(x_ref, pos_ref, lin_w_ref, lin_b_ref,
                          wqkv_ref, bqkv_ref, wo_ref, bo_ref,
                          *rest, num_heads, time_dims):
    # rest = (wt0T, bt0, wt1T, bt1, ..., wt4T, bt4, o_ref)
    o_ref = rest[-1]
    wt_refs = rest[:-1]

    xin = x_ref[...] + pos_ref[...]                    # (B, T0, J*C)
    B, T0, JC = xin.shape
    D = lin_w_ref.shape[1]
    Dh = D // num_heads

    # Input linear (J*C -> d_model).  BatchNorm1d(old_frames) at init/eval == identity.
    h = jnp.dot(xin.reshape(B * T0, JC), lin_w_ref[...],
                preferred_element_type=jnp.float32) + lin_b_ref[...]
    x = h.reshape(B, T0, D)

    for blk, (t_in, t_out) in enumerate(time_dims):
        wqkv = wqkv_ref[blk]                           # (D, 3D)  (scale folded in Wq)
        bqkv = bqkv_ref[blk]                           # (1, 3D)
        wo = wo_ref[blk]                               # (D, D)
        bo = bo_ref[blk]                               # (1, D)
        wtT = wt_refs[2 * blk][...]                    # (t_out, t_in)
        bt = wt_refs[2 * blk + 1][...]                 # (t_out, 1)

        # Fused Q/K/V projection.
        xf = x.reshape(B * t_in, D)
        qkv = jnp.dot(xf, wqkv, preferred_element_type=jnp.float32) + bqkv
        qkv = qkv.reshape(B, t_in, 3 * D)
        q = qkv[:, :, 0:D]
        k = qkv[:, :, D:2 * D]
        v = qkv[:, :, 2 * D:3 * D]

        # Per-head attention via static lane slices (no HBM transposes).
        head_outs = []
        for hd in range(num_heads):
            lo = hd * Dh
            hi = lo + Dh
            qh = q[:, :, lo:hi]
            kh = k[:, :, lo:hi]
            vh = v[:, :, lo:hi]
            s = jnp.einsum("bqd,bkd->bqk", qh, kh,
                           preferred_element_type=jnp.float32)
            s = s - jnp.max(s, axis=-1, keepdims=True)
            p = jnp.exp(s)
            p = p * pl.reciprocal(jnp.sum(p, axis=-1, keepdims=True), approx=True)
            head_outs.append(jnp.einsum("bqk,bkd->bqd", p, vh,
                                        preferred_element_type=jnp.float32))
        attn = jnp.concatenate(head_outs, axis=-1)     # (B, t_in, D)

        proj = jnp.dot(attn.reshape(B * t_in, D), wo,
                       preferred_element_type=jnp.float32) + bo
        x = x + proj.reshape(B, t_in, D)               # residual

        # Temporal down-sampling: contract time, keep D on the lane axis.
        rows = []
        for b in range(B):
            rows.append(jnp.dot(wtT, x[b], preferred_element_type=jnp.float32) + bt)
        x = jnp.maximum(jnp.stack(rows, axis=0), 0.0)  # (B, t_out, D), ReLU

    o_ref[...] = x                                     # (B, T_last, D)


def encoder_stack_forward(xf, params, *, num_heads, time_dims):
    B, T0, _ = xf.shape
    D = params["lin_w"].shape[1]
    T_last = time_dims[-1][1]
    wt_args = []
    for (wtT, bt) in params["wt"]:
        wt_args += [wtT, bt]
    kernel = functools.partial(_encoder_stack_kernel,
                               num_heads=num_heads, time_dims=tuple(time_dims))
    return pl.pallas_call(
        kernel,
        out_shape=jax.ShapeDtypeStruct((B, T_last, D), jnp.float32),
    )(xf, params["pos"], params["lin_w"], params["lin_b"],
      params["wqkv"], params["bqkv"], params["wo"], params["bo"], *wt_args)


# ----------------------------------------------------------------------------
# Fused decoder kernel (VAE head + all-prediction GRU unroll + output linear)
# ----------------------------------------------------------------------------

def _decoder_kernel(h_ref, eps_ref, wmu_ref, bmu_ref, wlv_ref, blv_ref,
                    wz_ref, bz_ref, wi_ref, wh_ref, bi_ref, bh_ref,
                    wout_ref, bout_ref, out_ref, kl_ref, *, num_steps):
    h = h_ref[...]                                     # (N, D)
    N = h.shape[0]
    D = wh_ref.shape[0]
    eps = eps_ref[...]                                 # (P*N, L)
    PN = eps.shape[0]
    P = PN // N
    out_pad = wout_ref.shape[1]

    mu = jnp.dot(h, wmu_ref[...], preferred_element_type=jnp.float32) + bmu_ref[...]
    logvar = jnp.dot(h, wlv_ref[...], preferred_element_type=jnp.float32) + blv_ref[...]
    # KL terms per context row; final -0.5*mean is done outside (scalar glue).
    kl_ref[...] = jnp.sum(1.0 + logvar - mu * mu - jnp.exp(logvar),
                          axis=-1, keepdims=True)

    # Reparameterize all P predictions at once.
    mu_t = jnp.tile(mu, (P, 1))                        # (P*N, L)
    lv_t = jnp.tile(logvar, (P, 1))
    z = mu_t + jnp.exp(0.5 * lv_t) * eps
    hdec = jnp.tanh(jnp.dot(z, wz_ref[...], preferred_element_type=jnp.float32)
                    + bz_ref[...])                     # (P*N, D)

    wi = wi_ref[...]                                   # (out_pad, 3D)
    wh = wh_ref[...]                                   # (D, 3D)
    bi = bi_ref[...]
    bh = bh_ref[...]
    wout = wout_ref[...]                               # (D, out_pad)
    bout = bout_ref[...]

    inp = jnp.zeros((PN, out_pad), jnp.float32)
    for step in range(num_steps):                      # fully unrolled recurrence
        gi = jnp.dot(inp, wi, preferred_element_type=jnp.float32) + bi    # (P*N, 3D)
        gh = jnp.dot(hdec, wh, preferred_element_type=jnp.float32) + bh   # (P*N, 3D)
        r = jax.nn.sigmoid(gi[:, 0:D] + gh[:, 0:D])
        zg = jax.nn.sigmoid(gi[:, D:2 * D] + gh[:, D:2 * D])
        n = jnp.tanh(gi[:, 2 * D:3 * D] + r * gh[:, 2 * D:3 * D])
        hdec = (1.0 - zg) * n + zg * hdec
        out = jnp.dot(hdec, wout, preferred_element_type=jnp.float32) + bout
        out_ref[step, :, :] = out                      # lane-dense (P*N, 128) store
        inp = out


def decoder_call(context, eps, dec, *, num_steps):
    N, _ = context.shape
    PN = eps.shape[0]
    out_pad = dec["wout"].shape[1]
    kernel = functools.partial(_decoder_kernel, num_steps=num_steps)
    res, kl_terms = pl.pallas_call(
        kernel,
        out_shape=(jax.ShapeDtypeStruct((num_steps, PN, out_pad), jnp.float32),
                   jax.ShapeDtypeStruct((N, 1), jnp.float32)),
    )(context, eps, dec["wmu"], dec["bmu"], dec["wlv"], dec["blv"],
      dec["wz"], dec["bz"], dec["wi"], dec["wh"], dec["bi"], dec["bh"],
      dec["wout"], dec["bout"])
    return res, kl_terms


# ----------------------------------------------------------------------------
# Parameter init (deterministic, kaiming-normal like the PyTorch module)
# ----------------------------------------------------------------------------

def kaiming(key, shape, fan_in):
    return (jnp.sqrt(2.0 / fan_in)
            * jax.random.normal(key, shape, dtype=jnp.float32))


def sinusoidal_pos_embed(C, T, J):
    # (1, C, T, J) sinusoidal embedding over flattened (T*J) positions.
    pos = jnp.arange(T * J, dtype=jnp.float32)[:, None]            # (TJ, 1)
    i = jnp.arange(C, dtype=jnp.float32)[None, :]                   # (1, C)
    angle = pos / jnp.power(10000.0, (2.0 * jnp.floor(i / 2.0)) / C)
    pe = jnp.where((jnp.arange(C) % 2 == 0)[None, :],
                   jnp.sin(angle), jnp.cos(angle))                  # (TJ, C)
    return jnp.transpose(pe.reshape(T, J, C), (2, 0, 1))[None]      # (1, C, T, J)


def init_model_params(key, *, C, T, J, d_model, num_heads, latent, config,
                      out_dim, out_pad):
    keys = iter(jax.random.split(key, 256))

    def nk():
        return next(keys)

    D = d_model
    Dh = D // num_heads
    scale = 1.0 / float(Dh) ** 0.5

    params = {}
    in_dim = C * J
    params["lin_w"] = kaiming(nk(), (in_dim, D), in_dim)
    params["lin_b"] = jnp.zeros((1, D), jnp.float32)
    pos = sinusoidal_pos_embed(C, T, J)                             # (1, C, T, J)
    # Pre-permute so the (permute + add + permute back) of the reference forward
    # collapses to a single add on (B, T, J*C).
    params["pos"] = jnp.transpose(pos, (0, 2, 3, 1)).reshape(1, T, J * C)

    wqkv_l, bqkv_l, wo_l, bo_l, wt_l = [], [], [], [], []
    for (d_, t_in, t_out) in config:
        assert d_ == D
        wq = kaiming(nk(), (d_, d_), d_) * scale     # fold 1/sqrt(Dh) into Wq
        wk = kaiming(nk(), (d_, d_), d_)
        wv = kaiming(nk(), (d_, d_), d_)
        wo = kaiming(nk(), (d_, d_), d_)
        wqkv_l.append(jnp.concatenate([wq, wk, wv], axis=1))        # (D, 3D)
        bqkv_l.append(jnp.zeros((1, 3 * d_), jnp.float32))
        wo_l.append(wo)
        bo_l.append(jnp.zeros((1, d_), jnp.float32))
        wt = kaiming(nk(), (t_in, t_out), t_in)
        wt_l.append((jnp.transpose(wt),                             # (t_out, t_in)
                     jnp.zeros((t_out, 1), jnp.float32)))
    params["wqkv"] = jnp.stack(wqkv_l)                              # (NB, D, 3D)
    params["bqkv"] = jnp.stack(bqkv_l)                              # (NB, 1, 3D)
    params["wo"] = jnp.stack(wo_l)                                  # (NB, D, D)
    params["bo"] = jnp.stack(bo_l)                                  # (NB, 1, D)
    params["wt"] = wt_l

    # GRU gate weights concatenated: [r | z | n], and out_dim padded to out_pad.
    wi = jnp.concatenate([kaiming(nk(), (out_dim, D), out_dim) for _ in range(3)],
                         axis=1)                                    # (66, 3D)
    wi = jnp.pad(wi, ((0, out_pad - out_dim), (0, 0)))              # (128, 3D)
    wh = jnp.concatenate([kaiming(nk(), (D, D), D) for _ in range(3)], axis=1)
    wout = jnp.pad(kaiming(nk(), (D, out_dim), D),
                   ((0, 0), (0, out_pad - out_dim)))                # (D, 128)

    params["dec"] = {
        "wmu": kaiming(nk(), (D, latent), D),
        "bmu": jnp.zeros((1, latent), jnp.float32),
        "wlv": kaiming(nk(), (D, latent), D),
        "blv": jnp.zeros((1, latent), jnp.float32),
        "wz": kaiming(nk(), (latent, D), latent),
        "bz": jnp.zeros((1, D), jnp.float32),
        "wi": wi, "wh": wh,
        "bi": jnp.zeros((1, 3 * D), jnp.float32),
        "bh": jnp.zeros((1, 3 * D), jnp.float32),
        "wout": wout,
        "bout": jnp.zeros((1, out_pad), jnp.float32),
    }
    return params


# ----------------------------------------------------------------------------
# Model forward (2 fused Pallas kernels + trivial JAX glue)
# ----------------------------------------------------------------------------

def model_forward(x, params, key, *, C, T, J, d_model, num_heads,
                  num_frames_out, num_predictions, latent, time_dims):
    out_dim = 22 * 3            # fixed by the reference forward (view ... 22, 3)
    B = x.shape[0]

    # view(-1, T, J, C).permute(0,3,1,2) + pos, permute back, flatten joints:
    # equivalent to adding a pre-permuted pos on (B, T, J*C).
    xf = x.reshape(B, T, J * C)

    h_last = encoder_stack_forward(xf, params, num_heads=num_heads,
                                   time_dims=time_dims)             # (B, T_last, D)
    context = h_last.reshape(-1, d_model)                           # (N, D)
    N = context.shape[0]

    eps = jax.random.normal(key, (num_predictions * N, latent), dtype=jnp.float32)
    res, kl_terms = decoder_call(context, eps, params["dec"],
                                 num_steps=num_frames_out)
    # res: (F, P*N, out_pad) -> slice padding, average over predictions.
    res = res[:, :, :out_dim].reshape(num_frames_out, num_predictions, N, out_dim)
    avg = jnp.mean(res, axis=1)                                     # (F, N, 66)
    avg_kl = -0.5 * jnp.mean(kl_terms)                              # same per-prediction
    return avg, avg_kl


# ----------------------------------------------------------------------------
# Main
# ----------------------------------------------------------------------------

if __name__ == "__main__":
    # Small, forward-consistent shapes (old_frames=10 forced by default config).
    B, T, J, C = 2, 10, 22, 3
    d_model, num_heads = 64, 4
    num_frames_out = 8
    num_predictions = 2
    latent = 16
    out_dim = 22 * 3
    out_pad = 128
    config = [[d_model, 10, 8], [d_model, 8, 6], [d_model, 6, 4],
              [d_model, 4, 2], [d_model, 2, 1]]
    time_dims = tuple((t_in, t_out) for (_, t_in, t_out) in config)

    key = jax.random.PRNGKey(0)
    pkey, xkey, skey = jax.random.split(key, 3)

    params = init_model_params(pkey, C=C, T=T, J=J, d_model=d_model,
                               num_heads=num_heads, latent=latent,
                               config=config, out_dim=out_dim, out_pad=out_pad)
    x = jax.random.normal(xkey, (B, T, J, C), dtype=jnp.float32)

    fwd = jax.jit(functools.partial(
        model_forward, C=C, T=T, J=J, d_model=d_model, num_heads=num_heads,
        num_frames_out=num_frames_out, num_predictions=num_predictions,
        latent=latent, time_dims=time_dims))

    out, avg_kl = fwd(x, params, skey)
    jax.block_until_ready(out)
    jax.block_until_ready(avg_kl)

    assert out.shape == (num_frames_out, B, out_dim), out.shape
    assert avg_kl.shape == (), avg_kl.shape
    assert bool(jnp.all(jnp.isfinite(out)))
    print("KERNEL_OK")
</pallas_src>

<mosaic_0001>
module attributes {stable_mosaic.version = 11 : i64} {
  func.func @_decoder_kernel(%arg0: memref<2x64xf32, #tpu.memory_space<vmem>>, %arg1: memref<4x16xf32, #tpu.memory_space<vmem>>, %arg2: memref<64x16xf32, #tpu.memory_space<vmem>>, %arg3: memref<1x16xf32, #tpu.memory_space<vmem>>, %arg4: memref<64x16xf32, #tpu.memory_space<vmem>>, %arg5: memref<1x16xf32, #tpu.memory_space<vmem>>, %arg6: memref<16x64xf32, #tpu.memory_space<vmem>>, %arg7: memref<1x64xf32, #tpu.memory_space<vmem>>, %arg8: memref<128x192xf32, #tpu.memory_space<vmem>>, %arg9: memref<64x192xf32, #tpu.memory_space<vmem>>, %arg10: memref<1x192xf32, #tpu.memory_space<vmem>>, %arg11: memref<1x192xf32, #tpu.memory_space<vmem>>, %arg12: memref<64x128xf32, #tpu.memory_space<vmem>>, %arg13: memref<1x128xf32, #tpu.memory_space<vmem>>, %arg14: memref<8x4x128xf32, #tpu.memory_space<vmem>>, %arg15: memref<2x1xf32, #tpu.memory_space<vmem>>) attributes {dimension_semantics = [], scalar_prefetch = 0 : i64, scratch_operands = 0 : i64, tpu.core_type = #tpu.core_type<tc>} {
    %c0 = arith.constant 0 : index
    %c0_0 = arith.constant 0 : index
    %0 = vector.load %arg0[%c0, %c0_0] : memref<2x64xf32, #tpu.memory_space<vmem>>, vector<2x64xf32>
    %c0_1 = arith.constant 0 : index
    %c0_2 = arith.constant 0 : index
    %1 = vector.load %arg1[%c0_1, %c0_2] : memref<4x16xf32, #tpu.memory_space<vmem>>, vector<4x16xf32>
    %c0_3 = arith.constant 0 : index
    %c0_4 = arith.constant 0 : index
    %2 = vector.load %arg2[%c0_3, %c0_4] : memref<64x16xf32, #tpu.memory_space<vmem>>, vector<64x16xf32>
    %cst = arith.constant dense<0.000000e+00> : vector<2x16xf32>
    %3 = tpu.matmul %0, %2, %cst {dimension_numbers = #tpu.dot_dimension_numbers<[1], [0], [0], [1], [0, 0, 1, 1], [], []>} : vector<2x64xf32>, vector<64x16xf32>, vector<2x16xf32> -> vector<2x16xf32>
    %c0_5 = arith.constant 0 : index
    %c0_6 = arith.constant 0 : index
    %4 = vector.load %arg3[%c0_5, %c0_6] : memref<1x16xf32, #tpu.memory_space<vmem>>, vector<1x16xf32>
    %5 = vector.broadcast %4 : vector<1x16xf32> to vector<2x16xf32>
    %6 = arith.addf %3, %5 : vector<2x16xf32>
    %c0_7 = arith.constant 0 : index
    %c0_8 = arith.constant 0 : index
    %7 = vector.load %arg4[%c0_7, %c0_8] : memref<64x16xf32, #tpu.memory_space<vmem>>, vector<64x16xf32>
    %cst_9 = arith.constant dense<0.000000e+00> : vector<2x16xf32>
    %8 = tpu.matmul %0, %7, %cst_9 {dimension_numbers = #tpu.dot_dimension_numbers<[1], [0], [0], [1], [0, 0, 1, 1], [], []>} : vector<2x64xf32>, vector<64x16xf32>, vector<2x16xf32> -> vector<2x16xf32>
    %c0_10 = arith.constant 0 : index
    %c0_11 = arith.constant 0 : index
    %9 = vector.load %arg5[%c0_10, %c0_11] : memref<1x16xf32, #tpu.memory_space<vmem>>, vector<1x16xf32>
    %10 = vector.broadcast %9 : vector<1x16xf32> to vector<2x16xf32>
    %11 = arith.addf %8, %10 : vector<2x16xf32>
    %cst_12 = arith.constant 1.000000e+00 : f32
    %12 = vector.broadcast %cst_12 : f32 to vector<2x16xf32>
    %13 = arith.addf %12, %11 : vector<2x16xf32>
    %14 = arith.mulf %6, %6 : vector<2x16xf32>
    %15 = arith.subf %13, %14 : vector<2x16xf32>
    %16 = math.exp %11 : vector<2x16xf32>
    %17 = arith.subf %15, %16 : vector<2x16xf32>
    %cst_13 = arith.constant dense<0.000000e+00> : vector<2xf32>
    %18 = vector.multi_reduction <add>, %17, %cst_13 [1] : vector<2x16xf32> to vector<2xf32>
    %19 = vector.shape_cast %18 : vector<2xf32> to vector<2x1xf32>
    %c0_14 = arith.constant 0 : index
    %c0_15 = arith.constant 0 : index
    %20 = vector.load %arg15[%c0_14, %c0_15] : memref<2x1xf32, #tpu.memory_space<vmem>>, vector<2x1xf32>
    tpu.vector_store %arg15[%c0_14, %c0_15], %19 {strides = array<i32>} : memref<2x1xf32, #tpu.memory_space<vmem>>, vector<2x1xf32>,
    %21 = tpu.concatenate %6, %6 in 0 : vector<2x16xf32>, vector<2x16xf32> -> vector<4x16xf32>
    %22 = tpu.concatenate %11, %11 in 0 : vector<2x16xf32>, vector<2x16xf32> -> vector<4x16xf32>
    %cst_16 = arith.constant 5.000000e-01 : f32
    %23 = vector.broadcast %cst_16 : f32 to vector<4x16xf32>
    %24 = arith.mulf %23, %22 : vector<4x16xf32>
    %25 = math.exp %24 : vector<4x16xf32>
    %26 = arith.mulf %25, %1 : vector<4x16xf32>
    %27 = arith.addf %21, %26 : vector<4x16xf32>
    %c0_17 = arith.constant 0 : index
    %c0_18 = arith.constant 0 : index
    %28 = vector.load %arg6[%c0_17, %c0_18] : memref<16x64xf32, #tpu.memory_space<vmem>>, vector<16x64xf32>
    %cst_19 = arith.constant dense<0.000000e+00> : vector<4x64xf32>
    %29 = tpu.matmul %27, %28, %cst_19 {dimension_numbers = #tpu.dot_dimension_numbers<[1], [0], [0], [1], [0, 0, 1, 1], [], []>} : vector<4x16xf32>, vector<16x64xf32>, vector<4x64xf32> -> vector<4x64xf32>
    %c0_20 = arith.constant 0 : index
    %c0_21 = arith.constant 0 : index
    %30 = vector.load %arg7[%c0_20, %c0_21] : memref<1x64xf32, #tpu.memory_space<vmem>>, vector<1x64xf32>
    %31 = vector.broadcast %30 : vector<1x64xf32> to vector<4x64xf32>
    %32 = arith.addf %29, %31 : vector<4x64xf32>
    %33 = math.tanh %32 : vector<4x64xf32>
    %c0_22 = arith.constant 0 : index
    %c0_23 = arith.constant 0 : index
    %34 = vector.load %arg8[%c0_22, %c0_23] : memref<128x192xf32, #tpu.memory_space<vmem>>, vector<128x192xf32>
    %c0_24 = arith.constant 0 : index
    %c0_25 = arith.constant 0 : index
    %35 = vector.load %arg9[%c0_24, %c0_25] : memref<64x192xf32, #tpu.memory_space<vmem>>, vector<64x192xf32>
    %c0_26 = arith.constant 0 : index
    %c0_27 = arith.constant 0 : index
    %36 = vector.load %arg10[%c0_26, %c0_27] : memref<1x192xf32, #tpu.memory_space<vmem>>, vector<1x192xf32>
    %c0_28 = arith.constant 0 : index
    %c0_29 = arith.constant 0 : index
    %37 = vector.load %arg11[%c0_28, %c0_29] : memref<1x192xf32, #tpu.memory_space<vmem>>, vector<1x192xf32>
    %c0_30 = arith.constant 0 : index
    %c0_31 = arith.constant 0 : index
    %38 = vector.load %arg12[%c0_30, %c0_31] : memref<64x128xf32, #tpu.memory_space<vmem>>, vector<64x128xf32>
    %c0_32 = arith.constant 0 : index
    %c0_33 = arith.constant 0 : index
    %39 = vector.load %arg13[%c0_32, %c0_33] : memref<1x128xf32, #tpu.memory_space<vmem>>, vector<1x128xf32>
    %cst_34 = arith.constant 0.000000e+00 : f32
    %40 = vector.broadcast %cst_34 : f32 to vector<4x128xf32>
    %cst_35 = arith.constant dense<0.000000e+00> : vector<4x192xf32>
    %41 = tpu.matmul %40, %34, %cst_35 {dimension_numbers = #tpu.dot_dimension_numbers<[1], [0], [0], [1], [0, 0, 1, 1], [], []>} : vector<4x128xf32>, vector<128x192xf32>, vector<4x192xf32> -> vector<4x192xf32>
    %42 = vector.broadcast %36 : vector<1x192xf32> to vector<4x192xf32>
    %43 = arith.addf %41, %42 : vector<4x192xf32>
    %cst_36 = arith.constant dense<0.000000e+00> : vector<4x192xf32>
    %44 = tpu.matmul %33, %35, %cst_36 {dimension_numbers = #tpu.dot_dimension_numbers<[1], [0], [0], [1], [0, 0, 1, 1], [], []>} : vector<4x64xf32>, vector<64x192xf32>, vector<4x192xf32> -> vector<4x192xf32>
    %45 = vector.broadcast %37 : vector<1x192xf32> to vector<4x192xf32>
    %46 = arith.addf %44, %45 : vector<4x192xf32>
    %47 = vector.extract_strided_slice %43 {offsets = [0, 0], sizes = [4, 64], strides = [1, 1]} : vector<4x192xf32> to vector<4x64xf32>
    %48 = vector.extract_strided_slice %46 {offsets = [0, 0], sizes = [4, 64], strides = [1, 1]} : vector<4x192xf32> to vector<4x64xf32>
    %49 = arith.addf %47, %48 : vector<4x64xf32>
    %50 = arith.negf %49 : vector<4x64xf32>
    %51 = math.exp %50 : vector<4x64xf32>
    %cst_37 = arith.constant 1.000000e+00 : f32
    %52 = vector.broadcast %cst_37 : f32 to vector<4x64xf32>
    %53 = arith.addf %52, %51 : vector<4x64xf32>
    %54 = arith.divf %52, %53 : vector<4x64xf32>
    %55 = vector.extract_strided_slice %43 {offsets = [0, 64], sizes = [4, 64], strides = [1, 1]} : vector<4x192xf32> to vector<4x64xf32>
    %56 = vector.extract_strided_slice %46 {offsets = [0, 64], sizes = [4, 64], strides = [1, 1]} : vector<4x192xf32> to vector<4x64xf32>
    %57 = arith.addf %55, %56 : vector<4x64xf32>
    %58 = arith.negf %57 : vector<4x64xf32>
    %59 = math.exp %58 : vector<4x64xf32>
    %cst_38 = arith.constant 1.000000e+00 : f32
    %60 = vector.broadcast %cst_38 : f32 to vector<4x64xf32>
    %61 = arith.addf %60, %59 : vector<4x64xf32>
    %62 = arith.divf %60, %61 : vector<4x64xf32>
    %63 = vector.extract_strided_slice %43 {offsets = [0, 128], sizes = [4, 64], strides = [1, 1]} : vector<4x192xf32> to vector<4x64xf32>
    %64 = vector.extract_strided_slice %46 {offsets = [0, 128], sizes = [4, 64], strides = [1, 1]} : vector<4x192xf32> to vector<4x64xf32>
    %65 = arith.mulf %54, %64 : vector<4x64xf32>
    %66 = arith.addf %63, %65 : vector<4x64xf32>
    %67 = math.tanh %66 : vector<4x64xf32>
    %cst_39 = arith.constant 1.000000e+00 : f32
    %68 = vector.broadcast %cst_39 : f32 to vector<4x64xf32>
    %69 = arith.subf %68, %62 : vector<4x64xf32>
    %70 = arith.mulf %69, %67 : vector<4x64xf32>
    %71 = arith.mulf %62, %33 : vector<4x64xf32>
    %72 = arith.addf %70, %71 : vector<4x64xf32>
    %cst_40 = arith.constant dense<0.000000e+00> : vector<4x128xf32>
    %73 = tpu.matmul %72, %38, %cst_40 {dimension_numbers = #tpu.dot_dimension_numbers<[1], [0], [0], [1], [0, 0, 1, 1], [], []>} : vector<4x64xf32>, vector<64x128xf32>, vector<4x128xf32> -> vector<4x128xf32>
    %74 = vector.broadcast %39 : vector<1x128xf32> to vector<4x128xf32>
    %75 = arith.addf %73, %74 : vector<4x128xf32>
    %c0_41 = arith.constant 0 : index
    %c0_42 = arith.constant 0 : index
    %c0_43 = arith.constant 0 : index
    %76 = vector.load %arg14[%c0_41, %c0_42, %c0_43] : memref<8x4x128xf32, #tpu.memory_space<vmem>>, vector<1x4x128xf32>
    %77 = vector.shape_cast %76 : vector<1x4x128xf32> to vector<4x128xf32>
    %78 = vector.shape_cast %75 : vector<4x128xf32> to vector<1x4x128xf32>
    tpu.vector_store %arg14[%c0_41, %c0_42, %c0_43], %78 {strides = array<i32>} : memref<8x4x128xf32, #tpu.memory_space<vmem>>, vector<1x4x128xf32>,
    %cst_44 = arith.constant dense<0.000000e+00> : vector<4x192xf32>
    %79 = tpu.matmul %75, %34, %cst_44 {dimension_numbers = #tpu.dot_dimension_numbers<[1], [0], [0], [1], [0, 0, 1, 1], [], []>} : vector<4x128xf32>, vector<128x192xf32>, vector<4x192xf32> -> vector<4x192xf32>
    %80 = vector.broadcast %36 : vector<1x192xf32> to vector<4x192xf32>
    %81 = arith.addf %79, %80 : vector<4x192xf32>
    %cst_45 = arith.constant dense<0.000000e+00> : vector<4x192xf32>
    %82 = tpu.matmul %72, %35, %cst_45 {dimension_numbers = #tpu.dot_dimension_numbers<[1], [0], [0], [1], [0, 0, 1, 1], [], []>} : vector<4x64xf32>, vector<64x192xf32>, vector<4x192xf32> -> vector<4x192xf32>
    %83 = vector.broadcast %37 : vector<1x192xf32> to vector<4x192xf32>
    %84 = arith.addf %82, %83 : vector<4x192xf32>
    %85 = vector.extract_strided_slice %81 {offsets = [0, 0], sizes = [4, 64], strides = [1, 1]} : vector<4x192xf32> to vector<4x64xf32>
    %86 = vector.extract_strided_slice %84 {offsets = [0, 0], sizes = [4, 64], strides = [1, 1]} : vector<4x192xf32> to vector<4x64xf32>
    %87 = arith.addf %85, %86 : vector<4x64xf32>
    %88 = arith.negf %87 : vector<4x64xf32>
    %89 = math.exp %88 : vector<4x64xf32>
    %cst_46 = arith.constant 1.000000e+00 : f32
    %90 = vector.broadcast %cst_46 : f32 to vector<4x64xf32>
    %91 = arith.addf %90, %89 : vector<4x64xf32>
    %92 = arith.divf %90, %91 : vector<4x64xf32>
    %93 = vector.extract_strided_slice %81 {offsets = [0, 64], sizes = [4, 64], strides = [1, 1]} : vector<4x192xf32> to vector<4x64xf32>
    %94 = vector.extract_strided_slice %84 {offsets = [0, 64], sizes = [4, 64], strides = [1, 1]} : vector<4x192xf32> to vector<4x64xf32>
    %95 = arith.addf %93, %94 : vector<4x64xf32>
    %96 = arith.negf %95 : vector<4x64xf32>
    %97 = math.exp %96 : vector<4x64xf32>
    %cst_47 = arith.constant 1.000000e+00 : f32
    %98 = vector.broadcast %cst_47 : f32 to vector<4x64xf32>
    %99 = arith.addf %98, %97 : vector<4x64xf32>
    %100 = arith.divf %98, %99 : vector<4x64xf32>
    %101 = vector.extract_strided_slice %81 {offsets = [0, 128], sizes = [4, 64], strides = [1, 1]} : vector<4x192xf32> to vector<4x64xf32>
    %102 = vector.extract_strided_slice %84 {offsets = [0, 128], sizes = [4, 64], strides = [1, 1]} : vector<4x192xf32> to vector<4x64xf32>
    %103 = arith.mulf %92, %102 : vector<4x64xf32>
    %104 = arith.addf %101, %103 : vector<4x64xf32>
    %105 = math.tanh %104 : vector<4x64xf32>
    %cst_48 = arith.constant 1.000000e+00 : f32
    %106 = vector.broadcast %cst_48 : f32 to vector<4x64xf32>
    %107 = arith.subf %106, %100 : vector<4x64xf32>
    %108 = arith.mulf %107, %105 : vector<4x64xf32>
    %109 = arith.mulf %100, %72 : vector<4x64xf32>
    %110 = arith.addf %108, %109 : vector<4x64xf32>
    %cst_49 = arith.constant dense<0.000000e+00> : vector<4x128xf32>
    %111 = tpu.matmul %110, %38, %cst_49 {dimension_numbers = #tpu.dot_dimension_numbers<[1], [0], [0], [1], [0, 0, 1, 1], [], []>} : vector<4x64xf32>, vector<64x128xf32>, vector<4x128xf32> -> vector<4x128xf32>
    %112 = vector.broadcast %39 : vector<1x128xf32> to vector<4x128xf32>
    %113 = arith.addf %111, %112 : vector<4x128xf32>
    %c1 = arith.constant 1 : index
    %c0_50 = arith.constant 0 : index
    %c0_51 = arith.constant 0 : index
    %114 = vector.load %arg14[%c1, %c0_50, %c0_51] : memref<8x4x128xf32, #tpu.memory_space<vmem>>, vector<1x4x128xf32>
    %115 = vector.shape_cast %114 : vector<1x4x128xf32> to vector<4x128xf32>
    %116 = vector.shape_cast %113 : vector<4x128xf32> to vector<1x4x128xf32>
    tpu.vector_store %arg14[%c1, %c0_50, %c0_51], %116 {strides = array<i32>} : memref<8x4x128xf32, #tpu.memory_space<vmem>>, vector<1x4x128xf32>,
    %cst_52 = arith.constant dense<0.000000e+00> : vector<4x192xf32>
    %117 = tpu.matmul %113, %34, %cst_52 {dimension_numbers = #tpu.dot_dimension_numbers<[1], [0], [0], [1], [0, 0, 1, 1], [], []>} : vector<4x128xf32>, vector<128x192xf32>, vector<4x192xf32> -> vector<4x192xf32>
    %118 = vector.broadcast %36 : vector<1x192xf32> to vector<4x192xf32>
    %119 = arith.addf %117, %118 : vector<4x192xf32>
    %cst_53 = arith.constant dense<0.000000e+00> : vector<4x192xf32>
    %120 = tpu.matmul %110, %35, %cst_53 {dimension_numbers = #tpu.dot_dimension_numbers<[1], [0], [0], [1], [0, 0, 1, 1], [], []>} : vector<4x64xf32>, vector<64x192xf32>, vector<4x192xf32> -> vector<4x192xf32>
    %121 = vector.broadcast %37 : vector<1x192xf32> to vector<4x192xf32>
    %122 = arith.addf %120, %121 : vector<4x192xf32>
    %123 = vector.extract_strided_slice %119 {offsets = [0, 0], sizes = [4, 64], strides = [1, 1]} : vector<4x192xf32> to vector<4x64xf32>
    %124 = vector.extract_strided_slice %122 {offsets = [0, 0], sizes = [4, 64], strides = [1, 1]} : vector<4x192xf32> to vector<4x64xf32>
    %125 = arith.addf %123, %124 : vector<4x64xf32>
    %126 = arith.negf %125 : vector<4x64xf32>
    %127 = math.exp %126 : vector<4x64xf32>
    %cst_54 = arith.constant 1.000000e+00 : f32
    %128 = vector.broadcast %cst_54 : f32 to vector<4x64xf32>
    %129 = arith.addf %128, %127 : vector<4x64xf32>
    %130 = arith.divf %128, %129 : vector<4x64xf32>
    %131 = vector.extract_strided_slice %119 {offsets = [0, 64], sizes = [4, 64], strides = [1, 1]} : vector<4x192xf32> to vector<4x64xf32>
    %132 = vector.extract_strided_slice %122 {offsets = [0, 64], sizes = [4, 64], strides = [1, 1]} : vector<4x192xf32> to vector<4x64xf32>
    %133 = arith.addf %131, %132 : vector<4x64xf32>
    %134 = arith.negf %133 : vector<4x64xf32>
    %135 = math.exp %134 : vector<4x64xf32>
    %cst_55 = arith.constant 1.000000e+00 : f32
    %136 = vector.broadcast %cst_55 : f32 to vector<4x64xf32>
    %137 = arith.addf %136, %135 : vector<4x64xf32>
    %138 = arith.divf %136, %137 : vector<4x64xf32>
    %139 = vector.extract_strided_slice %119 {offsets = [0, 128], sizes = [4, 64], strides = [1, 1]} : vector<4x192xf32> to vector<4x64xf32>
    %140 = vector.extract_strided_slice %122 {offsets = [0, 128], sizes = [4, 64], strides = [1, 1]} : vector<4x192xf32> to vector<4x64xf32>
    %141 = arith.mulf %130, %140 : vector<4x64xf32>
    %142 = arith.addf %139, %141 : vector<4x64xf32>
    %143 = math.tanh %142 : vector<4x64xf32>
    %cst_56 = arith.constant 1.000000e+00 : f32
    %144 = vector.broadcast %cst_56 : f32 to vector<4x64xf32>
    %145 = arith.subf %144, %138 : vector<4x64xf32>
    %146 = arith.mulf %145, %143 : vector<4x64xf32>
    %147 = arith.mulf %138, %110 : vector<4x64xf32>
    %148 = arith.addf %146, %147 : vector<4x64xf32>
    %cst_57 = arith.constant dense<0.000000e+00> : vector<4x128xf32>
    %149 = tpu.matmul %148, %38, %cst_57 {dimension_numbers = #tpu.dot_dimension_numbers<[1], [0], [0], [1], [0, 0, 1, 1], [], []>} : vector<4x64xf32>, vector<64x128xf32>, vector<4x128xf32> -> vector<4x128xf32>
    %150 = vector.broadcast %39 : vector<1x128xf32> to vector<4x128xf32>
    %151 = arith.addf %149, %150 : vector<4x128xf32>
    %c2 = arith.constant 2 : index
    %c0_58 = arith.constant 0 : index
    %c0_59 = arith.constant 0 : index
    %152 = vector.load %arg14[%c2, %c0_58, %c0_59] : memref<8x4x128xf32, #tpu.memory_space<vmem>>, vector<1x4x128xf32>
    %153 = vector.shape_cast %152 : vector<1x4x128xf32> to vector<4x128xf32>
    %154 = vector.shape_cast %151 : vector<4x128xf32> to vector<1x4x128xf32>
    tpu.vector_store %arg14[%c2, %c0_58, %c0_59], %154 {strides = array<i32>} : memref<8x4x128xf32, #tpu.memory_space<vmem>>, vector<1x4x128xf32>,
    %cst_60 = arith.constant dense<0.000000e+00> : vector<4x192xf32>
    %155 = tpu.matmul %151, %34, %cst_60 {dimension_numbers = #tpu.dot_dimension_numbers<[1], [0], [0], [1], [0, 0, 1, 1], [], []>} : vector<4x128xf32>, vector<128x192xf32>, vector<4x192xf32> -> vector<4x192xf32>
    %156 = vector.broadcast %36 : vector<1x192xf32> to vector<4x192xf32>
    %157 = arith.addf %155, %156 : vector<4x192xf32>
    %cst_61 = arith.constant dense<0.000000e+00> : vector<4x192xf32>
    %158 = tpu.matmul %148, %35, %cst_61 {dimension_numbers = #tpu.dot_dimension_numbers<[1], [0], [0], [1], [0, 0, 1, 1], [], []>} : vector<4x64xf32>, vector<64x192xf32>, vector<4x192xf32> -> vector<4x192xf32>
    %159 = vector.broadcast %37 : vector<1x192xf32> to vector<4x192xf32>
    %160 = arith.addf %158, %159 : vector<4x192xf32>
    %161 = vector.extract_strided_slice %157 {offsets = [0, 0], sizes = [4, 64], strides = [1, 1]} : vector<4x192xf32> to vector<4x64xf32>
    %162 = vector.extract_strided_slice %160 {offsets = [0, 0], sizes = [4, 64], strides = [1, 1]} : vector<4x192xf32> to vector<4x64xf32>
    %163 = arith.addf %161, %162 : vector<4x64xf32>
    %164 = arith.negf %163 : vector<4x64xf32>
    %165 = math.exp %164 : vector<4x64xf32>
    %cst_62 = arith.constant 1.000000e+00 : f32
    %166 = vector.broadcast %cst_62 : f32 to vector<4x64xf32>
    %167 = arith.addf %166, %165 : vector<4x64xf32>
    %168 = arith.divf %166, %167 : vector<4x64xf32>
    %169 = vector.extract_strided_slice %157 {offsets = [0, 64], sizes = [4, 64], strides = [1, 1]} : vector<4x192xf32> to vector<4x64xf32>
    %170 = vector.extract_strided_slice %160 {offsets = [0, 64], sizes = [4, 64], strides = [1, 1]} : vector<4x192xf32> to vector<4x64xf32>
    %171 = arith.addf %169, %170 : vector<4x64xf32>
    %172 = arith.negf %171 : vector<4x64xf32>
    %173 = math.exp %172 : vector<4x64xf32>
    %cst_63 = arith.constant 1.000000e+00 : f32
    %174 = vector.broadcast %cst_63 : f32 to vector<4x64xf32>
    %175 = arith.addf %174, %173 : vector<4x64xf32>
    %176 = arith.divf %174, %175 : vector<4x64xf32>
    %177 = vector.extract_strided_slice %157 {offsets = [0, 128], sizes = [4, 64], strides = [1, 1]} : vector<4x192xf32> to vector<4x64xf32>
    %178 = vector.extract_strided_slice %160 {offsets = [0, 128], sizes = [4, 64], strides = [1, 1]} : vector<4x192xf32> to vector<4x64xf32>
    %179 = arith.mulf %168, %178 : vector<4x64xf32>
    %180 = arith.addf %177, %179 : vector<4x64xf32>
    %181 = math.tanh %180 : vector<4x64xf32>
    %cst_64 = arith.constant 1.000000e+00 : f32
    %182 = vector.broadcast %cst_64 : f32 to vector<4x64xf32>
    %183 = arith.subf %182, %176 : vector<4x64xf32>
    %184 = arith.mulf %183, %181 : vector<4x64xf32>
    %185 = arith.mulf %176, %148 : vector<4x64xf32>
    %186 = arith.addf %184, %185 : vector<4x64xf32>
    %cst_65 = arith.constant dense<0.000000e+00> : vector<4x128xf32>
    %187 = tpu.matmul %186, %38, %cst_65 {dimension_numbers = #tpu.dot_dimension_numbers<[1], [0], [0], [1], [0, 0, 1, 1], [], []>} : vector<4x64xf32>, vector<64x128xf32>, vector<4x128xf32> -> vector<4x128xf32>
    %188 = vector.broadcast %39 : vector<1x128xf32> to vector<4x128xf32>
    %189 = arith.addf %187, %188 : vector<4x128xf32>
    %c3 = arith.constant 3 : index
    %c0_66 = arith.constant 0 : index
    %c0_67 = arith.constant 0 : index
    %190 = vector.load %arg14[%c3, %c0_66, %c0_67] : memref<8x4x128xf32, #tpu.memory_space<vmem>>, vector<1x4x128xf32>
    %191 = vector.shape_cast %190 : vector<1x4x128xf32> to vector<4x128xf32>
    %192 = vector.shape_cast %189 : vector<4x128xf32> to vector<1x4x128xf32>
    tpu.vector_store %arg14[%c3, %c0_66, %c0_67], %192 {strides = array<i32>} : memref<8x4x128xf32, #tpu.memory_space<vmem>>, vector<1x4x128xf32>,
    %cst_68 = arith.constant dense<0.000000e+00> : vector<4x192xf32>
    %193 = tpu.matmul %189, %34, %cst_68 {dimension_numbers = #tpu.dot_dimension_numbers<[1], [0], [0], [1], [0, 0, 1, 1], [], []>} : vector<4x128xf32>, vector<128x192xf32>, vector<4x192xf32> -> vector<4x192xf32>
    %194 = vector.broadcast %36 : vector<1x192xf32> to vector<4x192xf32>
    %195 = arith.addf %193, %194 : vector<4x192xf32>
    %cst_69 = arith.constant dense<0.000000e+00> : vector<4x192xf32>
    %196 = tpu.matmul %186, %35, %cst_69 {dimension_numbers = #tpu.dot_dimension_numbers<[1], [0], [0], [1], [0, 0, 1, 1], [], []>} : vector<4x64xf32>, vector<64x192xf32>, vector<4x192xf32> -> vector<4x192xf32>
    %197 = vector.broadcast %37 : vector<1x192xf32> to vector<4x192xf32>
    %198 = arith.addf %196, %197 : vector<4x192xf32>
    %199 = vector.extract_strided_slice %195 {offsets = [0, 0], sizes = [4, 64], strides = [1, 1]} : vector<4x192xf32> to vector<4x64xf32>
    %200 = vector.extract_strided_slice %198 {offsets = [0, 0], sizes = [4, 64], strides = [1, 1]} : vector<4x192xf32> to vector<4x64xf32>
    %201 = arith.addf %199, %200 : vector<4x64xf32>
    %202 = arith.negf %201 : vector<4x64xf32>
    %203 = math.exp %202 : vector<4x64xf32>
    %cst_70 = arith.constant 1.000000e+00 : f32
    %204 = vector.broadcast %cst_70 : f32 to vector<4x64xf32>
    %205 = arith.addf %204, %203 : vector<4x64xf32>
    %206 = arith.divf %204, %205 : vector<4x64xf32>
    %207 = vector.extract_strided_slice %195 {offsets = [0, 64], sizes = [4, 64], strides = [1, 1]} : vector<4x192xf32> to vector<4x64xf32>
    %208 = vector.extract_strided_slice %198 {offsets = [0, 64], sizes = [4, 64], strides = [1, 1]} : vector<4x192xf32> to vector<4x64xf32>
    %209 = arith.addf %207, %208 : vector<4x64xf32>
    %210 = arith.negf %209 : vector<4x64xf32>
    %211 = math.exp %210 : vector<4x64xf32>
    %cst_71 = arith.constant 1.000000e+00 : f32
    %212 = vector.broadcast %cst_71 : f32 to vector<4x64xf32>
    %213 = arith.addf %212, %211 : vector<4x64xf32>
    %214 = arith.divf %212, %213 : vector<4x64xf32>
    %215 = vector.extract_strided_slice %195 {offsets = [0, 128], sizes = [4, 64], strides = [1, 1]} : vector<4x192xf32> to vector<4x64xf32>
    %216 = vector.extract_strided_slice %198 {offsets = [0, 128], sizes = [4, 64], strides = [1, 1]} : vector<4x192xf32> to vector<4x64xf32>
    %217 = arith.mulf %206, %216 : vector<4x64xf32>
    %218 = arith.addf %215, %217 : vector<4x64xf32>
    %219 = math.tanh %218 : vector<4x64xf32>
    %cst_72 = arith.constant 1.000000e+00 : f32
    %220 = vector.broadcast %cst_72 : f32 to vector<4x64xf32>
    %221 = arith.subf %220, %214 : vector<4x64xf32>
    %222 = arith.mulf %221, %219 : vector<4x64xf32>
    %223 = arith.mulf %214, %186 : vector<4x64xf32>
    %224 = arith.addf %222, %223 : vector<4x64xf32>
    %cst_73 = arith.constant dense<0.000000e+00> : vector<4x128xf32>
    %225 = tpu.matmul %224, %38, %cst_73 {dimension_numbers = #tpu.dot_dimension_numbers<[1], [0], [0], [1], [0, 0, 1, 1], [], []>} : vector<4x64xf32>, vector<64x128xf32>, vector<4x128xf32> -> vector<4x128xf32>
    %226 = vector.broadcast %39 : vector<1x128xf32> to vector<4x128xf32>
    %227 = arith.addf %225, %226 : vector<4x128xf32>
    %c4 = arith.constant 4 : index
    %c0_74 = arith.constant 0 : index
    %c0_75 = arith.constant 0 : index
    %228 = vector.load %arg14[%c4, %c0_74, %c0_75] : memref<8x4x128xf32, #tpu.memory_space<vmem>>, vector<1x4x128xf32>
    %229 = vector.shape_cast %228 : vector<1x4x128xf32> to vector<4x128xf32>
    %230 = vector.shape_cast %227 : vector<4x128xf32> to vector<1x4x128xf32>
    tpu.vector_store %arg14[%c4, %c0_74, %c0_75], %230 {strides = array<i32>} : memref<8x4x128xf32, #tpu.memory_space<vmem>>, vector<1x4x128xf32>,
    %cst_76 = arith.constant dense<0.000000e+00> : vector<4x192xf32>
    %231 = tpu.matmul %227, %34, %cst_76 {dimension_numbers = #tpu.dot_dimension_numbers<[1], [0], [0], [1], [0, 0, 1, 1], [], []>} : vector<4x128xf32>, vector<128x192xf32>, vector<4x192xf32> -> vector<4x192xf32>
    %232 = vector.broadcast %36 : vector<1x192xf32> to vector<4x192xf32>
    %233 = arith.addf %231, %232 : vector<4x192xf32>
    %cst_77 = arith.constant dense<0.000000e+00> : vector<4x192xf32>
    %234 = tpu.matmul %224, %35, %cst_77 {dimension_numbers = #tpu.dot_dimension_numbers<[1], [0], [0], [1], [0, 0, 1, 1], [], []>} : vector<4x64xf32>, vector<64x192xf32>, vector<4x192xf32> -> vector<4x192xf32>
    %235 = vector.broadcast %37 : vector<1x192xf32> to vector<4x192xf32>
    %236 = arith.addf %234, %235 : vector<4x192xf32>
    %237 = vector.extract_strided_slice %233 {offsets = [0, 0], sizes = [4, 64], strides = [1, 1]} : vector<4x192xf32> to vector<4x64xf32>
    %238 = vector.extract_strided_slice %236 {offsets = [0, 0], sizes = [4, 64], strides = [1, 1]} : vector<4x192xf32> to vector<4x64xf32>
    %239 = arith.addf %237, %238 : vector<4x64xf32>
    %240 = arith.negf %239 : vector<4x64xf32>
    %241 = math.exp %240 : vector<4x64xf32>
    %cst_78 = arith.constant 1.000000e+00 : f32
    %242 = vector.broadcast %cst_78 : f32 to vector<4x64xf32>
    %243 = arith.addf %242, %241 : vector<4x64xf32>
    %244 = arith.divf %242, %243 : vector<4x64xf32>
    %245 = vector.extract_strided_slice %233 {offsets = [0, 64], sizes = [4, 64], strides = [1, 1]} : vector<4x192xf32> to vector<4x64xf32>
    %246 = vector.extract_strided_slice %236 {offsets = [0, 64], sizes = [4, 64], strides = [1, 1]} : vector<4x192xf32> to vector<4x64xf32>
    %247 = arith.addf %245, %246 : vector<4x64xf32>
    %248 = arith.negf %247 : vector<4x64xf32>
    %249 = math.exp %248 : vector<4x64xf32>
    %cst_79 = arith.constant 1.000000e+00 : f32
    %250 = vector.broadcast %cst_79 : f32 to vector<4x64xf32>
    %251 = arith.addf %250, %249 : vector<4x64xf32>
    %252 = arith.divf %250, %251 : vector<4x64xf32>
    %253 = vector.extract_strided_slice %233 {offsets = [0, 128], sizes = [4, 64], strides = [1, 1]} : vector<4x192xf32> to vector<4x64xf32>
    %254 = vector.extract_strided_slice %236 {offsets = [0, 128], sizes = [4, 64], strides = [1, 1]} : vector<4x192xf32> to vector<4x64xf32>
    %255 = arith.mulf %244, %254 : vector<4x64xf32>
    %256 = arith.addf %253, %255 : vector<4x64xf32>
    %257 = math.tanh %256 : vector<4x64xf32>
    %cst_80 = arith.constant 1.000000e+00 : f32
    %258 = vector.broadcast %cst_80 : f32 to vector<4x64xf32>
    %259 = arith.subf %258, %252 : vector<4x64xf32>
    %260 = arith.mulf %259, %257 : vector<4x64xf32>
    %261 = arith.mulf %252, %224 : vector<4x64xf32>
    %262 = arith.addf %260, %261 : vector<4x64xf32>
    %cst_81 = arith.constant dense<0.000000e+00> : vector<4x128xf32>
    %263 = tpu.matmul %262, %38, %cst_81 {dimension_numbers = #tpu.dot_dimension_numbers<[1], [0], [0], [1], [0, 0, 1, 1], [], []>} : vector<4x64xf32>, vector<64x128xf32>, vector<4x128xf32> -> vector<4x128xf32>
    %264 = vector.broadcast %39 : vector<1x128xf32> to vector<4x128xf32>
    %265 = arith.addf %263, %264 : vector<4x128xf32>
    %c5 = arith.constant 5 : index
    %c0_82 = arith.constant 0 : index
    %c0_83 = arith.constant 0 : index
    %266 = vector.load %arg14[%c5, %c0_82, %c0_83] : memref<8x4x128xf32, #tpu.memory_space<vmem>>, vector<1x4x128xf32>
    %267 = vector.shape_cast %266 : vector<1x4x128xf32> to vector<4x128xf32>
    %268 = vector.shape_cast %265 : vector<4x128xf32> to vector<1x4x128xf32>
    tpu.vector_store %arg14[%c5, %c0_82, %c0_83], %268 {strides = array<i32>} : memref<8x4x128xf32, #tpu.memory_space<vmem>>, vector<1x4x128xf32>,
    %cst_84 = arith.constant dense<0.000000e+00> : vector<4x192xf32>
    %269 = tpu.matmul %265, %34, %cst_84 {dimension_numbers = #tpu.dot_dimension_numbers<[1], [0], [0], [1], [0, 0, 1, 1], [], []>} : vector<4x128xf32>, vector<128x192xf32>, vector<4x192xf32> -> vector<4x192xf32>
    %270 = vector.broadcast %36 : vector<1x192xf32> to vector<4x192xf32>
    %271 = arith.addf %269, %270 : vector<4x192xf32>
    %cst_85 = arith.constant dense<0.000000e+00> : vector<4x192xf32>
    %272 = tpu.matmul %262, %35, %cst_85 {dimension_numbers = #tpu.dot_dimension_numbers<[1], [0], [0], [1], [0, 0, 1, 1], [], []>} : vector<4x64xf32>, vector<64x192xf32>, vector<4x192xf32> -> vector<4x192xf32>
    %273 = vector.broadcast %37 : vector<1x192xf32> to vector<4x192xf32>
    %274 = arith.addf %272, %273 : vector<4x192xf32>
    %275 = vector.extract_strided_slice %271 {offsets = [0, 0], sizes = [4, 64], strides = [1, 1]} : vector<4x192xf32> to vector<4x64xf32>
    %276 = vector.extract_strided_slice %274 {offsets = [0, 0], sizes = [4, 64], strides = [1, 1]} : vector<4x192xf32> to vector<4x64xf32>
    %277 = arith.addf %275, %276 : vector<4x64xf32>
    %278 = arith.negf %277 : vector<4x64xf32>
    %279 = math.exp %278 : vector<4x64xf32>
    %cst_86 = arith.constant 1.000000e+00 : f32
    %280 = vector.broadcast %cst_86 : f32 to vector<4x64xf32>
    %281 = arith.addf %280, %279 : vector<4x64xf32>
    %282 = arith.divf %280, %281 : vector<4x64xf32>
    %283 = vector.extract_strided_slice %271 {offsets = [0, 64], sizes = [4, 64], strides = [1, 1]} : vector<4x192xf32> to vector<4x64xf32>
    %284 = vector.extract_strided_slice %274 {offsets = [0, 64], sizes = [4, 64], strides = [1, 1]} : vector<4x192xf32> to vector<4x64xf32>
    %285 = arith.addf %283, %284 : vector<4x64xf32>
    %286 = arith.negf %285 : vector<4x64xf32>
    %287 = math.exp %286 : vector<4x64xf32>
    %cst_87 = arith.constant 1.000000e+00 : f32
    %288 = vector.broadcast %cst_87 : f32 to vector<4x64xf32>
    %289 = arith.addf %288, %287 : vector<4x64xf32>
    %290 = arith.divf %288, %289 : vector<4x64xf32>
    %291 = vector.extract_strided_slice %271 {offsets = [0, 128], sizes = [4, 64], strides = [1, 1]} : vector<4x192xf32> to vector<4x64xf32>
    %292 = vector.extract_strided_slice %274 {offsets = [0, 128], sizes = [4, 64], strides = [1, 1]} : vector<4x192xf32> to vector<4x64xf32>
    %293 = arith.mulf %282, %292 : vector<4x64xf32>
    %294 = arith.addf %291, %293 : vector<4x64xf32>
    %295 = math.tanh %294 : vector<4x64xf32>
    %cst_88 = arith.constant 1.000000e+00 : f32
    %296 = vector.broadcast %cst_88 : f32 to vector<4x64xf32>
    %297 = arith.subf %296, %290 : vector<4x64xf32>
    %298 = arith.mulf %297, %295 : vector<4x64xf32>
    %299 = arith.mulf %290, %262 : vector<4x64xf32>
    %300 = arith.addf %298, %299 : vector<4x64xf32>
    %cst_89 = arith.constant dense<0.000000e+00> : vector<4x128xf32>
    %301 = tpu.matmul %300, %38, %cst_89 {dimension_numbers = #tpu.dot_dimension_numbers<[1], [0], [0], [1], [0, 0, 1, 1], [], []>} : vector<4x64xf32>, vector<64x128xf32>, vector<4x128xf32> -> vector<4x128xf32>
    %302 = vector.broadcast %39 : vector<1x128xf32> to vector<4x128xf32>
    %303 = arith.addf %301, %302 : vector<4x128xf32>
    %c6 = arith.constant 6 : index
    %c0_90 = arith.constant 0 : index
    %c0_91 = arith.constant 0 : index
    %304 = vector.load %arg14[%c6, %c0_90, %c0_91] : memref<8x4x128xf32, #tpu.memory_space<vmem>>, vector<1x4x128xf32>
    %305 = vector.shape_cast %304 : vector<1x4x128xf32> to vector<4x128xf32>
    %306 = vector.shape_cast %303 : vector<4x128xf32> to vector<1x4x128xf32>
    tpu.vector_store %arg14[%c6, %c0_90, %c0_91], %306 {strides = array<i32>} : memref<8x4x128xf32, #tpu.memory_space<vmem>>, vector<1x4x128xf32>,
    %cst_92 = arith.constant dense<0.000000e+00> : vector<4x192xf32>
    %307 = tpu.matmul %303, %34, %cst_92 {dimension_numbers = #tpu.dot_dimension_numbers<[1], [0], [0], [1], [0, 0, 1, 1], [], []>} : vector<4x128xf32>, vector<128x192xf32>, vector<4x192xf32> -> vector<4x192xf32>
    %308 = vector.broadcast %36 : vector<1x192xf32> to vector<4x192xf32>
    %309 = arith.addf %307, %308 : vector<4x192xf32>
    %cst_93 = arith.constant dense<0.000000e+00> : vector<4x192xf32>
    %310 = tpu.matmul %300, %35, %cst_93 {dimension_numbers = #tpu.dot_dimension_numbers<[1], [0], [0], [1], [0, 0, 1, 1], [], []>} : vector<4x64xf32>, vector<64x192xf32>, vector<4x192xf32> -> vector<4x192xf32>
    %311 = vector.broadcast %37 : vector<1x192xf32> to vector<4x192xf32>
    %312 = arith.addf %310, %311 : vector<4x192xf32>
    %313 = vector.extract_strided_slice %309 {offsets = [0, 0], sizes = [4, 64], strides = [1, 1]} : vector<4x192xf32> to vector<4x64xf32>
    %314 = vector.extract_strided_slice %312 {offsets = [0, 0], sizes = [4, 64], strides = [1, 1]} : vector<4x192xf32> to vector<4x64xf32>
    %315 = arith.addf %313, %314 : vector<4x64xf32>
    %316 = arith.negf %315 : vector<4x64xf32>
    %317 = math.exp %316 : vector<4x64xf32>
    %cst_94 = arith.constant 1.000000e+00 : f32
    %318 = vector.broadcast %cst_94 : f32 to vector<4x64xf32>
    %319 = arith.addf %318, %317 : vector<4x64xf32>
    %320 = arith.divf %318, %319 : vector<4x64xf32>
    %321 = vector.extract_strided_slice %309 {offsets = [0, 64], sizes = [4, 64], strides = [1, 1]} : vector<4x192xf32> to vector<4x64xf32>
    %322 = vector.extract_strided_slice %312 {offsets = [0, 64], sizes = [4, 64], strides = [1, 1]} : vector<4x192xf32> to vector<4x64xf32>
    %323 = arith.addf %321, %322 : vector<4x64xf32>
    %324 = arith.negf %323 : vector<4x64xf32>
    %325 = math.exp %324 : vector<4x64xf32>
    %cst_95 = arith.constant 1.000000e+00 : f32
    %326 = vector.broadcast %cst_95 : f32 to vector<4x64xf32>
    %327 = arith.addf %326, %325 : vector<4x64xf32>
    %328 = arith.divf %326, %327 : vector<4x64xf32>
    %329 = vector.extract_strided_slice %309 {offsets = [0, 128], sizes = [4, 64], strides = [1, 1]} : vector<4x192xf32> to vector<4x64xf32>
    %330 = vector.extract_strided_slice %312 {offsets = [0, 128], sizes = [4, 64], strides = [1, 1]} : vector<4x192xf32> to vector<4x64xf32>
    %331 = arith.mulf %320, %330 : vector<4x64xf32>
    %332 = arith.addf %329, %331 : vector<4x64xf32>
    %333 = math.tanh %332 : vector<4x64xf32>
    %cst_96 = arith.constant 1.000000e+00 : f32
    %334 = vector.broadcast %cst_96 : f32 to vector<4x64xf32>
    %335 = arith.subf %334, %328 : vector<4x64xf32>
    %336 = arith.mulf %335, %333 : vector<4x64xf32>
    %337 = arith.mulf %328, %300 : vector<4x64xf32>
    %338 = arith.addf %336, %337 : vector<4x64xf32>
    %cst_97 = arith.constant dense<0.000000e+00> : vector<4x128xf32>
    %339 = tpu.matmul %338, %38, %cst_97 {dimension_numbers = #tpu.dot_dimension_numbers<[1], [0], [0], [1], [0, 0, 1, 1], [], []>} : vector<4x64xf32>, vector<64x128xf32>, vector<4x128xf32> -> vector<4x128xf32>
    %340 = vector.broadcast %39 : vector<1x128xf32> to vector<4x128xf32>
    %341 = arith.addf %339, %340 : vector<4x128xf32>
    %c7 = arith.constant 7 : index
    %c0_98 = arith.constant 0 : index
    %c0_99 = arith.constant 0 : index
    %342 = vector.load %arg14[%c7, %c0_98, %c0_99] : memref<8x4x128xf32, #tpu.memory_space<vmem>>, vector<1x4x128xf32>
    %343 = vector.shape_cast %342 : vector<1x4x128xf32> to vector<4x128xf32>
    %344 = vector.shape_cast %341 : vector<4x128xf32> to vector<1x4x128xf32>
    tpu.vector_store %arg14[%c7, %c0_98, %c0_99], %344 {strides = array<i32>} : memref<8x4x128xf32, #tpu.memory_space<vmem>>, vector<1x4x128xf32>,
    return
  }
}

module attributes {stable_mosaic.version = 11 : i64} {
  func.func @_encoder_stack_kernel(%arg0: memref<2x10x66xf32, #tpu.memory_space<vmem>>, %arg1: memref<1x10x66xf32, #tpu.memory_space<vmem>>, %arg2: memref<66x64xf32, #tpu.memory_space<vmem>>, %arg3: memref<1x64xf32, #tpu.memory_space<vmem>>, %arg4: memref<5x64x192xf32, #tpu.memory_space<vmem>>, %arg5: memref<5x1x192xf32, #tpu.memory_space<vmem>>, %arg6: memref<5x64x64xf32, #tpu.memory_space<vmem>>, %arg7: memref<5x1x64xf32, #tpu.memory_space<vmem>>, %arg8: memref<8x10xf32, #tpu.memory_space<vmem>>, %arg9: memref<8x1xf32, #tpu.memory_space<vmem>>, %arg10: memref<6x8xf32, #tpu.memory_space<vmem>>, %arg11: memref<6x1xf32, #tpu.memory_space<vmem>>, %arg12: memref<4x6xf32, #tpu.memory_space<vmem>>, %arg13: memref<4x1xf32, #tpu.memory_space<vmem>>, %arg14: memref<2x4xf32, #tpu.memory_space<vmem>>, %arg15: memref<2x1xf32, #tpu.memory_space<vmem>>, %arg16: memref<1x2xf32, #tpu.memory_space<vmem>>, %arg17: memref<1x1xf32, #tpu.memory_space<vmem>>, %arg18: memref<2x1x64xf32, #tpu.memory_space<vmem>>) attributes {dimension_semantics = [], scalar_prefetch = 0 : i64, scratch_operands = 0 : i64, tpu.core_type = #tpu.core_type<tc>} {
    %c0 = arith.constant 0 : index
    %c0_0 = arith.constant 0 : index
    %c0_1 = arith.constant 0 : index
    %0 = vector.load %arg0[%c0, %c0_0, %c0_1] : memref<2x10x66xf32, #tpu.memory_space<vmem>>, vector<2x10x66xf32>
    %c0_2 = arith.constant 0 : index
    %c0_3 = arith.constant 0 : index
    %c0_4 = arith.constant 0 : index
    %1 = vector.load %arg1[%c0_2, %c0_3, %c0_4] : memref<1x10x66xf32, #tpu.memory_space<vmem>>, vector<1x10x66xf32>
    %2 = vector.broadcast %1 : vector<1x10x66xf32> to vector<2x10x66xf32>
    %3 = arith.addf %0, %2 : vector<2x10x66xf32>
    %4 = vector.shape_cast %3 : vector<2x10x66xf32> to vector<20x66xf32>
    %c0_5 = arith.constant 0 : index
    %c0_6 = arith.constant 0 : index
    %5 = vector.load %arg2[%c0_5, %c0_6] : memref<66x64xf32, #tpu.memory_space<vmem>>, vector<66x64xf32>
    %cst = arith.constant dense<0.000000e+00> : vector<20x64xf32>
    %6 = tpu.matmul %4, %5, %cst {dimension_numbers = #tpu.dot_dimension_numbers<[1], [0], [0], [1], [0, 0, 1, 1], [], []>} : vector<20x66xf32>, vector<66x64xf32>, vector<20x64xf32> -> vector<20x64xf32>
    %c0_7 = arith.constant 0 : index
    %c0_8 = arith.constant 0 : index
    %7 = vector.load %arg3[%c0_7, %c0_8] : memref<1x64xf32, #tpu.memory_space<vmem>>, vector<1x64xf32>
    %8 = vector.broadcast %7 : vector<1x64xf32> to vector<20x64xf32>
    %9 = arith.addf %6, %8 : vector<20x64xf32>
    %10 = vector.shape_cast %9 : vector<20x64xf32> to vector<2x10x64xf32>
    %c0_9 = arith.constant 0 : index
    %c0_10 = arith.constant 0 : index
    %c0_11 = arith.constant 0 : index
    %11 = vector.load %arg4[%c0_9, %c0_10, %c0_11] : memref<5x64x192xf32, #tpu.memory_space<vmem>>, vector<1x64x192xf32>
    %12 = vector.shape_cast %11 : vector<1x64x192xf32> to vector<64x192xf32>
    %c0_12 = arith.constant 0 : index
    %c0_13 = arith.constant 0 : index
    %c0_14 = arith.constant 0 : index
    %13 = vector.load %arg5[%c0_12, %c0_13, %c0_14] : memref<5x1x192xf32, #tpu.memory_space<vmem>>, vector<1x1x192xf32>
    %14 = vector.shape_cast %13 : vector<1x1x192xf32> to vector<1x192xf32>
    %c0_15 = arith.constant 0 : index
    %c0_16 = arith.constant 0 : index
    %c0_17 = arith.constant 0 : index
    %15 = vector.load %arg6[%c0_15, %c0_16, %c0_17] : memref<5x64x64xf32, #tpu.memory_space<vmem>>, vector<1x64x64xf32>
    %16 = vector.shape_cast %15 : vector<1x64x64xf32> to vector<64x64xf32>
    %c0_18 = arith.constant 0 : index
    %c0_19 = arith.constant 0 : index
    %c0_20 = arith.constant 0 : index
    %17 = vector.load %arg7[%c0_18, %c0_19, %c0_20] : memref<5x1x64xf32, #tpu.memory_space<vmem>>, vector<1x1x64xf32>
    %18 = vector.shape_cast %17 : vector<1x1x64xf32> to vector<1x64xf32>
    %c0_21 = arith.constant 0 : index
    %c0_22 = arith.constant 0 : index
    %19 = vector.load %arg8[%c0_21, %c0_22] : memref<8x10xf32, #tpu.memory_space<vmem>>, vector<8x10xf32>
    %c0_23 = arith.constant 0 : index
    %c0_24 = arith.constant 0 : index
    %20 = vector.load %arg9[%c0_23, %c0_24] : memref<8x1xf32, #tpu.memory_space<vmem>>, vector<8x1xf32>
    %21 = vector.shape_cast %10 : vector<2x10x64xf32> to vector<20x64xf32>
    %cst_25 = arith.constant dense<0.000000e+00> : vector<20x192xf32>
    %22 = tpu.matmul %21, %12, %cst_25 {dimension_numbers = #tpu.dot_dimension_numbers<[1], [0], [0], [1], [0, 0, 1, 1], [], []>} : vector<20x64xf32>, vector<64x192xf32>, vector<20x192xf32> -> vector<20x192xf32>
    %23 = vector.broadcast %14 : vector<1x192xf32> to vector<20x192xf32>
    %24 = arith.addf %22, %23 : vector<20x192xf32>
    %25 = vector.shape_cast %24 : vector<20x192xf32> to vector<2x10x192xf32>
    %26 = vector.extract_strided_slice %25 {offsets = [0, 0, 0], sizes = [2, 10, 64], strides = [1, 1, 1]} : vector<2x10x192xf32> to vector<2x10x64xf32>
    %27 = vector.extract_strided_slice %25 {offsets = [0, 0, 64], sizes = [2, 10, 64], strides = [1, 1, 1]} : vector<2x10x192xf32> to vector<2x10x64xf32>
    %28 = vector.extract_strided_slice %25 {offsets = [0, 0, 128], sizes = [2, 10, 64], strides = [1, 1, 1]} : vector<2x10x192xf32> to vector<2x10x64xf32>
    %29 = vector.extract_strided_slice %26 {offsets = [0, 0, 0], sizes = [2, 10, 16], strides = [1, 1, 1]} : vector<2x10x64xf32> to vector<2x10x16xf32>
    %30 = vector.extract_strided_slice %27 {offsets = [0, 0, 0], sizes = [2, 10, 16], strides = [1, 1, 1]} : vector<2x10x64xf32> to vector<2x10x16xf32>
    %31 = vector.extract_strided_slice %28 {offsets = [0, 0, 0], sizes = [2, 10, 16], strides = [1, 1, 1]} : vector<2x10x64xf32> to vector<2x10x16xf32>
    "tpu.trace_start"() <{level = 10 : i32, message = "bqd,bkd->bqk"}> : () -> ()
    %cst_26 = arith.constant dense<0.000000e+00> : vector<2x10x10xf32>
    %32 = tpu.matmul %29, %30, %cst_26 {dimension_numbers = #tpu.dot_dimension_numbers<[2], [2], [1], [1], [0, 0, 0, 1, 1, 1], [0], [0]>} : vector<2x10x16xf32>, vector<2x10x16xf32>, vector<2x10x10xf32> -> vector<2x10x10xf32>
    "tpu.trace_stop"() : () -> ()
    %cst_27 = arith.constant dense<0xFF800000> : vector<2x10xf32>
    %33 = vector.multi_reduction <maximumf>, %32, %cst_27 [2] : vector<2x10x10xf32> to vector<2x10xf32>
    %34 = vector.shape_cast %33 : vector<2x10xf32> to vector<2x10x1xf32>
    %35 = vector.broadcast %34 : vector<2x10x1xf32> to vector<2x10x10xf32>
    %36 = arith.subf %32, %35 : vector<2x10x10xf32>
    %37 = math.exp %36 : vector<2x10x10xf32>
    %cst_28 = arith.constant dense<0.000000e+00> : vector<2x10xf32>
    %38 = vector.multi_reduction <add>, %37, %cst_28 [2] : vector<2x10x10xf32> to vector<2x10xf32>
    %39 = vector.shape_cast %38 : vector<2x10xf32> to vector<2x10x1xf32>
    %40 = tpu.reciprocal %39 {approx = true} : vector<2x10x1xf32> -> vector<2x10x1xf32>
    %41 = vector.broadcast %40 : vector<2x10x1xf32> to vector<2x10x10xf32>
    %42 = arith.mulf %37, %41 : vector<2x10x10xf32>
    "tpu.trace_start"() <{level = 10 : i32, message = "bqk,bkd->bqd"}> : () -> ()
    %cst_29 = arith.constant dense<0.000000e+00> : vector<2x10x16xf32>
    %43 = tpu.matmul %42, %31, %cst_29 {dimension_numbers = #tpu.dot_dimension_numbers<[2], [1], [1], [2], [0, 0, 0, 1, 1, 2], [0], [0]>} : vector<2x10x10xf32>, vector<2x10x16xf32>, vector<2x10x16xf32> -> vector<2x10x16xf32>
    "tpu.trace_stop"() : () -> ()
    %44 = vector.extract_strided_slice %26 {offsets = [0, 0, 16], sizes = [2, 10, 16], strides = [1, 1, 1]} : vector<2x10x64xf32> to vector<2x10x16xf32>
    %45 = vector.extract_strided_slice %27 {offsets = [0, 0, 16], sizes = [2, 10, 16], strides = [1, 1, 1]} : vector<2x10x64xf32> to vector<2x10x16xf32>
    %46 = vector.extract_strided_slice %28 {offsets = [0, 0, 16], sizes = [2, 10, 16], strides = [1, 1, 1]} : vector<2x10x64xf32> to vector<2x10x16xf32>
    "tpu.trace_start"() <{level = 10 : i32, message = "bqd,bkd->bqk"}> : () -> ()
    %cst_30 = arith.constant dense<0.000000e+00> : vector<2x10x10xf32>
    %47 = tpu.matmul %44, %45, %cst_30 {dimension_numbers = #tpu.dot_dimension_numbers<[2], [2], [1], [1], [0, 0, 0, 1, 1, 1], [0], [0]>} : vector<2x10x16xf32>, vector<2x10x16xf32>, vector<2x10x10xf32> -> vector<2x10x10xf32>
    "tpu.trace_stop"() : () -> ()
    %cst_31 = arith.constant dense<0xFF800000> : vector<2x10xf32>
    %48 = vector.multi_reduction <maximumf>, %47, %cst_31 [2] : vector<2x10x10xf32> to vector<2x10xf32>
    %49 = vector.shape_cast %48 : vector<2x10xf32> to vector<2x10x1xf32>
    %50 = vector.broadcast %49 : vector<2x10x1xf32> to vector<2x10x10xf32>
    %51 = arith.subf %47, %50 : vector<2x10x10xf32>
    %52 = math.exp %51 : vector<2x10x10xf32>
    %cst_32 = arith.constant dense<0.000000e+00> : vector<2x10xf32>
    %53 = vector.multi_reduction <add>, %52, %cst_32 [2] : vector<2x10x10xf32> to vector<2x10xf32>
    %54 = vector.shape_cast %53 : vector<2x10xf32> to vector<2x10x1xf32>
    %55 = tpu.reciprocal %54 {approx = true} : vector<2x10x1xf32> -> vector<2x10x1xf32>
    %56 = vector.broadcast %55 : vector<2x10x1xf32> to vector<2x10x10xf32>
    %57 = arith.mulf %52, %56 : vector<2x10x10xf32>
    "tpu.trace_start"() <{level = 10 : i32, message = "bqk,bkd->bqd"}> : () -> ()
    %cst_33 = arith.constant dense<0.000000e+00> : vector<2x10x16xf32>
    %58 = tpu.matmul %57, %46, %cst_33 {dimension_numbers = #tpu.dot_dimension_numbers<[2], [1], [1], [2], [0, 0, 0, 1, 1, 2], [0], [0]>} : vector<2x10x10xf32>, vector<2x10x16xf32>, vector<2x10x16xf32> -> vector<2x10x16xf32>
    "tpu.trace_stop"() : () -> ()
    %59 = vector.extract_strided_slice %26 {offsets = [0, 0, 32], sizes = [2, 10, 16], strides = [1, 1, 1]} : vector<2x10x64xf32> to vector<2x10x16xf32>
    %60 = vector.extract_strided_slice %27 {offsets = [0, 0, 32], sizes = [2, 10, 16], strides = [1, 1, 1]} : vector<2x10x64xf32> to vector<2x10x16xf32>
    %61 = vector.extract_strided_slice %28 {offsets = [0, 0, 32], sizes = [2, 10, 16], strides = [1, 1, 1]} : vector<2x10x64xf32> to vector<2x10x16xf32>
    "tpu.trace_start"() <{level = 10 : i32, message = "bqd,bkd->bqk"}> : () -> ()
    %cst_34 = arith.constant dense<0.000000e+00> : vector<2x10x10xf32>
    %62 = tpu.matmul %59, %60, %cst_34 {dimension_numbers = #tpu.dot_dimension_numbers<[2], [2], [1], [1], [0, 0, 0, 1, 1, 1], [0], [0]>} : vector<2x10x16xf32>, vector<2x10x16xf32>, vector<2x10x10xf32> -> vector<2x10x10xf32>
    "tpu.trace_stop"() : () -> ()
    %cst_35 = arith.constant dense<0xFF800000> : vector<2x10xf32>
    %63 = vector.multi_reduction <maximumf>, %62, %cst_35 [2] : vector<2x10x10xf32> to vector<2x10xf32>
    %64 = vector.shape_cast %63 : vector<2x10xf32> to vector<2x10x1xf32>
    %65 = vector.broadcast %64 : vector<2x10x1xf32> to vector<2x10x10xf32>
    %66 = arith.subf %62, %65 : vector<2x10x10xf32>
    %67 = math.exp %66 : vector<2x10x10xf32>
    %cst_36 = arith.constant dense<0.000000e+00> : vector<2x10xf32>
    %68 = vector.multi_reduction <add>, %67, %cst_36 [2] : vector<2x10x10xf32> to vector<2x10xf32>
    %69 = vector.shape_cast %68 : vector<2x10xf32> to vector<2x10x1xf32>
    %70 = tpu.reciprocal %69 {approx = true} : vector<2x10x1xf32> -> vector<2x10x1xf32>
    %71 = vector.broadcast %70 : vector<2x10x1xf32> to vector<2x10x10xf32>
    %72 = arith.mulf %67, %71 : vector<2x10x10xf32>
    "tpu.trace_start"() <{level = 10 : i32, message = "bqk,bkd->bqd"}> : () -> ()
    %cst_37 = arith.constant dense<0.000000e+00> : vector<2x10x16xf32>
    %73 = tpu.matmul %72, %61, %cst_37 {dimension_numbers = #tpu.dot_dimension_numbers<[2], [1], [1], [2], [0, 0, 0, 1, 1, 2], [0], [0]>} : vector<2x10x10xf32>, vector<2x10x16xf32>, vector<2x10x16xf32> -> vector<2x10x16xf32>
    "tpu.trace_stop"() : () -> ()
    %74 = vector.extract_strided_slice %26 {offsets = [0, 0, 48], sizes = [2, 10, 16], strides = [1, 1, 1]} : vector<2x10x64xf32> to vector<2x10x16xf32>
    %75 = vector.extract_strided_slice %27 {offsets = [0, 0, 48], sizes = [2, 10, 16], strides = [1, 1, 1]} : vector<2x10x64xf32> to vector<2x10x16xf32>
    %76 = vector.extract_strided_slice %28 {offsets = [0, 0, 48], sizes = [2, 10, 16], strides = [1, 1, 1]} : vector<2x10x64xf32> to vector<2x10x16xf32>
    "tpu.trace_start"() <{level = 10 : i32, message = "bqd,bkd->bqk"}> : () -> ()
    %cst_38 = arith.constant dense<0.000000e+00> : vector<2x10x10xf32>
    %77 = tpu.matmul %74, %75, %cst_38 {dimension_numbers = #tpu.dot_dimension_numbers<[2], [2], [1], [1], [0, 0, 0, 1, 1, 1], [0], [0]>} : vector<2x10x16xf32>, vector<2x10x16xf32>, vector<2x10x10xf32> -> vector<2x10x10xf32>
    "tpu.trace_stop"() : () -> ()
    %cst_39 = arith.constant dense<0xFF800000> : vector<2x10xf32>
    %78 = vector.multi_reduction <maximumf>, %77, %cst_39 [2] : vector<2x10x10xf32> to vector<2x10xf32>
    %79 = vector.shape_cast %78 : vector<2x10xf32> to vector<2x10x1xf32>
    %80 = vector.broadcast %79 : vector<2x10x1xf32> to vector<2x10x10xf32>
    %81 = arith.subf %77, %80 : vector<2x10x10xf32>
    %82 = math.exp %81 : vector<2x10x10xf32>
    %cst_40 = arith.constant dense<0.000000e+00> : vector<2x10xf32>
    %83 = vector.multi_reduction <add>, %82, %cst_40 [2] : vector<2x10x10xf32> to vector<2x10xf32>
    %84 = vector.shape_cast %83 : vector<2x10xf32> to vector<2x10x1xf32>
    %85 = tpu.reciprocal %84 {approx = true} : vector<2x10x1xf32> -> vector<2x10x1xf32>
    %86 = vector.broadcast %85 : vector<2x10x1xf32> to vector<2x10x10xf32>
    %87 = arith.mulf %82, %86 : vector<2x10x10xf32>
    "tpu.trace_start"() <{level = 10 : i32, message = "bqk,bkd->bqd"}> : () -> ()
    %cst_41 = arith.constant dense<0.000000e+00> : vector<2x10x16xf32>
    %88 = tpu.matmul %87, %76, %cst_41 {dimension_numbers = #tpu.dot_dimension_numbers<[2], [1], [1], [2], [0, 0, 0, 1, 1, 2], [0], [0]>} : vector<2x10x10xf32>, vector<2x10x16xf32>, vector<2x10x16xf32> -> vector<2x10x16xf32>
    "tpu.trace_stop"() : () -> ()
    %89 = tpu.concatenate %43, %58, %73, %88 in 2 : vector<2x10x16xf32>, vector<2x10x16xf32>, vector<2x10x16xf32>, vector<2x10x16xf32> -> vector<2x10x64xf32>
    %90 = vector.shape_cast %89 : vector<2x10x64xf32> to vector<20x64xf32>
    %cst_42 = arith.constant dense<0.000000e+00> : vector<20x64xf32>
    %91 = tpu.matmul %90, %16, %cst_42 {dimension_numbers = #tpu.dot_dimension_numbers<[1], [0], [0], [1], [0, 0, 1, 1], [], []>} : vector<20x64xf32>, vector<64x64xf32>, vector<20x64xf32> -> vector<20x64xf32>
    %92 = vector.broadcast %18 : vector<1x64xf32> to vector<20x64xf32>
    %93 = arith.addf %91, %92 : vector<20x64xf32>
    %94 = vector.shape_cast %93 : vector<20x64xf32> to vector<2x10x64xf32>
    %95 = arith.addf %10, %94 : vector<2x10x64xf32>
    %96 = vector.extract_strided_slice %95 {offsets = [0, 0, 0], sizes = [1, 10, 64], strides = [1, 1, 1]} : vector<2x10x64xf32> to vector<1x10x64xf32>
    %97 = vector.shape_cast %96 : vector<1x10x64xf32> to vector<10x64xf32>
    %cst_43 = arith.constant dense<0.000000e+00> : vector<8x64xf32>
    %98 = tpu.matmul %19, %97, %cst_43 {dimension_numbers = #tpu.dot_dimension_numbers<[1], [0], [0], [1], [0, 0, 1, 1], [], []>} : vector<8x10xf32>, vector<10x64xf32>, vector<8x64xf32> -> vector<8x64xf32>
    %99 = vector.broadcast %20 : vector<8x1xf32> to vector<8x64xf32>
    %100 = arith.addf %98, %99 : vector<8x64xf32>
    %101 = vector.extract_strided_slice %95 {offsets = [1, 0, 0], sizes = [1, 10, 64], strides = [1, 1, 1]} : vector<2x10x64xf32> to vector<1x10x64xf32>
    %102 = vector.shape_cast %101 : vector<1x10x64xf32> to vector<10x64xf32>
    %cst_44 = arith.constant dense<0.000000e+00> : vector<8x64xf32>
    %103 = tpu.matmul %19, %102, %cst_44 {dimension_numbers = #tpu.dot_dimension_numbers<[1], [0], [0], [1], [0, 0, 1, 1], [], []>} : vector<8x10xf32>, vector<10x64xf32>, vector<8x64xf32> -> vector<8x64xf32>
    %104 = vector.broadcast %20 : vector<8x1xf32> to vector<8x64xf32>
    %105 = arith.addf %103, %104 : vector<8x64xf32>
    %106 = vector.shape_cast %100 : vector<8x64xf32> to vector<1x8x64xf32>
    %107 = vector.shape_cast %105 : vector<8x64xf32> to vector<1x8x64xf32>
    %108 = tpu.concatenate %106, %107 in 0 : vector<1x8x64xf32>, vector<1x8x64xf32> -> vector<2x8x64xf32>
    %cst_45 = arith.constant 0.000000e+00 : f32
    %109 = vector.broadcast %cst_45 : f32 to vector<2x8x64xf32>
    %110 = arith.maximumf %108, %109 : vector<2x8x64xf32>
    %c1 = arith.constant 1 : index
    %c0_46 = arith.constant 0 : index
    %c0_47 = arith.constant 0 : index
    %111 = vector.load %arg4[%c1, %c0_46, %c0_47] : memref<5x64x192xf32, #tpu.memory_space<vmem>>, vector<1x64x192xf32>
    %112 = vector.shape_cast %111 : vector<1x64x192xf32> to vector<64x192xf32>
    %c1_48 = arith.constant 1 : index
    %c0_49 = arith.constant 0 : index
    %c0_50 = arith.constant 0 : index
    %113 = vector.load %arg5[%c1_48, %c0_49, %c0_50] : memref<5x1x192xf32, #tpu.memory_space<vmem>>, vector<1x1x192xf32>
    %114 = vector.shape_cast %113 : vector<1x1x192xf32> to vector<1x192xf32>
    %c1_51 = arith.constant 1 : index
    %c0_52 = arith.constant 0 : index
    %c0_53 = arith.constant 0 : index
    %115 = vector.load %arg6[%c1_51, %c0_52, %c0_53] : memref<5x64x64xf32, #tpu.memory_space<vmem>>, vector<1x64x64xf32>
    %116 = vector.shape_cast %115 : vector<1x64x64xf32> to vector<64x64xf32>
    %c1_54 = arith.constant 1 : index
    %c0_55 = arith.constant 0 : index
    %c0_56 = arith.constant 0 : index
    %117 = vector.load %arg7[%c1_54, %c0_55, %c0_56] : memref<5x1x64xf32, #tpu.memory_space<vmem>>, vector<1x1x64xf32>
    %118 = vector.shape_cast %117 : vector<1x1x64xf32> to vector<1x64xf32>
    %c0_57 = arith.constant 0 : index
    %c0_58 = arith.constant 0 : index
    %119 = vector.load %arg10[%c0_57, %c0_58] : memref<6x8xf32, #tpu.memory_space<vmem>>, vector<6x8xf32>
    %c0_59 = arith.constant 0 : index
    %c0_60 = arith.constant 0 : index
    %120 = vector.load %arg11[%c0_59, %c0_60] : memref<6x1xf32, #tpu.memory_space<vmem>>, vector<6x1xf32>
    %121 = vector.shape_cast %110 : vector<2x8x64xf32> to vector<16x64xf32>
    %cst_61 = arith.constant dense<0.000000e+00> : vector<16x192xf32>
    %122 = tpu.matmul %121, %112, %cst_61 {dimension_numbers = #tpu.dot_dimension_numbers<[1], [0], [0], [1], [0, 0, 1, 1], [], []>} : vector<16x64xf32>, vector<64x192xf32>, vector<16x192xf32> -> vector<16x192xf32>
    %123 = vector.broadcast %114 : vector<1x192xf32> to vector<16x192xf32>
    %124 = arith.addf %122, %123 : vector<16x192xf32>
    %125 = vector.shape_cast %124 : vector<16x192xf32> to vector<2x8x192xf32>
    %126 = vector.extract_strided_slice %125 {offsets = [0, 0, 0], sizes = [2, 8, 64], strides = [1, 1, 1]} : vector<2x8x192xf32> to vector<2x8x64xf32>
    %127 = vector.extract_strided_slice %125 {offsets = [0, 0, 64], sizes = [2, 8, 64], strides = [1, 1, 1]} : vector<2x8x192xf32> to vector<2x8x64xf32>
    %128 = vector.extract_strided_slice %125 {offsets = [0, 0, 128], sizes = [2, 8, 64], strides = [1, 1, 1]} : vector<2x8x192xf32> to vector<2x8x64xf32>
    %129 = vector.extract_strided_slice %126 {offsets = [0, 0, 0], sizes = [2, 8, 16], strides = [1, 1, 1]} : vector<2x8x64xf32> to vector<2x8x16xf32>
    %130 = vector.extract_strided_slice %127 {offsets = [0, 0, 0], sizes = [2, 8, 16], strides = [1, 1, 1]} : vector<2x8x64xf32> to vector<2x8x16xf32>
    %131 = vector.extract_strided_slice %128 {offsets = [0, 0, 0], sizes = [2, 8, 16], strides = [1, 1, 1]} : vector<2x8x64xf32> to vector<2x8x16xf32>
    "tpu.trace_start"() <{level = 10 : i32, message = "bqd,bkd->bqk"}> : () -> ()
    %cst_62 = arith.constant dense<0.000000e+00> : vector<2x8x8xf32>
    %132 = tpu.matmul %129, %130, %cst_62 {dimension_numbers = #tpu.dot_dimension_numbers<[2], [2], [1], [1], [0, 0, 0, 1, 1, 1], [0], [0]>} : vector<2x8x16xf32>, vector<2x8x16xf32>, vector<2x8x8xf32> -> vector<2x8x8xf32>
    "tpu.trace_stop"() : () -> ()
    %cst_63 = arith.constant dense<0xFF800000> : vector<2x8xf32>
    %133 = vector.multi_reduction <maximumf>, %132, %cst_63 [2] : vector<2x8x8xf32> to vector<2x8xf32>
    %134 = vector.shape_cast %133 : vector<2x8xf32> to vector<2x8x1xf32>
    %135 = vector.broadcast %134 : vector<2x8x1xf32> to vector<2x8x8xf32>
    %136 = arith.subf %132, %135 : vector<2x8x8xf32>
    %137 = math.exp %136 : vector<2x8x8xf32>
    %cst_64 = arith.constant dense<0.000000e+00> : vector<2x8xf32>
    %138 = vector.multi_reduction <add>, %137, %cst_64 [2] : vector<2x8x8xf32> to vector<2x8xf32>
    %139 = vector.shape_cast %138 : vector<2x8xf32> to vector<2x8x1xf32>
    %140 = tpu.reciprocal %139 {approx = true} : vector<2x8x1xf32> -> vector<2x8x1xf32>
    %141 = vector.broadcast %140 : vector<2x8x1xf32> to vector<2x8x8xf32>
    %142 = arith.mulf %137, %141 : vector<2x8x8xf32>
    "tpu.trace_start"() <{level = 10 : i32, message = "bqk,bkd->bqd"}> : () -> ()
    %cst_65 = arith.constant dense<0.000000e+00> : vector<2x8x16xf32>
    %143 = tpu.matmul %142, %131, %cst_65 {dimension_numbers = #tpu.dot_dimension_numbers<[2], [1], [1], [2], [0, 0, 0, 1, 1, 2], [0], [0]>} : vector<2x8x8xf32>, vector<2x8x16xf32>, vector<2x8x16xf32> -> vector<2x8x16xf32>
    "tpu.trace_stop"() : () -> ()
    %144 = vector.extract_strided_slice %126 {offsets = [0, 0, 16], sizes = [2, 8, 16], strides = [1, 1, 1]} : vector<2x8x64xf32> to vector<2x8x16xf32>
    %145 = vector.extract_strided_slice %127 {offsets = [0, 0, 16], sizes = [2, 8, 16], strides = [1, 1, 1]} : vector<2x8x64xf32> to vector<2x8x16xf32>
    %146 = vector.extract_strided_slice %128 {offsets = [0, 0, 16], sizes = [2, 8, 16], strides = [1, 1, 1]} : vector<2x8x64xf32> to vector<2x8x16xf32>
    "tpu.trace_start"() <{level = 10 : i32, message = "bqd,bkd->bqk"}> : () -> ()
    %cst_66 = arith.constant dense<0.000000e+00> : vector<2x8x8xf32>
    %147 = tpu.matmul %144, %145, %cst_66 {dimension_numbers = #tpu.dot_dimension_numbers<[2], [2], [1], [1], [0, 0, 0, 1, 1, 1], [0], [0]>} : vector<2x8x16xf32>, vector<2x8x16xf32>, vector<2x8x8xf32> -> vector<2x8x8xf32>
    "tpu.trace_stop"() : () -> ()
    %cst_67 = arith.constant dense<0xFF800000> : vector<2x8xf32>
    %148 = vector.multi_reduction <maximumf>, %147, %cst_67 [2] : vector<2x8x8xf32> to vector<2x8xf32>
    %149 = vector.shape_cast %148 : vector<2x8xf32> to vector<2x8x1xf32>
    %150 = vector.broadcast %149 : vector<2x8x1xf32> to vector<2x8x8xf32>
    %151 = arith.subf %147, %150 : vector<2x8x8xf32>
    %152 = math.exp %151 : vector<2x8x8xf32>
    %cst_68 = arith.constant dense<0.000000e+00> : vector<2x8xf32>
    %153 = vector.multi_reduction <add>, %152, %cst_68 [2] : vector<2x8x8xf32> to vector<2x8xf32>
    %154 = vector.shape_cast %153 : vector<2x8xf32> to vector<2x8x1xf32>
    %155 = tpu.reciprocal %154 {approx = true} : vector<2x8x1xf32> -> vector<2x8x1xf32>
    %156 = vector.broadcast %155 : vector<2x8x1xf32> to vector<2x8x8xf32>
    %157 = arith.mulf %152, %156 : vector<2x8x8xf32>
    "tpu.trace_start"() <{level = 10 : i32, message = "bqk,bkd->bqd"}> : () -> ()
    %cst_69 = arith.constant dense<0.000000e+00> : vector<2x8x16xf32>
    %158 = tpu.matmul %157, %146, %cst_69 {dimension_numbers = #tpu.dot_dimension_numbers<[2], [1], [1], [2], [0, 0, 0, 1, 1, 2], [0], [0]>} : vector<2x8x8xf32>, vector<2x8x16xf32>, vector<2x8x16xf32> -> vector<2x8x16xf32>
    "tpu.trace_stop"() : () -> ()
    %159 = vector.extract_strided_slice %126 {offsets = [0, 0, 32], sizes = [2, 8, 16], strides = [1, 1, 1]} : vector<2x8x64xf32> to vector<2x8x16xf32>
    %160 = vector.extract_strided_slice %127 {offsets = [0, 0, 32], sizes = [2, 8, 16], strides = [1, 1, 1]} : vector<2x8x64xf32> to vector<2x8x16xf32>
    %161 = vector.extract_strided_slice %128 {offsets = [0, 0, 32], sizes = [2, 8, 16], strides = [1, 1, 1]} : vector<2x8x64xf32> to vector<2x8x16xf32>
    "tpu.trace_start"() <{level = 10 : i32, message = "bqd,bkd->bqk"}> : () -> ()
    %cst_70 = arith.constant dense<0.000000e+00> : vector<2x8x8xf32>
    %162 = tpu.matmul %159, %160, %cst_70 {dimension_numbers = #tpu.dot_dimension_numbers<[2], [2], [1], [1], [0, 0, 0, 1, 1, 1], [0], [0]>} : vector<2x8x16xf32>, vector<2x8x16xf32>, vector<2x8x8xf32> -> vector<2x8x8xf32>
    "tpu.trace_stop"() : () -> ()
    %cst_71 = arith.constant dense<0xFF800000> : vector<2x8xf32>
    %163 = vector.multi_reduction <maximumf>, %162, %cst_71 [2] : vector<2x8x8xf32> to vector<2x8xf32>
    %164 = vector.shape_cast %163 : vector<2x8xf32> to vector<2x8x1xf32>
    %165 = vector.broadcast %164 : vector<2x8x1xf32> to vector<2x8x8xf32>
    %166 = arith.subf %162, %165 : vector<2x8x8xf32>
    %167 = math.exp %166 : vector<2x8x8xf32>
    %cst_72 = arith.constant dense<0.000000e+00> : vector<2x8xf32>
    %168 = vector.multi_reduction <add>, %167, %cst_72 [2] : vector<2x8x8xf32> to vector<2x8xf32>
    %169 = vector.shape_cast %168 : vector<2x8xf32> to vector<2x8x1xf32>
    %170 = tpu.reciprocal %169 {approx = true} : vector<2x8x1xf32> -> vector<2x8x1xf32>
    %171 = vector.broadcast %170 : vector<2x8x1xf32> to vector<2x8x8xf32>
    %172 = arith.mulf %167, %171 : vector<2x8x8xf32>
    "tpu.trace_start"() <{level = 10 : i32, message = "bqk,bkd->bqd"}> : () -> ()
    %cst_73 = arith.constant dense<0.000000e+00> : vector<2x8x16xf32>
    %173 = tpu.matmul %172, %161, %cst_73 {dimension_numbers = #tpu.dot_dimension_numbers<[2], [1], [1], [2], [0, 0, 0, 1, 1, 2], [0], [0]>} : vector<2x8x8xf32>, vector<2x8x16xf32>, vector<2x8x16xf32> -> vector<2x8x16xf32>
    "tpu.trace_stop"() : () -> ()
    %174 = vector.extract_strided_slice %126 {offsets = [0, 0, 48], sizes = [2, 8, 16], strides = [1, 1, 1]} : vector<2x8x64xf32> to vector<2x8x16xf32>
    %175 = vector.extract_strided_slice %127 {offsets = [0, 0, 48], sizes = [2, 8, 16], strides = [1, 1, 1]} : vector<2x8x64xf32> to vector<2x8x16xf32>
    %176 = vector.extract_strided_slice %128 {offsets = [0, 0, 48], sizes = [2, 8, 16], strides = [1, 1, 1]} : vector<2x8x64xf32> to vector<2x8x16xf32>
    "tpu.trace_start"() <{level = 10 : i32, message = "bqd,bkd->bqk"}> : () -> ()
    %cst_74 = arith.constant dense<0.000000e+00> : vector<2x8x8xf32>
    %177 = tpu.matmul %174, %175, %cst_74 {dimension_numbers = #tpu.dot_dimension_numbers<[2], [2], [1], [1], [0, 0, 0, 1, 1, 1], [0], [0]>} : vector<2x8x16xf32>, vector<2x8x16xf32>, vector<2x8x8xf32> -> vector<2x8x8xf32>
    "tpu.trace_stop"() : () -> ()
    %cst_75 = arith.constant dense<0xFF800000> : vector<2x8xf32>
    %178 = vector.multi_reduction <maximumf>, %177, %cst_75 [2] : vector<2x8x8xf32> to vector<2x8xf32>
    %179 = vector.shape_cast %178 : vector<2x8xf32> to vector<2x8x1xf32>
    %180 = vector.broadcast %179 : vector<2x8x1xf32> to vector<2x8x8xf32>
    %181 = arith.subf %177, %180 : vector<2x8x8xf32>
    %182 = math.exp %181 : vector<2x8x8xf32>
    %cst_76 = arith.constant dense<0.000000e+00> : vector<2x8xf32>
    %183 = vector.multi_reduction <add>, %182, %cst_76 [2] : vector<2x8x8xf32> to vector<2x8xf32>
    %184 = vector.shape_cast %183 : vector<2x8xf32> to vector<2x8x1xf32>
    %185 = tpu.reciprocal %184 {approx = true} : vector<2x8x1xf32> -> vector<2x8x1xf32>
    %186 = vector.broadcast %185 : vector<2x8x1xf32> to vector<2x8x8xf32>
    %187 = arith.mulf %182, %186 : vector<2x8x8xf32>
    "tpu.trace_start"() <{level = 10 : i32, message = "bqk,bkd->bqd"}> : () -> ()
    %cst_77 = arith.constant dense<0.000000e+00> : vector<2x8x16xf32>
    %188 = tpu.matmul %187, %176, %cst_77 {dimension_numbers = #tpu.dot_dimension_numbers<[2], [1], [1], [2], [0, 0, 0, 1, 1, 2], [0], [0]>} : vector<2x8x8xf32>, vector<2x8x16xf32>, vector<2x8x16xf32> -> vector<2x8x16xf32>
    "tpu.trace_stop"() : () -> ()
    %189 = tpu.concatenate %143, %158, %173, %188 in 2 : vector<2x8x16xf32>, vector<2x8x16xf32>, vector<2x8x16xf32>, vector<2x8x16xf32> -> vector<2x8x64xf32>
    %190 = vector.shape_cast %189 : vector<2x8x64xf32> to vector<16x64xf32>
    %cst_78 = arith.constant dense<0.000000e+00> : vector<16x64xf32>
    %191 = tpu.matmul %190, %116, %cst_78 {dimension_numbers = #tpu.dot_dimension_numbers<[1], [0], [0], [1], [0, 0, 1, 1], [], []>} : vector<16x64xf32>, vector<64x64xf32>, vector<16x64xf32> -> vector<16x64xf32>
    %192 = vector.broadcast %118 : vector<1x64xf32> to vector<16x64xf32>
    %193 = arith.addf %191, %192 : vector<16x64xf32>
    %194 = vector.shape_cast %193 : vector<16x64xf32> to vector<2x8x64xf32>
    %195 = arith.addf %110, %194 : vector<2x8x64xf32>
    %196 = vector.extract_strided_slice %195 {offsets = [0, 0, 0], sizes = [1, 8, 64], strides = [1, 1, 1]} : vector<2x8x64xf32> to vector<1x8x64xf32>
    %197 = vector.shape_cast %196 : vector<1x8x64xf32> to vector<8x64xf32>
    %cst_79 = arith.constant dense<0.000000e+00> : vector<6x64xf32>
    %198 = tpu.matmul %119, %197, %cst_79 {dimension_numbers = #tpu.dot_dimension_numbers<[1], [0], [0], [1], [0, 0, 1, 1], [], []>} : vector<6x8xf32>, vector<8x64xf32>, vector<6x64xf32> -> vector<6x64xf32>
    %199 = vector.broadcast %120 : vector<6x1xf32> to vector<6x64xf32>
    %200 = arith.addf %198, %199 : vector<6x64xf32>
    %201 = vector.extract_strided_slice %195 {offsets = [1, 0, 0], sizes = [1, 8, 64], strides = [1, 1, 1]} : vector<2x8x64xf32> to vector<1x8x64xf32>
    %202 = vector.shape_cast %201 : vector<1x8x64xf32> to vector<8x64xf32>
    %cst_80 = arith.constant dense<0.000000e+00> : vector<6x64xf32>
    %203 = tpu.matmul %119, %202, %cst_80 {dimension_numbers = #tpu.dot_dimension_numbers<[1], [0], [0], [1], [0, 0, 1, 1], [], []>} : vector<6x8xf32>, vector<8x64xf32>, vector<6x64xf32> -> vector<6x64xf32>
    %204 = vector.broadcast %120 : vector<6x1xf32> to vector<6x64xf32>
    %205 = arith.addf %203, %204 : vector<6x64xf32>
    %206 = vector.shape_cast %200 : vector<6x64xf32> to vector<1x6x64xf32>
    %207 = vector.shape_cast %205 : vector<6x64xf32> to vector<1x6x64xf32>
    %208 = tpu.concatenate %206, %207 in 0 : vector<1x6x64xf32>, vector<1x6x64xf32> -> vector<2x6x64xf32>
    %cst_81 = arith.constant 0.000000e+00 : f32
    %209 = vector.broadcast %cst_81 : f32 to vector<2x6x64xf32>
    %210 = arith.maximumf %208, %209 : vector<2x6x64xf32>
    %c2 = arith.constant 2 : index
    %c0_82 = arith.constant 0 : index
    %c0_83 = arith.constant 0 : index
    %211 = vector.load %arg4[%c2, %c0_82, %c0_83] : memref<5x64x192xf32, #tpu.memory_space<vmem>>, vector<1x64x192xf32>
    %212 = vector.shape_cast %211 : vector<1x64x192xf32> to vector<64x192xf32>
    %c2_84 = arith.constant 2 : index
    %c0_85 = arith.constant 0 : index
    %c0_86 = arith.constant 0 : index
    %213 = vector.load %arg5[%c2_84, %c0_85, %c0_86] : memref<5x1x192xf32, #tpu.memory_space<vmem>>, vector<1x1x192xf32>
    %214 = vector.shape_cast %213 : vector<1x1x192xf32> to vector<1x192xf32>
    %c2_87 = arith.constant 2 : index
    %c0_88 = arith.constant 0 : index
    %c0_89 = arith.constant 0 : index
    %215 = vector.load %arg6[%c2_87, %c0_88, %c0_89] : memref<5x64x64xf32, #tpu.memory_space<vmem>>, vector<1x64x64xf32>
    %216 = vector.shape_cast %215 : vector<1x64x64xf32> to vector<64x64xf32>
    %c2_90 = arith.constant 2 : index
    %c0_91 = arith.constant 0 : index
    %c0_92 = arith.constant 0 : index
    %217 = vector.load %arg7[%c2_90, %c0_91, %c0_92] : memref<5x1x64xf32, #tpu.memory_space<vmem>>, vector<1x1x64xf32>
    %218 = vector.shape_cast %217 : vector<1x1x64xf32> to vector<1x64xf32>
    %c0_93 = arith.constant 0 : index
    %c0_94 = arith.constant 0 : index
    %219 = vector.load %arg12[%c0_93, %c0_94] : memref<4x6xf32, #tpu.memory_space<vmem>>, vector<4x6xf32>
    %c0_95 = arith.constant 0 : index
    %c0_96 = arith.constant 0 : index
    %220 = vector.load %arg13[%c0_95, %c0_96] : memref<4x1xf32, #tpu.memory_space<vmem>>, vector<4x1xf32>
    %221 = vector.shape_cast %210 : vector<2x6x64xf32> to vector<12x64xf32>
    %cst_97 = arith.constant dense<0.000000e+00> : vector<12x192xf32>
    %222 = tpu.matmul %221, %212, %cst_97 {dimension_numbers = #tpu.dot_dimension_numbers<[1], [0], [0], [1], [0, 0, 1, 1], [], []>} : vector<12x64xf32>, vector<64x192xf32>, vector<12x192xf32> -> vector<12x192xf32>
    %223 = vector.broadcast %214 : vector<1x192xf32> to vector<12x192xf32>
    %224 = arith.addf %222, %223 : vector<12x192xf32>
    %225 = vector.shape_cast %224 : vector<12x192xf32> to vector<2x6x192xf32>
    %226 = vector.extract_strided_slice %225 {offsets = [0, 0, 0], sizes = [2, 6, 64], strides = [1, 1, 1]} : vector<2x6x192xf32> to vector<2x6x64xf32>
    %227 = vector.extract_strided_slice %225 {offsets = [0, 0, 64], sizes = [2, 6, 64], strides = [1, 1, 1]} : vector<2x6x192xf32> to vector<2x6x64xf32>
    %228 = vector.extract_strided_slice %225 {offsets = [0, 0, 128], sizes = [2, 6, 64], strides = [1, 1, 1]} : vector<2x6x192xf32> to vector<2x6x64xf32>
    %229 = vector.extract_strided_slice %226 {offsets = [0, 0, 0], sizes = [2, 6, 16], strides = [1, 1, 1]} : vector<2x6x64xf32> to vector<2x6x16xf32>
    %230 = vector.extract_strided_slice %227 {offsets = [0, 0, 0], sizes = [2, 6, 16], strides = [1, 1, 1]} : vector<2x6x64xf32> to vector<2x6x16xf32>
    %231 = vector.extract_strided_slice %228 {offsets = [0, 0, 0], sizes = [2, 6, 16], strides = [1, 1, 1]} : vector<2x6x64xf32> to vector<2x6x16xf32>
    "tpu.trace_start"() <{level = 10 : i32, message = "bqd,bkd->bqk"}> : () -> ()
    %cst_98 = arith.constant dense<0.000000e+00> : vector<2x6x6xf32>
    %232 = tpu.matmul %229, %230, %cst_98 {dimension_numbers = #tpu.dot_dimension_numbers<[2], [2], [1], [1], [0, 0, 0, 1, 1, 1], [0], [0]>} : vector<2x6x16xf32>, vector<2x6x16xf32>, vector<2x6x6xf32> -> vector<2x6x6xf32>
    "tpu.trace_stop"() : () -> ()
    %cst_99 = arith.constant dense<0xFF800000> : vector<2x6xf32>
    %233 = vector.multi_reduction <maximumf>, %232, %cst_99 [2] : vector<2x6x6xf32> to vector<2x6xf32>
    %234 = vector.shape_cast %233 : vector<2x6xf32> to vector<2x6x1xf32>
    %235 = vector.broadcast %234 : vector<2x6x1xf32> to vector<2x6x6xf32>
    %236 = arith.subf %232, %235 : vector<2x6x6xf32>
    %237 = math.exp %236 : vector<2x6x6xf32>
    %cst_100 = arith.constant dense<0.000000e+00> : vector<2x6xf32>
    %238 = vector.multi_reduction <add>, %237, %cst_100 [2] : vector<2x6x6xf32> to vector<2x6xf32>
    %239 = vector.shape_cast %238 : vector<2x6xf32> to vector<2x6x1xf32>
    %240 = tpu.reciprocal %239 {approx = true} : vector<2x6x1xf32> -> vector<2x6x1xf32>
    %241 = vector.broadcast %240 : vector<2x6x1xf32> to vector<2x6x6xf32>
    %242 = arith.mulf %237, %241 : vector<2x6x6xf32>
    "tpu.trace_start"() <{level = 10 : i32, message = "bqk,bkd->bqd"}> : () -> ()
    %cst_101 = arith.constant dense<0.000000e+00> : vector<2x6x16xf32>
    %243 = tpu.matmul %242, %231, %cst_101 {dimension_numbers = #tpu.dot_dimension_numbers<[2], [1], [1], [2], [0, 0, 0, 1, 1, 2], [0], [0]>} : vector<2x6x6xf32>, vector<2x6x16xf32>, vector<2x6x16xf32> -> vector<2x6x16xf32>
    "tpu.trace_stop"() : () -> ()
    %244 = vector.extract_strided_slice %226 {offsets = [0, 0, 16], sizes = [2, 6, 16], strides = [1, 1, 1]} : vector<2x6x64xf32> to vector<2x6x16xf32>
    %245 = vector.extract_strided_slice %227 {offsets = [0, 0, 16], sizes = [2, 6, 16], strides = [1, 1, 1]} : vector<2x6x64xf32> to vector<2x6x16xf32>
    %246 = vector.extract_strided_slice %228 {offsets = [0, 0, 16], sizes = [2, 6, 16], strides = [1, 1, 1]} : vector<2x6x64xf32> to vector<2x6x16xf32>
    "tpu.trace_start"() <{level = 10 : i32, message = "bqd,bkd->bqk"}> : () -> ()
    %cst_102 = arith.constant dense<0.000000e+00> : vector<2x6x6xf32>
    %247 = tpu.matmul %244, %245, %cst_102 {dimension_numbers = #tpu.dot_dimension_numbers<[2], [2], [1], [1], [0, 0, 0, 1, 1, 1], [0], [0]>} : vector<2x6x16xf32>, vector<2x6x16xf32>, vector<2x6x6xf32> -> vector<2x6x6xf32>
    "tpu.trace_stop"() : () -> ()
    %cst_103 = arith.constant dense<0xFF800000> : vector<2x6xf32>
    %248 = vector.multi_reduction <maximumf>, %247, %cst_103 [2] : vector<2x6x6xf32> to vector<2x6xf32>
    %249 = vector.shape_cast %248 : vector<2x6xf32> to vector<2x6x1xf32>
    %250 = vector.broadcast %249 : vector<2x6x1xf32> to vector<2x6x6xf32>
    %251 = arith.subf %247, %250 : vector<2x6x6xf32>
    %252 = math.exp %251 : vector<2x6x6xf32>
    %cst_104 = arith.constant dense<0.000000e+00> : vector<2x6xf32>
    %253 = vector.multi_reduction <add>, %252, %cst_104 [2] : vector<2x6x6xf32> to vector<2x6xf32>
    %254 = vector.shape_cast %253 : vector<2x6xf32> to vector<2x6x1xf32>
    %255 = tpu.reciprocal %254 {approx = true} : vector<2x6x1xf32> -> vector<2x6x1xf32>
    %256 = vector.broadcast %255 : vector<2x6x1xf32> to vector<2x6x6xf32>
    %257 = arith.mulf %252, %256 : vector<2x6x6xf32>
    "tpu.trace_start"() <{level = 10 : i32, message = "bqk,bkd->bqd"}> : () -> ()
    %cst_105 = arith.constant dense<0.000000e+00> : vector<2x6x16xf32>
    %258 = tpu.matmul %257, %246, %cst_105 {dimension_numbers = #tpu.dot_dimension_numbers<[2], [1], [1], [2], [0, 0, 0, 1, 1, 2], [0], [0]>} : vector<2x6x6xf32>, vector<2x6x16xf32>, vector<2x6x16xf32> -> vector<2x6x16xf32>
    "tpu.trace_stop"() : () -> ()
    %259 = vector.extract_strided_slice %226 {offsets = [0, 0, 32], sizes = [2, 6, 16], strides = [1, 1, 1]} : vector<2x6x64xf32> to vector<2x6x16xf32>
    %260 = vector.extract_strided_slice %227 {offsets = [0, 0, 32], sizes = [2, 6, 16], strides = [1, 1, 1]} : vector<2x6x64xf32> to vector<2x6x16xf32>
    %261 = vector.extract_strided_slice %228 {offsets = [0, 0, 32], sizes = [2, 6, 16], strides = [1, 1, 1]} : vector<2x6x64xf32> to vector<2x6x16xf32>
    "tpu.trace_start"() <{level = 10 : i32, message = "bqd,bkd->bqk"}> : () -> ()
    %cst_106 = arith.constant dense<0.000000e+00> : vector<2x6x6xf32>
    %262 = tpu.matmul %259, %260, %cst_106 {dimension_numbers = #tpu.dot_dimension_numbers<[2], [2], [1], [1], [0, 0, 0, 1, 1, 1], [0], [0]>} : vector<2x6x16xf32>, vector<2x6x16xf32>, vector<2x6x6xf32> -> vector<2x6x6xf32>
    "tpu.trace_stop"() : () -> ()
    %cst_107 = arith.constant dense<0xFF800000> : vector<2x6xf32>
    %263 = vector.multi_reduction <maximumf>, %262, %cst_107 [2] : vector<2x6x6xf32> to vector<2x6xf32>
    %264 = vector.shape_cast %263 : vector<2x6xf32> to vector<2x6x1xf32>
    %265 = vector.broadcast %264 : vector<2x6x1xf32> to vector<2x6x6xf32>
    %266 = arith.subf %262, %265 : vector<2x6x6xf32>
    %267 = math.exp %266 : vector<2x6x6xf32>
    %cst_108 = arith.constant dense<0.000000e+00> : vector<2x6xf32>
    %268 = vector.multi_reduction <add>, %267, %cst_108 [2] : vector<2x6x6xf32> to vector<2x6xf32>
    %269 = vector.shape_cast %268 : vector<2x6xf32> to vector<2x6x1xf32>
    %270 = tpu.reciprocal %269 {approx = true} : vector<2x6x1xf32> -> vector<2x6x1xf32>
    %271 = vector.broadcast %270 : vector<2x6x1xf32> to vector<2x6x6xf32>
    %272 = arith.mulf %267, %271 : vector<2x6x6xf32>
    "tpu.trace_start"() <{level = 10 : i32, message = "bqk,bkd->bqd"}> : () -> ()
    %cst_109 = arith.constant dense<0.000000e+00> : vector<2x6x16xf32>
    %273 = tpu.matmul %272, %261, %cst_109 {dimension_numbers = #tpu.dot_dimension_numbers<[2], [1], [1], [2], [0, 0, 0, 1, 1, 2], [0], [0]>} : vector<2x6x6xf32>, vector<2x6x16xf32>, vector<2x6x16xf32> -> vector<2x6x16xf32>
    "tpu.trace_stop"() : () -> ()
    %274 = vector.extract_strided_slice %226 {offsets = [0, 0, 48], sizes = [2, 6, 16], strides = [1, 1, 1]} : vector<2x6x64xf32> to vector<2x6x16xf32>
    %275 = vector.extract_strided_slice %227 {offsets = [0, 0, 48], sizes = [2, 6, 16], strides = [1, 1, 1]} : vector<2x6x64xf32> to vector<2x6x16xf32>
    %276 = vector.extract_strided_slice %228 {offsets = [0, 0, 48], sizes = [2, 6, 16], strides = [1, 1, 1]} : vector<2x6x64xf32> to vector<2x6x16xf32>
    "tpu.trace_start"() <{level = 10 : i32, message = "bqd,bkd->bqk"}> : () -> ()
    %cst_110 = arith.constant dense<0.000000e+00> : vector<2x6x6xf32>
    %277 = tpu.matmul %274, %275, %cst_110 {dimension_numbers = #tpu.dot_dimension_numbers<[2], [2], [1], [1], [0, 0, 0, 1, 1, 1], [0], [0]>} : vector<2x6x16xf32>, vector<2x6x16xf32>, vector<2x6x6xf32> -> vector<2x6x6xf32>
    "tpu.trace_stop"() : () -> ()
    %cst_111 = arith.constant dense<0xFF800000> : vector<2x6xf32>
    %278 = vector.multi_reduction <maximumf>, %277, %cst_111 [2] : vector<2x6x6xf32> to vector<2x6xf32>
    %279 = vector.shape_cast %278 : vector<2x6xf32> to vector<2x6x1xf32>
    %280 = vector.broadcast %279 : vector<2x6x1xf32> to vector<2x6x6xf32>
    %281 = arith.subf %277, %280 : vector<2x6x6xf32>
    %282 = math.exp %281 : vector<2x6x6xf32>
    %cst_112 = arith.constant dense<0.000000e+00> : vector<2x6xf32>
    %283 = vector.multi_reduction <add>, %282, %cst_112 [2] : vector<2x6x6xf32> to vector<2x6xf32>
    %284 = vector.shape_cast %283 : vector<2x6xf32> to vector<2x6x1xf32>
    %285 = tpu.reciprocal %284 {approx = true} : vector<2x6x1xf32> -> vector<2x6x1xf32>
    %286 = vector.broadcast %285 : vector<2x6x1xf32> to vector<2x6x6xf32>
    %287 = arith.mulf %282, %286 : vector<2x6x6xf32>
    "tpu.trace_start"() <{level = 10 : i32, message = "bqk,bkd->bqd"}> : () -> ()
    %cst_113 = arith.constant dense<0.000000e+00> : vector<2x6x16xf32>
    %288 = tpu.matmul %287, %276, %cst_113 {dimension_numbers = #tpu.dot_dimension_numbers<[2], [1], [1], [2], [0, 0, 0, 1, 1, 2], [0], [0]>} : vector<2x6x6xf32>, vector<2x6x16xf32>, vector<2x6x16xf32> -> vector<2x6x16xf32>
    "tpu.trace_stop"() : () -> ()
    %289 = tpu.concatenate %243, %258, %273, %288 in 2 : vector<2x6x16xf32>, vector<2x6x16xf32>, vector<2x6x16xf32>, vector<2x6x16xf32> -> vector<2x6x64xf32>
    %290 = vector.shape_cast %289 : vector<2x6x64xf32> to vector<12x64xf32>
    %cst_114 = arith.constant dense<0.000000e+00> : vector<12x64xf32>
    %291 = tpu.matmul %290, %216, %cst_114 {dimension_numbers = #tpu.dot_dimension_numbers<[1], [0], [0], [1], [0, 0, 1, 1], [], []>} : vector<12x64xf32>, vector<64x64xf32>, vector<12x64xf32> -> vector<12x64xf32>
    %292 = vector.broadcast %218 : vector<1x64xf32> to vector<12x64xf32>
    %293 = arith.addf %291, %292 : vector<12x64xf32>
    %294 = vector.shape_cast %293 : vector<12x64xf32> to vector<2x6x64xf32>
    %295 = arith.addf %210, %294 : vector<2x6x64xf32>
    %296 = vector.extract_strided_slice %295 {offsets = [0, 0, 0], sizes = [1, 6, 64], strides = [1, 1, 1]} : vector<2x6x64xf32> to vector<1x6x64xf32>
    %297 = vector.shape_cast %296 : vector<1x6x64xf32> to vector<6x64xf32>
    %cst_115 = arith.constant dense<0.000000e+00> : vector<4x64xf32>
    %298 = tpu.matmul %219, %297, %cst_115 {dimension_numbers = #tpu.dot_dimension_numbers<[1], [0], [0], [1], [0, 0, 1, 1], [], []>} : vector<4x6xf32>, vector<6x64xf32>, vector<4x64xf32> -> vector<4x64xf32>
    %299 = vector.broadcast %220 : vector<4x1xf32> to vector<4x64xf32>
    %300 = arith.addf %298, %299 : vector<4x64xf32>
    %301 = vector.extract_strided_slice %295 {offsets = [1, 0, 0], sizes = [1, 6, 64], strides = [1, 1, 1]} : vector<2x6x64xf32> to vector<1x6x64xf32>
    %302 = vector.shape_cast %301 : vector<1x6x64xf32> to vector<6x64xf32>
    %cst_116 = arith.constant dense<0.000000e+00> : vector<4x64xf32>
    %303 = tpu.matmul %219, %302, %cst_116 {dimension_numbers = #tpu.dot_dimension_numbers<[1], [0], [0], [1], [0, 0, 1, 1], [], []>} : vector<4x6xf32>, vector<6x64xf32>, vector<4x64xf32> -> vector<4x64xf32>
    %304 = vector.broadcast %220 : vector<4x1xf32> to vector<4x64xf32>
    %305 = arith.addf %303, %304 : vector<4x64xf32>
    %306 = vector.shape_cast %300 : vector<4x64xf32> to vector<1x4x64xf32>
    %307 = vector.shape_cast %305 : vector<4x64xf32> to vector<1x4x64xf32>
    %308 = tpu.concatenate %306, %307 in 0 : vector<1x4x64xf32>, vector<1x4x64xf32> -> vector<2x4x64xf32>
    %cst_117 = arith.constant 0.000000e+00 : f32
    %309 = vector.broadcast %cst_117 : f32 to vector<2x4x64xf32>
    %310 = arith.maximumf %308, %309 : vector<2x4x64xf32>
    %c3 = arith.constant 3 : index
    %c0_118 = arith.constant 0 : index
    %c0_119 = arith.constant 0 : index
    %311 = vector.load %arg4[%c3, %c0_118, %c0_119] : memref<5x64x192xf32, #tpu.memory_space<vmem>>, vector<1x64x192xf32>
    %312 = vector.shape_cast %311 : vector<1x64x192xf32> to vector<64x192xf32>
    %c3_120 = arith.constant 3 : index
    %c0_121 = arith.constant 0 : index
    %c0_122 = arith.constant 0 : index
    %313 = vector.load %arg5[%c3_120, %c0_121, %c0_122] : memref<5x1x192xf32, #tpu.memory_space<vmem>>, vector<1x1x192xf32>
    %314 = vector.shape_cast %313 : vector<1x1x192xf32> to vector<1x192xf32>
    %c3_123 = arith.constant 3 : index
    %c0_124 = arith.constant 0 : index
    %c0_125 = arith.constant 0 : index
    %315 = vector.load %arg6[%c3_123, %c0_124, %c0_125] : memref<5x64x64xf32, #tpu.memory_space<vmem>>, vector<1x64x64xf32>
    %316 = vector.shape_cast %315 : vector<1x64x64xf32> to vector<64x64xf32>
    %c3_126 = arith.constant 3 : index
    %c0_127 = arith.constant 0 : index
    %c0_128 = arith.constant 0 : index
    %317 = vector.load %arg7[%c3_126, %c0_127, %c0_128] : memref<5x1x64xf32, #tpu.memory_space<vmem>>, vector<1x1x64xf32>
    %318 = vector.shape_cast %317 : vector<1x1x64xf32> to vector<1x64xf32>
    %c0_129 = arith.constant 0 : index
    %c0_130 = arith.constant 0 : index
    %319 = vector.load %arg14[%c0_129, %c0_130] : memref<2x4xf32, #tpu.memory_space<vmem>>, vector<2x4xf32>
    %c0_131 = arith.constant 0 : index
    %c0_132 = arith.constant 0 : index
    %320 = vector.load %arg15[%c0_131, %c0_132] : memref<2x1xf32, #tpu.memory_space<vmem>>, vector<2x1xf32>
    %321 = vector.shape_cast %310 : vector<2x4x64xf32> to vector<8x64xf32>
    %cst_133 = arith.constant dense<0.000000e+00> : vector<8x192xf32>
    %322 = tpu.matmul %321, %312, %cst_133 {dimension_numbers = #tpu.dot_dimension_numbers<[1], [0], [0], [1], [0, 0, 1, 1], [], []>} : vector<8x64xf32>, vector<64x192xf32>, vector<8x192xf32> -> vector<8x192xf32>
    %323 = vector.broadcast %314 : vector<1x192xf32> to vector<8x192xf32>
    %324 = arith.addf %322, %323 : vector<8x192xf32>
    %325 = vector.shape_cast %324 : vector<8x192xf32> to vector<2x4x192xf32>
    %326 = vector.extract_strided_slice %325 {offsets = [0, 0, 0], sizes = [2, 4, 64], strides = [1, 1, 1]} : vector<2x4x192xf32> to vector<2x4x64xf32>
    %327 = vector.extract_strided_slice %325 {offsets = [0, 0, 64], sizes = [2, 4, 64], strides = [1, 1, 1]} : vector<2x4x192xf32> to vector<2x4x64xf32>
    %328 = vector.extract_strided_slice %325 {offsets = [0, 0, 128], sizes = [2, 4, 64], strides = [1, 1, 1]} : vector<2x4x192xf32> to vector<2x4x64xf32>
    %329 = vector.extract_strided_slice %326 {offsets = [0, 0, 0], sizes = [2, 4, 16], strides = [1, 1, 1]} : vector<2x4x64xf32> to vector<2x4x16xf32>
    %330 = vector.extract_strided_slice %327 {offsets = [0, 0, 0], sizes = [2, 4, 16], strides = [1, 1, 1]} : vector<2x4x64xf32> to vector<2x4x16xf32>
    %331 = vector.extract_strided_slice %328 {offsets = [0, 0, 0], sizes = [2, 4, 16], strides = [1, 1, 1]} : vector<2x4x64xf32> to vector<2x4x16xf32>
    "tpu.trace_start"() <{level = 10 : i32, message = "bqd,bkd->bqk"}> : () -> ()
    %cst_134 = arith.constant dense<0.000000e+00> : vector<2x4x4xf32>
    %332 = tpu.matmul %329, %330, %cst_134 {dimension_numbers = #tpu.dot_dimension_numbers<[2], [2], [1], [1], [0, 0, 0, 1, 1, 1], [0], [0]>} : vector<2x4x16xf32>, vector<2x4x16xf32>, vector<2x4x4xf32> -> vector<2x4x4xf32>
    "tpu.trace_stop"() : () -> ()
    %cst_135 = arith.constant dense<0xFF800000> : vector<2x4xf32>
    %333 = vector.multi_reduction <maximumf>, %332, %cst_135 [2] : vector<2x4x4xf32> to vector<2x4xf32>
    %334 = vector.shape_cast %333 : vector<2x4xf32> to vector<2x4x1xf32>
    %335 = vector.broadcast %334 : vector<2x4x1xf32> to vector<2x4x4xf32>
    %336 = arith.subf %332, %335 : vector<2x4x4xf32>
    %337 = math.exp %336 : vector<2x4x4xf32>
    %cst_136 = arith.constant dense<0.000000e+00> : vector<2x4xf32>
    %338 = vector.multi_reduction <add>, %337, %cst_136 [2] : vector<2x4x4xf32> to vector<2x4xf32>
    %339 = vector.shape_cast %338 : vector<2x4xf32> to vector<2x4x1xf32>
    %340 = tpu.reciprocal %339 {approx = true} : vector<2x4x1xf32> -> vector<2x4x1xf32>
    %341 = vector.broadcast %340 : vector<2x4x1xf32> to vector<2x4x4xf32>
    %342 = arith.mulf %337, %341 : vector<2x4x4xf32>
    "tpu.trace_start"() <{level = 10 : i32, message = "bqk,bkd->bqd"}> : () -> ()
    %cst_137 = arith.constant dense<0.000000e+00> : vector<2x4x16xf32>
    %343 = tpu.matmul %342, %331, %cst_137 {dimension_numbers = #tpu.dot_dimension_numbers<[2], [1], [1], [2], [0, 0, 0, 1, 1, 2], [0], [0]>} : vector<2x4x4xf32>, vector<2x4x16xf32>, vector<2x4x16xf32> -> vector<2x4x16xf32>
    "tpu.trace_stop"() : () -> ()
    %344 = vector.extract_strided_slice %326 {offsets = [0, 0, 16], sizes = [2, 4, 16], strides = [1, 1, 1]} : vector<2x4x64xf32> to vector<2x4x16xf32>
    %345 = vector.extract_strided_slice %327 {offsets = [0, 0, 16], sizes = [2, 4, 16], strides = [1, 1, 1]} : vector<2x4x64xf32> to vector<2x4x16xf32>
    %346 = vector.extract_strided_slice %328 {offsets = [0, 0, 16], sizes = [2, 4, 16], strides = [1, 1, 1]} : vector<2x4x64xf32> to vector<2x4x16xf32>
    "tpu.trace_start"() <{level = 10 : i32, message = "bqd,bkd->bqk"}> : () -> ()
    %cst_138 = arith.constant dense<0.000000e+00> : vector<2x4x4xf32>
    %347 = tpu.matmul %344, %345, %cst_138 {dimension_numbers = #tpu.dot_dimension_numbers<[2], [2], [1], [1], [0, 0, 0, 1, 1, 1], [0], [0]>} : vector<2x4x16xf32>, vector<2x4x16xf32>, vector<2x4x4xf32> -> vector<2x4x4xf32>
    "tpu.trace_stop"() : () -> ()
    %cst_139 = arith.constant dense<0xFF800000> : vector<2x4xf32>
    %348 = vector.multi_reduction <maximumf>, %347, %cst_139 [2] : vector<2x4x4xf32> to vector<2x4xf32>
    %349 = vector.shape_cast %348 : vector<2x4xf32> to vector<2x4x1xf32>
    %350 = vector.broadcast %349 : vector<2x4x1xf32> to vector<2x4x4xf32>
    %351 = arith.subf %347, %350 : vector<2x4x4xf32>
    %352 = math.exp %351 : vector<2x4x4xf32>
    %cst_140 = arith.constant dense<0.000000e+00> : vector<2x4xf32>
    %353 = vector.multi_reduction <add>, %352, %cst_140 [2] : vector<2x4x4xf32> to vector<2x4xf32>
    %354 = vector.shape_cast %353 : vector<2x4xf32> to vector<2x4x1xf32>
    %355 = tpu.reciprocal %354 {approx = true} : vector<2x4x1xf32> -> vector<2x4x1xf32>
    %356 = vector.broadcast %355 : vector<2x4x1xf32> to vector<2x4x4xf32>
    %357 = arith.mulf %352, %356 : vector<2x4x4xf32>
    "tpu.trace_start"() <{level = 10 : i32, message = "bqk,bkd->bqd"}> : () -> ()
    %cst_141 = arith.constant dense<0.000000e+00> : vector<2x4x16xf32>
    %358 = tpu.matmul %357, %346, %cst_141 {dimension_numbers = #tpu.dot_dimension_numbers<[2], [1], [1], [2], [0, 0, 0, 1, 1, 2], [0], [0]>} : vector<2x4x4xf32>, vector<2x4x16xf32>, vector<2x4x16xf32> -> vector<2x4x16xf32>
    "tpu.trace_stop"() : () -> ()
    %359 = vector.extract_strided_slice %326 {offsets = [0, 0, 32], sizes = [2, 4, 16], strides = [1, 1, 1]} : vector<2x4x64xf32> to vector<2x4x16xf32>
    %360 = vector.extract_strided_slice %327 {offsets = [0, 0, 32], sizes = [2, 4, 16], strides = [1, 1, 1]} : vector<2x4x64xf32> to vector<2x4x16xf32>
    %361 = vector.extract_strided_slice %328 {offsets = [0, 0, 32], sizes = [2, 4, 16], strides = [1, 1, 1]} : vector<2x4x64xf32> to vector<2x4x16xf32>
    "tpu.trace_start"() <{level = 10 : i32, message = "bqd,bkd->bqk"}> : () -> ()
    %cst_142 = arith.constant dense<0.000000e+00> : vector<2x4x4xf32>
    %362 = tpu.matmul %359, %360, %cst_142 {dimension_numbers = #tpu.dot_dimension_numbers<[2], [2], [1], [1], [0, 0, 0, 1, 1, 1], [0], [0]>} : vector<2x4x16xf32>, vector<2x4x16xf32>, vector<2x4x4xf32> -> vector<2x4x4xf32>
    "tpu.trace_stop"() : () -> ()
    %cst_143 = arith.constant dense<0xFF800000> : vector<2x4xf32>
    %363 = vector.multi_reduction <maximumf>, %362, %cst_143 [2] : vector<2x4x4xf32> to vector<2x4xf32>
    %364 = vector.shape_cast %363 : vector<2x4xf32> to vector<2x4x1xf32>
    %365 = vector.broadcast %364 : vector<2x4x1xf32> to vector<2x4x4xf32>
    %366 = arith.subf %362, %365 : vector<2x4x4xf32>
    %367 = math.exp %366 : vector<2x4x4xf32>
    %cst_144 = arith.constant dense<0.000000e+00> : vector<2x4xf32>
    %368 = vector.multi_reduction <add>, %367, %cst_144 [2] : vector<2x4x4xf32> to vector<2x4xf32>
    %369 = vector.shape_cast %368 : vector<2x4xf32> to vector<2x4x1xf32>
    %370 = tpu.reciprocal %369 {approx = true} : vector<2x4x1xf32> -> vector<2x4x1xf32>
    %371 = vector.broadcast %370 : vector<2x4x1xf32> to vector<2x4x4xf32>
    %372 = arith.mulf %367, %371 : vector<2x4x4xf32>
    "tpu.trace_start"() <{level = 10 : i32, message = "bqk,bkd->bqd"}> : () -> ()
    %cst_145 = arith.constant dense<0.000000e+00> : vector<2x4x16xf32>
    %373 = tpu.matmul %372, %361, %cst_145 {dimension_numbers = #tpu.dot_dimension_numbers<[2], [1], [1], [2], [0, 0, 0, 1, 1, 2], [0], [0]>} : vector<2x4x4xf32>, vector<2x4x16xf32>, vector<2x4x16xf32> -> vector<2x4x16xf32>
    "tpu.trace_stop"() : () -> ()
    %374 = vector.extract_strided_slice %326 {offsets = [0, 0, 48], sizes = [2, 4, 16], strides = [1, 1, 1]} : vector<2x4x64xf32> to vector<2x4x16xf32>
    %375 = vector.extract_strided_slice %327 {offsets = [0, 0, 48], sizes = [2, 4, 16], strides = [1, 1, 1]} : vector<2x4x64xf32> to vector<2x4x16xf32>
    %376 = vector.extract_strided_slice %328 {offsets = [0, 0, 48], sizes = [2, 4, 16], strides = [1, 1, 1]} : vector<2x4x64xf32> to vector<2x4x16xf32>
    "tpu.trace_start"() <{level = 10 : i32, message = "bqd,bkd->bqk"}> : () -> ()
    %cst_146 = arith.constant dense<0.000000e+00> : vector<2x4x4xf32>
    %377 = tpu.matmul %374, %375, %cst_146 {dimension_numbers = #tpu.dot_dimension_numbers<[2], [2], [1], [1], [0, 0, 0, 1, 1, 1], [0], [0]>} : vector<2x4x16xf32>, vector<2x4x16xf32>, vector<2x4x4xf32> -> vector<2x4x4xf32>
    "tpu.trace_stop"() : () -> ()
    %cst_147 = arith.constant dense<0xFF800000> : vector<2x4xf32>
    %378 = vector.multi_reduction <maximumf>, %377, %cst_147 [2] : vector<2x4x4xf32> to vector<2x4xf32>
    %379 = vector.shape_cast %378 : vector<2x4xf32> to vector<2x4x1xf32>
    %380 = vector.broadcast %379 : vector<2x4x1xf32> to vector<2x4x4xf32>
    %381 = arith.subf %377, %380 : vector<2x4x4xf32>
    %382 = math.exp %381 : vector<2x4x4xf32>
    %cst_148 = arith.constant dense<0.000000e+00> : vector<2x4xf32>
    %383 = vector.multi_reduction <add>, %382, %cst_148 [2] : vector<2x4x4xf32> to vector<2x4xf32>
    %384 = vector.shape_cast %383 : vector<2x4xf32> to vector<2x4x1xf32>
    %385 = tpu.reciprocal %384 {approx = true} : vector<2x4x1xf32> -> vector<2x4x1xf32>
    %386 = vector.broadcast %385 : vector<2x4x1xf32> to vector<2x4x4xf32>
    %387 = arith.mulf %382, %386 : vector<2x4x4xf32>
    "tpu.trace_start"() <{level = 10 : i32, message = "bqk,bkd->bqd"}> : () -> ()
    %cst_149 = arith.constant dense<0.000000e+00> : vector<2x4x16xf32>
    %388 = tpu.matmul %387, %376, %cst_149 {dimension_numbers = #tpu.dot_dimension_numbers<[2], [1], [1], [2], [0, 0, 0, 1, 1, 2], [0], [0]>} : vector<2x4x4xf32>, vector<2x4x16xf32>, vector<2x4x16xf32> -> vector<2x4x16xf32>
    "tpu.trace_stop"() : () -> ()
    %389 = tpu.concatenate %343, %358, %373, %388 in 2 : vector<2x4x16xf32>, vector<2x4x16xf32>, vector<2x4x16xf32>, vector<2x4x16xf32> -> vector<2x4x64xf32>
    %390 = vector.shape_cast %389 : vector<2x4x64xf32> to vector<8x64xf32>
    %cst_150 = arith.constant dense<0.000000e+00> : vector<8x64xf32>
    %391 = tpu.matmul %390, %316, %cst_150 {dimension_numbers = #tpu.dot_dimension_numbers<[1], [0], [0], [1], [0, 0, 1, 1], [], []>} : vector<8x64xf32>, vector<64x64xf32>, vector<8x64xf32> -> vector<8x64xf32>
    %392 = vector.broadcast %318 : vector<1x64xf32> to vector<8x64xf32>
    %393 = arith.addf %391, %392 : vector<8x64xf32>
    %394 = vector.shape_cast %393 : vector<8x64xf32> to vector<2x4x64xf32>
    %395 = arith.addf %310, %394 : vector<2x4x64xf32>
    %396 = vector.extract_strided_slice %395 {offsets = [0, 0, 0], sizes = [1, 4, 64], strides = [1, 1, 1]} : vector<2x4x64xf32> to vector<1x4x64xf32>
    %397 = vector.shape_cast %396 : vector<1x4x64xf32> to vector<4x64xf32>
    %cst_151 = arith.constant dense<0.000000e+00> : vector<2x64xf32>
    %398 = tpu.matmul %319, %397, %cst_151 {dimension_numbers = #tpu.dot_dimension_numbers<[1], [0], [0], [1], [0, 0, 1, 1], [], []>} : vector<2x4xf32>, vector<4x64xf32>, vector<2x64xf32> -> vector<2x64xf32>
    %399 = vector.broadcast %320 : vector<2x1xf32> to vector<2x64xf32>
    %400 = arith.addf %398, %399 : vector<2x64xf32>
    %401 = vector.extract_strided_slice %395 {offsets = [1, 0, 0], sizes = [1, 4, 64], strides = [1, 1, 1]} : vector<2x4x64xf32> to vector<1x4x64xf32>
    %402 = vector.shape_cast %401 : vector<1x4x64xf32> to vector<4x64xf32>
    %cst_152 = arith.constant dense<0.000000e+00> : vector<2x64xf32>
    %403 = tpu.matmul %319, %402, %cst_152 {dimension_numbers = #tpu.dot_dimension_numbers<[1], [0], [0], [1], [0, 0, 1, 1], [], []>} : vector<2x4xf32>, vector<4x64xf32>, vector<2x64xf32> -> vector<2x64xf32>
    %404 = vector.broadcast %320 : vector<2x1xf32> to vector<2x64xf32>
    %405 = arith.addf %403, %404 : vector<2x64xf32>
    %406 = vector.shape_cast %400 : vector<2x64xf32> to vector<1x2x64xf32>
    %407 = vector.shape_cast %405 : vector<2x64xf32> to vector<1x2x64xf32>
    %408 = tpu.concatenate %406, %407 in 0 : vector<1x2x64xf32>, vector<1x2x64xf32> -> vector<2x2x64xf32>
    %cst_153 = arith.constant 0.000000e+00 : f32
    %409 = vector.broadcast %cst_153 : f32 to vector<2x2x64xf32>
    %410 = arith.maximumf %408, %409 : vector<2x2x64xf32>
    %c4 = arith.constant 4 : index
    %c0_154 = arith.constant 0 : index
    %c0_155 = arith.constant 0 : index
    %411 = vector.load %arg4[%c4, %c0_154, %c0_155] : memref<5x64x192xf32, #tpu.memory_space<vmem>>, vector<1x64x192xf32>
    %412 = vector.shape_cast %411 : vector<1x64x192xf32> to vector<64x192xf32>
    %c4_156 = arith.constant 4 : index
    %c0_157 = arith.constant 0 : index
    %c0_158 = arith.constant 0 : index
    %413 = vector.load %arg5[%c4_156, %c0_157, %c0_158] : memref<5x1x192xf32, #tpu.memory_space<vmem>>, vector<1x1x192xf32>
    %414 = vector.shape_cast %413 : vector<1x1x192xf32> to vector<1x192xf32>
    %c4_159 = arith.constant 4 : index
    %c0_160 = arith.constant 0 : index
    %c0_161 = arith.constant 0 : index
    %415 = vector.load %arg6[%c4_159, %c0_160, %c0_161] : memref<5x64x64xf32, #tpu.memory_space<vmem>>, vector<1x64x64xf32>
    %416 = vector.shape_cast %415 : vector<1x64x64xf32> to vector<64x64xf32>
    %c4_162 = arith.constant 4 : index
    %c0_163 = arith.constant 0 : index
    %c0_164 = arith.constant 0 : index
    %417 = vector.load %arg7[%c4_162, %c0_163, %c0_164] : memref<5x1x64xf32, #tpu.memory_space<vmem>>, vector<1x1x64xf32>
    %418 = vector.shape_cast %417 : vector<1x1x64xf32> to vector<1x64xf32>
    %c0_165 = arith.constant 0 : index
    %c0_166 = arith.constant 0 : index
    %419 = vector.load %arg16[%c0_165, %c0_166] : memref<1x2xf32, #tpu.memory_space<vmem>>, vector<1x2xf32>
    %c0_167 = arith.constant 0 : index
    %c0_168 = arith.constant 0 : index
    %420 = vector.load %arg17[%c0_167, %c0_168] : memref<1x1xf32, #tpu.memory_space<vmem>>, vector<1x1xf32>
    %421 = vector.shape_cast %410 : vector<2x2x64xf32> to vector<4x64xf32>
    %cst_169 = arith.constant dense<0.000000e+00> : vector<4x192xf32>
    %422 = tpu.matmul %421, %412, %cst_169 {dimension_numbers = #tpu.dot_dimension_numbers<[1], [0], [0], [1], [0, 0, 1, 1], [], []>} : vector<4x64xf32>, vector<64x192xf32>, vector<4x192xf32> -> vector<4x192xf32>
    %423 = vector.broadcast %414 : vector<1x192xf32> to vector<4x192xf32>
    %424 = arith.addf %422, %423 : vector<4x192xf32>
    %425 = vector.shape_cast %424 : vector<4x192xf32> to vector<2x2x192xf32>
    %426 = vector.extract_strided_slice %425 {offsets = [0, 0, 0], sizes = [2, 2, 64], strides = [1, 1, 1]} : vector<2x2x192xf32> to vector<2x2x64xf32>
    %427 = vector.extract_strided_slice %425 {offsets = [0, 0, 64], sizes = [2, 2, 64], strides = [1, 1, 1]} : vector<2x2x192xf32> to vector<2x2x64xf32>
    %428 = vector.extract_strided_slice %425 {offsets = [0, 0, 128], sizes = [2, 2, 64], strides = [1, 1, 1]} : vector<2x2x192xf32> to vector<2x2x64xf32>
    %429 = vector.extract_strided_slice %426 {offsets = [0, 0, 0], sizes = [2, 2, 16], strides = [1, 1, 1]} : vector<2x2x64xf32> to vector<2x2x16xf32>
    %430 = vector.extract_strided_slice %427 {offsets = [0, 0, 0], sizes = [2, 2, 16], strides = [1, 1, 1]} : vector<2x2x64xf32> to vector<2x2x16xf32>
    %431 = vector.extract_strided_slice %428 {offsets = [0, 0, 0], sizes = [2, 2, 16], strides = [1, 1, 1]} : vector<2x2x64xf32> to vector<2x2x16xf32>
    "tpu.trace_start"() <{level = 10 : i32, message = "bqd,bkd->bqk"}> : () -> ()
    %cst_170 = arith.constant dense<0.000000e+00> : vector<2x2x2xf32>
    %432 = tpu.matmul %429, %430, %cst_170 {dimension_numbers = #tpu.dot_dimension_numbers<[2], [2], [1], [1], [0, 0, 0, 1, 1, 1], [0], [0]>} : vector<2x2x16xf32>, vector<2x2x16xf32>, vector<2x2x2xf32> -> vector<2x2x2xf32>
    "tpu.trace_stop"() : () -> ()
    %cst_171 = arith.constant dense<0xFF800000> : vector<2x2xf32>
    %433 = vector.multi_reduction <maximumf>, %432, %cst_171 [2] : vector<2x2x2xf32> to vector<2x2xf32>
    %434 = vector.shape_cast %433 : vector<2x2xf32> to vector<2x2x1xf32>
    %435 = vector.broadcast %434 : vector<2x2x1xf32> to vector<2x2x2xf32>
    %436 = arith.subf %432, %435 : vector<2x2x2xf32>
    %437 = math.exp %436 : vector<2x2x2xf32>
    %cst_172 = arith.constant dense<0.000000e+00> : vector<2x2xf32>
    %438 = vector.multi_reduction <add>, %437, %cst_172 [2] : vector<2x2x2xf32> to vector<2x2xf32>
    %439 = vector.shape_cast %438 : vector<2x2xf32> to vector<2x2x1xf32>
    %440 = tpu.reciprocal %439 {approx = true} : vector<2x2x1xf32> -> vector<2x2x1xf32>
    %441 = vector.broadcast %440 : vector<2x2x1xf32> to vector<2x2x2xf32>
    %442 = arith.mulf %437, %441 : vector<2x2x2xf32>
    "tpu.trace_start"() <{level = 10 : i32, message = "bqk,bkd->bqd"}> : () -> ()
    %cst_173 = arith.constant dense<0.000000e+00> : vector<2x2x16xf32>
    %443 = tpu.matmul %442, %431, %cst_173 {dimension_numbers = #tpu.dot_dimension_numbers<[2], [1], [1], [2], [0, 0, 0, 1, 1, 2], [0], [0]>} : vector<2x2x2xf32>, vector<2x2x16xf32>, vector<2x2x16xf32> -> vector<2x2x16xf32>
    "tpu.trace_stop"() : () -> ()
    %444 = vector.extract_strided_slice %426 {offsets = [0, 0, 16], sizes = [2, 2, 16], strides = [1, 1, 1]} : vector<2x2x64xf32> to vector<2x2x16xf32>
    %445 = vector.extract_strided_slice %427 {offsets = [0, 0, 16], sizes = [2, 2, 16], strides = [1, 1, 1]} : vector<2x2x64xf32> to vector<2x2x16xf32>
    %446 = vector.extract_strided_slice %428 {offsets = [0, 0, 16], sizes = [2, 2, 16], strides = [1, 1, 1]} : vector<2x2x64xf32> to vector<2x2x16xf32>
    "tpu.trace_start"() <{level = 10 : i32, message = "bqd,bkd->bqk"}> : () -> ()
    %cst_174 = arith.constant dense<0.000000e+00> : vector<2x2x2xf32>
    %447 = tpu.matmul %444, %445, %cst_174 {dimension_numbers = #tpu.dot_dimension_numbers<[2], [2], [1], [1], [0, 0, 0, 1, 1, 1], [0], [0]>} : vector<2x2x16xf32>, vector<2x2x16xf32>, vector<2x2x2xf32> -> vector<2x2x2xf32>
    "tpu.trace_stop"() : () -> ()
    %cst_175 = arith.constant dense<0xFF800000> : vector<2x2xf32>
    %448 = vector.multi_reduction <maximumf>, %447, %cst_175 [2] : vector<2x2x2xf32> to vector<2x2xf32>
    %449 = vector.shape_cast %448 : vector<2x2xf32> to vector<2x2x1xf32>
    %450 = vector.broadcast %449 : vector<2x2x1xf32> to vector<2x2x2xf32>
    %451 = arith.subf %447, %450 : vector<2x2x2xf32>
    %452 = math.exp %451 : vector<2x2x2xf32>
    %cst_176 = arith.constant dense<0.000000e+00> : vector<2x2xf32>
    %453 = vector.multi_reduction <add>, %452, %cst_176 [2] : vector<2x2x2xf32> to vector<2x2xf32>
    %454 = vector.shape_cast %453 : vector<2x2xf32> to vector<2x2x1xf32>
    %455 = tpu.reciprocal %454 {approx = true} : vector<2x2x1xf32> -> vector<2x2x1xf32>
    %456 = vector.broadcast %455 : vector<2x2x1xf32> to vector<2x2x2xf32>
    %457 = arith.mulf %452, %456 : vector<2x2x2xf32>
    "tpu.trace_start"() <{level = 10 : i32, message = "bqk,bkd->bqd"}> : () -> ()
    %cst_177 = arith.constant dense<0.000000e+00> : vector<2x2x16xf32>
    %458 = tpu.matmul %457, %446, %cst_177 {dimension_numbers = #tpu.dot_dimension_numbers<[2], [1], [1], [2], [0, 0, 0, 1, 1, 2], [0], [0]>} : vector<2x2x2xf32>, vector<2x2x16xf32>, vector<2x2x16xf32> -> vector<2x2x16xf32>
    "tpu.trace_stop"() : () -> ()
    %459 = vector.extract_strided_slice %426 {offsets = [0, 0, 32], sizes = [2, 2, 16], strides = [1, 1, 1]} : vector<2x2x64xf32> to vector<2x2x16xf32>
    %460 = vector.extract_strided_slice %427 {offsets = [0, 0, 32], sizes = [2, 2, 16], strides = [1, 1, 1]} : vector<2x2x64xf32> to vector<2x2x16xf32>
    %461 = vector.extract_strided_slice %428 {offsets = [0, 0, 32], sizes = [2, 2, 16], strides = [1, 1, 1]} : vector<2x2x64xf32> to vector<2x2x16xf32>
    "tpu.trace_start"() <{level = 10 : i32, message = "bqd,bkd->bqk"}> : () -> ()
    %cst_178 = arith.constant dense<0.000000e+00> : vector<2x2x2xf32>
    %462 = tpu.matmul %459, %460, %cst_178 {dimension_numbers = #tpu.dot_dimension_numbers<[2], [2], [1], [1], [0, 0, 0, 1, 1, 1], [0], [0]>} : vector<2x2x16xf32>, vector<2x2x16xf32>, vector<2x2x2xf32> -> vector<2x2x2xf32>
    "tpu.trace_stop"() : () -> ()
    %cst_179 = arith.constant dense<0xFF800000> : vector<2x2xf32>
    %463 = vector.multi_reduction <maximumf>, %462, %cst_179 [2] : vector<2x2x2xf32> to vector<2x2xf32>
    %464 = vector.shape_cast %463 : vector<2x2xf32> to vector<2x2x1xf32>
    %465 = vector.broadcast %464 : vector<2x2x1xf32> to vector<2x2x2xf32>
    %466 = arith.subf %462, %465 : vector<2x2x2xf32>
    %467 = math.exp %466 : vector<2x2x2xf32>
    %cst_180 = arith.constant dense<0.000000e+00> : vector<2x2xf32>
    %468 = vector.multi_reduction <add>, %467, %cst_180 [2] : vector<2x2x2xf32> to vector<2x2xf32>
    %469 = vector.shape_cast %468 : vector<2x2xf32> to vector<2x2x1xf32>
    %470 = tpu.reciprocal %469 {approx = true} : vector<2x2x1xf32> -> vector<2x2x1xf32>
    %471 = vector.broadcast %470 : vector<2x2x1xf32> to vector<2x2x2xf32>
    %472 = arith.mulf %467, %471 : vector<2x2x2xf32>
    "tpu.trace_start"() <{level = 10 : i32, message = "bqk,bkd->bqd"}> : () -> ()
    %cst_181 = arith.constant dense<0.000000e+00> : vector<2x2x16xf32>
    %473 = tpu.matmul %472, %461, %cst_181 {dimension_numbers = #tpu.dot_dimension_numbers<[2], [1], [1], [2], [0, 0, 0, 1, 1, 2], [0], [0]>} : vector<2x2x2xf32>, vector<2x2x16xf32>, vector<2x2x16xf32> -> vector<2x2x16xf32>
    "tpu.trace_stop"() : () -> ()
    %474 = vector.extract_strided_slice %426 {offsets = [0, 0, 48], sizes = [2, 2, 16], strides = [1, 1, 1]} : vector<2x2x64xf32> to vector<2x2x16xf32>
    %475 = vector.extract_strided_slice %427 {offsets = [0, 0, 48], sizes = [2, 2, 16], strides = [1, 1, 1]} : vector<2x2x64xf32> to vector<2x2x16xf32>
    %476 = vector.extract_strided_slice %428 {offsets = [0, 0, 48], sizes = [2, 2, 16], strides = [1, 1, 1]} : vector<2x2x64xf32> to vector<2x2x16xf32>
    "tpu.trace_start"() <{level = 10 : i32, message = "bqd,bkd->bqk"}> : () -> ()
    %cst_182 = arith.constant dense<0.000000e+00> : vector<2x2x2xf32>
    %477 = tpu.matmul %474, %475, %cst_182 {dimension_numbers = #tpu.dot_dimension_numbers<[2], [2], [1], [1], [0, 0, 0, 1, 1, 1], [0], [0]>} : vector<2x2x16xf32>, vector<2x2x16xf32>, vector<2x2x2xf32> -> vector<2x2x2xf32>
    "tpu.trace_stop"() : () -> ()
    %cst_183 = arith.constant dense<0xFF800000> : vector<2x2xf32>
    %478 = vector.multi_reduction <maximumf>, %477, %cst_183 [2] : vector<2x2x2xf32> to vector<2x2xf32>
    %479 = vector.shape_cast %478 : vector<2x2xf32> to vector<2x2x1xf32>
    %480 = vector.broadcast %479 : vector<2x2x1xf32> to vector<2x2x2xf32>
    %481 = arith.subf %477, %480 : vector<2x2x2xf32>
    %482 = math.exp %481 : vector<2x2x2xf32>
    %cst_184 = arith.constant dense<0.000000e+00> : vector<2x2xf32>
    %483 = vector.multi_reduction <add>, %482, %cst_184 [2] : vector<2x2x2xf32> to vector<2x2xf32>
    %484 = vector.shape_cast %483 : vector<2x2xf32> to vector<2x2x1xf32>
    %485 = tpu.reciprocal %484 {approx = true} : vector<2x2x1xf32> -> vector<2x2x1xf32>
    %486 = vector.broadcast %485 : vector<2x2x1xf32> to vector<2x2x2xf32>
    %487 = arith.mulf %482, %486 : vector<2x2x2xf32>
    "tpu.trace_start"() <{level = 10 : i32, message = "bqk,bkd->bqd"}> : () -> ()
    %cst_185 = arith.constant dense<0.000000e+00> : vector<2x2x16xf32>
    %488 = tpu.matmul %487, %476, %cst_185 {dimension_numbers = #tpu.dot_dimension_numbers<[2], [1], [1], [2], [0, 0, 0, 1, 1, 2], [0], [0]>} : vector<2x2x2xf32>, vector<2x2x16xf32>, vector<2x2x16xf32> -> vector<2x2x16xf32>
    "tpu.trace_stop"() : () -> ()
    %489 = tpu.concatenate %443, %458, %473, %488 in 2 : vector<2x2x16xf32>, vector<2x2x16xf32>, vector<2x2x16xf32>, vector<2x2x16xf32> -> vector<2x2x64xf32>
    %490 = vector.shape_cast %489 : vector<2x2x64xf32> to vector<4x64xf32>
    %cst_186 = arith.constant dense<0.000000e+00> : vector<4x64xf32>
    %491 = tpu.matmul %490, %416, %cst_186 {dimension_numbers = #tpu.dot_dimension_numbers<[1], [0], [0], [1], [0, 0, 1, 1], [], []>} : vector<4x64xf32>, vector<64x64xf32>, vector<4x64xf32> -> vector<4x64xf32>
    %492 = vector.broadcast %418 : vector<1x64xf32> to vector<4x64xf32>
    %493 = arith.addf %491, %492 : vector<4x64xf32>
    %494 = vector.shape_cast %493 : vector<4x64xf32> to vector<2x2x64xf32>
    %495 = arith.addf %410, %494 : vector<2x2x64xf32>
    %496 = vector.extract_strided_slice %495 {offsets = [0, 0, 0], sizes = [1, 2, 64], strides = [1, 1, 1]} : vector<2x2x64xf32> to vector<1x2x64xf32>
    %497 = vector.shape_cast %496 : vector<1x2x64xf32> to vector<2x64xf32>
    %cst_187 = arith.constant dense<0.000000e+00> : vector<1x64xf32>
    %498 = tpu.matmul %419, %497, %cst_187 {dimension_numbers = #tpu.dot_dimension_numbers<[1], [0], [0], [1], [0, 0, 1, 1], [], []>} : vector<1x2xf32>, vector<2x64xf32>, vector<1x64xf32> -> vector<1x64xf32>
    %499 = vector.broadcast %420 : vector<1x1xf32> to vector<1x64xf32>
    %500 = arith.addf %498, %499 : vector<1x64xf32>
    %501 = vector.extract_strided_slice %495 {offsets = [1, 0, 0], sizes = [1, 2, 64], strides = [1, 1, 1]} : vector<2x2x64xf32> to vector<1x2x64xf32>
    %502 = vector.shape_cast %501 : vector<1x2x64xf32> to vector<2x64xf32>
    %cst_188 = arith.constant dense<0.000000e+00> : vector<1x64xf32>
    %503 = tpu.matmul %419, %502, %cst_188 {dimension_numbers = #tpu.dot_dimension_numbers<[1], [0], [0], [1], [0, 0, 1, 1], [], []>} : vector<1x2xf32>, vector<2x64xf32>, vector<1x64xf32> -> vector<1x64xf32>
    %504 = vector.broadcast %420 : vector<1x1xf32> to vector<1x64xf32>
    %505 = arith.addf %503, %504 : vector<1x64xf32>
    %506 = vector.shape_cast %500 : vector<1x64xf32> to vector<1x1x64xf32>
    %507 = vector.shape_cast %505 : vector<1x64xf32> to vector<1x1x64xf32>
    %508 = tpu.concatenate %506, %507 in 0 : vector<1x1x64xf32>, vector<1x1x64xf32> -> vector<2x1x64xf32>
    %cst_189 = arith.constant 0.000000e+00 : f32
    %509 = vector.broadcast %cst_189 : f32 to vector<2x1x64xf32>
    %510 = arith.maximumf %508, %509 : vector<2x1x64xf32>
    %c0_190 = arith.constant 0 : index
    %c0_191 = arith.constant 0 : index
    %c0_192 = arith.constant 0 : index
    %511 = vector.load %arg18[%c0_190, %c0_191, %c0_192] : memref<2x1x64xf32, #tpu.memory_space<vmem>>, vector<2x1x64xf32>
    tpu.vector_store %arg18[%c0_190, %c0_191, %c0_192], %510 {strides = array<i32>} : memref<2x1x64xf32, #tpu.memory_space<vmem>>, vector<2x1x64xf32>,
    return
  }
}

</mosaic_0001>

<bundles_post_ra>
// kernel: model_forward.3
= control target key start
LH: loop header
LB: loop body
LE: loop exit
PB: predicated region body
PF: predicated region fallthrough
CT: control target
= control target key end

     0   :  { %v3224_v0 = vmov 0.0|0.0   ;;  %vm3225_vm0 = vmmov 0   ;;  %v3226_v8 = vmov 0.0   ;;  %vm66_vm1 = vcmask 523264   ;;  %s3227_s30 = smov 64   ;;  %s4055_s2 = inlined_call_operand.vmem [shape: f32[64,16], index: 2, kind: input, shape index: {}]   ;;  %s4056_s4 = inlined_call_operand.vmem [shape: f32[64,16], index: 4, kind: input, shape index: {}]   ;;  %s4057_s0 = inlined_call_operand.vmem [shape: f32[2,64], index: 0, kind: input, shape index: {}]   ;;  %s4058_s6 = inlined_call_operand.vmem [shape: f32[16,64], index: 6, kind: input, shape index: {}]   ;;  %s4059_s8 = inlined_call_operand.vmem [shape: f32[128,192], index: 8, kind: input, shape index: {}]   ;;  %s4060_s9 = inlined_call_operand.vmem [shape: f32[64,192], index: 9, kind: input, shape index: {}]   ;;  %s4061_s3 = inlined_call_operand.vmem [shape: f32[1,16], index: 3, kind: input, shape index: {}]   ;;  %s4062_s5 = inlined_call_operand.vmem [shape: f32[1,16], index: 5, kind: input, shape index: {}]   ;;  %s4063_s1 = inlined_call_operand.vmem [shape: f32[4,16], index: 1, kind: input, shape index: {}]   ;;  %s4064_s7 = inlined_call_operand.vmem [shape: f32[1,64], index: 7, kind: input, shape index: {}]   ;;  %s4065_s10 = inlined_call_operand.vmem [shape: f32[1,192], index: 10, kind: input, shape index: {}]   ;;  %s4066_s11 = inlined_call_operand.vmem [shape: f32[1,192], index: 11, kind: input, shape index: {}]   ;;  %s4067_s12 = inlined_call_operand.vmem [shape: f32[64,128], index: 12, kind: input, shape index: {}]   ;;  %s4068_s13 = inlined_call_operand.vmem [shape: f32[1,128], index: 13, kind: input, shape index: {}]   ;;  %s4069_s14 = inlined_call_operand.vmem [shape: f32[8,4,128], index: 14, kind: output, shape index: {0}]   ;;  %s4070_s15 = inlined_call_operand.vmem [shape: f32[2,1], index: 15, kind: output, shape index: {1}]  }
   0x1   :  { %2659 = vmatprep.subr.bf16.mxu0 %v3224_v0  ;;  %2671 = vmatprep.subr.bf16.mxu1 %v3224_v0  ;;  %v51_v1 = vld [vmem:[%s4055_s2] sm:$0xff]  ;;  %v52_v2 = vld [vmem:[%s4055_s2 + $0x8] sm:$0xff]  ;;  %v53_v6 = vld [vmem:[%s4055_s2 + $0x10] sm:$0xff]  ;;  %vm240_vm2 = vcmask 1041408   ;;  %vm260_vm3 = vcmask 130048   ;;  %vm231_vm4 = vcmask 123904  }
   0x2   :  { %v140_v3 = vld [vmem:[%s4056_s4] sm:$0xff]  ;;  %v2660_v4 = vpack.c.bf16 %v52_v2, %v51_v1  ;;  %v141_v5 = vld [vmem:[%s4056_s4 + $0x8] sm:$0xff]  ;;  %v54_v7 = vld [vmem:[%s4055_s2 + $0x18] sm:$0xff]  ;;  %2478 = vmatprep.mubr.msk.f32.mxu0 %vm3225_vm0, %v3226_v8  ;;  %2497 = vmatprep.mubr.msk.f32.mxu1 %vm3225_vm0, %v3226_v8  ;;  %vm235_vm5 = vcmask 1024  }
   0x3   :  { %v2672_v9 = vpack.c.bf16 %v141_v5, %v140_v3  ;;  %v142_v10 = vld [vmem:[%s4056_s4 + $0x10] sm:$0xff]  ;;  %v143_v11 = vld [vmem:[%s4056_s4 + $0x18] sm:$0xff]  ;;  %v2663_v12 = vpack.c.bf16 %v54_v7, %v53_v6  ;;  %v55_v14 = vld [vmem:[%s4055_s2 + $0x20] sm:$0xff] }
   0x4   :  { %2661 = vmatpush3.bf16.msra.mxu0 %v2660_v4  ;;  %v2675_v13 = vpack.c.bf16 %v143_v11, %v142_v10  ;;  %v56_v15 = vld [vmem:[%s4055_s2 + $0x28] sm:$0xff]  ;;  %v144_v16 = vld [vmem:[%s4056_s4 + $0x20] sm:$0xff]  ;;  %v57_v20 = vld [vmem:[%s4055_s2 + $0x30] sm:$0xff] }
   0x5   :  { %2673 = vmatpush3.bf16.msra.mxu1 %v2672_v9  ;;  %2662 = vmatprep.subr.bf16.mxu0 %v3224_v0  ;;  %v145_v17 = vld [vmem:[%s4056_s4 + $0x28] sm:$0xff]  ;;  %v2666_v18 = vpack.c.bf16 %v56_v15, %v55_v14  ;;  %v58_v21 = vld [vmem:[%s4055_s2 + $0x38] sm:$0xff]  ;;  %v146_v22 = vld [vmem:[%s4056_s4 + $0x30] sm:$0xff] }
   0x6   :  { %2674 = vmatprep.subr.bf16.mxu1 %v3224_v0  ;;  %v2678_v19 = vpack.c.bf16 %v145_v17, %v144_v16  ;;  %v147_v23 = vld [vmem:[%s4056_s4 + $0x38] sm:$0xff]  ;;  %v2669_v24 = vpack.c.bf16 %v58_v21, %v57_v20  ;;  %v49_v26 = vld [vmem:[%s4057_s0] sm:$0x3]  ;;  %v252_v28 = vld [vmem:[%s4058_s6 + $0x8] sm:$0xff] }
   0x7   :  { %v2681_v25 = vpack.c.bf16 %v147_v23, %v146_v22  ;;  %v251_v27 = vld [vmem:[%s4058_s6] sm:$0xff]  ;;  %v336_v30 = vld [vmem:[%s4059_s8 + $0x8] sm:$0xff]  ;;  %v338_v31 = vld [vmem:[%s4059_s8 + $0x18] sm:$0xff] }
   0x8   :  { %2664 = vmatpush3.bf16.msra.mxu0 %v2663_v12  ;;  %v2684_v29 = vpack.c.bf16 %v252_v28, %v251_v27  ;;  %v335_v32 = vld [vmem:[%s4059_s8] sm:$0xff]  ;;  %v3392_v33 = vpack.c.bf16 %v338_v31, %v336_v30  ;;  %v337_v34 = vld [vmem:[%s4059_s8 + $0x10] sm:$0xff]  ;;  %v340_v35 = vld [vmem:[%s4059_s8 + $0x28] sm:$0xff] }
   0x9   :  { %2676 = vmatpush3.bf16.msra.mxu1 %v2675_v13  ;;  %2665 = vmatprep.subr.bf16.mxu0 %v3224_v0  ;;  %v342_v36 = vld [vmem:[%s4059_s8 + $0x38] sm:$0xff]  ;;  %v3403_v37 = vpack.c.bf16 %v337_v34, %v335_v32  ;;  %v339_v39 = vld [vmem:[%s4059_s8 + $0x20] sm:$0xff]  ;;  %v341_v40 = vld [vmem:[%s4059_s8 + $0x30] sm:$0xff] }
   0xa   :  { %2677 = vmatprep.subr.bf16.mxu1 %v3224_v0  ;;  %v3405_v38 = vpack.c.bf16 %v342_v36, %v340_v35  ;;  %v344_v41 = vld [vmem:[%s4059_s8 + $0x48] sm:$0xff]  ;;  %v346_v42 = vld [vmem:[%s4059_s8 + $0x58] sm:$0xff]  ;;  %v3421_v43 = vpack.c.bf16 %v341_v40, %v339_v39  ;;  %v343_v45 = vld [vmem:[%s4059_s8 + $0x40] sm:$0xff] }
   0xb   :  { %v3424_v44 = vpack.c.bf16 %v346_v42, %v344_v41  ;;  %v345_v46 = vld [vmem:[%s4059_s8 + $0x50] sm:$0xff]  ;;  %v348_v47 = vld [vmem:[%s4059_s8 + $0x68] sm:$0xff]  ;;  %v350_v48 = vld [vmem:[%s4059_s8 + $0x78] sm:$0xff] }
   0xc   :  { %2667 = vmatpush3.bf16.msra.mxu0 %v2666_v18  ;;  %v368_v49 = vld [vmem:[%s4060_s9 + $0x8] sm:$0xff]  ;;  %v370_v50 = vld [vmem:[%s4060_s9 + $0x18] sm:$0xff]  ;;  %v3445_v51 = vpack.c.bf16 %v345_v46, %v343_v45  ;;  %v3450_v53 = vpack.c.bf16 %v350_v48, %v348_v47  ;;  %v347_v54 = vld [vmem:[%s4059_s8 + $0x60] sm:$0xff] }
   0xd   :  { %2679 = vmatpush3.bf16.msra.mxu1 %v2678_v19  ;;  %2668 = vmatprep.subr.bf16.mxu0 %v3224_v0  ;;  %v3447_v52 = vpack.c.bf16 %v370_v50, %v368_v49  ;;  %v349_v55 = vld [vmem:[%s4059_s8 + $0x70] sm:$0xff]  ;;  %v352_v56 = vld [vmem:[%s4059_s8 + $0x88] sm:$0xff]  ;;  %v354_v57 = vld [vmem:[%s4059_s8 + $0x98] sm:$0xff] }
   0xe   :  { %2680 = vmatprep.subr.bf16.mxu1 %v3224_v0  ;;  %v3466_v58 = vpack.c.bf16 %v349_v55, %v347_v54  ;;  %v3469_v59 = vpack.c.bf16 %v354_v57, %v352_v56  ;;  %v351_v60 = vld [vmem:[%s4059_s8 + $0x80] sm:$0xff]  ;;  %v353_v61 = vld [vmem:[%s4059_s8 + $0x90] sm:$0xff]  ;;  %v356_v28 = vld [vmem:[%s4059_s8 + $0xa8] sm:$0xff] }
   0xf   :  { %v3478_v62 = vpack.c.bf16 %v353_v61, %v351_v60  ;;  %v2331_v63 = vld [vmem:[%s4061_s3] ss:$0 sm:$0xff]  ;;  %v369_v22 = vld [vmem:[%s4060_s9 + $0x10] sm:$0xff]  ;;  %v372_v34 = vld [vmem:[%s4060_s9 + $0x28] sm:$0xff] }
  0x10   :  { %2670 = vmatpush3.bf16.msra.mxu0 %v2669_v24  ;;  %v2333_v1 = vld [vmem:[%s4062_s5] ss:$0 sm:$0xff]  ;;  %v357_v32 = vld [vmem:[%s4059_s8 + $0xb0] sm:$0xff]  ;;  %v374_v36 = vld [vmem:[%s4060_s9 + $0x38] sm:$0xff] }
  0x11   :  { %2682 = vmatpush3.bf16.msra.mxu1 %v2681_v25  ;;  %2683 = vmatprep.subr.bf16.mxu0 %v3224_v0  ;;  %v50_v20 = vld [vmem:[%s4063_s1] sm:$0xf]  ;;  %v373_v40 = vld [vmem:[%s4060_s9 + $0x30] sm:$0xff]  ;;  %v3534_v41 = vpack.c.bf16 %v374_v36, %v372_v34  ;;  %v360_v45 = vld [vmem:[%s4059_s8 + $0xc8] sm:$0xff] }
  0x12   :  { %2687 = vmatprep.subr.bf16.mxu1 %v3392_v33  ;;  %v367_v21 = vld [vmem:[%s4060_s9] sm:$0xff]  ;;  %v362_v46 = vld [vmem:[%s4059_s8 + $0xd8] sm:$0xff]  ;;  %v361_v49 = vld [vmem:[%s4059_s8 + $0xd0] sm:$0xff] }
  0x13   :  { %2479 = vmatmul.mubr.msk.f32.vlgmr.msra.gmra.mrb[0].mxu0 %vm66_vm1, %v49_v26  ;;  %v355_v31 = vld [vmem:[%s4059_s8 + $0xa0] sm:$0xff]  ;;  %v3546_v47 = vpack.c.bf16 %v362_v46, %v360_v45  ;;  %v376_v50 = vld [vmem:[%s4060_s9 + $0x48] sm:$0xff]  ;;  %v378_v55 = vld [vmem:[%s4060_s9 + $0x58] sm:$0xff] }
  0x14   :  { %2498 = vmatmul.mubr.msk.f32.vlgmr.msra.gmra.mrb[0].mxu1 %vm66_vm1, %v49_v26  ;;  %2504 = vmatprep.mubr.msk.f32.mxu0 %vm3225_vm0, %v3226_v8  ;;  %v3501_v26 = vpack.c.bf16 %v369_v22, %v367_v21  ;;  %v3522_v35 = vpack.c.bf16 %v357_v32, %v355_v31  ;;  %v371_v39 = vld [vmem:[%s4060_s9 + $0x20] sm:$0xff]  ;;  %v377_v57 = vld [vmem:[%s4060_s9 + $0x50] sm:$0xff]  ;;  %v3570_v60 = vpack.c.bf16 %v378_v55, %v376_v50  ;;  %v395_v21 = vlaneseq }
  0x15   :  { %469 = vmatprep.mubr.f32.mxu1 %v3226_v8  ;;  %2685 = vmatpush3.bf16.msra.mxu0 %v2684_v29  ;;  %v358_v29 = vld [vmem:[%s4059_s8 + $0xb8] sm:$0xff]  ;;  %v3536_v42 = vpack.c.bf16 %v373_v40, %v371_v39  ;;  %v359_v48 = vld [vmem:[%s4059_s8 + $0xc0] sm:$0xff] }
  0x16   :  { %2689 = vmatpush1.bf16.msra.mxu1 %v3403_v37  ;;  %2719 = vmatprep.subr.bf16.mxu0 %v3447_v52  ;;  %v3511_v30 = vpack.c.bf16 %v358_v29, %v356_v28  ;;  %v3558_v54 = vpack.c.bf16 %v361_v49, %v359_v48  ;;  %v375_v56 = vld [vmem:[%s4060_s9 + $0x40] sm:$0xff]  ;;  %v396_v22 = vshrl.u32 %v395_v21, 7 }
  0x17   :  { %2691 = vmatprep.subr.bf16.mxu1 %v3405_v38  ;;  %v3572_v61 = vpack.c.bf16 %v377_v57, %v375_v56 }
  0x18   :  { %v401_v46 = vsub.s32 1, %v396_v22 }
  0x1a   :  { %2693 = vmatpush1.bf16.msra.mxu1 %v3421_v43 }
  0x1b   :  { %2695 = vmatprep.subr.bf16.mxu1 %v3424_v44 }
  0x1e   :  { %2697 = vmatpush1.bf16.msra.mxu1 %v3445_v51 }
  0x1f   :  { %2699 = vmatprep.subr.bf16.mxu1 %v3450_v53 }
  0x22   :  { %2701 = vmatpush1.bf16.msra.mxu1 %v3466_v58 }
  0x23   :  { %2703 = vmatprep.subr.bf16.mxu1 %v3469_v59 }
  0x26   :  { %2705 = vmatpush1.bf16.msra.mxu1 %v3478_v62 }
  0x27   :  { %2707 = vmatprep.subr.bf16.mxu1 %v3511_v30 }
  0x2a   :  { %2709 = vmatpush1.bf16.msra.mxu1 %v3522_v35 }
  0x2b   :  { %2711 = vmatprep.subr.bf16.mxu1 %v3546_v47 }
  0x2e   :  { %2713 = vmatpush1.bf16.msra.mxu1 %v3558_v54 }
  0xe6   :  { %v136_v2 = vpop.f32.mrb[0].mxu0 }
  0xe7   :  { %v137_v3 = vadd.f32 %v2331_v63, %v136_v2  ;;  %v221_v4 = vpop.f32.mrb[0].mxu1  ;;  %v2480_v5 = vpop.f32.mrb[1].mxu0  ;;  %v364_v63 = vld [vmem:[%s4059_s8 + $0xe8] sm:$0xff]  ;;  %v363_v2 = vld [vmem:[%s4059_s8 + $0xe0] sm:$0xff] }
  0xe8   :  { %v222_v6 = vadd.f32 %v2333_v1, %v221_v4  ;;  %v2499_v7 = vpop.f32.mrb[1].mxu1  ;;  %v366_v1 = vld [vmem:[%s4059_s8 + $0xf8] sm:$0xff]  ;;  %v365_v4 = vld [vmem:[%s4059_s8 + $0xf0] sm:$0xff]  ;;  %v380_v5 = vld [vmem:[%s4060_s9 + $0x68] sm:$0xff] }
  0xe9   :  { %v226_v9 = vmul.f32 %v137_v3, %v137_v3  ;;  %v238_v19 = vrot.slane %v137_v3, 6  ;;  %v3596_v7 = vpack.c.bf16 %v365_v4, %v363_v2  ;;  %v386_v2 = vld [vmem:[%s4067_s12 + $0x8] sm:$0xff]  ;;  %v387_v4 = vld [vmem:[%s4067_s12 + $0x10] sm:$0xff] }
  0xea   :  { %v228_v10 = vmul.f32 1.442695, %v222_v6  ;;  %v243_v11 = vrot.slane %v222_v6, 6  ;;  %v225_v12 = vadd.f32 1.0, %v222_v6 }
  0xeb   :  { %v241_v25 = vsel %vm240_vm2, %v137_v3, %v238_v19  ;;  %v3584_v3 = vpack.c.bf16 %v366_v1, %v364_v63  ;;  %v385_v1 = vld [vmem:[%s4067_s12] sm:$0xff] }
  0xec   :  { %3170 = vpow2.f32 %v228_v10  ;;  %v245_v13 = vsel %vm240_vm2, %v222_v6, %v243_v11  ;;  %v227_v14 = vsub.f32 %v225_v12, %v226_v9  ;;  %v382_v6 = vld [vmem:[%s4060_s9 + $0x78] sm:$0xff]  ;;  %v379_v10 = vld [vmem:[%s4060_s9 + $0x60] sm:$0xff]  ;;  %v381_v11 = vld [vmem:[%s4060_s9 + $0x70] sm:$0xff] }
  0xed   :  { %v246_v15 = vmul.f32 0.5, %v245_v13  ;;  %v3598_v9 = vpack.c.bf16 %v382_v6, %v380_v5  ;;  %2715 = vmatprep.subr.bf16.mxu1 %v3584_v3  ;;  %v3608_v12 = vpack.c.bf16 %v381_v11, %v379_v10  ;;  %v2335_v13 = vld [vmem:[%s4064_s7] ss:$0 sm:$0xff]  ;;  %v3666_v5 = vpack.c.bf16 %v386_v2, %v385_v1  ;;  %v388_v6 = vld [vmem:[%s4067_s12 + $0x18] sm:$0xff] }
  0xee   :  { %2717 = vmatpush1.bf16.msra.mxu1 %v3596_v7  ;;  %v3672_v11 = vpack.c.bf16 %v388_v6, %v387_v4 }
  0xef   :  { %v247_v16 = vmul.f32 1.442695, %v246_v15  ;;  %2747 = vmatprep.subr.bf16.mxu1 %v3392_v33 }
  0xf1   :  { %3172 = vpow2.f32 %v247_v16  ;;  %470 = vmatmul.mubr.f32.vlgmr.msra.gmra.mrb[2].mxu1 %v3226_v8 }
  0xf2   :  { %2749 = vmatpush1.bf16.msra.mxu1 %v3403_v37  ;;  %728 = vmatprep.mubr.f32.mxu1 %v3226_v8 }
  0xf3   :  { %2751 = vmatprep.subr.bf16.mxu1 %v3405_v38 }
  0xf6   :  { %v3171_v17 = vpop.eup %3170  ;;  %2753 = vmatpush1.bf16.msra.mxu1 %v3421_v43 }
  0xf7   :  { %v3489_v18 = vsub.f32 %v227_v14, %v3171_v17  ;;  %2755 = vmatprep.subr.bf16.mxu1 %v3424_v44 }
  0xfa   :  { %2757 = vmatpush1.bf16.msra.mxu1 %v3445_v51 }
  0xfb   :  { %v3173_v23 = vpop.eup %3172  ;;  %2759 = vmatprep.subr.bf16.mxu1 %v3450_v53 }
  0xfc   :  { %v249_v24 = vmul.f32 %v3173_v23, %v50_v20  ;;  %v397_v23 = vsub.s32 0, %v396_v22 }
  0xfe   :  { %v250_v27 = vadd.f32 %v249_v24, %v241_v25  ;;  %2761 = vmatpush1.bf16.msra.mxu1 %v3466_v58  ;;  %v383_v24 = vld [vmem:[%s4065_s10] sm:$0x3] }
  0xff   :  { %2763 = vmatprep.subr.bf16.mxu1 %v3469_v59  ;;  %v384_v25 = vld [vmem:[%s4066_s11] sm:$0x3]  ;;  %v3653_v49 = vrot.slane %v383_v24, %v401_v46 }
 0x100   :  { %2505 = vmatmul.mubr.msk.f32.vlgmr.msra.gmra.mrb[2].mxu0 %vm260_vm3, %v250_v27  ;;  %v3645_v27 = vrot.slane %v383_v24, %v397_v23  ;;  %v3647_v28 = vrot.slane %v384_v25, %v397_v23  ;;  %v3651_v48 = vrot.slane %v384_v25, %v401_v46 }
 0x101   :  { %2721 = vmatpush1.bf16.msra.mxu0 %v3501_v26  ;;  %554 = vmatprep.mubr.f32.mxu0 %v3226_v8 }
 0x102   :  { %2723 = vmatprep.subr.bf16.mxu0 %v3534_v41  ;;  %2765 = vmatpush1.bf16.msra.mxu1 %v3478_v62 }
 0x103   :  { %2767 = vmatprep.subr.bf16.mxu1 %v3511_v30 }
 0x105   :  { %2725 = vmatpush1.bf16.msra.mxu0 %v3536_v42 }
 0x106   :  { %2727 = vmatprep.subr.bf16.mxu0 %v3570_v60  ;;  %2769 = vmatpush1.bf16.msra.mxu1 %v3522_v35 }
 0x107   :  { %2771 = vmatprep.subr.bf16.mxu1 %v3546_v47 }
 0x109   :  { %2729 = vmatpush1.bf16.msra.mxu0 %v3572_v61 }
 0x10a   :  { %2731 = vmatprep.subr.bf16.mxu0 %v3598_v9  ;;  %2773 = vmatpush1.bf16.msra.mxu1 %v3558_v54 }
 0x10b   :  { %2775 = vmatprep.subr.bf16.mxu1 %v3584_v3 }
 0x10d   :  { %2733 = vmatpush1.bf16.msra.mxu0 %v3608_v12 }
 0x10e   :  { %2734 = vmatprep.subr.bf16.mxu0 %v3224_v0  ;;  %2777 = vmatpush1.bf16.msra.mxu1 %v3596_v7 }
 0x10f   :  { %2807 = vmatprep.subr.bf16.mxu1 %v3392_v33 }
 0x1c4   :  { %v471_v19 = vpop.f32.mrb[2].mxu1 }
 0x1c5   :  { %v473_v20 = vpop.f32.mrb[3].mxu1  ;;  %v472_v29 = vadd.f32 %v471_v19, %v3645_v27  ;;  %v392_v19 = vld [vmem:[%s4067_s12 + $0x38] sm:$0xff] }
 0x1c6   :  { %v474_v56 = vadd.f32 %v473_v20, %v3653_v49 }
 0x1d3   :  { %v330_v14 = vpop.f32.mrb[2].mxu0 }
 0x1d4   :  { %v331_v15 = vadd.f32 %v2335_v13, %v330_v14  ;;  %v2506_v16 = vpop.f32.mrb[3].mxu0  ;;  %v389_v13 = vld [vmem:[%s4067_s12 + $0x20] sm:$0xff]  ;;  %v390_v14 = vld [vmem:[%s4067_s12 + $0x28] sm:$0xff] }
 0x1d5   :  { %v391_v16 = vld [vmem:[%s4067_s12 + $0x30] sm:$0xff] }
 0x1d6   :  { %3174 = vtanh.f32 %v331_v15  ;;  %v3683_v15 = vpack.c.bf16 %v390_v14, %v389_v13  ;;  %v3694_v20 = vpack.c.bf16 %v392_v19, %v391_v16 }
 0x1e0   :  { %v3175_v17 = vpop.eup %3174 }
 0x1e1   :  { %2337 = vmatmul.mubr.msk.f32.vlgmr.msra.gmra.mrb[4].mxu0 %vm66_vm1, %v3175_v17 }
 0x1e2   :  { %2523 = vmatprep.mubr.msk.f32.mxu0 %vm3225_vm0, %v3226_v8  ;;  %2736 = vmatpush3.bf16.msra.mxu0 %v3666_v5 }
 0x1e3   :  { %2737 = vmatprep.subr.bf16.mxu0 %v3224_v0 }
 0x1e6   :  { %2739 = vmatpush3.bf16.msra.mxu0 %v3672_v11 }
 0x1e7   :  { %2740 = vmatprep.subr.bf16.mxu0 %v3224_v0 }
 0x1ea   :  { %2742 = vmatpush3.bf16.msra.mxu0 %v3683_v15 }
 0x1eb   :  { %2743 = vmatprep.subr.bf16.mxu0 %v3224_v0 }
 0x1ee   :  { %2745 = vmatpush3.bf16.msra.mxu0 %v3694_v20 }
 0x1ef   :  { %2779 = vmatprep.subr.bf16.mxu0 %v3447_v52 }
 0x2b4   :  { %v556_v31 = vpop.f32.mrb[4].mxu0 }
 0x2b5   :  { %v557_v32 = vadd.f32 %v556_v31, %v3647_v28  ;;  %v558_v34 = vpop.f32.mrb[5].mxu0  ;;  %v3727_v31 = vld [vmem:[%s4068_s13] ss:$0 sm:$0xff] }
 0x2b6   :  { %v559_v50 = vadd.f32 %v558_v34, %v3651_v48 }
 0x2b7   :  { %v561_v36 = vadd.f32 %v557_v32, %v472_v29 }
 0x2b9   :  { %v2338_v39 = vmul.f32 -1.442695, %v561_v36 }
 0x2bb   :  { %3176 = vpow2.f32 %v2338_v39 }
 0x2c5   :  { %v3177_v40 = vpop.eup %3176 }
 0x2c6   :  { %v565_v45 = vadd.f32 1.0, %v3177_v40 }
 0x2c8   :  { %3178 = vrcp.f32 %v565_v45 }
 0x2d2   :  { %v3179_v55 = vpop.eup %3178 }
 0x2d3   :  { %v568_v57 = vmul.f32 %v3179_v55, %v559_v50  ;;  %v571_v21 = vsub.f32 1.0, %v3179_v55 }
 0x2d5   :  { %v569_v63 = vadd.f32 %v568_v57, %v474_v56 }
 0x2d7   :  { %3180 = vtanh.f32 %v569_v63 }
 0x2e1   :  { %v3181_v10 = vpop.eup %3180 }
 0x2e2   :  { %573 = vrot.lane.b32.xlu0 %v3181_v10, %s3227_s30 }
 0x2e6   :  { %577 = vrot.lane.b32.xlu0 %v3175_v17, %s3227_s30 }
 0x354   :  { %v574_v17 = vpop.permute.xlu0 %573 }
 0x355   :  { %v576_v23 = vmul.f32 %v574_v17, %v571_v21 }
 0x358   :  { %v578_v22 = vpop.permute.xlu0 %577 }
 0x359   :  { %v580_v24 = vmul.f32 %v3179_v55, %v578_v22 }
 0x35b   :  { %v3699_v25 = vadd.f32 %v580_v24, %v576_v23 }
 0x35d   :  { %589 = vrot.lane.b32.xlu1 %v3699_v25, %s3227_s30 }
 0x3cf   :  { %v590_v29 = vpop.permute.xlu1 %589 }
 0x3d0   :  { %2524 = vmatmul.mubr.msk.f32.vlgmr.msra.gmra.mrb[6].mxu0 %vm66_vm1, %v590_v29 }
 0x3d1   :  { %2781 = vmatpush1.bf16.msra.mxu0 %v3501_v26  ;;  %799 = vmatprep.mubr.f32.mxu0 %v3226_v8 }
 0x3d2   :  { %2783 = vmatprep.subr.bf16.mxu0 %v3534_v41 }
 0x3d5   :  { %2785 = vmatpush1.bf16.msra.mxu0 %v3536_v42 }
 0x3d6   :  { %2787 = vmatprep.subr.bf16.mxu0 %v3570_v60 }
 0x3d9   :  { %2789 = vmatpush1.bf16.msra.mxu0 %v3572_v61 }
 0x3da   :  { %2791 = vmatprep.subr.bf16.mxu0 %v3598_v9 }
 0x3dd   :  { %2793 = vmatpush1.bf16.msra.mxu0 %v3608_v12 }
 0x3de   :  { %2794 = vmatprep.subr.bf16.mxu0 %v3224_v0 }
 0x3e0   :  { %2341 = vmatmul.mubr.msk.f32.vlgmr.msra.gmra.mrb[8].mxu0 %vm66_vm1, %v590_v29 }
 0x3e1   :  { %2796 = vmatpush3.bf16.msra.mxu0 %v3666_v5  ;;  %2542 = vmatprep.mubr.msk.f32.mxu0 %vm3225_vm0, %v3226_v8 }
 0x3e2   :  { %2797 = vmatprep.subr.bf16.mxu0 %v3224_v0 }
 0x3e5   :  { %2799 = vmatpush3.bf16.msra.mxu0 %v3672_v11 }
 0x3e6   :  { %2800 = vmatprep.subr.bf16.mxu0 %v3224_v0 }
 0x3e9   :  { %2802 = vmatpush3.bf16.msra.mxu0 %v3683_v15 }
 0x3ea   :  { %2803 = vmatprep.subr.bf16.mxu0 %v3224_v0 }
 0x3ed   :  { %2805 = vmatpush3.bf16.msra.mxu0 %v3694_v20 }
 0x3ee   :  { %2839 = vmatprep.subr.bf16.mxu0 %v3447_v52 }
 0x4a3   :  { %v659_v32 = vpop.f32.mrb[6].mxu0 }
 0x4a4   :  { %v660_v34 = vadd.f32 %v3727_v31, %v659_v32  ;;  %v2525_v36 = vpop.f32.mrb[7].mxu0 }
 0x4a6   :  { %663 = vst [vmem:[%s4069_s14] sm:$0xf] %v660_v34  ;;  %729 = vmatmul.mubr.f32.vlgmr.msra.gmra.mrb[4].mxu1 %v660_v34 }
 0x4a7   :  { %2809 = vmatpush1.bf16.msra.mxu1 %v3403_v37  ;;  %965 = vmatprep.mubr.f32.mxu1 %v3226_v8 }
 0x4a8   :  { %2811 = vmatprep.subr.bf16.mxu1 %v3405_v38 }
 0x4ab   :  { %2813 = vmatpush1.bf16.msra.mxu1 %v3421_v43 }
 0x4ac   :  { %2815 = vmatprep.subr.bf16.mxu1 %v3424_v44 }
 0x4af   :  { %2817 = vmatpush1.bf16.msra.mxu1 %v3445_v51 }
 0x4b0   :  { %2819 = vmatprep.subr.bf16.mxu1 %v3450_v53 }
 0x4b3   :  { %v801_v39 = vpop.f32.mrb[8].mxu0  ;;  %2821 = vmatpush1.bf16.msra.mxu1 %v3466_v58 }
 0x4b4   :  { %v803_v40 = vpop.f32.mrb[9].mxu0  ;;  %2823 = vmatprep.subr.bf16.mxu1 %v3469_v59  ;;  %v802_v46 = vadd.f32 %v801_v39, %v3647_v28 }
 0x4b5   :  { %v804_v2 = vadd.f32 %v803_v40, %v3651_v48 }
 0x4b7   :  { %2825 = vmatpush1.bf16.msra.mxu1 %v3478_v62 }
 0x4b8   :  { %2827 = vmatprep.subr.bf16.mxu1 %v3511_v30 }
 0x4bb   :  { %2829 = vmatpush1.bf16.msra.mxu1 %v3522_v35 }
 0x4bc   :  { %2831 = vmatprep.subr.bf16.mxu1 %v3546_v47 }
 0x4bf   :  { %2833 = vmatpush1.bf16.msra.mxu1 %v3558_v54 }
 0x4c0   :  { %2835 = vmatprep.subr.bf16.mxu1 %v3584_v3 }
 0x4c3   :  { %2837 = vmatpush1.bf16.msra.mxu1 %v3596_v7 }
 0x4c4   :  { %2867 = vmatprep.subr.bf16.mxu1 %v3392_v33 }
 0x579   :  { %v730_v45 = vpop.f32.mrb[4].mxu1 }
 0x57a   :  { %v731_v50 = vadd.f32 %v730_v45, %v3645_v27  ;;  %v732_v55 = vpop.f32.mrb[5].mxu1 }
 0x57b   :  { %v733_v6 = vadd.f32 %v732_v55, %v3653_v49 }
 0x57c   :  { %v806_v56 = vadd.f32 %v802_v46, %v731_v50 }
 0x57e   :  { %v2342_v57 = vmul.f32 -1.442695, %v806_v56 }
 0x580   :  { %3182 = vpow2.f32 %v2342_v57 }
 0x58a   :  { %v3183_v63 = vpop.eup %3182 }
 0x58b   :  { %v810_v1 = vadd.f32 1.0, %v3183_v63 }
 0x58d   :  { %3184 = vrcp.f32 %v810_v1 }
 0x597   :  { %v3185_v4 = vpop.eup %3184 }
 0x598   :  { %v813_v10 = vmul.f32 %v3185_v4, %v804_v2  ;;  %v816_v16 = vsub.f32 1.0, %v3185_v4  ;;  %v822_v17 = vmul.f32 %v3185_v4, %v3699_v25 }
 0x59a   :  { %v814_v13 = vadd.f32 %v813_v10, %v733_v6 }
 0x59c   :  { %3186 = vtanh.f32 %v814_v13 }
 0x5a6   :  { %v3187_v14 = vpop.eup %3186 }
 0x5a7   :  { %818 = vrot.lane.b32.xlu1 %v3187_v14, %s3227_s30 }
 0x619   :  { %v819_v19 = vpop.permute.xlu1 %818 }
 0x61a   :  { %v821_v21 = vmul.f32 %v819_v19, %v816_v16 }
 0x61c   :  { %v3756_v22 = vadd.f32 %v822_v17, %v821_v21 }
 0x61e   :  { %825 = vrot.lane.b32.xlu0 %v3756_v22, %s3227_s30 }
 0x690   :  { %v826_v23 = vpop.permute.xlu0 %825 }
 0x691   :  { %2543 = vmatmul.mubr.msk.f32.vlgmr.msra.gmra.mrb[10].mxu0 %vm66_vm1, %v826_v23 }
 0x692   :  { %2841 = vmatpush1.bf16.msra.mxu0 %v3501_v26  ;;  %1036 = vmatprep.mubr.f32.mxu0 %v3226_v8 }
 0x693   :  { %2843 = vmatprep.subr.bf16.mxu0 %v3534_v41 }
 0x696   :  { %2845 = vmatpush1.bf16.msra.mxu0 %v3536_v42 }
 0x697   :  { %2847 = vmatprep.subr.bf16.mxu0 %v3570_v60 }
 0x69a   :  { %2849 = vmatpush1.bf16.msra.mxu0 %v3572_v61 }
 0x69b   :  { %2851 = vmatprep.subr.bf16.mxu0 %v3598_v9 }
 0x69e   :  { %2853 = vmatpush1.bf16.msra.mxu0 %v3608_v12 }
 0x69f   :  { %2854 = vmatprep.subr.bf16.mxu0 %v3224_v0 }
 0x6a1   :  { %2345 = vmatmul.mubr.msk.f32.vlgmr.msra.gmra.mrb[12].mxu0 %vm66_vm1, %v826_v23 }
 0x6a2   :  { %2856 = vmatpush3.bf16.msra.mxu0 %v3666_v5  ;;  %2561 = vmatprep.mubr.msk.f32.mxu0 %vm3225_vm0, %v3226_v8 }
 0x6a3   :  { %2857 = vmatprep.subr.bf16.mxu0 %v3224_v0 }
 0x6a6   :  { %2859 = vmatpush3.bf16.msra.mxu0 %v3672_v11 }
 0x6a7   :  { %2860 = vmatprep.subr.bf16.mxu0 %v3224_v0 }
 0x6aa   :  { %2862 = vmatpush3.bf16.msra.mxu0 %v3683_v15 }
 0x6ab   :  { %2863 = vmatprep.subr.bf16.mxu0 %v3224_v0 }
 0x6ae   :  { %2865 = vmatpush3.bf16.msra.mxu0 %v3694_v20 }
 0x6af   :  { %2899 = vmatprep.subr.bf16.mxu0 %v3447_v52 }
 0x764   :  { %v895_v24 = vpop.f32.mrb[10].mxu0 }
 0x765   :  { %v896_v25 = vadd.f32 %v3727_v31, %v895_v24  ;;  %v2544_v29 = vpop.f32.mrb[11].mxu0 }
 0x767   :  { %2344 = vst [vmem:[%s4069_s14 + $0x4] sm:$0xf] %v896_v25  ;;  %966 = vmatmul.mubr.f32.vlgmr.msra.gmra.mrb[6].mxu1 %v896_v25 }
 0x768   :  { %2869 = vmatpush1.bf16.msra.mxu1 %v3403_v37  ;;  %1202 = vmatprep.mubr.f32.mxu1 %v3226_v8 }
 0x769   :  { %2871 = vmatprep.subr.bf16.mxu1 %v3405_v38 }
 0x76c   :  { %2873 = vmatpush1.bf16.msra.mxu1 %v3421_v43 }
 0x76d   :  { %2875 = vmatprep.subr.bf16.mxu1 %v3424_v44 }
 0x770   :  { %2877 = vmatpush1.bf16.msra.mxu1 %v3445_v51 }
 0x771   :  { %2879 = vmatprep.subr.bf16.mxu1 %v3450_v53 }
 0x774   :  { %v1038_v32 = vpop.f32.mrb[12].mxu0  ;;  %2881 = vmatpush1.bf16.msra.mxu1 %v3466_v58 }
 0x775   :  { %v1040_v34 = vpop.f32.mrb[13].mxu0  ;;  %2883 = vmatprep.subr.bf16.mxu1 %v3469_v59  ;;  %v1039_v39 = vadd.f32 %v1038_v32, %v3647_v28 }
 0x776   :  { %v1041_v57 = vadd.f32 %v1040_v34, %v3651_v48 }
 0x778   :  { %2885 = vmatpush1.bf16.msra.mxu1 %v3478_v62 }
 0x779   :  { %2887 = vmatprep.subr.bf16.mxu1 %v3511_v30 }
 0x77c   :  { %2889 = vmatpush1.bf16.msra.mxu1 %v3522_v35 }
 0x77d   :  { %2891 = vmatprep.subr.bf16.mxu1 %v3546_v47 }
 0x780   :  { %2893 = vmatpush1.bf16.msra.mxu1 %v3558_v54 }
 0x781   :  { %2895 = vmatprep.subr.bf16.mxu1 %v3584_v3 }
 0x784   :  { %2897 = vmatpush1.bf16.msra.mxu1 %v3596_v7 }
 0x785   :  { %2927 = vmatprep.subr.bf16.mxu1 %v3392_v33 }
 0x83a   :  { %v967_v36 = vpop.f32.mrb[6].mxu1 }
 0x83b   :  { %v968_v40 = vadd.f32 %v967_v36, %v3645_v27  ;;  %v969_v45 = vpop.f32.mrb[7].mxu1 }
 0x83c   :  { %v970_v1 = vadd.f32 %v969_v45, %v3653_v49 }
 0x83d   :  { %v1043_v46 = vadd.f32 %v1039_v39, %v968_v40 }
 0x83f   :  { %v2346_v50 = vmul.f32 -1.442695, %v1043_v46 }
 0x841   :  { %3188 = vpow2.f32 %v2346_v50 }
 0x84b   :  { %v3189_v55 = vpop.eup %3188 }
 0x84c   :  { %v1047_v56 = vadd.f32 1.0, %v3189_v55 }
 0x84e   :  { %3190 = vrcp.f32 %v1047_v56 }
 0x858   :  { %v3191_v63 = vpop.eup %3190 }
 0x859   :  { %v1050_v2 = vmul.f32 %v3191_v63, %v1041_v57  ;;  %v1053_v10 = vsub.f32 1.0, %v3191_v63  ;;  %v1059_v14 = vmul.f32 %v3191_v63, %v3756_v22 }
 0x85b   :  { %v1051_v4 = vadd.f32 %v1050_v2, %v970_v1 }
 0x85d   :  { %3192 = vtanh.f32 %v1051_v4 }
 0x867   :  { %v3193_v6 = vpop.eup %3192 }
 0x868   :  { %1055 = vrot.lane.b32.xlu1 %v3193_v6, %s3227_s30 }
 0x8da   :  { %v1056_v13 = vpop.permute.xlu1 %1055 }
 0x8db   :  { %v1058_v16 = vmul.f32 %v1056_v13, %v1053_v10 }
 0x8dd   :  { %v3808_v19 = vadd.f32 %v1059_v14, %v1058_v16 }
 0x8df   :  { %1062 = vrot.lane.b32.xlu0 %v3808_v19, %s3227_s30 }
 0x951   :  { %v1063_v17 = vpop.permute.xlu0 %1062 }
 0x952   :  { %2562 = vmatmul.mubr.msk.f32.vlgmr.msra.gmra.mrb[14].mxu0 %vm66_vm1, %v1063_v17 }
 0x953   :  { %2901 = vmatpush1.bf16.msra.mxu0 %v3501_v26  ;;  %1273 = vmatprep.mubr.f32.mxu0 %v3226_v8 }
 0x954   :  { %2903 = vmatprep.subr.bf16.mxu0 %v3534_v41 }
 0x957   :  { %2905 = vmatpush1.bf16.msra.mxu0 %v3536_v42 }
 0x958   :  { %2907 = vmatprep.subr.bf16.mxu0 %v3570_v60 }
 0x95b   :  { %2909 = vmatpush1.bf16.msra.mxu0 %v3572_v61 }
 0x95c   :  { %2911 = vmatprep.subr.bf16.mxu0 %v3598_v9 }
 0x95f   :  { %2913 = vmatpush1.bf16.msra.mxu0 %v3608_v12 }
 0x960   :  { %2914 = vmatprep.subr.bf16.mxu0 %v3224_v0 }
 0x962   :  { %2349 = vmatmul.mubr.msk.f32.vlgmr.msra.gmra.mrb[16].mxu0 %vm66_vm1, %v1063_v17 }
 0x963   :  { %2916 = vmatpush3.bf16.msra.mxu0 %v3666_v5  ;;  %2580 = vmatprep.mubr.msk.f32.mxu0 %vm3225_vm0, %v3226_v8 }
 0x964   :  { %2917 = vmatprep.subr.bf16.mxu0 %v3224_v0 }
 0x967   :  { %2919 = vmatpush3.bf16.msra.mxu0 %v3672_v11 }
 0x968   :  { %2920 = vmatprep.subr.bf16.mxu0 %v3224_v0 }
 0x96b   :  { %2922 = vmatpush3.bf16.msra.mxu0 %v3683_v15 }
 0x96c   :  { %2923 = vmatprep.subr.bf16.mxu0 %v3224_v0 }
 0x96f   :  { %2925 = vmatpush3.bf16.msra.mxu0 %v3694_v20 }
 0x970   :  { %2959 = vmatprep.subr.bf16.mxu0 %v3447_v52 }
 0xa25   :  { %v1132_v21 = vpop.f32.mrb[14].mxu0 }
 0xa26   :  { %v1133_v22 = vadd.f32 %v3727_v31, %v1132_v21  ;;  %v2563_v23 = vpop.f32.mrb[15].mxu0 }
 0xa28   :  { %2348 = vst [vmem:[%s4069_s14 + $0x8] sm:$0xf] %v1133_v22  ;;  %1203 = vmatmul.mubr.f32.vlgmr.msra.gmra.mrb[8].mxu1 %v1133_v22 }
 0xa29   :  { %2929 = vmatpush1.bf16.msra.mxu1 %v3403_v37  ;;  %1439 = vmatprep.mubr.f32.mxu1 %v3226_v8 }
 0xa2a   :  { %2931 = vmatprep.subr.bf16.mxu1 %v3405_v38 }
 0xa2d   :  { %2933 = vmatpush1.bf16.msra.mxu1 %v3421_v43 }
 0xa2e   :  { %2935 = vmatprep.subr.bf16.mxu1 %v3424_v44 }
 0xa31   :  { %2937 = vmatpush1.bf16.msra.mxu1 %v3445_v51 }
 0xa32   :  { %2939 = vmatprep.subr.bf16.mxu1 %v3450_v53 }
 0xa35   :  { %v1275_v24 = vpop.f32.mrb[16].mxu0  ;;  %2941 = vmatpush1.bf16.msra.mxu1 %v3466_v58 }
 0xa36   :  { %v1277_v25 = vpop.f32.mrb[17].mxu0  ;;  %2943 = vmatprep.subr.bf16.mxu1 %v3469_v59  ;;  %v1276_v32 = vadd.f32 %v1275_v24, %v3647_v28 }
 0xa37   :  { %v1278_v50 = vadd.f32 %v1277_v25, %v3651_v48 }
 0xa39   :  { %2945 = vmatpush1.bf16.msra.mxu1 %v3478_v62 }
 0xa3a   :  { %2947 = vmatprep.subr.bf16.mxu1 %v3511_v30 }
 0xa3d   :  { %2949 = vmatpush1.bf16.msra.mxu1 %v3522_v35 }
 0xa3e   :  { %2951 = vmatprep.subr.bf16.mxu1 %v3546_v47 }
 0xa41   :  { %2953 = vmatpush1.bf16.msra.mxu1 %v3558_v54 }
 0xa42   :  { %2955 = vmatprep.subr.bf16.mxu1 %v3584_v3 }
 0xa45   :  { %2957 = vmatpush1.bf16.msra.mxu1 %v3596_v7 }
 0xa46   :  { %2987 = vmatprep.subr.bf16.mxu1 %v3392_v33 }
 0xafb   :  { %v1204_v29 = vpop.f32.mrb[8].mxu1 }
 0xafc   :  { %v1205_v34 = vadd.f32 %v1204_v29, %v3645_v27  ;;  %v1206_v36 = vpop.f32.mrb[9].mxu1 }
 0xafd   :  { %v1207_v56 = vadd.f32 %v1206_v36, %v3653_v49 }
 0xafe   :  { %v1280_v39 = vadd.f32 %v1276_v32, %v1205_v34 }
 0xb00   :  { %v2350_v40 = vmul.f32 -1.442695, %v1280_v39 }
 0xb02   :  { %3194 = vpow2.f32 %v2350_v40 }
 0xb0c   :  { %v3195_v45 = vpop.eup %3194 }
 0xb0d   :  { %v1284_v46 = vadd.f32 1.0, %v3195_v45 }
 0xb0f   :  { %3196 = vrcp.f32 %v1284_v46 }
 0xb19   :  { %v3197_v55 = vpop.eup %3196 }
 0xb1a   :  { %v1287_v57 = vmul.f32 %v3197_v55, %v1278_v50  ;;  %v1290_v2 = vsub.f32 1.0, %v3197_v55  ;;  %v1296_v6 = vmul.f32 %v3197_v55, %v3808_v19 }
 0xb1c   :  { %v1288_v63 = vadd.f32 %v1287_v57, %v1207_v56 }
 0xb1e   :  { %3198 = vtanh.f32 %v1288_v63 }
 0xb28   :  { %v3199_v1 = vpop.eup %3198 }
 0xb29   :  { %1292 = vrot.lane.b32.xlu1 %v3199_v1, %s3227_s30 }
 0xb9b   :  { %v1293_v4 = vpop.permute.xlu1 %1292 }
 0xb9c   :  { %v1295_v10 = vmul.f32 %v1293_v4, %v1290_v2 }
 0xb9e   :  { %v3860_v13 = vadd.f32 %v1296_v6, %v1295_v10 }
 0xba0   :  { %1299 = vrot.lane.b32.xlu0 %v3860_v13, %s3227_s30 }
 0xc12   :  { %v1300_v14 = vpop.permute.xlu0 %1299 }
 0xc13   :  { %2581 = vmatmul.mubr.msk.f32.vlgmr.msra.gmra.mrb[18].mxu0 %vm66_vm1, %v1300_v14 }
 0xc14   :  { %2961 = vmatpush1.bf16.msra.mxu0 %v3501_v26  ;;  %1510 = vmatprep.mubr.f32.mxu0 %v3226_v8 }
 0xc15   :  { %2963 = vmatprep.subr.bf16.mxu0 %v3534_v41 }
 0xc18   :  { %2965 = vmatpush1.bf16.msra.mxu0 %v3536_v42 }
 0xc19   :  { %2967 = vmatprep.subr.bf16.mxu0 %v3570_v60 }
 0xc1c   :  { %2969 = vmatpush1.bf16.msra.mxu0 %v3572_v61 }
 0xc1d   :  { %2971 = vmatprep.subr.bf16.mxu0 %v3598_v9 }
 0xc20   :  { %2973 = vmatpush1.bf16.msra.mxu0 %v3608_v12 }
 0xc21   :  { %2974 = vmatprep.subr.bf16.mxu0 %v3224_v0 }
 0xc23   :  { %2353 = vmatmul.mubr.msk.f32.vlgmr.msra.gmra.mrb[20].mxu0 %vm66_vm1, %v1300_v14 }
 0xc24   :  { %2976 = vmatpush3.bf16.msra.mxu0 %v3666_v5  ;;  %2599 = vmatprep.mubr.msk.f32.mxu0 %vm3225_vm0, %v3226_v8 }
 0xc25   :  { %2977 = vmatprep.subr.bf16.mxu0 %v3224_v0 }
 0xc28   :  { %2979 = vmatpush3.bf16.msra.mxu0 %v3672_v11 }
 0xc29   :  { %2980 = vmatprep.subr.bf16.mxu0 %v3224_v0 }
 0xc2c   :  { %2982 = vmatpush3.bf16.msra.mxu0 %v3683_v15 }
 0xc2d   :  { %2983 = vmatprep.subr.bf16.mxu0 %v3224_v0 }
 0xc30   :  { %2985 = vmatpush3.bf16.msra.mxu0 %v3694_v20 }
 0xc31   :  { %3019 = vmatprep.subr.bf16.mxu0 %v3447_v52 }
 0xce6   :  { %v1369_v16 = vpop.f32.mrb[18].mxu0 }
 0xce7   :  { %v1370_v19 = vadd.f32 %v3727_v31, %v1369_v16  ;;  %v2582_v17 = vpop.f32.mrb[19].mxu0 }
 0xce9   :  { %2352 = vst [vmem:[%s4069_s14 + $0xc] sm:$0xf] %v1370_v19  ;;  %1440 = vmatmul.mubr.f32.vlgmr.msra.gmra.mrb[10].mxu1 %v1370_v19 }
 0xcea   :  { %2989 = vmatpush1.bf16.msra.mxu1 %v3403_v37  ;;  %1676 = vmatprep.mubr.f32.mxu1 %v3226_v8 }
 0xceb   :  { %2991 = vmatprep.subr.bf16.mxu1 %v3405_v38 }
 0xcee   :  { %2993 = vmatpush1.bf16.msra.mxu1 %v3421_v43 }
 0xcef   :  { %2995 = vmatprep.subr.bf16.mxu1 %v3424_v44 }
 0xcf2   :  { %2997 = vmatpush1.bf16.msra.mxu1 %v3445_v51 }
 0xcf3   :  { %2999 = vmatprep.subr.bf16.mxu1 %v3450_v53 }
 0xcf6   :  { %v1512_v21 = vpop.f32.mrb[20].mxu0  ;;  %3001 = vmatpush1.bf16.msra.mxu1 %v3466_v58 }
 0xcf7   :  { %v1514_v22 = vpop.f32.mrb[21].mxu0  ;;  %3003 = vmatprep.subr.bf16.mxu1 %v3469_v59  ;;  %v1513_v24 = vadd.f32 %v1512_v21, %v3647_v28 }
 0xcf8   :  { %v1515_v40 = vadd.f32 %v1514_v22, %v3651_v48 }
 0xcfa   :  { %3005 = vmatpush1.bf16.msra.mxu1 %v3478_v62 }
 0xcfb   :  { %3007 = vmatprep.subr.bf16.mxu1 %v3511_v30 }
 0xcfe   :  { %3009 = vmatpush1.bf16.msra.mxu1 %v3522_v35 }
 0xcff   :  { %3011 = vmatprep.subr.bf16.mxu1 %v3546_v47 }
 0xd02   :  { %3013 = vmatpush1.bf16.msra.mxu1 %v3558_v54 }
 0xd03   :  { %3015 = vmatprep.subr.bf16.mxu1 %v3584_v3 }
 0xd06   :  { %3017 = vmatpush1.bf16.msra.mxu1 %v3596_v7 }
 0xd07   :  { %3047 = vmatprep.subr.bf16.mxu1 %v3392_v33 }
 0xdbc   :  { %v1441_v23 = vpop.f32.mrb[10].mxu1 }
 0xdbd   :  { %v1442_v25 = vadd.f32 %v1441_v23, %v3645_v27  ;;  %v1443_v29 = vpop.f32.mrb[11].mxu1 }
 0xdbe   :  { %v1444_v46 = vadd.f32 %v1443_v29, %v3653_v49 }
 0xdbf   :  { %v1517_v32 = vadd.f32 %v1513_v24, %v1442_v25 }
 0xdc1   :  { %v2354_v34 = vmul.f32 -1.442695, %v1517_v32 }
 0xdc3   :  { %3200 = vpow2.f32 %v2354_v34 }
 0xdcd   :  { %v3201_v36 = vpop.eup %3200 }
 0xdce   :  { %v1521_v39 = vadd.f32 1.0, %v3201_v36 }
 0xdd0   :  { %3202 = vrcp.f32 %v1521_v39 }
 0xdda   :  { %v3203_v45 = vpop.eup %3202 }
 0xddb   :  { %v1524_v50 = vmul.f32 %v3203_v45, %v1515_v40  ;;  %v1527_v57 = vsub.f32 1.0, %v3203_v45  ;;  %v1533_v1 = vmul.f32 %v3203_v45, %v3860_v13 }
 0xddd   :  { %v1525_v55 = vadd.f32 %v1524_v50, %v1444_v46 }
 0xddf   :  { %3204 = vtanh.f32 %v1525_v55 }
 0xde9   :  { %v3205_v56 = vpop.eup %3204 }
 0xdea   :  { %1529 = vrot.lane.b32.xlu1 %v3205_v56, %s3227_s30 }
 0xe5c   :  { %v1530_v63 = vpop.permute.xlu1 %1529 }
 0xe5d   :  { %v1532_v2 = vmul.f32 %v1530_v63, %v1527_v57 }
 0xe5f   :  { %v3912_v4 = vadd.f32 %v1533_v1, %v1532_v2 }
 0xe61   :  { %1536 = vrot.lane.b32.xlu0 %v3912_v4, %s3227_s30 }
 0xed3   :  { %v1537_v6 = vpop.permute.xlu0 %1536 }
 0xed4   :  { %2600 = vmatmul.mubr.msk.f32.vlgmr.msra.gmra.mrb[22].mxu0 %vm66_vm1, %v1537_v6 }
 0xed5   :  { %3021 = vmatpush1.bf16.msra.mxu0 %v3501_v26  ;;  %1747 = vmatprep.mubr.f32.mxu0 %v3226_v8 }
 0xed6   :  { %3023 = vmatprep.subr.bf16.mxu0 %v3534_v41 }
 0xed9   :  { %3025 = vmatpush1.bf16.msra.mxu0 %v3536_v42 }
 0xeda   :  { %3027 = vmatprep.subr.bf16.mxu0 %v3570_v60 }
 0xedd   :  { %3029 = vmatpush1.bf16.msra.mxu0 %v3572_v61 }
 0xede   :  { %3031 = vmatprep.subr.bf16.mxu0 %v3598_v9 }
 0xee1   :  { %3033 = vmatpush1.bf16.msra.mxu0 %v3608_v12 }
 0xee2   :  { %3034 = vmatprep.subr.bf16.mxu0 %v3224_v0 }
 0xee4   :  { %2357 = vmatmul.mubr.msk.f32.vlgmr.msra.gmra.mrb[24].mxu0 %vm66_vm1, %v1537_v6 }
 0xee5   :  { %3036 = vmatpush3.bf16.msra.mxu0 %v3666_v5  ;;  %2618 = vmatprep.mubr.msk.f32.mxu0 %vm3225_vm0, %v3226_v8 }
 0xee6   :  { %3037 = vmatprep.subr.bf16.mxu0 %v3224_v0 }
 0xee9   :  { %3039 = vmatpush3.bf16.msra.mxu0 %v3672_v11 }
 0xeea   :  { %3040 = vmatprep.subr.bf16.mxu0 %v3224_v0 }
 0xeed   :  { %3042 = vmatpush3.bf16.msra.mxu0 %v3683_v15 }
 0xeee   :  { %3043 = vmatprep.subr.bf16.mxu0 %v3224_v0 }
 0xef1   :  { %3045 = vmatpush3.bf16.msra.mxu0 %v3694_v20 }
 0xef2   :  { %3079 = vmatprep.subr.bf16.mxu0 %v3447_v52 }
 0xfa7   :  { %v1606_v10 = vpop.f32.mrb[22].mxu0 }
 0xfa8   :  { %v1607_v13 = vadd.f32 %v3727_v31, %v1606_v10  ;;  %v2601_v14 = vpop.f32.mrb[23].mxu0 }
 0xfaa   :  { %2356 = vst [vmem:[%s4069_s14 + $0x10] sm:$0xf] %v1607_v13  ;;  %1677 = vmatmul.mubr.f32.vlgmr.msra.gmra.mrb[12].mxu1 %v1607_v13 }
 0xfab   :  { %3049 = vmatpush1.bf16.msra.mxu1 %v3403_v37  ;;  %1913 = vmatprep.mubr.f32.mxu1 %v3226_v8 }
 0xfac   :  { %3051 = vmatprep.subr.bf16.mxu1 %v3405_v38 }
 0xfaf   :  { %3053 = vmatpush1.bf16.msra.mxu1 %v3421_v43 }
 0xfb0   :  { %3055 = vmatprep.subr.bf16.mxu1 %v3424_v44 }
 0xfb3   :  { %3057 = vmatpush1.bf16.msra.mxu1 %v3445_v51 }
 0xfb4   :  { %3059 = vmatprep.subr.bf16.mxu1 %v3450_v53 }
 0xfb7   :  { %v1749_v16 = vpop.f32.mrb[24].mxu0  ;;  %3061 = vmatpush1.bf16.msra.mxu1 %v3466_v58 }
 0xfb8   :  { %v1751_v19 = vpop.f32.mrb[25].mxu0  ;;  %3063 = vmatprep.subr.bf16.mxu1 %v3469_v59  ;;  %v1750_v21 = vadd.f32 %v1749_v16, %v3647_v28 }
 0xfb9   :  { %v1752_v34 = vadd.f32 %v1751_v19, %v3651_v48 }
 0xfbb   :  { %3065 = vmatpush1.bf16.msra.mxu1 %v3478_v62 }
 0xfbc   :  { %3067 = vmatprep.subr.bf16.mxu1 %v3511_v30 }
 0xfbf   :  { %3069 = vmatpush1.bf16.msra.mxu1 %v3522_v35 }
 0xfc0   :  { %3071 = vmatprep.subr.bf16.mxu1 %v3546_v47 }
 0xfc3   :  { %3073 = vmatpush1.bf16.msra.mxu1 %v3558_v54 }
 0xfc4   :  { %3075 = vmatprep.subr.bf16.mxu1 %v3584_v3 }
 0xfc7   :  { %3077 = vmatpush1.bf16.msra.mxu1 %v3596_v7 }
 0xfc8   :  { %3107 = vmatprep.subr.bf16.mxu1 %v3392_v33 }
0x107d   :  { %v1678_v17 = vpop.f32.mrb[12].mxu1 }
0x107e   :  { %v1679_v22 = vadd.f32 %v1678_v17, %v3645_v27  ;;  %v1680_v23 = vpop.f32.mrb[13].mxu1 }
0x107f   :  { %v1681_v39 = vadd.f32 %v1680_v23, %v3653_v49 }
0x1080   :  { %v1754_v24 = vadd.f32 %v1750_v21, %v1679_v22 }
0x1082   :  { %v2358_v25 = vmul.f32 -1.442695, %v1754_v24 }
0x1084   :  { %3206 = vpow2.f32 %v2358_v25 }
0x108e   :  { %v3207_v29 = vpop.eup %3206 }
0x108f   :  { %v1758_v32 = vadd.f32 1.0, %v3207_v29 }
0x1091   :  { %3208 = vrcp.f32 %v1758_v32 }
0x109b   :  { %v3209_v36 = vpop.eup %3208 }
0x109c   :  { %v1761_v40 = vmul.f32 %v3209_v36, %v1752_v34  ;;  %v1764_v46 = vsub.f32 1.0, %v3209_v36  ;;  %v1770_v55 = vmul.f32 %v3209_v36, %v3912_v4 }
0x109e   :  { %v1762_v45 = vadd.f32 %v1761_v40, %v1681_v39 }
0x10a0   :  { %3210 = vtanh.f32 %v1762_v45 }
0x10aa   :  { %v3211_v33 = vpop.eup %3210 }
0x10ab   :  { %1766 = vrot.lane.b32.xlu1 %v3211_v33, %s3227_s30 }
0x111d   :  { %v1767_v50 = vpop.permute.xlu1 %1766 }
0x111e   :  { %v1769_v56 = vmul.f32 %v1767_v50, %v1764_v46 }
0x1120   :  { %v3964_v57 = vadd.f32 %v1770_v55, %v1769_v56 }
0x1122   :  { %1773 = vrot.lane.b32.xlu0 %v3964_v57, %s3227_s30 }
0x1194   :  { %v1774_v63 = vpop.permute.xlu0 %1773 }
0x1195   :  { %2619 = vmatmul.mubr.msk.f32.vlgmr.msra.gmra.mrb[26].mxu0 %vm66_vm1, %v1774_v63 }
0x1196   :  { %3081 = vmatpush1.bf16.msra.mxu0 %v3501_v26  ;;  %1984 = vmatprep.mubr.f32.mxu0 %v3226_v8 }
0x1197   :  { %3083 = vmatprep.subr.bf16.mxu0 %v3534_v41 }
0x119a   :  { %3085 = vmatpush1.bf16.msra.mxu0 %v3536_v42 }
0x119b   :  { %3087 = vmatprep.subr.bf16.mxu0 %v3570_v60 }
0x119e   :  { %3089 = vmatpush1.bf16.msra.mxu0 %v3572_v61 }
0x119f   :  { %3091 = vmatprep.subr.bf16.mxu0 %v3598_v9 }
0x11a2   :  { %3093 = vmatpush1.bf16.msra.mxu0 %v3608_v12 }
0x11a3   :  { %3094 = vmatprep.subr.bf16.mxu0 %v3224_v0 }
0x11a5   :  { %2361 = vmatmul.mubr.msk.f32.vlgmr.msra.gmra.mrb[28].mxu0 %vm66_vm1, %v1774_v63 }
0x11a6   :  { %3096 = vmatpush3.bf16.msra.mxu0 %v3666_v5  ;;  %2637 = vmatprep.mubr.msk.f32.mxu0 %vm3225_vm0, %v3226_v8 }
0x11a7   :  { %3097 = vmatprep.subr.bf16.mxu0 %v3224_v0 }
0x11aa   :  { %3099 = vmatpush3.bf16.msra.mxu0 %v3672_v11 }
0x11ab   :  { %3100 = vmatprep.subr.bf16.mxu0 %v3224_v0 }
0x11ae   :  { %3102 = vmatpush3.bf16.msra.mxu0 %v3683_v15 }
0x11af   :  { %3103 = vmatprep.subr.bf16.mxu0 %v3224_v0 }
0x11b2   :  { %3105 = vmatpush3.bf16.msra.mxu0 %v3694_v20 }
0x11b3   :  { %3139 = vmatprep.subr.bf16.mxu0 %v3447_v52 }
0x1268   :  { %v1843_v1 = vpop.f32.mrb[26].mxu0 }
0x1269   :  { %v1844_v2 = vadd.f32 %v3727_v31, %v1843_v1  ;;  %v2620_v4 = vpop.f32.mrb[27].mxu0 }
0x126b   :  { %2360 = vst [vmem:[%s4069_s14 + $0x14] sm:$0xf] %v1844_v2  ;;  %1914 = vmatmul.mubr.f32.vlgmr.msra.gmra.mrb[14].mxu1 %v1844_v2 }
0x126c   :  { %3109 = vmatpush1.bf16.msra.mxu1 %v3403_v37  ;;  %2150 = vmatprep.mubr.f32.mxu1 %v3226_v8 }
0x126d   :  { %3111 = vmatprep.subr.bf16.mxu1 %v3405_v38 }
0x1270   :  { %3113 = vmatpush1.bf16.msra.mxu1 %v3421_v43 }
0x1271   :  { %3115 = vmatprep.subr.bf16.mxu1 %v3424_v44 }
0x1274   :  { %3117 = vmatpush1.bf16.msra.mxu1 %v3445_v51 }
0x1275   :  { %3119 = vmatprep.subr.bf16.mxu1 %v3450_v53 }
0x1278   :  { %v1986_v52 = vpop.f32.mrb[28].mxu0  ;;  %3121 = vmatpush1.bf16.msra.mxu1 %v3466_v58 }
0x1279   :  { %v1988_v6 = vpop.f32.mrb[29].mxu0  ;;  %3123 = vmatprep.subr.bf16.mxu1 %v3469_v59  ;;  %v1987_v38 = vadd.f32 %v1986_v52, %v3647_v28 }
0x127c   :  { %3125 = vmatpush1.bf16.msra.mxu1 %v3478_v62  ;;  %v1989_v62 = vadd.f32 %v1988_v6, %v3651_v48 }
0x127d   :  { %3127 = vmatprep.subr.bf16.mxu1 %v3511_v30 }
0x1280   :  { %3129 = vmatpush1.bf16.msra.mxu1 %v3522_v35 }
0x1281   :  { %3131 = vmatprep.subr.bf16.mxu1 %v3546_v47 }
0x1284   :  { %3133 = vmatpush1.bf16.msra.mxu1 %v3558_v54 }
0x1285   :  { %3135 = vmatprep.subr.bf16.mxu1 %v3584_v3 }
0x1288   :  { %3137 = vmatpush1.bf16.msra.mxu1 %v3596_v7 }
0x133e   :  { %v1915_v37 = vpop.f32.mrb[14].mxu1 }
0x133f   :  { %v1916_v43 = vadd.f32 %v1915_v37, %v3645_v27  ;;  %v1917_v44 = vpop.f32.mrb[15].mxu1 }
0x1340   :  { %v1918_v35 = vadd.f32 %v1917_v44, %v3653_v49 }
0x1341   :  { %v1991_v51 = vadd.f32 %v1987_v38, %v1916_v43 }
0x1343   :  { %v2362_v53 = vmul.f32 -1.442695, %v1991_v51 }
0x1345   :  { %3212 = vpow2.f32 %v2362_v53 }
0x134f   :  { %v3213_v58 = vpop.eup %3212 }
0x1350   :  { %v1995_v59 = vadd.f32 1.0, %v3213_v58 }
0x1352   :  { %3214 = vrcp.f32 %v1995_v59 }
0x135c   :  { %v3215_v30 = vpop.eup %3214 }
0x135d   :  { %v1998_v47 = vmul.f32 %v3215_v30, %v1989_v62  ;;  %v2001_v7 = vsub.f32 1.0, %v3215_v30  ;;  %v2007_v13 = vmul.f32 %v3215_v30, %v3964_v57 }
0x135f   :  { %v1999_v54 = vadd.f32 %v1998_v47, %v1918_v35 }
0x1361   :  { %3216 = vtanh.f32 %v1999_v54 }
0x136b   :  { %v3217_v3 = vpop.eup %3216 }
0x136c   :  { %2003 = vrot.lane.b32.xlu1 %v3217_v3, %s3227_s30 }
0x13de   :  { %v2004_v10 = vpop.permute.xlu1 %2003 }
0x13df   :  { %v2006_v14 = vmul.f32 %v2004_v10, %v2001_v7 }
0x13e1   :  { %v2008_v16 = vadd.f32 %v2007_v13, %v2006_v14 }
0x13e3   :  { %2010 = vrot.lane.b32.xlu0 %v2008_v16, %s3227_s30 }
0x1455   :  { %v2011_v19 = vpop.permute.xlu0 %2010 }
0x1456   :  { %2638 = vmatmul.mubr.msk.f32.vlgmr.msra.gmra.mrb[30].mxu0 %vm66_vm1, %v2011_v19 }
0x1457   :  { %3141 = vmatpush1.bf16.msra.mxu0 %v3501_v26  ;;  %2221 = vmatprep.mubr.f32.mxu0 %v3226_v8 }
0x1458   :  { %3143 = vmatprep.subr.bf16.mxu0 %v3534_v41 }
0x145b   :  { %3145 = vmatpush1.bf16.msra.mxu0 %v3536_v42 }
0x145c   :  { %3147 = vmatprep.subr.bf16.mxu0 %v3570_v60 }
0x145f   :  { %3149 = vmatpush1.bf16.msra.mxu0 %v3572_v61 }
0x1460   :  { %3151 = vmatprep.subr.bf16.mxu0 %v3598_v9 }
0x1463   :  { %3153 = vmatpush1.bf16.msra.mxu0 %v3608_v12 }
0x1464   :  { %3154 = vmatprep.subr.bf16.mxu0 %v3224_v0 }
0x1466   :  { %2365 = vmatmul.mubr.msk.f32.vlgmr.msra.gmra.mrb[32].mxu0 %vm66_vm1, %v2011_v19 }
0x1467   :  { %3156 = vmatpush3.bf16.msra.mxu0 %v3666_v5  ;;  %2656 = vmatprep.mubr.msk.f32.mxu0 %vm3225_vm0, %v3226_v8 }
0x1468   :  { %3157 = vmatprep.subr.bf16.mxu0 %v3224_v0 }
0x146b   :  { %3159 = vmatpush3.bf16.msra.mxu0 %v3672_v11 }
0x146c   :  { %3160 = vmatprep.subr.bf16.mxu0 %v3224_v0 }
0x146f   :  { %3162 = vmatpush3.bf16.msra.mxu0 %v3683_v15 }
0x1470   :  { %3163 = vmatprep.subr.bf16.mxu0 %v3224_v0 }
0x1473   :  { %3165 = vmatpush3.bf16.msra.mxu0 %v3694_v20 }
0x1529   :  { %v2080_v26 = vpop.f32.mrb[30].mxu0 }
0x152a   :  { %v2081_v41 = vadd.f32 %v3727_v31, %v2080_v26  ;;  %v2639_v42 = vpop.f32.mrb[31].mxu0 }
0x152c   :  { %2364 = vst [vmem:[%s4069_s14 + $0x18] sm:$0xf] %v2081_v41  ;;  %2151 = vmatmul.mubr.f32.vlgmr.msra.gmra.mrb[16].mxu1 %v2081_v41 }
0x1539   :  { %v2223_v8 = vpop.f32.mrb[32].mxu0 }
0x153a   :  { %v2225_v60 = vpop.f32.mrb[33].mxu0  ;;  %v2224_v9 = vadd.f32 %v2223_v8, %v3647_v28 }
0x153b   :  { %v2226_v17 = vadd.f32 %v2225_v60, %v3651_v48 }
0x15ff   :  { %v2152_v61 = vpop.f32.mrb[16].mxu1 }
0x1600   :  { %v2153_v12 = vadd.f32 %v2152_v61, %v3645_v27  ;;  %v2154_v5 = vpop.f32.mrb[17].mxu1  ;;  %v232_v27 = vsel %vm231_vm4, %v3489_v18, 0.0 }
0x1601   :  { %v2155_v22 = vadd.f32 %v2154_v5, %v3653_v49 }
0x1602   :  { %v2228_v0 = vadd.f32 %v2224_v9, %v2153_v12 }
0x1604   :  { %v2366_v11 = vmul.f32 -1.442695, %v2228_v0 }
0x1606   :  { %3218 = vpow2.f32 %v2366_v11 }
0x1610   :  { %v3219_v15 = vpop.eup %3218 }
0x1611   :  { %v2232_v20 = vadd.f32 1.0, %v3219_v15 }
0x1613   :  { %3220 = vrcp.f32 %v2232_v20 }
0x161d   :  { %v3221_v21 = vpop.eup %3220 }
0x161e   :  { %v2235_v23 = vmul.f32 %v3221_v21, %v2226_v17  ;;  %v2238_v28 = vsub.f32 1.0, %v3221_v21  ;;  %v2244_v32 = vmul.f32 %v3221_v21, %v2008_v16 }
0x1620   :  { %v2236_v24 = vadd.f32 %v2235_v23, %v2155_v22 }
0x1622   :  { %3222 = vtanh.f32 %v2236_v24 }
0x162c   :  { %v3223_v25 = vpop.eup %3222 }
0x162d   :  { %2240 = vrot.lane.b32.xlu1 %v3223_v25, %s3227_s30 }
0x1651   :  { %233 = vadd.xlane.f32.xlu1 %v232_v27 }
0x169f   :  { %v2241_v29 = vpop.permute.xlu1 %2240 }
0x16a0   :  { %v2243_v34 = vmul.f32 %v2241_v29, %v2238_v28 }
0x16a2   :  { %v2245_v36 = vadd.f32 %v2244_v32, %v2243_v34 }
0x16a4   :  { %2247 = vrot.lane.b32.xlu0 %v2245_v36, %s3227_s30 }
0x16de   :  { %v234_v48 = vpop.xlane.xlu1 %233 }
0x16df   :  { %236 = vst.msk [vmem:[%s4070_s15] sm:$0x3] %vm235_vm5, %v234_v48 }
0x1716   :  { %v2248_v49 = vpop.permute.xlu0 %2247 }
0x1717   :  { %2657 = vmatmul.mubr.msk.f32.vlgmr.msra.gmra.mrb[34].mxu0 %vm66_vm1, %v2248_v49 }
0x17ea   :  { %v2317_v39 = vpop.f32.mrb[34].mxu0 }
0x17eb   :  { %v2318_v18 = vadd.f32 %v3727_v31, %v2317_v39  ;;  %v2658_v40 = vpop.f32.mrb[35].mxu0 }
0x17ed   :  { %2368 = vst [vmem:[%s4069_s14 + $0x1c] sm:$0xf] %v2318_v18 }

// kernel: model_forward.2
= control target key start
LH: loop header
LB: loop body
LE: loop exit
PB: predicated region body
PF: predicated region fallthrough
CT: control target
= control target key end

     0   :  { %s13936_s0 = inlined_call_operand.vmem [shape: f32[2,10,66], index: 0, kind: input, shape index: {}]   ;;  %s13937_s1 = inlined_call_operand.vmem [shape: f32[1,10,66], index: 1, kind: input, shape index: {}]   ;;  %s13938_s2 = inlined_call_operand.vmem [shape: f32[66,64], index: 2, kind: input, shape index: {}]   ;;  %s13939_s3 = inlined_call_operand.vmem [shape: f32[1,64], index: 3, kind: input, shape index: {}]   ;;  %s13940_s4 = inlined_call_operand.vmem [shape: f32[5,64,192], index: 4, kind: input, shape index: {}]   ;;  %s13941_s5 = inlined_call_operand.vmem [shape: f32[5,1,192], index: 5, kind: input, shape index: {}]   ;;  %s13942_s6 = inlined_call_operand.hbm [shape: f32[5,64,64], index: 6, kind: input, shape index: {}]   ;;  %s13943_s7 = inlined_call_operand.vmem [shape: f32[5,1,64], index: 7, kind: input, shape index: {}]   ;;  %s13944_s8 = inlined_call_operand.vmem [shape: f32[8,10], index: 8, kind: input, shape index: {}]   ;;  %s13945_s9 = inlined_call_operand.vmem [shape: f32[8,1], index: 9, kind: input, shape index: {}]   ;;  %s13946_s10 = inlined_call_operand.vmem [shape: f32[6,8], index: 10, kind: input, shape index: {}]   ;;  %s13947_s11 = inlined_call_operand.vmem [shape: f32[6,1], index: 11, kind: input, shape index: {}]   ;;  %s13948_s12 = inlined_call_operand.vmem [shape: f32[4,6], index: 12, kind: input, shape index: {}]   ;;  %s13949_s13 = inlined_call_operand.vmem [shape: f32[4,1], index: 13, kind: input, shape index: {}]   ;;  %s13950_s14 = inlined_call_operand.vmem [shape: f32[2,4], index: 14, kind: input, shape index: {}]   ;;  %s13951_s15 = inlined_call_operand.vmem [shape: f32[2,1], index: 15, kind: input, shape index: {}]   ;;  %s13952_s16 = inlined_call_operand.vmem [shape: f32[1,2], index: 16, kind: input, shape index: {}]   ;;  %s13953_s17 = inlined_call_operand.<no memory space> [shape: f32[1,1], index: 17, kind: input, shape index: {}]   ;;  %s13954_s18 = inlined_call_operand.vmem [shape: f32[2,1,64], index: 18, kind: output, shape index: {}]  }
   0x1   :  { %13958 = sst [smem:[#allocation6_spill]] %s13936_s0  ;;  %v23_v0 = vstv %s13953_s17 }
   0x2   :  { %13959 = sst [smem:[#allocation7_spill]] %s13937_s1  ;;  %24 = vst [vmem:[#allocation2] sm:$0x1] %v23_v0 }
   0x3   :  { %13960 = sst [smem:[#allocation8_spill]] %s13938_s2 }
   0x4   :  { %25 = vsyncpa [#allocation4], 0  ;;  %s12022_s29 = smov [#allocation3]   ;;  %s11998_s1 = scalar_lea.hbm %s13942_s6, 5120 }
   0x5   :  { %s43_s30 = sshll.u32 %s12022_s29, 4  ;;  %p11999_p0 = scmp.ne.s32.totalorder %s13942_s6, %s11998_s1  ;;  %s44_s30 = int_to_ptr.vmem [resolvable:$true] %s43_s30 }
   0x6   :  { %p12002_p1 = scmp.lt.u32.totalorder %s11998_s1, %s13942_s6 }
   0x8   :  { %p12004_p2 = pnand %p12002_p1, %p11999_p0 }
   0xa   :  { %12007 = shalt.err (!%p12004_p2)
}
   0xb   :  { %s12008_s17 = scalar_lea.vmem %s44_s30, 5120  ;;  %p12013_p4 = scmp.lt.s32.totalorder %s44_s30, %s44_s30 }
   0xc   :  { %p12009_p3 = scmp.ne.s32.totalorder %s44_s30, %s12008_s17  ;;  %p12014_p5 = scmp.lt.s32.totalorder %s12008_s17, %s12008_s17 }
   0xe   :  { %p12015_p6 = por %p12014_p5, %p12013_p4 }
  0x10   :  { %p12016_p7 = pnand %p12015_p6, %p12009_p3 }
  0x12   :  { %12019 = shalt.err (!%p12016_p7)
}
  0x13   :  { %s12023_s23 = smov 128   ;;  %s12024_s24 = smov 8  }
  0x14   :  { %49 = dma.hbm_to_vmem [thread:$0]  %s13942_s6, 5120, %s44_s30, [#allocation4], %s12023_s23, %s12023_s23, %s12024_s24  }
  0x15   :  { %12020 = dma.done.wait [#allocation4], 5120  }
  0x16   :  { %12021 = vsyncadd [#allocation4], 4294962176  ;;  %v12025_v1 = vmov 0.0|0.0   ;;  %v93_v2 = vlaneseq  ;;  %v12026_v3 = vmov 0.0   ;;  %vm12027_vm0 = vmmov 0   ;;  %s13961_s28 = sld [smem:[#allocation8_spill]] }
  0x17   :  { %11484 = vmatprep.subr.bf16.mxu0 %v12025_v1  ;;  %451 = vmatprep.mubr.f32.mxu1 %v12026_v3  ;;  %v12028_v4 = vmov 1983009808   ;;  %s13962_s23 = sld [smem:[#allocation6_spill]]  ;;  %s13963_s26 = sld [smem:[#allocation7_spill]]  ;;  %v342_v25 = vld [vmem:[%s13940_s4 + $0x8] sm:$0xff]  ;;  %v344_v26 = vld [vmem:[%s13940_s4 + $0x18] sm:$0xff] }
  0x18   :  { %10888 = vmatprep.mubr.msk.f32.mxu0 %vm12027_vm0, %v12026_v3  ;;  %v91_v5 = vunpack.c.l.s4 %v12028_v4  ;;  %v12152_v7 = vshrl.u32 %v93_v2, 7  ;;  %v341_v27 = vld [vmem:[%s13940_s4] sm:$0xff]  ;;  %v11496_v31 = vpack.c.bf16 %v344_v26, %v342_v25  ;;  %v343_v32 = vld [vmem:[%s13940_s4 + $0x10] sm:$0xff]  ;;  %v346_v33 = vld [vmem:[%s13940_s4 + $0x28] sm:$0xff]  ;;  %vm202_vm1 = vcmask 1041408   ;;  %s12031_s0 = smov 48  }
  0x19   :  { %v348_v34 = vld [vmem:[%s13940_s4 + $0x38] sm:$0xff]  ;;  %v345_v40 = vld [vmem:[%s13940_s4 + $0x20] sm:$0xff]  ;;  %v347_v41 = vld [vmem:[%s13940_s4 + $0x30] sm:$0xff]  ;;  %v11498_v45 = vpack.c.bf16 %v343_v32, %v341_v27  ;;  %vm195_vm2 = vcmask 539648   ;;  %vm380_vm3 = vcmask 523264   ;;  %vm549_vm4 = vcmask 130048  }
  0x1a   :  { %v92_v6 = vunpack.c.0.s8 %v91_v5  ;;  %11497 = vmatprep.subr.bf16.mxu1 %v11496_v31  ;;  %v350_v46 = vld [vmem:[%s13940_s4 + $0x48] sm:$0xff]  ;;  %v352_v47 = vld [vmem:[%s13940_s4 + $0x58] sm:$0xff]  ;;  %v11500_v50 = vpack.c.bf16 %v348_v34, %v346_v33  ;;  %v11502_v53 = vpack.c.bf16 %v347_v41, %v345_v40  ;;  %v349_v57 = vld [vmem:[%s13940_s4 + $0x40] sm:$0xff]  ;;  %v12294_v32 = vsub.s32 1, %v12152_v7  ;;  %s12032_s19 = smov 112   ;;  %s12033_s1 = smov 32  }
  0x1b   :  { %11499 = vmatpush1.bf16.msra.mxu1 %v11498_v45  ;;  %v11504_v56 = vpack.c.bf16 %v352_v47, %v350_v46  ;;  %v351_v58 = vld [vmem:[%s13940_s4 + $0x50] sm:$0xff]  ;;  %v354_v63 = vld [vmem:[%s13940_s4 + $0x68] sm:$0xff]  ;;  %v356_v0 = vld [vmem:[%s13940_s4 + $0x78] sm:$0xff]  ;;  %vm12030_vm6 = vmmov 1   ;;  %vm744_vm8 = vcmask 80896   ;;  %vm748_vm9 = vcmask 74752  }
  0x1c   :  { %v137_v8 = vld [vmem:[%s13961_s28] sm:$0xff]  ;;  %v138_v9 = vld [vmem:[%s13961_s28 + $0x8] sm:$0xff]  ;;  %v139_v10 = vld [vmem:[%s13961_s28 + $0x10] sm:$0xff]  ;;  %v12170_v14 = vsub.s32 %v92_v6, %v12152_v7  ;;  %11501 = vmatprep.subr.bf16.mxu1 %v11500_v50  ;;  %v11506_v4 = vpack.c.bf16 %v351_v58, %v349_v57  ;;  %v11508_v6 = vpack.c.bf16 %v356_v0, %v354_v63  ;;  %s12034_s20 = smov 96   ;;  %s12035_s21 = smov 16   ;;  %vm2484_vm10 = vcmask 261120  }
  0x1d   :  { %v11485_v11 = vpack.c.bf16 %v138_v9, %v137_v8  ;;  %v140_v12 = vld [vmem:[%s13961_s28 + $0x18] sm:$0xff]  ;;  %v141_v13 = vld [vmem:[%s13961_s28 + $0x20] sm:$0xff]  ;;  %v76_v18 = vld [vmem:[%s13962_s23 + $0x8] sm:$0x3]  ;;  %s12036_s22 = smov 80   ;;  %vm2489_vm11 = vcmask 392192  }
  0x1e   :  { %v11488_v15 = vpack.c.bf16 %v140_v12, %v139_v10  ;;  %v75_v16 = vld [vmem:[%s13962_s23] sm:$0xff]  ;;  %v142_v19 = vld [vmem:[%s13961_s28 + $0x28] sm:$0xff]  ;;  %v77_v21 = vld [vmem:[%s13962_s23 + $0x10] sm:$0xff]  ;;  %vm3239_vm12 = vcmask 64512   ;;  %vm5113_vm13 = vcmask 1045504   ;;  %vm5067_vm14 = vcmask 46080  }
  0x1f   :  { %11486 = vmatpush3.bf16.msra.mxu0 %v11485_v11  ;;  %v79_v17 = vld [vmem:[%s13963_s26] sm:$0xff]  ;;  %v80_v22 = vld [vmem:[%s13963_s26 + $0x8] sm:$0x3]  ;;  %v143_v28 = vld [vmem:[%s13961_s28 + $0x30] sm:$0xff]  ;;  %v11491_v35 = vpack.c.bf16 %v142_v19, %v141_v13  ;;  %11503 = vmatpush1.bf16.msra.mxu1 %v11502_v53  ;;  %vm5109_vm15 = vcmask 48128  }
  0x20   :  { %11487 = vmatprep.subr.bf16.mxu0 %v12025_v1  ;;  %v81_v20 = vadd.f32 %v79_v17, %v75_v16  ;;  %v82_v23 = vadd.f32 %v80_v22, %v76_v18  ;;  %v83_v24 = vadd.f32 %v79_v17, %v77_v21  ;;  %v144_v36 = vld [vmem:[%s13961_s28 + $0x38] sm:$0xff]  ;;  %11505 = vmatprep.subr.bf16.mxu1 %v11504_v56  ;;  %v145_v8 = vld [vmem:[%s13961_s28 + $0x40] sm:$0x3]  ;;  %v355_v18 = vld [vmem:[%s13940_s4 + $0x70] sm:$0xff] }
  0x21   :  { %v78_v44 = vld [vmem:[%s13962_s23 + $0x18] sm:$0x3]  ;;  %v11494_v54 = vpack.c.bf16 %v144_v36, %v143_v28  ;;  %v353_v17 = vld [vmem:[%s13940_s4 + $0x60] sm:$0xff]  ;;  %s12029_s23 = smov 64   ;;  %vm12379_vm5 = vmpackc.low %vm549_vm4, %vm549_vm4 }
  0x22   :  { %v89_v29 = vcombine.high %v81_v20, %v81_v20  ;;  %v96_v30 = vrot.slane %v81_v20, %v12170_v14  ;;  %v112_v37 = vrot.slane %v82_v23, %v12170_v14  ;;  %v113_v38 = vcombine.high %v83_v24, %v83_v24  ;;  %v10301_v20 = vld [vmem:[%s13939_s3] ss:$0 sm:$0xff]  ;;  %vm12396_vm7 = vmpackc.low %vm202_vm1, %vm12030_vm6 }
  0x23   :  { %11489 = vmatpush3.bf16.msra.mxu0 %v11488_v15  ;;  %v120_v39 = vrot.slane %v83_v24, %v12170_v14  ;;  %v84_v55 = vadd.f32 %v80_v22, %v78_v44  ;;  %11507 = vmatpush1.bf16.msra.mxu1 %v11506_v4  ;;  %v11510_v19 = vpack.c.bf16 %v355_v18, %v353_v17  ;;  %v357_v31 = vld [vmem:[%s13941_s5] sm:$0x3]  ;;  %vm7106_vm6 = vcmask 31744  }
  0x24   :  { %11490 = vmatprep.subr.bf16.mxu0 %v12025_v1  ;;  %v103_v42 = vrot.slane %v89_v29, %v12170_v14  ;;  %v104_v43 = vcombine.high %v96_v30, %v96_v30  ;;  %v127_v48 = vrot.slane %v113_v38, %v12170_v14  ;;  %11509 = vmatprep.subr.bf16.mxu1 %v11508_v6 }
  0x25   :  { %v128_v49 = vcombine.high %v120_v39, %v120_v39  ;;  %v170_v61 = vcombine.low %v112_v37, %v120_v39  ;;  %v136_v5 = vrot.slane %v84_v55, %v12170_v14  ;;  %v377_v34 = vrot.slane %v357_v31, %v12294_v32 }
  0x26   :  { %v105_v51 = vcombine.high %v103_v42, %v103_v42  ;;  %v153_v52 = vcombine.low %v96_v30, %v104_v43  ;;  %v129_v12 = vcombine.high %v127_v48, %v127_v48  ;;  %v12288_v30 = vsub.s32 0, %v12152_v7 }
  0x27   :  { %11492 = vmatpush3.bf16.msra.mxu0 %v11491_v35  ;;  %v171_v62 = vcombine.low %v128_v49, %v127_v48  ;;  %v178_v10 = vrot.slane %v170_v61, %v12170_v14  ;;  %11511 = vmatpush1.bf16.msra.mxu1 %v11510_v19 }
  0x28   :  { %11493 = vmatprep.subr.bf16.mxu0 %v12025_v1  ;;  %v154_v59 = vcombine.low %v103_v42, %v105_v51  ;;  %v161_v60 = vrot.slane %v153_v52, %v12170_v14  ;;  %v187_v15 = vcombine.low %v129_v12, %v136_v5  ;;  %v373_v33 = vrot.slane %v357_v31, %v12288_v30 }
  0x29   :  { %v185_v11 = vrot.slane %v171_v62, %v12170_v14 }
  0x2a   :  { %v168_v2 = vrot.slane %v154_v59, %v12170_v14  ;;  %v194_v16 = vrot.slane %v187_v15, %v12170_v14 }
  0x2b   :  { %11495 = vmatpush3.bf16.msra.mxu0 %v11494_v54  ;;  %v186_v13 = vcombine.low %v178_v10, %v185_v11 }
  0x2c   :  { %10886 = vmatprep.subr.mxu0 %v12026_v3  ;;  %v169_v9 = vcombine.low %v161_v60, %v168_v2 }
  0x2f   :  { %10887 = vmatpush3.msk.msra.mxu0 %vm202_vm1, %v145_v8 }
  0x30   :  { %10889 = vmatmul.mubr.msk.f32.vlgmr.msra.gmra.mrb[0].mxu0 %vm195_vm2, %v169_v9 }
  0x31   :  { %10891 = vmatprep.mubr.msk.f32.mxu0 %vm12027_vm0, %v12026_v3 }
  0x34   :  { %10892 = vmatmul.mubr.msk.f32.gmra.mrb[2].mxu0 %vm195_vm2, %v186_v13 }
  0x35   :  { %10894 = vmatprep.mubr.msk.f32.mxu0 %vm12027_vm0, %v12026_v3 }
  0x38   :  { %10895 = vmatmul.mubr.msk.f32.gmra.mrb[4].mxu0 %vm195_vm2, %v194_v16  ;;  %vm7110_vm2 = vcmask 1043456  }
 0x103   :  { %v272_v21 = vpop.f32.mrb[0].mxu0 }
 0x104   :  { %v12273_v22 = vadd.f32 %v10301_v20, %v272_v21  ;;  %v10890_v23 = vpop.f32.mrb[1].mxu0 }
 0x106   :  { %10306 = vmatmul.mubr.msk.f32.vlgmr.msra.gmra.mrb[0].mxu1 %vm380_vm3, %v12273_v22 }
 0x107   :  { %v277_v24 = vpop.f32.mrb[2].mxu0  ;;  %457 = vmatprep.mubr.f32.mxu1 %v12026_v3 }
 0x108   :  { %v12278_v25 = vadd.f32 %v10301_v20, %v277_v24  ;;  %v10893_v26 = vpop.f32.mrb[3].mxu0 }
 0x10a   :  { %10307 = vmatmul.mubr.msk.f32.gmra.mrb[2].mxu1 %vm380_vm3, %v12278_v25 }
 0x10b   :  { %v282_v27 = vpop.f32.mrb[4].mxu0  ;;  %463 = vmatprep.mubr.f32.mxu1 %v12026_v3 }
 0x10c   :  { %v12283_v28 = vadd.f32 %v10301_v20, %v282_v27  ;;  %v10896_v29 = vpop.f32.mrb[5].mxu0 }
 0x10e   :  { %10308 = vmatmul.mubr.msk.f32.gmra.mrb[4].mxu1 %vm380_vm3, %v12283_v28 }
 0x1d9   :  { %v453_v35 = vpop.f32.mrb[0].mxu1 }
 0x1da   :  { %v454_v36 = vadd.f32 %v453_v35, %v373_v33  ;;  %v455_v37 = vpop.f32.mrb[1].mxu1 }
 0x1db   :  { %v456_v38 = vadd.f32 %v455_v37, %v377_v34 }
 0x1dd   :  { %v476_v39 = vcombine.low %v454_v36, %v456_v38  ;;  %v477_v40 = vcombine.high %v454_v36, %v456_v38  ;;  %v459_v41 = vpop.f32.mrb[2].mxu1 }
 0x1de   :  { %v460_v42 = vadd.f32 %v459_v41, %v373_v33  ;;  %v461_v43 = vpop.f32.mrb[3].mxu1 }
 0x1df   :  { %v12299_v44 = vrot.slane %v476_v39, %v12170_v14  ;;  %v12302_v45 = vrot.slane %v477_v40, %v12170_v14  ;;  %v462_v7 = vadd.f32 %v461_v43, %v377_v34 }
 0x1e1   :  { %v12306_v46 = vcombine.high %v12299_v44, %v12299_v44  ;;  %v12310_v47 = vcombine.high %v12302_v45, %v12302_v45  ;;  %v494_v48 = vcombine.low %v460_v42, %v462_v7  ;;  %v495_v49 = vcombine.high %v460_v42, %v462_v7  ;;  %v465_v50 = vpop.f32.mrb[4].mxu1 }
 0x1e2   :  { %v466_v51 = vadd.f32 %v465_v50, %v373_v33  ;;  %v467_v52 = vpop.f32.mrb[5].mxu1  ;;  %v790_v17 = vrot.slane %v12299_v44, 2  ;;  %v792_v18 = vrot.slane %v12302_v45, 2 }
 0x1e3   :  { %v521_v53 = vcombine.low %v12299_v44, %v12306_v46  ;;  %v522_v54 = vcombine.low %v12302_v45, %v12310_v47  ;;  %v12317_v55 = vrot.slane %v494_v48, %v12170_v14  ;;  %v12320_v56 = vrot.slane %v495_v49, %v12170_v14  ;;  %v10384_v49 = vld [vmem:[%s13940_s4 + $0xd8] sm:$0xff] }
 0x1e4   :  { %v468_v57 = vadd.f32 %v467_v52, %v377_v34  ;;  %v791_v15 = vrot.slane %v12306_v46, 2  ;;  %v793_v16 = vrot.slane %v12310_v47, 2 }
 0x1e5   :  { %v529_v58 = vrot.slane %v521_v53, %v12170_v14  ;;  %v536_v59 = vrot.slane %v522_v54, %v12170_v14  ;;  %v12326_v60 = vcombine.high %v12317_v55, %v12317_v55  ;;  %v12330_v61 = vcombine.high %v12320_v56, %v12320_v56 }
 0x1e6   :  { %v12334_v62 = vrot.slane %v12317_v55, %v12170_v14  ;;  %v512_v63 = vcombine.low %v466_v51, %v468_v57  ;;  %v795_v20 = vcombine.low %v790_v17, %v791_v15  ;;  %v796_v21 = vcombine.low %v792_v18, %v793_v16 }
 0x1e7   :  { %v12336_v0 = vcombine.low %v529_v58, %v536_v59  ;;  %v633_v2 = vcombine.low %v12326_v60, %v12320_v56  ;;  %v794_v29 = vrot.slane %v12317_v55, 2  ;;  %v905_v34 = vrot.slane %v12330_v61, 2 }
 0x1e8   :  { %v12341_v4 = vrot.slane %v512_v63, %v12170_v14  ;;  %v803_v31 = vrot.slane %v795_v20, %v12170_v14  ;;  %v810_v33 = vrot.slane %v796_v21, %v12170_v14  ;;  %v903_v36 = vrot.slane %v12326_v60, 2 }
 0x1e9   :  { %10901 = vmatprep.mubr.msk.f32.mxu1 %vm549_vm4, %v12336_v0  ;;  %v12347_v5 = vpack.i.bf16 %v12334_v62, %v12336_v0  ;;  %v641_v9 = vrot.slane %v633_v2, %v12170_v14  ;;  %v904_v37 = vrot.slane %v12320_v56, 2  ;;  %v818_v39 = vrot.slane %v794_v29, %v12170_v14 }
 0x1ea   :  { %v12351_v6 = vcombine.high %v12341_v4, %v12341_v4  ;;  %v634_v8 = vcombine.low %v12330_v61, %v12341_v4  ;;  %v906_v35 = vrot.slane %v12341_v4, 2  ;;  %v811_v42 = vcombine.low %v803_v31, %v810_v33 }
 0x1eb   :  { %11765 = vrot.lane.b32.xlu0 %v12347_v5, %s12029_s23  ;;  %v908_v48 = vcombine.low %v903_v36, %v904_v37 }
 0x1ec   :  { %v648_v10 = vrot.slane %v634_v8, %v12170_v14  ;;  %v12361_v11 = vrot.slane %v12351_v6, %v12170_v14  ;;  %v909_v43 = vcombine.low %v905_v34, %v906_v35  ;;  %v11524_v50 = vpack.c.bf16 %v818_v39, %v811_v42 }
 0x1ed   :  { %v907_v51 = vrot.slane %v12351_v6, 2  ;;  %v916_v53 = vrot.slane %v908_v48, %v12170_v14 }
 0x1ee   :  { %v12363_v12 = vcombine.low %v641_v9, %v648_v10  ;;  %v923_v52 = vrot.slane %v909_v43, %v12170_v14 }
 0x1ef   :  { %v931_v57 = vrot.slane %v907_v51, %v12170_v14 }
 0x1f0   :  { %10908 = vmatprep.mubr.msk.f32.mxu0 %vm549_vm4, %v12363_v12  ;;  %v12369_v13 = vpack.i.bf16 %v12361_v11, %v12363_v12  ;;  %v924_v54 = vcombine.low %v916_v53, %v923_v52 }
 0x1f2   :  { %11770 = vrot.lane.b32.xlu0 %v12369_v13, %s12029_s23  ;;  %v12414_v58 = vpack.c.bf16 %v931_v57, %v924_v54 }
 0x25d   :  { %v11766_v19 = vpop.permute.xlu0 %11765 }
 0x25e   :  { %v11768_v23 = vunpack.i.h.bf16 %v11766_v19  ;;  %v11767_v24 = vunpack.i.l.bf16 %v11766_v19 }
 0x260   :  { %v11512_v27 = vpack.c.bf16 %v11768_v23, %v11767_v24 }
 0x262   :  { %11514 = vmatprep.subr.msk.bf16.mxu1 %vm12379_vm5, %v11512_v27 }
 0x263   :  { %11517 = vmatpush3.bf16.xpose.msk.msra.mxu1 %vm12379_vm5, %v11512_v27 }
 0x264   :  { %v11771_v38 = vpop.permute.xlu0 %11770 }
 0x265   :  { %v11773_v40 = vunpack.i.h.bf16 %v11771_v38  ;;  %v11772_v41 = vunpack.i.l.bf16 %v11771_v38 }
 0x267   :  { %v11518_v7 = vpack.c.bf16 %v11773_v40, %v11772_v41 }
 0x269   :  { %11520 = vmatprep.subr.msk.bf16.mxu0 %vm12379_vm5, %v11518_v7 }
 0x26a   :  { %11523 = vmatpush3.bf16.xpose.msk.msra.mxu0 %vm12379_vm5, %v11518_v7  ;;  %10902 = vmatmul.mubr.msk.f32.vlgmr.msra.gmra.mrb[6].mxu1 %vm549_vm4, %v12334_v62 }
 0x26b   :  { %11526 = vmatprep.subr.msk.bf16.mxu0 %vm12396_vm7, %v11524_v50 }
 0x271   :  { %10909 = vmatmul.mubr.msk.f32.vlgmr.msra.gmra.mrb[6].mxu0 %vm549_vm4, %v12361_v11 }
 0x272   :  { %11529 = vmatpush3.bf16.msk.msra.mxu0 %vm12396_vm7, %v11524_v50 }
 0x273   :  { %11532 = vmatprep.subr.msk.bf16.mxu0 %vm12396_vm7, %v12414_v58 }
 0x33d   :  { %v10903_v59 = vpop.f32.mrb[6].mxu1 }
 0x33e   :  { %v624_v63 = vpop.f32.mrb[7].mxu1  ;;  %v749_v8 = vsel %vm748_vm9, %v10903_v59, -inf }
 0x33f   :  { %v745_v2 = vsel %vm744_vm8, %v624_v63, -inf }
 0x340   :  { %746 = vmax.xlane.f32.xlu1 %v745_v2 }
 0x344   :  { %v10910_v9 = vpop.f32.mrb[6].mxu0  ;;  %750 = vmax.xlane.f32.xlu1 %v749_v8 }
 0x345   :  { %v735_v10 = vpop.f32.mrb[7].mxu0  ;;  %v755_v16 = vsel %vm748_vm9, %v10910_v9, -inf }
 0x346   :  { %v752_v15 = vsel %vm744_vm8, %v735_v10, -inf }
 0x347   :  { %753 = vmax.xlane.f32.xlu0 %v752_v15 }
 0x348   :  { %756 = vmax.xlane.f32.xlu1 %v755_v16 }
 0x359   :  { %11775 = vrot.lane.b32.xlu1 %v12347_v5, %s12031_s0 }
 0x35d   :  { %11780 = vrot.lane.b32.xlu0 %v12369_v13, %s12031_s0  ;;  %1016 = vrot.lane.b32.xlu1 %v12336_v0, %s12032_s19 }
 0x361   :  { %1018 = vrot.lane.b32.xlu1 %v12334_v62, %s12032_s19 }
 0x365   :  { %1107 = vrot.lane.b32.xlu1 %v12363_v12, %s12032_s19 }
 0x3cd   :  { %v747_v17 = vpop.xlane.xlu1 %746 }
 0x3ce   :  { %v758_v18 = vsub.f32 %v624_v63, %v747_v17 }
 0x3d0   :  { %v762_v21 = vmul.f32 1.442695, %v758_v18 }
 0x3d1   :  { %v751_v19 = vpop.xlane.xlu1 %750 }
 0x3d2   :  { %v759_v20 = vsub.f32 %v10903_v59, %v751_v19 }
 0x3d4   :  { %v764_v23 = vmul.f32 1.442695, %v759_v20  ;;  %v754_v24 = vpop.xlane.xlu0 %753 }
 0x3d5   :  { %v757_v27 = vpop.xlane.xlu1 %756  ;;  %v760_v31 = vsub.f32 %v735_v10, %v754_v24 }
 0x3d6   :  { %11806 = vpow2.f32 %v764_v23  ;;  %v761_v29 = vsub.f32 %v10910_v9, %v757_v27 }
 0x3d7   :  { %11808 = vpow2.f32 %v762_v21  ;;  %v766_v37 = vmul.f32 1.442695, %v760_v31 }
 0x3d8   :  { %v768_v33 = vmul.f32 1.442695, %v761_v29  ;;  %v11781_v63 = vpop.permute.xlu0 %11780 }
 0x3d9   :  { %v11776_v34 = vpop.permute.xlu1 %11775  ;;  %v11783_v10 = vunpack.i.h.bf16 %v11781_v63  ;;  %v11782_v15 = vunpack.i.l.bf16 %v11781_v63 }
 0x3da   :  { %v11778_v35 = vunpack.i.h.bf16 %v11776_v34  ;;  %v11777_v36 = vunpack.i.l.bf16 %v11776_v34  ;;  %11810 = vpow2.f32 %v768_v33 }
 0x3db   :  { %11812 = vpow2.f32 %v766_v37  ;;  %v11542_v18 = vpack.c.bf16 %v11783_v10, %v11782_v15 }
 0x3dc   :  { %v11536_v38 = vpack.c.bf16 %v11778_v35, %v11777_v36 }
 0x3dd   :  { %v1017_v39 = vpop.permute.xlu1 %1016 }
 0x3de   :  { %11538 = vmatprep.subr.msk.bf16.mxu1 %vm12379_vm5, %v11536_v38  ;;  %10929 = vmatprep.mubr.msk.f32.mxu1 %vm549_vm4, %v1017_v39 }
 0x3df   :  { %11541 = vmatpush3.bf16.xpose.msk.msra.mxu1 %vm12379_vm5, %v11536_v38 }
 0x3e0   :  { %v11807_v40 = vpop.eup %11806 }
 0x3e1   :  { %v773_v41 = vsel %vm748_vm9, %v11807_v40, 0.0  ;;  %v11809_v42 = vpop.eup %11808  ;;  %v1019_v43 = vpop.permute.xlu1 %1018 }
 0x3e2   :  { %774 = vadd.xlane.f32.xlu1 %v773_v41  ;;  %v770_v7 = vsel %vm744_vm8, %v11809_v42, 0.0 }
 0x3e4   :  { %v11811_v48 = vpop.eup %11810 }
 0x3e5   :  { %v779_v50 = vsel %vm748_vm9, %v11811_v48, 0.0  ;;  %v11813_v51 = vpop.eup %11812  ;;  %v1108_v53 = vpop.permute.xlu1 %1107 }
 0x3e6   :  { %771 = vadd.xlane.f32.xlu1 %v770_v7  ;;  %10930 = vmatmul.mubr.msk.f32.vlgmr.msra.gmra.mrb[8].mxu1 %vm549_vm4, %v1019_v43  ;;  %v776_v52 = vsel %vm744_vm8, %v11813_v51, 0.0 }
 0x3ea   :  { %780 = vadd.xlane.f32.xlu1 %v779_v50 }
 0x3ee   :  { %777 = vadd.xlane.f32.xlu1 %v776_v52 }
 0x3ff   :  { %1109 = vrot.lane.b32.xlu1 %v12361_v11, %s12032_s19 }
 0x46f   :  { %v775_v54 = vpop.xlane.xlu1 %774 }
 0x470   :  { %11814 = vrcp.f32 %v775_v54 }
 0x473   :  { %v772_v57 = vpop.xlane.xlu1 %771 }
 0x474   :  { %11816 = vrcp.f32 %v772_v57 }
 0x477   :  { %v781_v59 = vpop.xlane.xlu1 %780 }
 0x478   :  { %11818 = vrcp.f32 %v781_v59 }
 0x47a   :  { %v11815_v8 = vpop.eup %11814 }
 0x47b   :  { %v778_v2 = vpop.xlane.xlu1 %777  ;;  %v787_v17 = vmul.f32 %v11815_v8, %v11807_v40 }
 0x47c   :  { %11820 = vrcp.f32 %v778_v2 }
 0x47e   :  { %v11817_v9 = vpop.eup %11816 }
 0x47f   :  { %v786_v16 = vmul.f32 %v11817_v9, %v11809_v42  ;;  %v1110_v24 = vpop.permute.xlu1 %1109 }
 0x481   :  { %10915 = vmatprep.mubr.msk.f32.mxu0 %vm744_vm8, %v786_v16 }
 0x482   :  { %10916 = vmatmul.mubr.msk.f32.vlgmr.msra.gmra.mrb[8].mxu0 %vm744_vm8, %v787_v17  ;;  %v11819_v19 = vpop.eup %11818 }
 0x483   :  { %11535 = vmatpush3.bf16.msk.msra.mxu0 %vm12396_vm7, %v12414_v58  ;;  %v789_v23 = vmul.f32 %v11819_v19, %v11811_v48 }
 0x484   :  { %11544 = vmatprep.subr.msk.bf16.mxu0 %vm12379_vm5, %v11542_v18 }
 0x486   :  { %v11821_v20 = vpop.eup %11820 }
 0x487   :  { %v788_v21 = vmul.f32 %v11821_v20, %v11813_v51 }
 0x489   :  { %10922 = vmatprep.mubr.msk.f32.mxu0 %vm744_vm8, %v788_v21 }
 0x48a   :  { %10923 = vmatmul.mubr.msk.f32.vlgmr.msra.gmra.mrb[10].mxu0 %vm744_vm8, %v789_v23 }
 0x48b   :  { %10936 = vmatprep.mubr.msk.f32.mxu0 %vm549_vm4, %v1108_v53 }
 0x48c   :  { %11547 = vmatpush3.bf16.xpose.msk.msra.mxu0 %vm12379_vm5, %v11542_v18 }
 0x493   :  { %10937 = vmatmul.mubr.msk.f32.vlgmr.msra.gmra.mrb[12].mxu0 %vm549_vm4, %v1110_v24 }
 0x4b9   :  { %v10931_v58 = vpop.f32.mrb[8].mxu1 }
 0x4ba   :  { %v1098_v27 = vpop.f32.mrb[9].mxu1  ;;  %v1201_v29 = vsel %vm748_vm9, %v10931_v58, -inf }
 0x4bb   :  { %1202 = vmax.xlane.f32.xlu1 %v1201_v29  ;;  %v1198_v31 = vsel %vm744_vm8, %v1098_v27, -inf }
 0x4bc   :  { %1199 = vmax.xlane.f32.xlu0 %v1198_v31 }
 0x548   :  { %v1203_v39 = vpop.xlane.xlu1 %1202 }
 0x549   :  { %v1200_v33 = vpop.xlane.xlu0 %1199  ;;  %v1211_v41 = vsub.f32 %v10931_v58, %v1203_v39 }
 0x54a   :  { %v1210_v34 = vsub.f32 %v1098_v27, %v1200_v33 }
 0x54b   :  { %v1216_v7 = vmul.f32 1.442695, %v1211_v41 }
 0x54c   :  { %v1214_v35 = vmul.f32 1.442695, %v1210_v34 }
 0x54e   :  { %11822 = vpow2.f32 %v1214_v35 }
 0x54f   :  { %11824 = vpow2.f32 %v1216_v7 }
 0x555   :  { %v12462_v36 = vpop.f32.mrb[8].mxu0 }
 0x556   :  { %v12464_v37 = vpop.f32.mrb[9].mxu0 }
 0x558   :  { %v11823_v38 = vpop.eup %11822 }
 0x559   :  { %v1222_v40 = vsel %vm744_vm8, %v11823_v38, 0.0  ;;  %v12475_v53 = vpop.eup %11824 }
 0x55a   :  { %1223 = vadd.xlane.f32.xlu1 %v1222_v40  ;;  %v1225_v54 = vsel %vm748_vm9, %v12475_v53, 0.0 }
 0x55d   :  { %v12467_v42 = vpop.f32.mrb[10].mxu0 }
 0x55e   :  { %v12469_v43 = vpop.f32.mrb[11].mxu0 }
 0x566   :  { %v10938_v48 = vpop.f32.mrb[12].mxu0 }
 0x567   :  { %v1189_v50 = vpop.f32.mrb[13].mxu0  ;;  %v1207_v52 = vsel %vm748_vm9, %v10938_v48, -inf }
 0x568   :  { %v1204_v51 = vsel %vm744_vm8, %v1189_v50, -inf }
 0x569   :  { %1205 = vmax.xlane.f32.xlu0 %v1204_v51 }
 0x56b   :  { %1242 = vrot.lane.b32.xlu1 %v12299_v44, %s12032_s19 }
 0x56d   :  { %1208 = vmax.xlane.f32.xlu0 %v1207_v52 }
 0x56f   :  { %1246 = vrot.lane.b32.xlu1 %v12302_v45, %s12032_s19 }
 0x571   :  { %1226 = vadd.xlane.f32.xlu0 %v1225_v54 }
 0x573   :  { %1248 = vrot.lane.b32.xlu1 %v12310_v47, %s12032_s19 }
 0x577   :  { %1365 = vrot.lane.b32.xlu1 %v12326_v60, %s12032_s19 }
 0x57b   :  { %1369 = vrot.lane.b32.xlu1 %v12330_v61, %s12032_s19 }
 0x57f   :  { %1373 = vrot.lane.b32.xlu1 %v12351_v6, %s12032_s19 }
 0x583   :  { %11790 = vrot.lane.b32.xlu1 %v12369_v13, %s12033_s1 }
 0x587   :  { %1244 = vrot.lane.b32.xlu0 %v12306_v46, %s12032_s19  ;;  %1490 = vrot.lane.b32.xlu1 %v12334_v62, %s12034_s20 }
 0x58b   :  { %1250 = vrot.lane.b32.xlu0 %v12317_v55, %s12032_s19 }
 0x58f   :  { %1367 = vrot.lane.b32.xlu0 %v12320_v56, %s12032_s19 }
 0x593   :  { %1371 = vrot.lane.b32.xlu0 %v12341_v4, %s12032_s19 }
 0x597   :  { %11785 = vrot.lane.b32.xlu0 %v12347_v5, %s12033_s1 }
 0x5e7   :  { %v1224_v57 = vpop.xlane.xlu1 %1223 }
 0x5e8   :  { %11826 = vrcp.f32 %v1224_v57 }
 0x5eb   :  { %v1243_v59 = vpop.permute.xlu1 %1242 }
 0x5ec   :  { %v1252_v27 = vrot.slane %v1243_v59, 2 }
 0x5ef   :  { %v1247_v8 = vpop.permute.xlu1 %1246 }
 0x5f0   :  { %v1254_v24 = vrot.slane %v1247_v8, 2 }
 0x5f2   :  { %v11827_v63 = vpop.eup %11826 }
 0x5f3   :  { %v1238_v2 = vmul.f32 %v11827_v63, %v11823_v38  ;;  %v1249_v16 = vpop.permute.xlu1 %1248 }
 0x5f4   :  { %v1255_v21 = vrot.slane %v1249_v16, 2 }
 0x5f5   :  { %10943 = vmatprep.mubr.msk.f32.mxu1 %vm744_vm8, %v1238_v2 }
 0x5f6   :  { %v1206_v9 = vpop.xlane.xlu0 %1205  ;;  %v1258_v29 = vcombine.low %v1254_v24, %v1255_v21 }
 0x5f7   :  { %v1212_v10 = vsub.f32 %v1189_v50, %v1206_v9  ;;  %v1366_v23 = vpop.permute.xlu1 %1365 }
 0x5f8   :  { %v1272_v40 = vrot.slane %v1258_v29, %v12170_v14  ;;  %v1375_v8 = vrot.slane %v1366_v23, 2 }
 0x5f9   :  { %v1218_v15 = vmul.f32 1.442695, %v1212_v10 }
 0x5fa   :  { %v1209_v17 = vpop.xlane.xlu0 %1208 }
 0x5fb   :  { %11828 = vpow2.f32 %v1218_v15  ;;  %v1213_v18 = vsub.f32 %v10938_v48, %v1209_v17  ;;  %v1370_v35 = vpop.permute.xlu1 %1369 }
 0x5fc   :  { %v1377_v10 = vrot.slane %v1370_v35, 2 }
 0x5fd   :  { %v1220_v19 = vmul.f32 1.442695, %v1213_v18 }
 0x5fe   :  { %v1227_v20 = vpop.xlane.xlu0 %1226 }
 0x5ff   :  { %11830 = vpow2.f32 %v1220_v19  ;;  %v1374_v2 = vpop.permute.xlu1 %1373 }
 0x600   :  { %11832 = vrcp.f32 %v1227_v20  ;;  %v1379_v18 = vrot.slane %v1374_v2, 2 }
 0x602   :  { %v1245_v58 = vpop.permute.xlu0 %1244  ;;  %v1403_v29 = vrot.slane %v1379_v18, %v12170_v14 }
 0x603   :  { %v1253_v31 = vrot.slane %v1245_v58, 2  ;;  %v11791_v20 = vpop.permute.xlu1 %11790 }
 0x605   :  { %v11829_v33 = vpop.eup %11828  ;;  %v1257_v34 = vcombine.low %v1252_v27, %v1253_v31  ;;  %v11793_v31 = vunpack.i.h.bf16 %v11791_v20 }
 0x606   :  { %v1251_v38 = vpop.permute.xlu0 %1250  ;;  %v1228_v39 = vsel %vm744_vm8, %v11829_v33, 0.0 }
 0x607   :  { %v1265_v41 = vrot.slane %v1257_v34, %v12170_v14  ;;  %v1256_v7 = vrot.slane %v1251_v38, 2  ;;  %1229 = vadd.xlane.f32.xlu1 %v1228_v39  ;;  %v11792_v34 = vunpack.i.l.bf16 %v11791_v20 }
 0x609   :  { %v11831_v48 = vpop.eup %11830  ;;  %v1273_v50 = vcombine.low %v1265_v41, %v1272_v40  ;;  %v1280_v51 = vrot.slane %v1256_v7, %v12170_v14  ;;  %v11566_v39 = vpack.c.bf16 %v11793_v31, %v11792_v34  ;;  %v1491_v40 = vpop.permute.xlu1 %1490 }
 0x60a   :  { %v1368_v52 = vpop.permute.xlu0 %1367  ;;  %v1231_v54 = vsel %vm748_vm9, %v11831_v48, 0.0  ;;  %v11833_v63 = vpop.eup %11832 }
 0x60b   :  { %v11548_v57 = vpack.c.bf16 %v1280_v51, %v1273_v50  ;;  %v1376_v59 = vrot.slane %v1368_v52, 2  ;;  %1232 = vadd.xlane.f32.xlu0 %v1231_v54  ;;  %v1239_v17 = vmul.f32 %v11833_v63, %v12475_v53 }
 0x60d   :  { %11550 = vmatprep.subr.msk.bf16.mxu1 %vm12396_vm7, %v11548_v57  ;;  %v1380_v15 = vcombine.low %v1375_v8, %v1376_v59 }
 0x60e   :  { %11553 = vmatpush3.bf16.msk.msra.mxu1 %vm12396_vm7, %v11548_v57  ;;  %v1372_v9 = vpop.permute.xlu0 %1371 }
 0x60f   :  { %v1378_v16 = vrot.slane %v1372_v9, 2  ;;  %v1388_v23 = vrot.slane %v1380_v15, %v12170_v14 }
 0x611   :  { %v1381_v19 = vcombine.low %v1377_v10, %v1378_v16  ;;  %10944 = vmatmul.mubr.msk.f32.vlgmr.msra.gmra.mrb[10].mxu1 %vm744_vm8, %v1239_v17 }
 0x612   :  { %v11786_v21 = vpop.permute.xlu0 %11785 }
 0x613   :  { %v1395_v24 = vrot.slane %v1381_v19, %v12170_v14  ;;  %v11788_v58 = vunpack.i.h.bf16 %v11786_v21  ;;  %v11787_v27 = vunpack.i.l.bf16 %v11786_v21 }
 0x615   :  { %v1396_v35 = vcombine.low %v1388_v23, %v1395_v24  ;;  %v11560_v38 = vpack.c.bf16 %v11788_v58, %v11787_v27 }
 0x617   :  { %11562 = vmatprep.subr.msk.bf16.mxu1 %vm12379_vm5, %v11560_v38  ;;  %v11554_v53 = vpack.c.bf16 %v1403_v29, %v1396_v35 }
 0x618   :  { %1581 = vrot.lane.b32.xlu1 %v12361_v11, %s12034_s20  ;;  %11565 = vmatpush3.bf16.xpose.msk.msra.mxu1 %vm12379_vm5, %v11560_v38 }
 0x619   :  { %11556 = vmatprep.subr.msk.bf16.mxu0 %vm12396_vm7, %v11554_v53 }
 0x61a   :  { %11559 = vmatpush3.bf16.msk.msra.mxu0 %vm12396_vm7, %v11554_v53 }
 0x61b   :  { %11568 = vmatprep.subr.msk.bf16.mxu0 %vm12379_vm5, %v11566_v39 }
 0x621   :  { %1488 = vrot.lane.b32.xlu0 %v12336_v0, %s12034_s20 }
 0x625   :  { %1579 = vrot.lane.b32.xlu0 %v12363_v12, %s12034_s20 }
 0x694   :  { %v1230_v41 = vpop.xlane.xlu1 %1229 }
 0x695   :  { %11834 = vrcp.f32 %v1230_v41 }
 0x698   :  { %v1233_v7 = vpop.xlane.xlu0 %1232  ;;  %v1582_v63 = vpop.permute.xlu1 %1581 }
 0x699   :  { %11836 = vrcp.f32 %v1233_v7 }
 0x69c   :  { %v1489_v50 = vpop.permute.xlu0 %1488 }
 0x69d   :  { %10957 = vmatprep.mubr.msk.f32.mxu1 %vm549_vm4, %v1489_v50 }
 0x69e   :  { %10958 = vmatmul.mubr.msk.f32.vlgmr.msra.gmra.mrb[12].mxu1 %vm549_vm4, %v1491_v40 }
 0x69f   :  { %v11835_v51 = vpop.eup %11834 }
 0x6a0   :  { %v1240_v52 = vmul.f32 %v11835_v51, %v11829_v33  ;;  %v1580_v59 = vpop.permute.xlu0 %1579 }
 0x6a2   :  { %10950 = vmatprep.mubr.msk.f32.mxu0 %vm744_vm8, %v1240_v52 }
 0x6a3   :  { %v11837_v54 = vpop.eup %11836 }
 0x6a4   :  { %v1241_v57 = vmul.f32 %v11837_v54, %v11831_v48 }
 0x6a6   :  { %10951 = vmatmul.mubr.msk.f32.vlgmr.msra.gmra.mrb[14].mxu0 %vm744_vm8, %v1241_v57 }
 0x6a7   :  { %11571 = vmatpush3.bf16.xpose.msk.msra.mxu0 %vm12379_vm5, %v11566_v39  ;;  %10964 = vmatprep.mubr.msk.f32.mxu0 %vm549_vm4, %v1580_v59 }
 0x6ae   :  { %10965 = vmatmul.mubr.msk.f32.vlgmr.msra.gmra.mrb[16].mxu0 %vm549_vm4, %v1582_v63 }
 0x6e4   :  { %v12542_v2 = vpop.f32.mrb[10].mxu1 }
 0x6e5   :  { %v12544_v8 = vpop.f32.mrb[11].mxu1 }
 0x771   :  { %v10959_v33 = vpop.f32.mrb[12].mxu1 }
 0x772   :  { %v1570_v9 = vpop.f32.mrb[13].mxu1  ;;  %v1673_v10 = vsel %vm748_vm9, %v10959_v33, -inf }
 0x773   :  { %1674 = vmax.xlane.f32.xlu1 %v1673_v10  ;;  %v1670_v48 = vsel %vm744_vm8, %v1570_v9, -inf }
 0x774   :  { %1671 = vmax.xlane.f32.xlu0 %v1670_v48 }
 0x779   :  { %v12548_v15 = vpop.f32.mrb[14].mxu0 }
 0x77a   :  { %v12550_v16 = vpop.f32.mrb[15].mxu0 }
 0x781   :  { %v10966_v17 = vpop.f32.mrb[16].mxu0 }
 0x782   :  { %v1661_v18 = vpop.f32.mrb[17].mxu0  ;;  %v1679_v20 = vsel %vm748_vm9, %v10966_v17, -inf }
 0x783   :  { %v1676_v19 = vsel %vm744_vm8, %v1661_v18, -inf }
 0x784   :  { %1677 = vmax.xlane.f32.xlu0 %v1676_v19 }
 0x788   :  { %1680 = vmax.xlane.f32.xlu0 %v1679_v20 }
 0x800   :  { %v1675_v21 = vpop.xlane.xlu1 %1674 }
 0x801   :  { %v1683_v23 = vsub.f32 %v10959_v33, %v1675_v21  ;;  %v1672_v24 = vpop.xlane.xlu0 %1671 }
 0x802   :  { %v1682_v58 = vsub.f32 %v1570_v9, %v1672_v24 }
 0x803   :  { %v1688_v27 = vmul.f32 1.442695, %v1683_v23 }
 0x804   :  { %v1686_v29 = vmul.f32 1.442695, %v1682_v58 }
 0x805   :  { %11838 = vpow2.f32 %v1688_v27 }
 0x806   :  { %11840 = vpow2.f32 %v1686_v29 }
 0x80f   :  { %v12554_v31 = vpop.eup %11838 }
 0x810   :  { %v11841_v34 = vpop.eup %11840  ;;  %v1697_v35 = vsel %vm748_vm9, %v12554_v31, 0.0 }
 0x811   :  { %1698 = vadd.xlane.f32.xlu0 %v1697_v35  ;;  %v1694_v38 = vsel %vm744_vm8, %v11841_v34, 0.0  ;;  %v1678_v53 = vpop.xlane.xlu0 %1677 }
 0x812   :  { %1695 = vadd.xlane.f32.xlu1 %v1694_v38  ;;  %v1684_v7 = vsub.f32 %v1661_v18, %v1678_v53 }
 0x814   :  { %v1690_v50 = vmul.f32 1.442695, %v1684_v7 }
 0x815   :  { %v1681_v39 = vpop.xlane.xlu0 %1680 }
 0x816   :  { %v1685_v40 = vsub.f32 %v10966_v17, %v1681_v39 }
 0x818   :  { %v1692_v41 = vmul.f32 1.442695, %v1685_v40 }
 0x81a   :  { %11842 = vpow2.f32 %v1692_v41 }
 0x81b   :  { %11844 = vpow2.f32 %v1690_v50 }
 0x823   :  { %1714 = vrot.lane.b32.xlu1 %v12299_v44, %s12034_s20 }
 0x824   :  { %v12585_v51 = vpop.eup %11842 }
 0x825   :  { %v12589_v52 = vpop.eup %11844 }
 0x827   :  { %1716 = vrot.lane.b32.xlu0 %v12306_v46, %s12034_s20  ;;  %1718 = vrot.lane.b32.xlu1 %v12302_v45, %s12034_s20 }
 0x82b   :  { %1722 = vrot.lane.b32.xlu0 %v12317_v55, %s12034_s20  ;;  %1720 = vrot.lane.b32.xlu1 %v12310_v47, %s12034_s20 }
 0x82f   :  { %1839 = vrot.lane.b32.xlu0 %v12320_v56, %s12034_s20  ;;  %1837 = vrot.lane.b32.xlu1 %v12326_v60, %s12034_s20 }
 0x833   :  { %1843 = vrot.lane.b32.xlu0 %v12341_v4, %s12034_s20  ;;  %1841 = vrot.lane.b32.xlu1 %v12330_v61, %s12034_s20 }
 0x837   :  { %11795 = vrot.lane.b32.xlu0 %v12347_v5, %s12035_s21  ;;  %1845 = vrot.lane.b32.xlu1 %v12351_v6, %s12034_s20  ;;  %v1703_v5 = vsel %vm748_vm9, %v12585_v51, 0.0 }
 0x83b   :  { %11800 = vrot.lane.b32.xlu1 %v12369_v13, %s12035_s21  ;;  %v1700_v13 = vsel %vm744_vm8, %v12589_v52, 0.0 }
 0x83f   :  { %1962 = vrot.lane.b32.xlu1 %v12334_v62, %s12036_s22 }
 0x856   :  { %1704 = vadd.xlane.f32.xlu0 %v1703_v5 }
 0x863   :  { %1701 = vadd.xlane.f32.xlu1 %v1700_v13 }
 0x86c   :  { %1960 = vrot.lane.b32.xlu0 %v12336_v0, %s12036_s22 }
 0x870   :  { %2051 = vrot.lane.b32.xlu0 %v12363_v12, %s12036_s22 }
 0x874   :  { %2053 = vrot.lane.b32.xlu1 %v12361_v11, %s12036_s22 }
 0x89e   :  { %v1699_v62 = vpop.xlane.xlu0 %1698 }
 0x89f   :  { %v1696_v54 = vpop.xlane.xlu1 %1695 }
 0x8a0   :  { %11846 = vrcp.f32 %v1696_v54 }
 0x8a1   :  { %11848 = vrcp.f32 %v1699_v62 }
 0x8a2   :  { %v1717_v57 = vpop.permute.xlu0 %1716 }
 0x8a3   :  { %v1715_v59 = vpop.permute.xlu1 %1714  ;;  %v1725_v9 = vrot.slane %v1717_v57, 2 }
 0x8a4   :  { %v1724_v10 = vrot.slane %v1715_v59, 2 }
 0x8a6   :  { %v1723_v63 = vpop.permute.xlu0 %1722  ;;  %v1729_v19 = vcombine.low %v1724_v10, %v1725_v9 }
 0x8a7   :  { %v1719_v33 = vpop.permute.xlu1 %1718  ;;  %v1728_v11 = vrot.slane %v1723_v63, 2 }
 0x8a8   :  { %v1726_v20 = vrot.slane %v1719_v33, 2  ;;  %v1737_v58 = vrot.slane %v1729_v19, %v12170_v14 }
 0x8a9   :  { %v1752_v35 = vrot.slane %v1728_v11, %v12170_v14 }
 0x8aa   :  { %v11847_v48 = vpop.eup %11846  ;;  %v1840_v17 = vpop.permute.xlu0 %1839 }
 0x8ab   :  { %v1721_v18 = vpop.permute.xlu1 %1720  ;;  %v1710_v0 = vmul.f32 %v11847_v48, %v11841_v34  ;;  %v1848_v38 = vrot.slane %v1840_v17, 2  ;;  %v11849_v62 = vpop.eup %11848 }
 0x8ac   :  { %v1727_v12 = vrot.slane %v1721_v18, 2  ;;  %v1711_v10 = vmul.f32 %v11849_v62, %v12554_v31 }
 0x8ad   :  { %10971 = vmatprep.mubr.msk.f32.mxu1 %vm744_vm8, %v1710_v0 }
 0x8ae   :  { %v1730_v21 = vcombine.low %v1726_v20, %v1727_v12  ;;  %v1844_v23 = vpop.permute.xlu0 %1843 }
 0x8af   :  { %v1838_v24 = vpop.permute.xlu1 %1837  ;;  %v1850_v7 = vrot.slane %v1844_v23, 2 }
 0x8b0   :  { %v1744_v27 = vrot.slane %v1730_v21, %v12170_v14  ;;  %v1847_v29 = vrot.slane %v1838_v24, 2 }
 0x8b2   :  { %v1745_v53 = vcombine.low %v1737_v58, %v1744_v27  ;;  %v11796_v39 = vpop.permute.xlu0 %11795  ;;  %v1852_v50 = vcombine.low %v1847_v29, %v1848_v38 }
 0x8b3   :  { %v11798_v34 = vunpack.i.h.bf16 %v11796_v39  ;;  %v11797_v40 = vunpack.i.l.bf16 %v11796_v39  ;;  %v1842_v41 = vpop.permute.xlu1 %1841 }
 0x8b4   :  { %v1849_v5 = vrot.slane %v1842_v41, 2  ;;  %v11572_v13 = vpack.c.bf16 %v1752_v35, %v1745_v53  ;;  %v1860_v63 = vrot.slane %v1852_v50, %v12170_v14 }
 0x8b5   :  { %v11584_v54 = vpack.c.bf16 %v11798_v34, %v11797_v40 }
 0x8b6   :  { %v1853_v57 = vcombine.low %v1849_v5, %v1850_v7  ;;  %11574 = vmatprep.subr.msk.bf16.mxu1 %vm12396_vm7, %v11572_v13 }
 0x8b7   :  { %v1846_v59 = vpop.permute.xlu1 %1845  ;;  %11577 = vmatpush3.bf16.msk.msra.mxu1 %vm12396_vm7, %v11572_v13 }
 0x8b8   :  { %v1867_v33 = vrot.slane %v1853_v57, %v12170_v14  ;;  %v1851_v9 = vrot.slane %v1846_v59, 2  ;;  %11586 = vmatprep.subr.msk.bf16.mxu1 %vm12379_vm5, %v11584_v54 }
 0x8ba   :  { %v1868_v48 = vcombine.low %v1860_v63, %v1867_v33  ;;  %v1875_v17 = vrot.slane %v1851_v9, %v12170_v14  ;;  %10972 = vmatmul.mubr.msk.f32.vlgmr.msra.gmra.mrb[14].mxu1 %vm744_vm8, %v1711_v10 }
 0x8bb   :  { %v11801_v18 = vpop.permute.xlu1 %11800 }
 0x8bc   :  { %v11578_v0 = vpack.c.bf16 %v1875_v17, %v1868_v48  ;;  %v11803_v19 = vunpack.i.h.bf16 %v11801_v18  ;;  %v11802_v20 = vunpack.i.l.bf16 %v11801_v18 }
 0x8be   :  { %v11590_v12 = vpack.c.bf16 %v11803_v19, %v11802_v20  ;;  %11580 = vmatprep.subr.msk.bf16.mxu0 %vm12396_vm7, %v11578_v0 }
 0x8bf   :  { %11583 = vmatpush3.bf16.msk.msra.mxu0 %vm12396_vm7, %v11578_v0  ;;  %v1963_v21 = vpop.permute.xlu1 %1962 }
 0x8c0   :  { %11589 = vmatpush3.bf16.xpose.msk.msra.mxu1 %vm12379_vm5, %v11584_v54  ;;  %11592 = vmatprep.subr.msk.bf16.mxu0 %vm12379_vm5, %v11590_v12 }
 0x8e3   :  { %v1705_v31 = vpop.xlane.xlu0 %1704 }
 0x8e4   :  { %11850 = vrcp.f32 %v1705_v31 }
 0x8e7   :  { %v1961_v11 = vpop.permute.xlu0 %1960 }
 0x8e8   :  { %10985 = vmatprep.mubr.msk.f32.mxu1 %vm549_vm4, %v1961_v11 }
 0x8e9   :  { %10986 = vmatmul.mubr.msk.f32.vlgmr.msra.gmra.mrb[16].mxu1 %vm549_vm4, %v1963_v21 }
 0x8eb   :  { %v2052_v35 = vpop.permute.xlu0 %2051 }
 0x8ee   :  { %v11851_v24 = vpop.eup %11850 }
 0x8ef   :  { %v1713_v29 = vmul.f32 %v11851_v24, %v12585_v51 }
 0x8f0   :  { %v1702_v23 = vpop.xlane.xlu1 %1701 }
 0x8f1   :  { %11852 = vrcp.f32 %v1702_v23 }
 0x8f4   :  { %v2054_v38 = vpop.permute.xlu1 %2053 }
 0x8fb   :  { %v11853_v58 = vpop.eup %11852 }
 0x8fc   :  { %v1712_v27 = vmul.f32 %v11853_v58, %v12589_v52 }
 0x8fe   :  { %10978 = vmatprep.mubr.msk.f32.mxu0 %vm744_vm8, %v1712_v27 }
 0x8ff   :  { %10979 = vmatmul.mubr.msk.f32.vlgmr.msra.gmra.mrb[18].mxu0 %vm744_vm8, %v1713_v29 }
 0x900   :  { %11595 = vmatpush3.bf16.xpose.msk.msra.mxu0 %vm12379_vm5, %v11590_v12  ;;  %10992 = vmatprep.mubr.msk.f32.mxu0 %vm549_vm4, %v2052_v35  ;;  %vm7082_vm5 = vcmask 27648  }
 0x907   :  { %10993 = vmatmul.mubr.msk.f32.vlgmr.msra.gmra.mrb[20].mxu0 %vm549_vm4, %v2054_v38 }
 0x98d   :  { %v10973_v53 = vpop.f32.mrb[14].mxu1 }
 0x98e   :  { %v1828_v39 = vpop.f32.mrb[15].mxu1 }
 0x9bc   :  { %v10987_v34 = vpop.f32.mrb[16].mxu1 }
 0x9bd   :  { %v2042_v40 = vpop.f32.mrb[17].mxu1  ;;  %v2145_v52 = vsel %vm748_vm9, %v10987_v34, -inf }
 0x9be   :  { %2146 = vmax.xlane.f32.xlu1 %v2145_v52  ;;  %v2142_v51 = vsel %vm744_vm8, %v2042_v40, -inf }
 0x9bf   :  { %2143 = vmax.xlane.f32.xlu0 %v2142_v51 }
 0x9d2   :  { %v12634_v41 = vpop.f32.mrb[18].mxu0 }
 0x9d3   :  { %v12636_v7 = vpop.f32.mrb[19].mxu0 }
 0x9da   :  { %v10994_v26 = vpop.f32.mrb[20].mxu0 }
 0x9db   :  { %v2133_v50 = vpop.f32.mrb[21].mxu0  ;;  %v2151_v13 = vsel %vm748_vm9, %v10994_v26, -inf }
 0x9dc   :  { %v2148_v5 = vsel %vm744_vm8, %v2133_v50, -inf }
 0x9dd   :  { %2149 = vmax.xlane.f32.xlu0 %v2148_v5 }
 0x9e1   :  { %2152 = vmax.xlane.f32.xlu0 %v2151_v13 }
 0xa4b   :  { %v2147_v62 = vpop.xlane.xlu1 %2146 }
 0xa4c   :  { %v2155_v54 = vsub.f32 %v10987_v34, %v2147_v62  ;;  %v2144_v57 = vpop.xlane.xlu0 %2143 }
 0xa4d   :  { %v2154_v59 = vsub.f32 %v2042_v40, %v2144_v57 }
 0xa4e   :  { %v2160_v63 = vmul.f32 1.442695, %v2155_v54 }
 0xa4f   :  { %v2158_v33 = vmul.f32 1.442695, %v2154_v59 }
 0xa50   :  { %11854 = vpow2.f32 %v2160_v63 }
 0xa51   :  { %11856 = vpow2.f32 %v2158_v33 }
 0xa5a   :  { %v12640_v9 = vpop.eup %11854 }
 0xa5b   :  { %v11857_v10 = vpop.eup %11856  ;;  %v2169_v48 = vsel %vm748_vm9, %v12640_v9, 0.0 }
 0xa5c   :  { %2170 = vadd.xlane.f32.xlu0 %v2169_v48  ;;  %v2166_v17 = vsel %vm744_vm8, %v11857_v10, 0.0 }
 0xa5d   :  { %2167 = vadd.xlane.f32.xlu1 %v2166_v17 }
 0xa6a   :  { %v2150_v18 = vpop.xlane.xlu0 %2149 }
 0xa6e   :  { %2186 = vrot.lane.b32.xlu1 %v12299_v44, %s12036_s22  ;;  %v2153_v44 = vpop.xlane.xlu0 %2152 }
 0xa72   :  { %2188 = vrot.lane.b32.xlu0 %v12306_v46, %s12036_s22  ;;  %2190 = vrot.lane.b32.xlu1 %v12302_v45, %s12036_s22  ;;  %v2157_v46 = vsub.f32 %v10994_v26, %v2153_v44  ;;  %v2156_v45 = vsub.f32 %v2133_v50, %v2150_v18 }
 0xa74   :  { %v2164_v0 = vmul.f32 1.442695, %v2157_v46  ;;  %v2162_v19 = vmul.f32 1.442695, %v2156_v45 }
 0xa76   :  { %2194 = vrot.lane.b32.xlu0 %v12317_v55, %s12036_s22  ;;  %2192 = vrot.lane.b32.xlu1 %v12310_v47, %s12036_s22  ;;  %11858 = vpow2.f32 %v2164_v0 }
 0xa77   :  { %11860 = vpow2.f32 %v2162_v19 }
 0xa7a   :  { %2311 = vrot.lane.b32.xlu0 %v12320_v56, %s12036_s22  ;;  %2309 = vrot.lane.b32.xlu1 %v12326_v60, %s12036_s22 }
 0xa7e   :  { %2313 = vrot.lane.b32.xlu1 %v12330_v61, %s12036_s22 }
 0xa80   :  { %v12661_v55 = vpop.eup %11858 }
 0xa81   :  { %v2175_v47 = vsel %vm748_vm9, %v12661_v55, 0.0  ;;  %v12665_v56 = vpop.eup %11860 }
 0xa82   :  { %v2172_v60 = vsel %vm744_vm8, %v12665_v56, 0.0 }
 0xa99   :  { %2176 = vadd.xlane.f32.xlu0 %v2175_v47 }
 0xaa2   :  { %2173 = vadd.xlane.f32.xlu1 %v2172_v60  ;;  %v358_v60 = vld [vmem:[#allocation3] sm:$0xff] }
 0xaaf   :  { %2315 = vrot.lane.b32.xlu0 %v12341_v4, %s12036_s22 }
 0xab3   :  { %2317 = vrot.lane.b32.xlu1 %v12351_v6, %s12036_s22  ;;  %2436 = vrot.lane.b32.xlu0 %v12544_v8, %s12035_s21 }
 0xab7   :  { %2452 = vrot.lane.b32.xlu1 %v1828_v39, %s12033_s1 }
 0xabb   :  { %2440 = vrot.lane.b32.xlu1 %v12550_v16, %s12035_s21 }
 0xabf   :  { %2438 = vrot.lane.b32.xlu1 %v12542_v2, %s12035_s21 }
 0xac3   :  { %2454 = vrot.lane.b32.xlu1 %v10973_v53, %s12033_s1 }
 0xac7   :  { %2442 = vrot.lane.b32.xlu1 %v12548_v15, %s12035_s21 }
 0xae9   :  { %v2171_v61 = vpop.xlane.xlu0 %2170 }
 0xaea   :  { %v2168_v4 = vpop.xlane.xlu1 %2167 }
 0xaeb   :  { %11862 = vrcp.f32 %v2168_v4 }
 0xaec   :  { %11864 = vrcp.f32 %v2171_v61  ;;  %v359_v61 = vld [vmem:[#allocation3 + $0x8] sm:$0xff] }
 0xaed   :  { %v2189_v20 = vpop.permute.xlu0 %2188  ;;  %v11609_v4 = vpack.c.bf16 %v359_v61, %v358_v60 }
 0xaee   :  { %v2187_v6 = vpop.permute.xlu1 %2186  ;;  %v2197_v8 = vrot.slane %v2189_v20, 2  ;;  %v361_v20 = vld [vmem:[#allocation3 + $0x18] sm:$0xff] }
 0xaef   :  { %v2196_v31 = vrot.slane %v2187_v6, 2  ;;  %v360_v6 = vld [vmem:[#allocation3 + $0x10] sm:$0xff] }
 0xaf1   :  { %v2195_v21 = vpop.permute.xlu0 %2194  ;;  %v2201_v24 = vcombine.low %v2196_v31, %v2197_v8  ;;  %v364_v31 = vld [vmem:[#allocation3 + $0x30] sm:$0xff] }
 0xaf2   :  { %v2191_v12 = vpop.permute.xlu1 %2190  ;;  %v2200_v27 = vrot.slane %v2195_v21, 2 }
 0xaf3   :  { %v2198_v2 = vrot.slane %v2191_v12, 2  ;;  %v2209_v29 = vrot.slane %v2201_v24, %v12170_v14  ;;  %v363_v12 = vld [vmem:[#allocation3 + $0x28] sm:$0xff] }
 0xaf4   :  { %v2224_v38 = vrot.slane %v2200_v27, %v12170_v14 }
 0xaf5   :  { %v11863_v11 = vpop.eup %11862  ;;  %v2312_v52 = vpop.permute.xlu0 %2311 }
 0xaf6   :  { %v2193_v16 = vpop.permute.xlu1 %2192  ;;  %v2182_v23 = vmul.f32 %v11863_v11, %v11857_v10  ;;  %v11865_v34 = vpop.eup %11864  ;;  %v2320_v57 = vrot.slane %v2312_v52, 2  ;;  %v365_v11 = vld [vmem:[#allocation3 + $0x38] sm:$0xff] }
 0xaf7   :  { %v2199_v58 = vrot.slane %v2193_v16, 2  ;;  %v2183_v40 = vmul.f32 %v11865_v34, %v12640_v9  ;;  %v11618_v21 = vpack.c.bf16 %v365_v11, %v364_v31  ;;  %v368_v31 = vld [vmem:[%s13945_s9] sm:$0xff]  ;;  %v12037_v11 = vmov 0  }
 0xaf8   :  { %10999 = vmatprep.mubr.msk.f32.mxu1 %vm744_vm8, %v2182_v23  ;;  %11804 = vset.pattern.permute.xlu0 %v12037_v11 }
 0xaf9   :  { %v2202_v15 = vcombine.low %v2198_v2, %v2199_v58  ;;  %11805 = vset.pattern.permute.xlu1 %v12037_v11  ;;  %v10376_v11 = vld [vmem:[%s13940_s4 + $0x98] sm:$0xff] }
 0xafa   :  { %v2310_v51 = vpop.permute.xlu1 %2309 }
 0xafb   :  { %v2216_v35 = vrot.slane %v2202_v15, %v12170_v14  ;;  %v2319_v62 = vrot.slane %v2310_v51, 2 }
 0xafd   :  { %v2217_v53 = vcombine.low %v2209_v29, %v2216_v35  ;;  %v2324_v33 = vcombine.low %v2319_v62, %v2320_v57 }
 0xafe   :  { %v2314_v50 = vpop.permute.xlu1 %2313 }
 0xaff   :  { %v11596_v39 = vpack.c.bf16 %v2224_v38, %v2217_v53  ;;  %v2321_v54 = vrot.slane %v2314_v50, 2  ;;  %v2332_v48 = vrot.slane %v2324_v33, %v12170_v14 }
 0xb01   :  { %11598 = vmatprep.subr.msk.bf16.mxu1 %vm12396_vm7, %v11596_v39 }
 0xb02   :  { %11601 = vmatpush3.bf16.msk.msra.mxu1 %vm12396_vm7, %v11596_v39 }
 0xb03   :  { %11608 = vmatprep.subr.bf16.mxu1 %v12025_v1 }
 0xb05   :  { %11000 = vmatmul.mubr.msk.f32.vlgmr.msra.gmra.mrb[18].mxu1 %vm744_vm8, %v2183_v40 }
 0xb06   :  { %11025 = vmatprep.mubr.msk.f32.mxu1 %vm12027_vm0, %v12026_v3  ;;  %11610 = vmatpush3.bf16.msra.mxu1 %v11609_v4 }
 0xb07   :  { %11611 = vmatprep.subr.bf16.mxu1 %v12025_v1 }
 0xb26   :  { %v2177_v26 = vpop.xlane.xlu0 %2176 }
 0xb27   :  { %11866 = vrcp.f32 %v2177_v26 }
 0xb2a   :  { %v2316_v5 = vpop.permute.xlu0 %2315 }
 0xb2b   :  { %v2322_v13 = vrot.slane %v2316_v5, 2 }
 0xb2d   :  { %v2325_v59 = vcombine.low %v2321_v54, %v2322_v13 }
 0xb2e   :  { %v2437_v58 = vpop.permute.xlu0 %2436 }
 0xb2f   :  { %v2174_v63 = vpop.xlane.xlu1 %2173  ;;  %v2339_v9 = vrot.slane %v2325_v59, %v12170_v14  ;;  %v2480_v15 = vsel %vm549_vm4, %v12464_v37, %v2437_v58 }
 0xb30   :  { %11868 = vrcp.f32 %v2174_v63 }
 0xb31   :  { %v2340_v18 = vcombine.low %v2332_v48, %v2339_v9  ;;  %v11867_v0 = vpop.eup %11866 }
 0xb32   :  { %v2185_v47 = vmul.f32 %v11867_v0, %v12661_v55  ;;  %v362_v55 = vld [vmem:[#allocation3 + $0x20] sm:$0xff] }
 0xb33   :  { %v2318_v10 = vpop.permute.xlu1 %2317  ;;  %v11615_v8 = vpack.c.bf16 %v363_v12, %v362_v55 }
 0xb34   :  { %v2323_v17 = vrot.slane %v2318_v10, 2 }
 0xb36   :  { %v2347_v44 = vrot.slane %v2323_v17, %v12170_v14 }
 0xb37   :  { %v2453_v27 = vpop.permute.xlu1 %2452 }
 0xb38   :  { %v11602_v46 = vpack.c.bf16 %v2347_v44, %v2340_v18 }
 0xb3a   :  { %v11869_v45 = vpop.eup %11868  ;;  %11604 = vmatprep.subr.msk.bf16.mxu0 %vm12396_vm7, %v11602_v46 }
 0xb3b   :  { %11607 = vmatpush3.bf16.msk.msra.mxu0 %vm12396_vm7, %v11602_v46  ;;  %v2184_v19 = vmul.f32 %v11869_v45, %v12665_v56  ;;  %v11612_v56 = vpack.c.bf16 %v361_v20, %v360_v6  ;;  %v2441_v37 = vpop.permute.xlu1 %2440 }
 0xb3c   :  { %11620 = vmatprep.subr.bf16.mxu0 %v12025_v1  ;;  %v2482_v62 = vsel %vm549_vm4, %v12469_v43, %v2441_v37 }
 0xb3d   :  { %11006 = vmatprep.mubr.msk.f32.mxu0 %vm744_vm8, %v2184_v19  ;;  %11613 = vmatpush3.bf16.msra.mxu1 %v11612_v56 }
 0xb3e   :  { %11007 = vmatmul.mubr.msk.f32.vlgmr.msra.gmra.mrb[22].mxu0 %vm744_vm8, %v2185_v47  ;;  %11614 = vmatprep.subr.bf16.mxu1 %v12025_v1 }
 0xb3f   :  { %11038 = vmatprep.mubr.msk.f32.mxu0 %vm12027_vm0, %v12026_v3  ;;  %v2439_v5 = vpop.permute.xlu1 %2438 }
 0xb40   :  { %v2481_v10 = vsel %vm549_vm4, %v12462_v36, %v2439_v5  ;;  %v306_v5 = vcombine.high %v12278_v25, %v12278_v25 }
 0xb41   :  { %11616 = vmatpush3.bf16.msra.mxu1 %v11615_v8 }
 0xb42   :  { %11617 = vmatprep.subr.bf16.mxu1 %v12025_v1 }
 0xb43   :  { %v2455_v54 = vpop.permute.xlu1 %2454 }
 0xb44   :  { %v2486_v48 = vsel %vm2484_vm10, %v2481_v10, %v2455_v54 }
 0xb45   :  { %11619 = vmatpush3.bf16.msra.mxu1 %v11618_v21  ;;  %v10365_v21 = vld [vmem:[%s13943_s7] ss:$0 sm:$0xff] }
 0xb46   :  { %11048 = vmatprep.subr.mxu1 %v12026_v3 }
 0xb47   :  { %v2443_v46 = vpop.permute.xlu1 %2442 }
 0xb48   :  { %v2483_v19 = vsel %vm549_vm4, %v12467_v42, %v2443_v46 }
 0xbd8   :  { %v11001_v16 = vpop.f32.mrb[18].mxu1 }
 0xbd9   :  { %v2300_v23 = vpop.f32.mrb[19].mxu1 }
 0xbda   :  { %2468 = vrot.lane.b32.xlu0 %v2300_v23, %s12031_s0 }
 0xbde   :  { %2456 = vrot.lane.b32.xlu0 %v12636_v7, %s12033_s1  ;;  %v2485_v7 = vsel %vm2484_vm10, %v2480_v15, %v2453_v27 }
 0xc11   :  { %v11008_v24 = vpop.f32.mrb[22].mxu0 }
 0xc12   :  { %2474 = vrot.lane.b32.xlu1 %v11008_v24, %s12031_s0  ;;  %v2423_v2 = vpop.f32.mrb[23].mxu0  ;;  %v296_v24 = vrot.slane %v12273_v22, %v12170_v14 }
 0xc13   :  { %2472 = vrot.lane.b32.xlu0 %v2423_v2, %s12031_s0 }
 0xc17   :  { %2470 = vrot.lane.b32.xlu0 %v11001_v16, %s12031_s0  ;;  %v289_v16 = vcombine.high %v12273_v22, %v12273_v22 }
 0xc19   :  { %v303_v27 = vrot.slane %v289_v16, %v12170_v14 }
 0xc1b   :  { %2458 = vrot.lane.b32.xlu0 %v12634_v41, %s12033_s1 }
 0xc1f   :  { %2747 = vperm.xlu0 %11804, %v368_v31   ;;  %v10374_v31 = vld [vmem:[%s13940_s4 + $0x88] sm:$0xff] }
 0xc4c   :  { %v2469_v29 = vpop.permute.xlu0 %2468 }
 0xc4d   :  { %v2490_v35 = vsel %vm2489_vm11, %v2485_v7, %v2469_v29  ;;  %v304_v29 = vcombine.high %v296_v24, %v296_v24 }
 0xc4e   :  { %v2498_v38 = vcombine.high %v2490_v35, %v2490_v35  ;;  %v2505_v53 = vrot.slane %v2490_v35, %v12170_v14 }
 0xc50   :  { %v2512_v39 = vrot.slane %v2498_v38, %v12170_v14  ;;  %v2513_v34 = vcombine.high %v2505_v53, %v2505_v53  ;;  %v2457_v13 = vpop.permute.xlu0 %2456 }
 0xc51   :  { %v2487_v57 = vsel %vm2484_vm10, %v2482_v62, %v2457_v13  ;;  %v313_v13 = vrot.slane %v12278_v25, %v12170_v14  ;;  %v329_v25 = vrot.slane %v12283_v28, %v12170_v14  ;;  %v367_v28 = vld [vmem:[%s13944_s8] sm:$0xff] }
 0xc52   :  { %v2514_v40 = vcombine.high %v2512_v39, %v2512_v39  ;;  %v2552_v41 = vcombine.low %v2505_v53, %v2513_v34 }
 0xc54   :  { %v2553_v52 = vcombine.low %v2512_v39, %v2514_v40  ;;  %v2560_v51 = vrot.slane %v2552_v41, %v12170_v14  ;;  %v305_v39 = vcombine.high %v303_v27, %v303_v27 }
 0xc56   :  { %v2567_v26 = vrot.slane %v2553_v52, %v12170_v14 }
 0xc58   :  { %v2568_v50 = vcombine.low %v2560_v51, %v2567_v26 }
 0xc5a   :  { %11026 = vmatmul.mubr.msk.f32.vlgmr.msra.gmra.mrb[20].mxu1 %vm380_vm3, %v2568_v50 }
 0xc5b   :  { %11028 = vmatprep.mubr.msk.f32.mxu1 %vm12027_vm0, %v12026_v3 }
 0xc84   :  { %v2475_v61 = vpop.permute.xlu1 %2474 }
 0xc85   :  { %v2473_v59 = vpop.permute.xlu0 %2472 }
 0xc86   :  { %v2492_v63 = vsel %vm2489_vm11, %v2487_v57, %v2473_v59  ;;  %v320_v59 = vrot.slane %v306_v5, %v12170_v14 }
 0xc87   :  { %v2522_v33 = vcombine.high %v2492_v63, %v2492_v63  ;;  %v2529_v9 = vrot.slane %v2492_v63, %v12170_v14 }
 0xc89   :  { %v2536_v17 = vrot.slane %v2522_v33, %v12170_v14  ;;  %v2537_v18 = vcombine.high %v2529_v9, %v2529_v9  ;;  %v2471_v44 = vpop.permute.xlu0 %2470 }
 0xc8a   :  { %v2491_v43 = vsel %vm2489_vm11, %v2486_v48, %v2471_v44 }
 0xc8b   :  { %v2570_v0 = vcombine.low %v2537_v18, %v2536_v17  ;;  %v2521_v45 = vrot.slane %v2491_v43, %v12170_v14  ;;  %v2538_v56 = vcombine.high %v2536_v17, %v2536_v17  ;;  %v322_v43 = vcombine.high %v320_v59, %v320_v59 }
 0xc8d   :  { %v2569_v47 = vcombine.low %v2521_v45, %v2529_v9  ;;  %v2459_v60 = vpop.permute.xlu0 %2458  ;;  %v2584_v4 = vrot.slane %v2570_v0, %v12170_v14  ;;  %v321_v9 = vcombine.high %v313_v13, %v313_v13 }
 0xc8e   :  { %v2488_v36 = vsel %vm2484_vm10, %v2483_v19, %v2459_v60 }
 0xc8f   :  { %v2577_v6 = vrot.slane %v2569_v47, %v12170_v14  ;;  %v2493_v20 = vsel %vm2489_vm11, %v2488_v36, %v2475_v61 }
 0xc90   :  { %v2545_v55 = vrot.slane %v2493_v20, %v12170_v14 }
 0xc91   :  { %v2585_v12 = vcombine.low %v2577_v6, %v2584_v4  ;;  %v330_v6 = vcombine.high %v329_v25, %v329_v25 }
 0xc92   :  { %v2586_v8 = vcombine.low %v2538_v56, %v2545_v55 }
 0xc93   :  { %11029 = vmatmul.mubr.msk.f32.gmra.mrb[22].mxu1 %vm380_vm3, %v2585_v12 }
 0xc94   :  { %11031 = vmatprep.mubr.msk.f32.mxu1 %vm12027_vm0, %v12026_v3  ;;  %v2593_v42 = vrot.slane %v2586_v8, %v12170_v14 }
 0xc97   :  { %11032 = vmatmul.mubr.msk.f32.gmra.mrb[24].mxu1 %vm380_vm3, %v2593_v42 }
 0xc98   :  { %11050 = vmatprep.mubr.msk.f32.mxu1 %vm12027_vm0, %v12026_v3 }
 0xd2d   :  { %v2666_v23 = vpop.f32.mrb[20].mxu1 }
 0xd2e   :  { %v2667_v2 = vadd.f32 %v10365_v21, %v2666_v23  ;;  %v11027_v58 = vpop.f32.mrb[21].mxu1  ;;  %v11628_v23 = vpack.c.bf16 %v10376_v11, %v10374_v31 }
 0xd30   :  { %v2683_v15 = vcombine.high %v2667_v2, %v2667_v2  ;;  %v2690_v7 = vrot.slane %v2667_v2, %v12170_v14  ;;  %v10375_v2 = vld [vmem:[%s13940_s4 + $0x90] sm:$0xff] }
 0xd32   :  { %v2697_v35 = vrot.slane %v2683_v15, %v12170_v14  ;;  %v2698_v38 = vcombine.high %v2690_v7, %v2690_v7  ;;  %v2735_v53 = vadd.f32 %v2690_v7, %v296_v24  ;;  %v10373_v24 = vld [vmem:[%s13940_s4 + $0x80] sm:$0xff]  ;;  %v10380_v15 = vld [vmem:[%s13940_s4 + $0xb8] sm:$0xff] }
 0xd33   :  { %v11630_v7 = vpack.c.bf16 %v10375_v2, %v10373_v24 }
 0xd34   :  { %v2699_v34 = vcombine.high %v2697_v35, %v2697_v35  ;;  %v2736_v40 = vadd.f32 %v2698_v38, %v304_v29  ;;  %v2737_v41 = vadd.f32 %v2697_v35, %v303_v27  ;;  %v10378_v27 = vld [vmem:[%s13940_s4 + $0xa8] sm:$0xff]  ;;  %v10377_v35 = vld [vmem:[%s13940_s4 + $0xa0] sm:$0xff]  ;;  %v10379_v38 = vld [vmem:[%s13940_s4 + $0xb0] sm:$0xff] }
 0xd35   :  { %v11632_v29 = vpack.c.bf16 %v10380_v15, %v10378_v27 }
 0xd36   :  { %v2738_v52 = vadd.f32 %v2699_v34, %v305_v39  ;;  %v2755_v51 = vcombine.low %v2735_v53, %v2736_v40  ;;  %v10382_v53 = vld [vmem:[%s13940_s4 + $0xc8] sm:$0xff]  ;;  %v11634_v39 = vpack.c.bf16 %v10379_v38, %v10377_v35  ;;  %v10381_v40 = vld [vmem:[%s13940_s4 + $0xc0] sm:$0xff] }
 0xd37   :  { %v11636_v34 = vpack.c.bf16 %v10384_v49, %v10382_v53 }
 0xd38   :  { %v2756_v26 = vcombine.low %v2737_v41, %v2738_v52  ;;  %v2763_v22 = vrot.slane %v2755_v51, %v12170_v14  ;;  %v10383_v41 = vld [vmem:[%s13940_s4 + $0xd0] sm:$0xff]  ;;  %v10386_v51 = vld [vmem:[%s13940_s4 + $0xe8] sm:$0xff] }
 0xd39   :  { %v11638_v52 = vpack.c.bf16 %v10383_v41, %v10381_v40 }
 0xd3a   :  { %v2770_v50 = vrot.slane %v2756_v26, %v12170_v14  ;;  %v10388_v26 = vld [vmem:[%s13940_s4 + $0xf8] sm:$0xff] }
 0xd3c   :  { %v2771_v37 = vcombine.low %v2763_v22, %v2770_v50  ;;  %v11640_v22 = vpack.c.bf16 %v10388_v26, %v10386_v51  ;;  %v10385_v50 = vld [vmem:[%s13940_s4 + $0xe0] sm:$0xff] }
 0xd66   :  { %v2671_v62 = vpop.f32.mrb[22].mxu1 }
 0xd67   :  { %v2672_v54 = vadd.f32 %v10365_v21, %v2671_v62  ;;  %v11030_v57 = vpop.f32.mrb[23].mxu1 }
 0xd69   :  { %v2700_v63 = vcombine.high %v2672_v54, %v2672_v54  ;;  %v2707_v33 = vrot.slane %v2672_v54, %v12170_v14 }
 0xd6a   :  { %v2676_v10 = vpop.f32.mrb[24].mxu1 }
 0xd6b   :  { %v2714_v48 = vrot.slane %v2700_v63, %v12170_v14  ;;  %v2715_v17 = vcombine.high %v2707_v33, %v2707_v33  ;;  %v2739_v18 = vadd.f32 %v2707_v33, %v313_v13  ;;  %v2677_v44 = vadd.f32 %v10365_v21, %v2676_v10  ;;  %v11033_v46 = vpop.f32.mrb[25].mxu1  ;;  %v2748_v13 = vpop.permute.xlu0 %2747 }
 0xd6d   :  { %v2716_v0 = vcombine.high %v2714_v48, %v2714_v48  ;;  %v2740_v45 = vadd.f32 %v2715_v17, %v321_v9  ;;  %v2741_v19 = vadd.f32 %v2714_v48, %v320_v59  ;;  %v2778_v47 = vrot.slane %v2739_v18, %v12170_v14  ;;  %v10389_v48 = vld [vmem:[%s13941_s5 + $0x2] sm:$0x3] }
 0xd6e   :  { %v2723_v60 = vrot.slane %v2677_v44, %v12170_v14  ;;  %v2995_v17 = vrot.slane %v10389_v48, %v12288_v30  ;;  %v2999_v18 = vrot.slane %v10389_v48, %v12294_v32 }
 0xd6f   :  { %v11621_v61 = vpack.c.bf16 %v2778_v47, %v2771_v37  ;;  %v2860_v36 = vcombine.low %v2740_v45, %v2741_v19  ;;  %v2742_v4 = vadd.f32 %v2716_v0, %v322_v43  ;;  %v10387_v37 = vld [vmem:[%s13940_s4 + $0xf0] sm:$0xff] }
 0xd70   :  { %v2724_v20 = vcombine.high %v2723_v60, %v2723_v60  ;;  %v2743_v56 = vadd.f32 %v2723_v60, %v329_v25  ;;  %v11642_v5 = vpack.c.bf16 %v10387_v37, %v10385_v50 }
 0xd71   :  { %11623 = vmatpush3.bf16.msk.msra.mxu0 %vm12396_vm7, %v11621_v61  ;;  %v2868_v8 = vrot.slane %v2860_v36, %v12170_v14 }
 0xd72   :  { %v2744_v55 = vadd.f32 %v2724_v20, %v330_v6  ;;  %v2861_v12 = vcombine.low %v2742_v4, %v2743_v56  ;;  %11624 = vmatprep.subr.bf16.mxu0 %v12025_v1 }
 0xd74   :  { %v2875_v42 = vrot.slane %v2861_v12, %v12170_v14  ;;  %11039 = vmatmul.mubr.msk.f32.vlgmr.msra.gmra.mrb[24].mxu0 %vm744_vm8, %v367_v28  ;;  %v2883_v16 = vrot.slane %v2744_v55, %v12170_v14 }
 0xd75   :  { %11045 = vmatprep.mubr.msk.f32.mxu0 %vm12027_vm0, %v12026_v3 }
 0xd76   :  { %v2876_v21 = vcombine.low %v2868_v8, %v2875_v42 }
 0xd78   :  { %v11625_v58 = vpack.c.bf16 %v2883_v16, %v2876_v21 }
 0xd7a   :  { %11627 = vmatpush3.bf16.msk.msra.mxu0 %vm12396_vm7, %v11625_v58  ;;  %vm8824_vm7 = vcmask 9216  }
 0xd7b   :  { %11629 = vmatprep.subr.bf16.mxu0 %v11628_v23 }
 0xd7d   :  { %11046 = vmatmul.mubr.msk.f32.vlgmr.msra.gmra.mrb[26].mxu0 %vm744_vm8, %v367_v28  ;;  %vm8848_vm8 = vcmask 15360  }
 0xd7e   :  { %11631 = vmatpush1.bf16.msra.mxu0 %v11630_v7  ;;  %3072 = vmatprep.mubr.f32.mxu0 %v12026_v3 }
 0xd7f   :  { %11633 = vmatprep.subr.bf16.mxu0 %v11632_v29 }
 0xd82   :  { %11635 = vmatpush1.bf16.msra.mxu0 %v11634_v39 }
 0xd83   :  { %11637 = vmatprep.subr.bf16.mxu0 %v11636_v34 }
 0xd86   :  { %11639 = vmatpush1.bf16.msra.mxu0 %v11638_v52 }
 0xd87   :  { %11641 = vmatprep.subr.bf16.mxu0 %v11640_v22 }
 0xd8a   :  { %11643 = vmatpush1.bf16.msra.mxu0 %v11642_v5 }
 0xd8b   :  { %11058 = vmatprep.subr.mxu0 %v12026_v3 }
 0xe47   :  { %v2851_v62 = vpop.f32.mrb[24].mxu0 }
 0xe48   :  { %v12849_v54 = vadd.f32 %v2851_v62, %v2748_v13  ;;  %v11040_v57 = vpop.f32.mrb[25].mxu0 }
 0xe4a   :  { %v2957_v59 = vmax.f32 %v12849_v54, 0.0  ;;  %v10423_v54 = vld [vmem:[%s13940_s4 + $0x108] sm:$0xff] }
 0xe4c   :  { %10391 = vmatmul.mubr.msk.f32.vlgmr.msra.gmra.mrb[28].mxu0 %vm380_vm3, %v2957_v59 }
 0xe4d   :  { %3078 = vmatprep.mubr.f32.mxu0 %v12026_v3 }
 0xe50   :  { %v2953_v63 = vpop.f32.mrb[26].mxu0 }
 0xe51   :  { %v12856_v33 = vadd.f32 %v2953_v63, %v2748_v13  ;;  %v11047_v9 = vpop.f32.mrb[27].mxu0 }
 0xe53   :  { %v2958_v10 = vmax.f32 %v12856_v33, 0.0 }
 0xe55   :  { %10392 = vmatmul.mubr.msk.f32.gmra.mrb[30].mxu0 %vm380_vm3, %v2958_v10 }
 0xe56   :  { %11060 = vmatprep.mubr.msk.f32.mxu0 %vm12027_vm0, %v12026_v3 }
 0xf1f   :  { %v3074_v44 = vpop.f32.mrb[28].mxu0 }
 0xf20   :  { %v12869_v46 = vadd.f32 %v3074_v44, %v2995_v17  ;;  %v3076_v43 = vpop.f32.mrb[29].mxu0 }
 0xf21   :  { %v12871_v25 = vadd.f32 %v3076_v43, %v2999_v18 }
 0xf22   :  { %3086 = vrot.lane.b32.xlu1 %v12869_v46, %s12029_s23 }
 0xf23   :  { %11059 = vmatpush3.msra.mxu0 %v12871_v25 }
 0xf24   :  { %11068 = vmatprep.subr.mxu0 %v12026_v3 }
 0xf28   :  { %v3080_v0 = vpop.f32.mrb[30].mxu0 }
 0xf29   :  { %v12877_v45 = vadd.f32 %v3080_v0, %v2995_v17  ;;  %v3082_v19 = vpop.f32.mrb[31].mxu0 }
 0xf2a   :  { %v12879_v47 = vadd.f32 %v3082_v19, %v2999_v18 }
 0xf2b   :  { %3163 = vrot.lane.b32.xlu1 %v12877_v45, %s12029_s23 }
 0xf94   :  { %v3087_v60 = vpop.permute.xlu1 %3086 }
 0xf95   :  { %11049 = vmatpush3.xpose.msk.msra.mxu1 %vm549_vm4, %v3087_v60 }
 0xf96   :  { %11053 = vmatprep.subr.mxu1 %v12026_v3 }
 0xf98   :  { %11051 = vmatmul.mubr.msk.f32.vlgmr.msra.gmra.mrb[26].mxu1 %vm549_vm4, %v12869_v46 }
 0xf99   :  { %11055 = vmatprep.mubr.msk.f32.mxu1 %vm12027_vm0, %v12026_v3 }
 0xf9d   :  { %v3164_v61 = vpop.permute.xlu1 %3163 }
 0xf9e   :  { %11054 = vmatpush3.xpose.msk.msra.mxu1 %vm549_vm4, %v3164_v61 }
 0xf9f   :  { %11063 = vmatprep.subr.mxu1 %v12026_v3 }
 0xfa1   :  { %11056 = vmatmul.mubr.msk.f32.vlgmr.msra.gmra.mrb[28].mxu1 %vm549_vm4, %v12877_v45 }
 0xfa2   :  { %11064 = vmatpush3.msra.mxu1 %v12879_v47  ;;  %11065 = vmatprep.mubr.msk.f32.mxu1 %vm12027_vm0, %v12026_v3 }
 0xfa3   :  { %11073 = vmatprep.subr.mxu1 %v12026_v3 }
0x106b   :  { %v3158_v36 = vpop.f32.mrb[26].mxu1 }
0x106c   :  { %v11052_v4 = vpop.f32.mrb[27].mxu1  ;;  %v3240_v6 = vsel %vm3239_vm12, %v3158_v36, -inf }
0x106d   :  { %3241 = vmax.xlane.f32.xlu0 %v3240_v6 }
0x1074   :  { %v3235_v20 = vpop.f32.mrb[28].mxu1 }
0x1075   :  { %v11057_v56 = vpop.f32.mrb[29].mxu1  ;;  %v3243_v28 = vsel %vm3239_vm12, %v3235_v20, -inf }
0x1076   :  { %3244 = vmax.xlane.f32.xlu1 %v3243_v28 }
0x1087   :  { %3410 = vrot.lane.b32.xlu1 %v12869_v46, %s12031_s0 }
0x108b   :  { %3408 = vrot.lane.b32.xlu1 %v12869_v46, %s12032_s19 }
0x108f   :  { %3486 = vrot.lane.b32.xlu1 %v12877_v45, %s12032_s19 }
0x10fa   :  { %v3242_v55 = vpop.xlane.xlu0 %3241 }
0x10fb   :  { %v3246_v12 = vsub.f32 %v3158_v36, %v3242_v55 }
0x10fd   :  { %v3248_v8 = vmul.f32 1.442695, %v3246_v12 }
0x10ff   :  { %11870 = vpow2.f32 %v3248_v8 }
0x1103   :  { %v3245_v42 = vpop.xlane.xlu1 %3244 }
0x1104   :  { %v3247_v31 = vsub.f32 %v3235_v20, %v3245_v42 }
0x1106   :  { %v3250_v11 = vmul.f32 1.442695, %v3247_v31 }
0x1107   :  { %v3411_v15 = vpop.permute.xlu1 %3410 }
0x1108   :  { %11872 = vpow2.f32 %v3250_v11 }
0x1109   :  { %v11871_v21 = vpop.eup %11870 }
0x110a   :  { %v3252_v16 = vsel %vm3239_vm12, %v11871_v21, 0.0 }
0x110b   :  { %3253 = vadd.xlane.f32.xlu0 %v3252_v16  ;;  %v3409_v29 = vpop.permute.xlu1 %3408 }
0x110f   :  { %v3487_v49 = vpop.permute.xlu1 %3486 }
0x1112   :  { %v11873_v23 = vpop.eup %11872 }
0x1113   :  { %v3255_v24 = vsel %vm3239_vm12, %v11873_v23, 0.0 }
0x1114   :  { %3256 = vadd.xlane.f32.xlu0 %v3255_v24 }
0x112a   :  { %3488 = vrot.lane.b32.xlu0 %v12877_v45, %s12031_s0 }
0x1198   :  { %v3254_v2 = vpop.xlane.xlu0 %3253 }
0x1199   :  { %11874 = vrcp.f32 %v3254_v2 }
0x11a1   :  { %v3257_v58 = vpop.xlane.xlu0 %3256 }
0x11a2   :  { %11876 = vrcp.f32 %v3257_v58 }
0x11a3   :  { %v11875_v27 = vpop.eup %11874 }
0x11a4   :  { %v3260_v7 = vmul.f32 %v11875_v27, %v11871_v21 }
0x11a5   :  { %v3489_v53 = vpop.permute.xlu0 %3488 }
0x11a6   :  { %11061 = vmatmul.mubr.msk.f32.vlgmr.msra.gmra.mrb[32].mxu0 %vm3239_vm12, %v3260_v7 }
0x11a7   :  { %11069 = vmatpush3.xpose.msk.msra.mxu0 %vm549_vm4, %v3411_v15  ;;  %11070 = vmatprep.mubr.msk.f32.mxu0 %vm12027_vm0, %v12026_v3 }
0x11a8   :  { %11078 = vmatprep.subr.mxu0 %v12026_v3 }
0x11aa   :  { %11071 = vmatmul.mubr.msk.f32.vlgmr.msra.gmra.mrb[34].mxu0 %vm549_vm4, %v3409_v29 }
0x11ab   :  { %11080 = vmatprep.mubr.msk.f32.mxu0 %vm12027_vm0, %v12026_v3 }
0x11ac   :  { %v11877_v35 = vpop.eup %11876 }
0x11ad   :  { %v3261_v38 = vmul.f32 %v11877_v35, %v11873_v23 }
0x11af   :  { %11066 = vmatmul.mubr.msk.f32.vlgmr.msra.gmra.mrb[30].mxu1 %vm3239_vm12, %v3261_v38 }
0x11b0   :  { %11074 = vmatpush3.xpose.msk.msra.mxu1 %vm549_vm4, %v3489_v53  ;;  %11075 = vmatprep.mubr.msk.f32.mxu1 %vm12027_vm0, %v12026_v3 }
0x11b1   :  { %11083 = vmatprep.subr.mxu1 %v12026_v3 }
0x11b3   :  { %11076 = vmatmul.mubr.msk.f32.vlgmr.msra.gmra.mrb[32].mxu1 %vm549_vm4, %v3487_v49 }
0x11b4   :  { %11085 = vmatprep.mubr.msk.f32.mxu1 %vm12027_vm0, %v12026_v3 }
0x1279   :  { %v12925_v39 = vpop.f32.mrb[32].mxu0 }
0x127a   :  { %v11062_v34 = vpop.f32.mrb[33].mxu0 }
0x127d   :  { %v3482_v40 = vpop.f32.mrb[34].mxu0 }
0x127e   :  { %v11072_v41 = vpop.f32.mrb[35].mxu0  ;;  %v3564_v52 = vsel %vm3239_vm12, %v3482_v40, -inf }
0x127f   :  { %3565 = vmax.xlane.f32.xlu0 %v3564_v52 }
0x1282   :  { %v12928_v51 = vpop.f32.mrb[30].mxu1 }
0x1283   :  { %v11067_v26 = vpop.f32.mrb[31].mxu1 }
0x1286   :  { %v3560_v22 = vpop.f32.mrb[32].mxu1 }
0x1287   :  { %v11077_v50 = vpop.f32.mrb[33].mxu1  ;;  %v3567_v37 = vsel %vm3239_vm12, %v3560_v22, -inf }
0x1288   :  { %3568 = vmax.xlane.f32.xlu1 %v3567_v37 }
0x1295   :  { %3664 = vrot.lane.b32.xlu0 %v12879_v47, %s12032_s19 }
0x1299   :  { %3587 = vrot.lane.b32.xlu1 %v12871_v25, %s12032_s19 }
0x129d   :  { %3742 = vrot.lane.b32.xlu1 %v12869_v46, %s12033_s1 }
0x12a1   :  { %3820 = vrot.lane.b32.xlu1 %v12877_v45, %s12033_s1 }
0x12a5   :  { %3818 = vrot.lane.b32.xlu1 %v12877_v45, %s12034_s20 }
0x130c   :  { %v3566_v5 = vpop.xlane.xlu0 %3565 }
0x130d   :  { %v3570_v13 = vsub.f32 %v3482_v40, %v3566_v5 }
0x130f   :  { %v3572_v62 = vmul.f32 1.442695, %v3570_v13 }
0x1310   :  { %v3665_v57 = vpop.permute.xlu0 %3664 }
0x1311   :  { %11878 = vpow2.f32 %v3572_v62  ;;  %11084 = vmatpush3.msra.mxu1 %v3665_v57 }
0x1312   :  { %11093 = vmatprep.subr.mxu1 %v12026_v3 }
0x1315   :  { %v3569_v63 = vpop.xlane.xlu1 %3568 }
0x1316   :  { %v3571_v9 = vsub.f32 %v3560_v22, %v3569_v63 }
0x1318   :  { %v3574_v48 = vmul.f32 1.442695, %v3571_v9 }
0x1319   :  { %v3588_v17 = vpop.permute.xlu1 %3587 }
0x131a   :  { %11880 = vpow2.f32 %v3574_v48  ;;  %11079 = vmatpush3.msra.mxu0 %v3588_v17 }
0x131b   :  { %v11879_v18 = vpop.eup %11878  ;;  %11088 = vmatprep.subr.mxu0 %v12026_v3 }
0x131c   :  { %v3576_v44 = vsel %vm3239_vm12, %v11879_v18, 0.0 }
0x131d   :  { %3577 = vadd.xlane.f32.xlu0 %v3576_v44  ;;  %v3743_v4 = vpop.permute.xlu1 %3742 }
0x1321   :  { %v3821_v56 = vpop.permute.xlu1 %3820 }
0x1324   :  { %v11881_v43 = vpop.eup %11880 }
0x1325   :  { %v3579_v0 = vsel %vm3239_vm12, %v11881_v43, 0.0  ;;  %v3819_v55 = vpop.permute.xlu1 %3818 }
0x1326   :  { %3580 = vadd.xlane.f32.xlu0 %v3579_v0 }
0x133c   :  { %3740 = vrot.lane.b32.xlu0 %v12869_v46, %s12034_s20 }
0x13aa   :  { %v3578_v19 = vpop.xlane.xlu0 %3577 }
0x13ab   :  { %11882 = vrcp.f32 %v3578_v19 }
0x13b3   :  { %v3581_v60 = vpop.xlane.xlu0 %3580 }
0x13b4   :  { %11884 = vrcp.f32 %v3581_v60 }
0x13b5   :  { %v11883_v61 = vpop.eup %11882 }
0x13b6   :  { %v3584_v36 = vmul.f32 %v11883_v61, %v11879_v18 }
0x13b7   :  { %v3741_v6 = vpop.permute.xlu0 %3740 }
0x13b8   :  { %11081 = vmatmul.mubr.msk.f32.vlgmr.msra.gmra.mrb[36].mxu0 %vm3239_vm12, %v3584_v36 }
0x13b9   :  { %11089 = vmatpush3.xpose.msk.msra.mxu0 %vm549_vm4, %v3743_v4  ;;  %11090 = vmatprep.mubr.msk.f32.mxu0 %vm12027_vm0, %v12026_v3 }
0x13ba   :  { %11098 = vmatprep.subr.mxu0 %v12026_v3 }
0x13bc   :  { %11091 = vmatmul.mubr.msk.f32.vlgmr.msra.gmra.mrb[38].mxu0 %vm549_vm4, %v3741_v6 }
0x13bd   :  { %11100 = vmatprep.mubr.msk.f32.mxu0 %vm12027_vm0, %v12026_v3 }
0x13be   :  { %v11885_v20 = vpop.eup %11884 }
0x13bf   :  { %v3585_v28 = vmul.f32 %v11885_v20, %v11881_v43 }
0x13c1   :  { %11086 = vmatmul.mubr.msk.f32.vlgmr.msra.gmra.mrb[34].mxu1 %vm3239_vm12, %v3585_v28 }
0x13c2   :  { %11094 = vmatpush3.xpose.msk.msra.mxu1 %vm549_vm4, %v3821_v56  ;;  %11095 = vmatprep.mubr.msk.f32.mxu1 %vm12027_vm0, %v12026_v3 }
0x13c3   :  { %11103 = vmatprep.subr.mxu1 %v12026_v3 }
0x13c5   :  { %11096 = vmatmul.mubr.msk.f32.vlgmr.msra.gmra.mrb[36].mxu1 %vm549_vm4, %v3819_v55 }
0x13c6   :  { %11105 = vmatprep.mubr.msk.f32.mxu1 %vm12027_vm0, %v12026_v3 }
0x148b   :  { %v12963_v12 = vpop.f32.mrb[36].mxu0 }
0x148c   :  { %v11082_v8 = vpop.f32.mrb[37].mxu0 }
0x148f   :  { %v3814_v42 = vpop.f32.mrb[38].mxu0 }
0x1490   :  { %v11092_v31 = vpop.f32.mrb[39].mxu0  ;;  %v3896_v11 = vsel %vm3239_vm12, %v3814_v42, -inf }
0x1491   :  { %3897 = vmax.xlane.f32.xlu0 %v3896_v11 }
0x1494   :  { %v12966_v21 = vpop.f32.mrb[34].mxu1 }
0x1495   :  { %v11087_v16 = vpop.f32.mrb[35].mxu1 }
0x1498   :  { %v3892_v23 = vpop.f32.mrb[36].mxu1 }
0x1499   :  { %v11097_v24 = vpop.f32.mrb[37].mxu1  ;;  %v3899_v2 = vsel %vm3239_vm12, %v3892_v23, -inf }
0x149a   :  { %3900 = vmax.xlane.f32.xlu1 %v3899_v2  ;;  %v2980_v24 = vld [vmem:[#allocation3 + $0x48] sm:$0xff]  ;;  %v2981_v2 = vld [vmem:[#allocation3 + $0x50] sm:$0xff] }
0x14a7   :  { %3994 = vrot.lane.b32.xlu0 %v12879_v47, %s12034_s20 }
0x14ab   :  { %3918 = vrot.lane.b32.xlu1 %v12871_v25, %s12034_s20 }
0x14af   :  { %4072 = vrot.lane.b32.xlu1 %v12869_v46, %s12035_s21 }
0x14b3   :  { %4150 = vrot.lane.b32.xlu1 %v12877_v45, %s12035_s21 }
0x14b7   :  { %4148 = vrot.lane.b32.xlu1 %v12877_v45, %s12036_s22 }
0x151e   :  { %v3898_v58 = vpop.xlane.xlu0 %3897 }
0x151f   :  { %v3902_v27 = vsub.f32 %v3814_v42, %v3898_v58 }
0x1521   :  { %v3904_v15 = vmul.f32 1.442695, %v3902_v27  ;;  %v2982_v27 = vld [vmem:[#allocation3 + $0x58] sm:$0xff] }
0x1522   :  { %v3995_v7 = vpop.permute.xlu0 %3994 }
0x1523   :  { %11886 = vpow2.f32 %v3904_v15  ;;  %11104 = vmatpush3.msra.mxu1 %v3995_v7  ;;  %v11648_v15 = vpack.c.bf16 %v2982_v27, %v2981_v2  ;;  %v2983_v7 = vld [vmem:[#allocation3 + $0x60] sm:$0xff] }
0x1524   :  { %11113 = vmatprep.subr.mxu1 %v12026_v3 }
0x1527   :  { %v3901_v29 = vpop.xlane.xlu1 %3900 }
0x1528   :  { %v3903_v35 = vsub.f32 %v3892_v23, %v3901_v29  ;;  %v2984_v29 = vld [vmem:[#allocation3 + $0x68] sm:$0xff] }
0x152a   :  { %v3906_v38 = vmul.f32 1.442695, %v3903_v35  ;;  %v11652_v35 = vpack.c.bf16 %v2984_v29, %v2983_v7 }
0x152b   :  { %v3919_v53 = vpop.permute.xlu1 %3918 }
0x152c   :  { %11888 = vpow2.f32 %v3906_v38  ;;  %11099 = vmatpush3.msra.mxu0 %v3919_v53  ;;  %v2985_v38 = vld [vmem:[#allocation3 + $0x70] sm:$0xff]  ;;  %v2986_v53 = vld [vmem:[#allocation3 + $0x78] sm:$0xff] }
0x152d   :  { %v11887_v49 = vpop.eup %11886  ;;  %11108 = vmatprep.subr.mxu0 %v12026_v3 }
0x152e   :  { %v3908_v34 = vsel %vm3239_vm12, %v11887_v49, 0.0 }
0x152f   :  { %3909 = vadd.xlane.f32.xlu0 %v3908_v34  ;;  %v4073_v50 = vpop.permute.xlu1 %4072 }
0x1533   :  { %v4151_v5 = vpop.permute.xlu1 %4150 }
0x1536   :  { %v11889_v45 = vpop.eup %11888 }
0x1537   :  { %v3911_v40 = vsel %vm3239_vm12, %v11889_v45, 0.0  ;;  %v4149_v62 = vpop.permute.xlu1 %4148 }
0x1538   :  { %3912 = vadd.xlane.f32.xlu0 %v3911_v40  ;;  %v2990_v40 = vld [vmem:[%s13947_s11] sm:$0x3f] }
0x154e   :  { %4070 = vrot.lane.b32.xlu0 %v12869_v46, %s12036_s22 }
0x15bc   :  { %v3910_v41 = vpop.xlane.xlu0 %3909 }
0x15bd   :  { %11890 = vrcp.f32 %v3910_v41 }
0x15c5   :  { %v3913_v52 = vpop.xlane.xlu0 %3912 }
0x15c6   :  { %11892 = vrcp.f32 %v3913_v52 }
0x15c7   :  { %v11891_v26 = vpop.eup %11890 }
0x15c8   :  { %v3916_v22 = vmul.f32 %v11891_v26, %v11887_v49  ;;  %v11656_v49 = vpack.c.bf16 %v2986_v53, %v2985_v38 }
0x15c9   :  { %v4071_v37 = vpop.permute.xlu0 %4070 }
0x15ca   :  { %11101 = vmatmul.mubr.msk.f32.vlgmr.msra.gmra.mrb[40].mxu0 %vm3239_vm12, %v3916_v22 }
0x15cb   :  { %11109 = vmatpush3.xpose.msk.msra.mxu0 %vm549_vm4, %v4073_v50  ;;  %11110 = vmatprep.mubr.msk.f32.mxu0 %vm12027_vm0, %v12026_v3 }
0x15cc   :  { %11118 = vmatprep.subr.mxu0 %v12026_v3 }
0x15ce   :  { %11111 = vmatmul.mubr.msk.f32.vlgmr.msra.gmra.mrb[42].mxu0 %vm549_vm4, %v4071_v37 }
0x15cf   :  { %11120 = vmatprep.mubr.msk.f32.mxu0 %vm12027_vm0, %v12026_v3 }
0x15d0   :  { %v11893_v46 = vpop.eup %11892 }
0x15d1   :  { %v3917_v13 = vmul.f32 %v11893_v46, %v11889_v45 }
0x15d3   :  { %11106 = vmatmul.mubr.msk.f32.vlgmr.msra.gmra.mrb[38].mxu1 %vm3239_vm12, %v3917_v13 }
0x15d4   :  { %11114 = vmatpush3.xpose.msk.msra.mxu1 %vm549_vm4, %v4151_v5  ;;  %11115 = vmatprep.mubr.msk.f32.mxu1 %vm12027_vm0, %v12026_v3 }
0x15d5   :  { %11123 = vmatprep.subr.mxu1 %v12026_v3 }
0x15d7   :  { %11116 = vmatmul.mubr.msk.f32.vlgmr.msra.gmra.mrb[40].mxu1 %vm549_vm4, %v4149_v62 }
0x15d8   :  { %11125 = vmatprep.mubr.msk.f32.mxu1 %vm12027_vm0, %v12026_v3 }
0x169d   :  { %v3990_v57 = vpop.f32.mrb[40].mxu0 }
0x169e   :  { %v11102_v63 = vpop.f32.mrb[41].mxu0 }
0x16a1   :  { %v4144_v9 = vpop.f32.mrb[42].mxu0 }
0x16a2   :  { %v11112_v48 = vpop.f32.mrb[43].mxu0  ;;  %v4226_v17 = vsel %vm3239_vm12, %v4144_v9, -inf }
0x16a3   :  { %4227 = vmax.xlane.f32.xlu0 %v4226_v17 }
0x16a6   :  { %v4066_v18 = vpop.f32.mrb[38].mxu1 }
0x16a7   :  { %v11107_v44 = vpop.f32.mrb[39].mxu1 }
0x16aa   :  { %v4222_v43 = vpop.f32.mrb[40].mxu1 }
0x16ab   :  { %v11117_v0 = vpop.f32.mrb[41].mxu1  ;;  %v4229_v19 = vsel %vm3239_vm12, %v4222_v43, -inf }
0x16ac   :  { %4230 = vmax.xlane.f32.xlu1 %v4229_v19  ;;  %v2989_v0 = vld [vmem:[%s13946_s10] sm:$0x3f] }
0x16bd   :  { %4248 = vrot.lane.b32.xlu1 %v12871_v25, %s12036_s22 }
0x16c1   :  { %4402 = vrot.lane.b32.xlu1 %v12963_v12, %s12035_s21 }
0x16c5   :  { %4404 = vrot.lane.b32.xlu1 %v12966_v21, %s12035_s21 }
0x16c9   :  { %4412 = vrot.lane.b32.xlu1 %v4066_v18, %s12033_s1 }
0x1730   :  { %v4228_v60 = vpop.xlane.xlu0 %4227 }
0x1731   :  { %v4232_v61 = vsub.f32 %v4144_v9, %v4228_v60  ;;  %v10424_v60 = vld [vmem:[%s13940_s4 + $0x110] sm:$0xff] }
0x1733   :  { %v4234_v36 = vmul.f32 1.442695, %v4232_v61 }
0x1735   :  { %11894 = vpow2.f32 %v4234_v36  ;;  %v10427_v36 = vld [vmem:[%s13940_s4 + $0x128] sm:$0xff] }
0x1739   :  { %v4231_v4 = vpop.xlane.xlu1 %4230 }
0x173a   :  { %v4233_v6 = vsub.f32 %v4222_v43, %v4231_v4  ;;  %v10429_v4 = vld [vmem:[%s13940_s4 + $0x138] sm:$0xff] }
0x173c   :  { %v4236_v20 = vmul.f32 1.442695, %v4233_v6  ;;  %v11664_v6 = vpack.c.bf16 %v10429_v4, %v10427_v36 }
0x173d   :  { %v4249_v56 = vpop.permute.xlu1 %4248 }
0x173e   :  { %11896 = vpow2.f32 %v4236_v20  ;;  %11119 = vmatpush3.msra.mxu0 %v4249_v56  ;;  %v10426_v20 = vld [vmem:[%s13940_s4 + $0x120] sm:$0xff]  ;;  %v10428_v56 = vld [vmem:[%s13940_s4 + $0x130] sm:$0xff] }
0x173f   :  { %v11895_v28 = vpop.eup %11894 }
0x1740   :  { %v4238_v25 = vsel %vm3239_vm12, %v11895_v28, 0.0 }
0x1741   :  { %4239 = vadd.xlane.f32.xlu0 %v4238_v25  ;;  %v4403_v26 = vpop.permute.xlu1 %4402  ;;  %v10431_v25 = vld [vmem:[%s13940_s4 + $0x148] sm:$0xff] }
0x1742   :  { %v4424_v50 = vsel %vm549_vm4, %v12925_v39, %v4403_v26  ;;  %v10417_v39 = vld [vmem:[%s13943_s7 + $0x1] ss:$0 sm:$0xff] }
0x1745   :  { %v4405_v37 = vpop.permute.xlu1 %4404 }
0x1748   :  { %v11897_v55 = vpop.eup %11896 }
0x1749   :  { %v4241_v12 = vsel %vm3239_vm12, %v11897_v55, 0.0  ;;  %v4413_v62 = vpop.permute.xlu1 %4412 }
0x174a   :  { %4242 = vadd.xlane.f32.xlu0 %v4241_v12 }
0x1760   :  { %4324 = vrot.lane.b32.xlu0 %v12879_v47, %s12036_s22  ;;  %v2979_v47 = vld [vmem:[#allocation3 + $0x40] sm:$0xff] }
0x1761   :  { %v11644_v58 = vpack.c.bf16 %v2980_v24, %v2979_v47  ;;  %v10436_v47 = vld [vmem:[%s13940_s4 + $0x170] sm:$0xff] }
0x1763   :  { %11645 = vmatprep.subr.bf16.mxu0 %v11644_v58 }
0x1764   :  { %4410 = vrot.lane.b32.xlu0 %v3990_v57, %s12033_s1  ;;  %v4425_v57 = vsel %vm549_vm4, %v12928_v51, %v4405_v37 }
0x1765   :  { %v4427_v63 = vsel %vm2484_vm10, %v4425_v57, %v4413_v62 }
0x17ce   :  { %v4240_v8 = vpop.xlane.xlu0 %4239 }
0x17cf   :  { %11898 = vrcp.f32 %v4240_v8  ;;  %v10430_v8 = vld [vmem:[%s13940_s4 + $0x140] sm:$0xff] }
0x17d7   :  { %v4243_v42 = vpop.xlane.xlu0 %4242 }
0x17d8   :  { %11900 = vrcp.f32 %v4243_v42  ;;  %v10432_v42 = vld [vmem:[%s13940_s4 + $0x150] sm:$0xff] }
0x17d9   :  { %v11899_v31 = vpop.eup %11898 }
0x17da   :  { %v4246_v11 = vmul.f32 %v11899_v31, %v11895_v28  ;;  %v11666_v28 = vpack.c.bf16 %v10428_v56, %v10426_v20  ;;  %v11670_v31 = vpack.c.bf16 %v10432_v42, %v10430_v8 }
0x17db   :  { %v4325_v21 = vpop.permute.xlu0 %4324 }
0x17dc   :  { %11124 = vmatpush3.msra.mxu1 %v4325_v21  ;;  %11121 = vmatmul.mubr.msk.f32.vlgmr.msra.gmra.mrb[44].mxu0 %vm3239_vm12, %v4246_v11  ;;  %v10435_v11 = vld [vmem:[%s13940_s4 + $0x168] sm:$0xff]  ;;  %v10437_v21 = vld [vmem:[%s13940_s4 + $0x178] sm:$0xff] }
0x17dd   :  { %11147 = vmatprep.subr.mxu1 %v12026_v3  ;;  %11647 = vmatpush3.bf16.msra.mxu0 %v11644_v58 }
0x17de   :  { %11649 = vmatprep.subr.bf16.mxu0 %v11648_v15 }
0x17df   :  { %v4411_v22 = vpop.permute.xlu0 %4410 }
0x17e0   :  { %v4426_v46 = vsel %vm2484_vm10, %v4424_v50, %v4411_v22 }
0x17e1   :  { %11651 = vmatpush3.bf16.msra.mxu0 %v11648_v15 }
0x17e2   :  { %v11901_v16 = vpop.eup %11900  ;;  %11653 = vmatprep.subr.bf16.mxu0 %v11652_v35 }
0x17e3   :  { %v4247_v23 = vmul.f32 %v11901_v16, %v11897_v55  ;;  %v10433_v55 = vld [vmem:[%s13940_s4 + $0x158] sm:$0xff]  ;;  %v11672_v16 = vpack.c.bf16 %v10437_v21, %v10435_v11 }
0x17e4   :  { %v11668_v12 = vpack.c.bf16 %v10433_v55, %v10431_v25 }
0x17e5   :  { %11126 = vmatmul.mubr.msk.f32.vlgmr.msra.gmra.mrb[42].mxu1 %vm3239_vm12, %v4247_v23  ;;  %11655 = vmatpush3.bf16.msra.mxu0 %v11652_v35  ;;  %v10434_v23 = vld [vmem:[%s13940_s4 + $0x160] sm:$0xff] }
0x17e6   :  { %11149 = vmatprep.mubr.msk.f32.mxu1 %vm12027_vm0, %v12026_v3  ;;  %11657 = vmatprep.subr.bf16.mxu0 %v11656_v49  ;;  %v11674_v24 = vpack.c.bf16 %v10436_v47, %v10434_v23 }
0x17e9   :  { %11659 = vmatpush3.bf16.msra.mxu0 %v11656_v49 }
0x17ea   :  { %11157 = vmatprep.subr.mxu0 %v12026_v3 }
0x18af   :  { %v4320_v34 = vpop.f32.mrb[44].mxu0 }
0x18b0   :  { %4418 = vrot.lane.b32.xlu0 %v4320_v34, %s12031_s0  ;;  %v11122_v45 = vpop.f32.mrb[45].mxu0 }
0x18b4   :  { %4521 = vperm.xlu0 %11804, %v2990_v40  }
0x18b8   :  { %v4396_v41 = vpop.f32.mrb[42].mxu1 }
0x18b9   :  { %4420 = vrot.lane.b32.xlu1 %v4396_v41, %s12031_s0  ;;  %v11127_v52 = vpop.f32.mrb[43].mxu1 }
0x1922   :  { %v4419_v5 = vpop.permute.xlu0 %4418 }
0x1923   :  { %v4428_v13 = vsel %vm2489_vm11, %v4426_v46, %v4419_v5 }
0x1924   :  { %11144 = vmatprep.mubr.msk.f32.mxu0 %vm380_vm3, %v4428_v13 }
0x192b   :  { %v4421_v9 = vpop.permute.xlu1 %4420 }
0x192c   :  { %v4429_v48 = vsel %vm2489_vm11, %v4427_v63, %v4421_v9  ;;  %v10438_v63 = vld [vmem:[%s13941_s5 + $0x4] sm:$0x3] }
0x192d   :  { %11145 = vmatmul.mubr.msk.f32.vlgmr.msra.gmra.mrb[46].mxu0 %vm380_vm3, %v4429_v48  ;;  %v4739_v9 = vrot.slane %v10438_v63, %v12288_v30  ;;  %v4743_v48 = vrot.slane %v10438_v63, %v12294_v32 }
0x192e   :  { %11159 = vmatprep.mubr.msk.f32.mxu0 %vm12027_vm0, %v12026_v3 }
0x1933   :  { %v4522_v2 = vpop.permute.xlu0 %4521 }
0x1a00   :  { %v11146_v17 = vpop.f32.mrb[46].mxu0 }
0x1a01   :  { %v4508_v18 = vpop.f32.mrb[47].mxu0  ;;  %v4514_v44 = vadd.f32 %v11146_v17, %v10417_v39 }
0x1a02   :  { %v4509_v43 = vadd.f32 %v10417_v39, %v4508_v18 }
0x1a03   :  { %v4518_v19 = vadd.f32 %v4514_v44, %v2958_v10  ;;  %v10422_v10 = vld [vmem:[%s13940_s4 + $0x100] sm:$0xff] }
0x1a04   :  { %v4517_v51 = vadd.f32 %v4509_v43, %v2957_v59  ;;  %v10425_v59 = vld [vmem:[%s13940_s4 + $0x118] sm:$0xff]  ;;  %v11662_v61 = vpack.c.bf16 %v10424_v60, %v10422_v10 }
0x1a05   :  { %v11660_v33 = vpack.c.bf16 %v10425_v59, %v10423_v54 }
0x1a06   :  { %11148 = vmatpush3.msra.mxu1 %v4517_v51 }
0x1a07   :  { %11150 = vmatmul.mubr.msk.f32.vlgmr.msra.gmra.mrb[44].mxu1 %vm3239_vm12, %v2989_v0  ;;  %11152 = vmatprep.subr.mxu1 %v12026_v3 }
0x1a08   :  { %11153 = vmatpush3.msra.mxu1 %v4518_v19  ;;  %11154 = vmatprep.mubr.msk.f32.mxu1 %vm12027_vm0, %v12026_v3 }
0x1a09   :  { %11661 = vmatprep.subr.bf16.mxu1 %v11660_v33 }
0x1a0b   :  { %11155 = vmatmul.mubr.msk.f32.vlgmr.msra.gmra.mrb[46].mxu1 %vm3239_vm12, %v2989_v0 }
0x1a0c   :  { %4839 = vmatprep.mubr.f32.mxu1 %v12026_v3  ;;  %11663 = vmatpush1.bf16.msra.mxu1 %v11662_v61 }
0x1a0d   :  { %11665 = vmatprep.subr.bf16.mxu1 %v11664_v6 }
0x1a10   :  { %11667 = vmatpush1.bf16.msra.mxu1 %v11666_v28 }
0x1a11   :  { %11669 = vmatprep.subr.bf16.mxu1 %v11668_v12 }
0x1a14   :  { %11671 = vmatpush1.bf16.msra.mxu1 %v11670_v31 }
0x1a15   :  { %11673 = vmatprep.subr.bf16.mxu1 %v11672_v16 }
0x1a18   :  { %11675 = vmatpush1.bf16.msra.mxu1 %v11674_v24 }
0x1a19   :  { %11177 = vmatprep.subr.mxu1 %v12026_v3 }
0x1ada   :  { %v4593_v58 = vpop.f32.mrb[44].mxu1 }
0x1adb   :  { %v4594_v27 = vadd.f32 %v4593_v58, %v4522_v2  ;;  %v11151_v15 = vpop.f32.mrb[45].mxu1 }
0x1add   :  { %v13103_v7 = vmax.f32 %v4594_v27, 0.0 }
0x1ade   :  { %v4663_v29 = vpop.f32.mrb[46].mxu1 }
0x1adf   :  { %v4703_v35 = vcombine.high %v13103_v7, %v13103_v7  ;;  %v4710_v38 = vrot.slane %v13103_v7, %v12170_v14  ;;  %v4664_v53 = vadd.f32 %v4663_v29, %v4522_v2  ;;  %v11156_v49 = vpop.f32.mrb[47].mxu1 }
0x1ae1   :  { %v4718_v34 = vcombine.high %v4710_v38, %v4710_v38  ;;  %v13109_v45 = vmax.f32 %v4664_v53, 0.0  ;;  %v4717_v40 = vrot.slane %v4703_v35, %v12170_v14 }
0x1ae3   :  { %v4746_v41 = vcombine.low %v4710_v38, %v4718_v34  ;;  %v4719_v52 = vcombine.high %v13109_v45, %v13109_v45  ;;  %v4726_v26 = vrot.slane %v13109_v45, %v12170_v14 }
0x1ae5   :  { %v4733_v22 = vrot.slane %v4719_v52, %v12170_v14  ;;  %v4734_v50 = vcombine.high %v4726_v26, %v4726_v26  ;;  %v4747_v37 = vcombine.low %v4717_v40, %v4726_v26  ;;  %v4754_v46 = vrot.slane %v4746_v41, %v12170_v14 }
0x1ae7   :  { %v4761_v5 = vrot.slane %v4747_v37, %v12170_v14  ;;  %v4763_v62 = vcombine.low %v4734_v50, %v4733_v22 }
0x1ae9   :  { %v4762_v13 = vcombine.low %v4754_v46, %v4761_v5  ;;  %v4770_v57 = vrot.slane %v4763_v62, %v12170_v14 }
0x1aeb   :  { %10440 = vmatmul.mubr.msk.f32.vlgmr.msra.gmra.mrb[48].mxu1 %vm380_vm3, %v4762_v13 }
0x1aec   :  { %4845 = vmatprep.mubr.f32.mxu1 %v12026_v3 }
0x1aef   :  { %10441 = vmatmul.mubr.msk.f32.gmra.mrb[50].mxu1 %vm380_vm3, %v4770_v57 }
0x1af0   :  { %11179 = vmatprep.mubr.msk.f32.mxu1 %vm12027_vm0, %v12026_v3 }
0x1bbe   :  { %v4841_v39 = vpop.f32.mrb[48].mxu1 }
0x1bbf   :  { %v4842_v17 = vadd.f32 %v4841_v39, %v4739_v9  ;;  %v4843_v18 = vpop.f32.mrb[49].mxu1 }
0x1bc0   :  { %v4844_v44 = vadd.f32 %v4843_v18, %v4743_v48 }
0x1bc2   :  { %v4856_v43 = vcombine.low %v4842_v17, %v4844_v44  ;;  %v4857_v51 = vcombine.high %v4842_v17, %v4844_v44  ;;  %v4847_v0 = vpop.f32.mrb[50].mxu1 }
0x1bc3   :  { %v4848_v19 = vadd.f32 %v4847_v0, %v4739_v9  ;;  %v4849_v54 = vpop.f32.mrb[51].mxu1 }
0x1bc4   :  { %v13131_v59 = vrot.slane %v4856_v43, %v12170_v14  ;;  %v13134_v33 = vrot.slane %v4857_v51, %v12170_v14  ;;  %v4850_v10 = vadd.f32 %v4849_v54, %v4743_v48 }
0x1bc6   :  { %v13138_v60 = vcombine.high %v13131_v59, %v13131_v59  ;;  %v4874_v61 = vcombine.low %v4848_v19, %v4850_v10  ;;  %v13142_v36 = vcombine.high %v13134_v33, %v13134_v33  ;;  %v4897_v56 = vrot.slane %v13134_v33, %v12170_v14 }
0x1bc7   :  { %v5090_v11 = vrot.slane %v13131_v59, 2  ;;  %v5092_v23 = vrot.slane %v13134_v33, 2 }
0x1bc8   :  { %v4883_v4 = vcombine.low %v13131_v59, %v13138_v60  ;;  %v13147_v6 = vrot.slane %v4874_v61, %v12170_v14  ;;  %v5091_v31 = vrot.slane %v13138_v60, 2  ;;  %v5186_v57 = vrot.slane %v13142_v36, 2 }
0x1bc9   :  { %v5107_v2 = vrot.slane %v5092_v23, %v12170_v14 }
0x1bca   :  { %v4890_v20 = vrot.slane %v4883_v4, %v12170_v14  ;;  %v13154_v28 = vcombine.high %v13147_v6, %v13147_v6  ;;  %v4975_v25 = vcombine.low %v13142_v36, %v13147_v6  ;;  %v5093_v21 = vcombine.low %v5090_v11, %v5091_v31 }
0x1bcb   :  { %v5187_v62 = vrot.slane %v13147_v6, 2 }
0x1bcc   :  { %v13158_v55 = vcombine.low %v4890_v20, %v4897_v56  ;;  %v4982_v12 = vrot.slane %v4975_v25, %v12170_v14  ;;  %v4989_v8 = vrot.slane %v13154_v28, %v12170_v14  ;;  %v5100_v47 = vrot.slane %v5093_v21, %v12170_v14 }
0x1bcd   :  { %v5188_v48 = vrot.slane %v13154_v28, 2  ;;  %v5189_v39 = vcombine.low %v5186_v57, %v5187_v62 }
0x1bce   :  { %v13163_v42 = vcombine.low %v4982_v12, %v4989_v8  ;;  %4899 = vrot.lane.b32.xlu1 %v13158_v55, %s12029_s23  ;;  %v5108_v58 = vcombine.low %v5100_v47, %v5107_v2 }
0x1bcf   :  { %v5196_v18 = vrot.slane %v5189_v39, %v12170_v14  ;;  %v5203_v44 = vrot.slane %v5188_v48, %v12170_v14 }
0x1bd0   :  { %4991 = vrot.lane.b32.xlu0 %v13163_v42, %s12029_s23 }
0x1bd1   :  { %v5204_v0 = vcombine.low %v5196_v18, %v5203_v44 }
0x1c40   :  { %v4900_v16 = vpop.permute.xlu1 %4899 }
0x1c41   :  { %11158 = vmatpush3.xpose.msk.msra.mxu0 %vm549_vm4, %v4900_v16 }
0x1c42   :  { %11162 = vmatprep.subr.mxu0 %v12026_v3  ;;  %v4992_v24 = vpop.permute.xlu0 %4991 }
0x1c44   :  { %11160 = vmatmul.mubr.msk.f32.vlgmr.msra.gmra.mrb[48].mxu0 %vm549_vm4, %v13158_v55 }
0x1c45   :  { %11163 = vmatpush3.xpose.msk.msra.mxu0 %vm549_vm4, %v4992_v24  ;;  %11164 = vmatprep.mubr.msk.f32.mxu0 %vm12027_vm0, %v12026_v3 }
0x1c46   :  { %11167 = vmatprep.subr.mxu0 %v12026_v3 }
0x1c48   :  { %11165 = vmatmul.mubr.msk.f32.vlgmr.msra.gmra.mrb[50].mxu0 %vm549_vm4, %v13163_v42 }
0x1c49   :  { %11168 = vmatpush3.msk.msra.mxu0 %vm5113_vm13, %v5108_v58  ;;  %11169 = vmatprep.mubr.msk.f32.mxu0 %vm12027_vm0, %v12026_v3 }
0x1c4a   :  { %11172 = vmatprep.subr.mxu0 %v12026_v3 }
0x1d17   :  { %v4971_v27 = vpop.f32.mrb[48].mxu0 }
0x1d18   :  { %v11161_v15 = vpop.f32.mrb[49].mxu0  ;;  %v5068_v29 = vsel %vm5067_vm14, %v4971_v27, -inf }
0x1d19   :  { %5069 = vmax.xlane.f32.xlu1 %v5068_v29 }
0x1d1b   :  { %v5063_v35 = vpop.f32.mrb[50].mxu0 }
0x1d1c   :  { %v11166_v38 = vpop.f32.mrb[51].mxu0  ;;  %v5071_v53 = vsel %vm5067_vm14, %v5063_v35, -inf }
0x1d1d   :  { %5072 = vmax.xlane.f32.xlu0 %v5071_v53 }
0x1d2a   :  { %5360 = vrot.lane.b32.xlu1 %v13163_v42, %s12031_s0 }
0x1da6   :  { %v5070_v49 = vpop.xlane.xlu1 %5069 }
0x1da7   :  { %v5074_v34 = vsub.f32 %v4971_v27, %v5070_v49 }
0x1da9   :  { %v5076_v40 = vmul.f32 1.442695, %v5074_v34 }
0x1daa   :  { %v5073_v41 = vpop.xlane.xlu0 %5072  ;;  %v5361_v5 = vpop.permute.xlu1 %5360 }
0x1dab   :  { %11902 = vpow2.f32 %v5076_v40  ;;  %v5075_v52 = vsub.f32 %v5063_v35, %v5073_v41 }
0x1dad   :  { %v5078_v26 = vmul.f32 1.442695, %v5075_v52 }
0x1daf   :  { %11904 = vpow2.f32 %v5078_v26 }
0x1db5   :  { %v11903_v22 = vpop.eup %11902 }
0x1db6   :  { %v5080_v50 = vsel %vm5067_vm14, %v11903_v22, 0.0 }
0x1db7   :  { %5081 = vadd.xlane.f32.xlu0 %v5080_v50 }
0x1db9   :  { %v11905_v37 = vpop.eup %11904 }
0x1dba   :  { %v5083_v46 = vsel %vm5067_vm14, %v11905_v37, 0.0 }
0x1dbb   :  { %5084 = vadd.xlane.f32.xlu1 %v5083_v46 }
0x1dcc   :  { %5280 = vrot.lane.b32.xlu1 %v13158_v55, %s12032_s19 }
0x1dcd   :  { %5282 = vrot.lane.b32.xlu0 %v13158_v55, %s12031_s0 }
0x1dd1   :  { %5358 = vrot.lane.b32.xlu0 %v13163_v42, %s12032_s19 }
0x1e44   :  { %v5082_v13 = vpop.xlane.xlu0 %5081 }
0x1e45   :  { %11906 = vrcp.f32 %v5082_v13 }
0x1e48   :  { %v5085_v63 = vpop.xlane.xlu1 %5084  ;;  %v5283_v9 = vpop.permute.xlu0 %5282 }
0x1e49   :  { %11908 = vrcp.f32 %v5085_v63  ;;  %11178 = vmatpush3.xpose.msk.msra.mxu1 %vm549_vm4, %v5283_v9 }
0x1e4a   :  { %11187 = vmatprep.subr.mxu1 %v12026_v3 }
0x1e4c   :  { %v5281_v17 = vpop.permute.xlu1 %5280  ;;  %v5359_v10 = vpop.permute.xlu0 %5358 }
0x1e4d   :  { %11180 = vmatmul.mubr.msk.f32.vlgmr.msra.gmra.mrb[52].mxu1 %vm549_vm4, %v5281_v17 }
0x1e4e   :  { %11189 = vmatprep.mubr.msk.f32.mxu1 %vm12027_vm0, %v12026_v3 }
0x1e4f   :  { %v11907_v43 = vpop.eup %11906 }
0x1e50   :  { %v5088_v51 = vmul.f32 %v11907_v43, %v11903_v22 }
0x1e52   :  { %11170 = vmatmul.mubr.msk.f32.vlgmr.msra.gmra.mrb[52].mxu0 %vm5109_vm15, %v5088_v51 }
0x1e53   :  { %v11909_v19 = vpop.eup %11908  ;;  %11173 = vmatpush3.msk.msra.mxu0 %vm5113_vm13, %v5204_v0  ;;  %11174 = vmatprep.mubr.msk.f32.mxu0 %vm12027_vm0, %v12026_v3 }
0x1e54   :  { %v5089_v54 = vmul.f32 %v11909_v19, %v11905_v37  ;;  %11182 = vmatprep.subr.mxu0 %v12026_v3 }
0x1e56   :  { %11175 = vmatmul.mubr.msk.f32.vlgmr.msra.gmra.mrb[54].mxu0 %vm5109_vm15, %v5089_v54 }
0x1e57   :  { %11184 = vmatprep.mubr.msk.f32.mxu0 %vm12027_vm0, %v12026_v3 }
0x1e5a   :  { %11183 = vmatpush3.xpose.msk.msra.mxu0 %vm549_vm4, %v5361_v5 }
0x1e5b   :  { %11192 = vmatprep.subr.mxu0 %v12026_v3 }
0x1e5d   :  { %11185 = vmatmul.mubr.msk.f32.vlgmr.msra.gmra.mrb[56].mxu0 %vm549_vm4, %v5359_v10 }
0x1e5e   :  { %11194 = vmatprep.mubr.msk.f32.mxu0 %vm12027_vm0, %v12026_v3 }
0x1f20   :  { %v5354_v61 = vpop.f32.mrb[52].mxu1 }
0x1f21   :  { %v11181_v4 = vpop.f32.mrb[53].mxu1  ;;  %v5436_v20 = vsel %vm5067_vm14, %v5354_v61, -inf }
0x1f22   :  { %5437 = vmax.xlane.f32.xlu1 %v5436_v20 }
0x1f25   :  { %v13224_v56 = vpop.f32.mrb[52].mxu0 }
0x1f26   :  { %v11171_v25 = vpop.f32.mrb[53].mxu0 }
0x1f29   :  { %v13226_v12 = vpop.f32.mrb[54].mxu0 }
0x1f2a   :  { %v11176_v8 = vpop.f32.mrb[55].mxu0 }
0x1f30   :  { %v5432_v31 = vpop.f32.mrb[56].mxu0 }
0x1f31   :  { %v11186_v11 = vpop.f32.mrb[57].mxu0  ;;  %v5439_v21 = vsel %vm5067_vm14, %v5432_v31, -inf }
0x1f32   :  { %5440 = vmax.xlane.f32.xlu0 %v5439_v21 }
0x1f33   :  { %5460 = vrot.lane.b32.xlu1 %v13138_v60, %s12032_s19 }
0x1f37   :  { %5462 = vrot.lane.b32.xlu1 %v13134_v33, %s12032_s19 }
0x1f3b   :  { %5560 = vrot.lane.b32.xlu1 %v13147_v6, %s12032_s19 }
0x1f3f   :  { %5660 = vrot.lane.b32.xlu1 %v13158_v55, %s12033_s1 }
0x1faf   :  { %v5438_v16 = vpop.xlane.xlu1 %5437 }
0x1fb0   :  { %v5442_v23 = vsub.f32 %v5354_v61, %v5438_v16 }
0x1fb2   :  { %v5444_v47 = vmul.f32 1.442695, %v5442_v23 }
0x1fb3   :  { %v5461_v38 = vpop.permute.xlu1 %5460 }
0x1fb4   :  { %11910 = vpow2.f32 %v5444_v47  ;;  %v5465_v40 = vrot.slane %v5461_v38, 2 }
0x1fb7   :  { %v5463_v53 = vpop.permute.xlu1 %5462 }
0x1fb8   :  { %v5466_v41 = vrot.slane %v5463_v53, 2 }
0x1fba   :  { %v5481_v37 = vrot.slane %v5466_v41, %v12170_v14 }
0x1fbb   :  { %v5561_v26 = vpop.permute.xlu1 %5560 }
0x1fbc   :  { %v5565_v46 = vrot.slane %v5561_v26, 2 }
0x1fbe   :  { %v11911_v24 = vpop.eup %11910 }
0x1fbf   :  { %v5441_v2 = vpop.xlane.xlu0 %5440  ;;  %v5448_v58 = vsel %vm5067_vm14, %v11911_v24, 0.0  ;;  %v5661_v9 = vpop.permute.xlu1 %5660 }
0x1fc0   :  { %v5443_v27 = vsub.f32 %v5432_v31, %v5441_v2  ;;  %5449 = vadd.xlane.f32.xlu0 %v5448_v58 }
0x1fc2   :  { %v5446_v15 = vmul.f32 1.442695, %v5443_v27 }
0x1fc4   :  { %11912 = vpow2.f32 %v5446_v15 }
0x1fce   :  { %v11913_v29 = vpop.eup %11912 }
0x1fcf   :  { %v5451_v35 = vsel %vm5067_vm14, %v11913_v29, 0.0 }
0x1fd0   :  { %5452 = vadd.xlane.f32.xlu1 %v5451_v35 }
0x1fd6   :  { %5458 = vrot.lane.b32.xlu0 %v13131_v59, %s12032_s19 }
0x1fda   :  { %5558 = vrot.lane.b32.xlu0 %v13142_v36, %s12032_s19 }
0x1fde   :  { %5562 = vrot.lane.b32.xlu0 %v13154_v28, %s12032_s19 }
0x1fe1   :  { %5658 = vrot.lane.b32.xlu1 %v13158_v55, %s12034_s20 }
0x1fe2   :  { %5738 = vrot.lane.b32.xlu0 %v13163_v42, %s12033_s1 }
0x1fe6   :  { %5736 = vrot.lane.b32.xlu0 %v13163_v42, %s12034_s20 }
0x204d   :  { %v5450_v49 = vpop.xlane.xlu0 %5449 }
0x204e   :  { %11914 = vrcp.f32 %v5450_v49 }
0x2051   :  { %v5459_v34 = vpop.permute.xlu0 %5458 }
0x2052   :  { %v5464_v52 = vrot.slane %v5459_v34, 2 }
0x2054   :  { %v5467_v22 = vcombine.low %v5464_v52, %v5465_v40 }
0x2055   :  { %v5559_v50 = vpop.permute.xlu0 %5558 }
0x2056   :  { %v5474_v5 = vrot.slane %v5467_v22, %v12170_v14  ;;  %v5564_v13 = vrot.slane %v5559_v50, 2 }
0x2058   :  { %v11915_v62 = vpop.eup %11914  ;;  %v5482_v57 = vcombine.low %v5474_v5, %v5481_v37  ;;  %v5567_v63 = vcombine.low %v5564_v13, %v5565_v46 }
0x2059   :  { %v5563_v48 = vpop.permute.xlu0 %5562  ;;  %v5456_v39 = vmul.f32 %v11915_v62, %v11911_v24 }
0x205a   :  { %v5566_v17 = vrot.slane %v5563_v48, 2  ;;  %11188 = vmatpush3.msk.msra.mxu1 %vm5113_vm13, %v5482_v57  ;;  %v5574_v18 = vrot.slane %v5567_v63, %v12170_v14 }
0x205b   :  { %11190 = vmatmul.mubr.msk.f32.vlgmr.msra.gmra.mrb[54].mxu1 %vm5109_vm15, %v5456_v39  ;;  %11197 = vmatprep.subr.mxu1 %v12026_v3 }
0x205c   :  { %v5581_v44 = vrot.slane %v5566_v17, %v12170_v14  ;;  %11199 = vmatprep.mubr.msk.f32.mxu1 %vm12027_vm0, %v12026_v3 }
0x205d   :  { %v5453_v43 = vpop.xlane.xlu1 %5452  ;;  %v5739_v54 = vpop.permute.xlu0 %5738 }
0x205e   :  { %v5582_v51 = vcombine.low %v5574_v18, %v5581_v44  ;;  %11916 = vrcp.f32 %v5453_v43 }
0x2060   :  { %11193 = vmatpush3.msk.msra.mxu0 %vm5113_vm13, %v5582_v51 }
0x2061   :  { %11198 = vmatpush3.xpose.msk.msra.mxu1 %vm549_vm4, %v5661_v9  ;;  %11202 = vmatprep.subr.mxu0 %v12026_v3  ;;  %v5659_v0 = vpop.permute.xlu1 %5658  ;;  %v5737_v61 = vpop.permute.xlu0 %5736 }
0x2062   :  { %11207 = vmatprep.subr.mxu1 %v12026_v3 }
0x2064   :  { %11200 = vmatmul.mubr.msk.f32.vlgmr.msra.gmra.mrb[56].mxu1 %vm549_vm4, %v5659_v0 }
0x2065   :  { %11209 = vmatprep.mubr.msk.f32.mxu1 %vm12027_vm0, %v12026_v3 }
0x2068   :  { %v11917_v19 = vpop.eup %11916 }
0x2069   :  { %v5457_v10 = vmul.f32 %v11917_v19, %v11913_v29 }
0x206b   :  { %11195 = vmatmul.mubr.msk.f32.vlgmr.msra.gmra.mrb[58].mxu0 %vm5109_vm15, %v5457_v10 }
0x206c   :  { %11203 = vmatpush3.xpose.msk.msra.mxu0 %vm549_vm4, %v5739_v54  ;;  %11204 = vmatprep.mubr.msk.f32.mxu0 %vm12027_vm0, %v12026_v3 }
0x206d   :  { %11212 = vmatprep.subr.mxu0 %v12026_v3 }
0x206f   :  { %11205 = vmatmul.mubr.msk.f32.vlgmr.msra.gmra.mrb[60].mxu0 %vm549_vm4, %v5737_v61 }
0x2070   :  { %11214 = vmatprep.mubr.msk.f32.mxu0 %vm12027_vm0, %v12026_v3 }
0x212e   :  { %v13275_v4 = vpop.f32.mrb[54].mxu1 }
0x212f   :  { %v11191_v20 = vpop.f32.mrb[55].mxu1 }
0x2137   :  { %v5732_v25 = vpop.f32.mrb[56].mxu1 }
0x2138   :  { %v11201_v8 = vpop.f32.mrb[57].mxu1  ;;  %v5814_v31 = vsel %vm5067_vm14, %v5732_v25, -inf }
0x2139   :  { %5815 = vmax.xlane.f32.xlu1 %v5814_v31 }
0x213e   :  { %v13278_v11 = vpop.f32.mrb[58].mxu0 }
0x213f   :  { %v11196_v21 = vpop.f32.mrb[59].mxu0 }
0x2142   :  { %v5810_v16 = vpop.f32.mrb[60].mxu0 }
0x2143   :  { %v11206_v23 = vpop.f32.mrb[61].mxu0  ;;  %v5817_v47 = vsel %vm5067_vm14, %v5810_v16, -inf }
0x2144   :  { %5818 = vmax.xlane.f32.xlu0 %v5817_v47 }
0x214a   :  { %5838 = vrot.lane.b32.xlu1 %v13138_v60, %s12034_s20 }
0x214e   :  { %5840 = vrot.lane.b32.xlu1 %v13134_v33, %s12034_s20 }
0x2152   :  { %5938 = vrot.lane.b32.xlu1 %v13147_v6, %s12034_s20 }
0x2156   :  { %6038 = vrot.lane.b32.xlu1 %v13158_v55, %s12035_s21 }
0x21c6   :  { %v5816_v24 = vpop.xlane.xlu1 %5815 }
0x21c7   :  { %v5820_v2 = vsub.f32 %v5732_v25, %v5816_v24 }
0x21c9   :  { %v5822_v58 = vmul.f32 1.442695, %v5820_v2 }
0x21ca   :  { %v5839_v34 = vpop.permute.xlu1 %5838 }
0x21cb   :  { %11918 = vpow2.f32 %v5822_v58  ;;  %v5843_v22 = vrot.slane %v5839_v34, 2 }
0x21ce   :  { %v5841_v40 = vpop.permute.xlu1 %5840 }
0x21cf   :  { %v5844_v50 = vrot.slane %v5841_v40, 2 }
0x21d1   :  { %v5819_v27 = vpop.xlane.xlu0 %5818  ;;  %v5859_v13 = vrot.slane %v5844_v50, %v12170_v14 }
0x21d2   :  { %v5821_v15 = vsub.f32 %v5810_v16, %v5819_v27  ;;  %v5939_v52 = vpop.permute.xlu1 %5938 }
0x21d3   :  { %v5943_v62 = vrot.slane %v5939_v52, 2 }
0x21d4   :  { %v5824_v29 = vmul.f32 1.442695, %v5821_v15 }
0x21d5   :  { %v11919_v35 = vpop.eup %11918 }
0x21d6   :  { %11920 = vpow2.f32 %v5824_v29  ;;  %v5826_v38 = vsel %vm5067_vm14, %v11919_v35, 0.0  ;;  %v6039_v46 = vpop.permute.xlu1 %6038 }
0x21d7   :  { %5827 = vadd.xlane.f32.xlu0 %v5826_v38 }
0x21e0   :  { %v11921_v53 = vpop.eup %11920 }
0x21e1   :  { %v5829_v49 = vsel %vm5067_vm14, %v11921_v53, 0.0 }
0x21e2   :  { %5830 = vadd.xlane.f32.xlu1 %v5829_v49 }
0x21ed   :  { %5836 = vrot.lane.b32.xlu0 %v13131_v59, %s12034_s20 }
0x21f1   :  { %5936 = vrot.lane.b32.xlu0 %v13142_v36, %s12034_s20 }
0x21f3   :  { %6036 = vrot.lane.b32.xlu1 %v13158_v55, %s12036_s22 }
0x21f5   :  { %5940 = vrot.lane.b32.xlu0 %v13154_v28, %s12034_s20 }
0x21f9   :  { %6116 = vrot.lane.b32.xlu0 %v13163_v42, %s12035_s21 }
0x21fd   :  { %6114 = vrot.lane.b32.xlu0 %v13163_v42, %s12036_s22 }
0x2264   :  { %v5828_v41 = vpop.xlane.xlu0 %5827 }
0x2265   :  { %11922 = vrcp.f32 %v5828_v41 }
0x2268   :  { %v5837_v26 = vpop.permute.xlu0 %5836 }
0x2269   :  { %v5842_v37 = vrot.slane %v5837_v26, 2 }
0x226b   :  { %v5845_v55 = vcombine.low %v5842_v37, %v5843_v22 }
0x226c   :  { %v5937_v5 = vpop.permute.xlu0 %5936 }
0x226d   :  { %v5852_v57 = vrot.slane %v5845_v55, %v12170_v14  ;;  %v5942_v63 = vrot.slane %v5937_v5, 2 }
0x226f   :  { %v11923_v9 = vpop.eup %11922  ;;  %v5860_v42 = vcombine.low %v5852_v57, %v5859_v13  ;;  %v5945_v48 = vcombine.low %v5942_v63, %v5943_v62  ;;  %v5831_v39 = vpop.xlane.xlu1 %5830 }
0x2270   :  { %11924 = vrcp.f32 %v5831_v39  ;;  %v5941_v17 = vpop.permute.xlu0 %5940  ;;  %v5834_v18 = vmul.f32 %v11923_v9, %v11919_v35 }
0x2271   :  { %v5944_v44 = vrot.slane %v5941_v17, 2  ;;  %11208 = vmatpush3.msk.msra.mxu1 %vm5113_vm13, %v5860_v42  ;;  %v5952_v43 = vrot.slane %v5945_v48, %v12170_v14 }
0x2272   :  { %11210 = vmatmul.mubr.msk.f32.vlgmr.msra.gmra.mrb[58].mxu1 %vm5109_vm15, %v5834_v18  ;;  %11217 = vmatprep.subr.mxu1 %v12026_v3 }
0x2273   :  { %v5959_v51 = vrot.slane %v5944_v44, %v12170_v14  ;;  %11219 = vmatprep.mubr.msk.f32.mxu1 %vm12027_vm0, %v12026_v3  ;;  %v6037_v54 = vpop.permute.xlu1 %6036  ;;  %v4689_v44 = vld [vmem:[#allocation3 + $0x80] sm:$0xff] }
0x2274   :  { %v6117_v10 = vpop.permute.xlu0 %6116 }
0x2275   :  { %v5960_v0 = vcombine.low %v5952_v43, %v5959_v51  ;;  %v4690_v43 = vld [vmem:[#allocation3 + $0x88] sm:$0xff] }
0x2276   :  { %v11676_v51 = vpack.c.bf16 %v4690_v43, %v4689_v44 }
0x2277   :  { %11213 = vmatpush3.msk.msra.mxu0 %vm5113_vm13, %v5960_v0  ;;  %v4691_v0 = vld [vmem:[#allocation3 + $0x90] sm:$0xff] }
0x2278   :  { %11218 = vmatpush3.xpose.msk.msra.mxu1 %vm549_vm4, %v6039_v46  ;;  %11222 = vmatprep.subr.mxu0 %v12026_v3  ;;  %v6115_v20 = vpop.permute.xlu0 %6114 }
0x2279   :  { %11227 = vmatprep.subr.mxu1 %v12026_v3 }
0x227a   :  { %v11925_v19 = vpop.eup %11924 }
0x227b   :  { %11220 = vmatmul.mubr.msk.f32.vlgmr.msra.gmra.mrb[60].mxu1 %vm549_vm4, %v6037_v54  ;;  %v5835_v61 = vmul.f32 %v11925_v19, %v11921_v53  ;;  %v4692_v19 = vld [vmem:[#allocation3 + $0x98] sm:$0xff] }
0x227c   :  { %11229 = vmatprep.mubr.msk.f32.mxu1 %vm12027_vm0, %v12026_v3  ;;  %v11680_v54 = vpack.c.bf16 %v4692_v19, %v4691_v0 }
0x227d   :  { %11215 = vmatmul.mubr.msk.f32.vlgmr.msra.gmra.mrb[62].mxu0 %vm5109_vm15, %v5835_v61  ;;  %v4694_v61 = vld [vmem:[#allocation3 + $0xa8] sm:$0xff] }
0x227e   :  { %11223 = vmatpush3.xpose.msk.msra.mxu0 %vm549_vm4, %v6117_v10  ;;  %11224 = vmatprep.mubr.msk.f32.mxu0 %vm12027_vm0, %v12026_v3  ;;  %v4693_v10 = vld [vmem:[#allocation3 + $0xa0] sm:$0xff] }
0x227f   :  { %11232 = vmatprep.subr.mxu0 %v12026_v3 }
0x2281   :  { %11225 = vmatmul.mubr.msk.f32.vlgmr.msra.gmra.mrb[64].mxu0 %vm549_vm4, %v6115_v20  ;;  %v11684_v20 = vpack.c.bf16 %v4694_v61, %v4693_v10  ;;  %v10482_v10 = vld [vmem:[%s13940_s4 + $0x188] sm:$0xff]  ;;  %v10484_v61 = vld [vmem:[%s13940_s4 + $0x198] sm:$0xff] }
0x2282   :  { %11234 = vmatprep.mubr.msk.f32.mxu0 %vm12027_vm0, %v12026_v3 }
0x2345   :  { %v5932_v25 = vpop.f32.mrb[58].mxu1 }
0x2346   :  { %v11211_v8 = vpop.f32.mrb[59].mxu1 }
0x2347   :  { %v4696_v8 = vld [vmem:[#allocation3 + $0xb8] sm:$0xff] }
0x234e   :  { %v6110_v31 = vpop.f32.mrb[60].mxu1 }
0x234f   :  { %v11221_v21 = vpop.f32.mrb[61].mxu1  ;;  %v6192_v16 = vsel %vm5067_vm14, %v6110_v31, -inf }
0x2350   :  { %v6032_v23 = vpop.f32.mrb[62].mxu0  ;;  %6193 = vmax.xlane.f32.xlu1 %v6192_v16 }
0x2351   :  { %v11216_v47 = vpop.f32.mrb[63].mxu0 }
0x2354   :  { %v6188_v24 = vpop.f32.mrb[64].mxu0 }
0x2355   :  { %v11226_v2 = vpop.f32.mrb[65].mxu0  ;;  %v6195_v58 = vsel %vm5067_vm14, %v6188_v24, -inf }
0x2356   :  { %6196 = vmax.xlane.f32.xlu0 %v6195_v58 }
0x2361   :  { %6216 = vrot.lane.b32.xlu1 %v13138_v60, %s12036_s22 }
0x2365   :  { %6218 = vrot.lane.b32.xlu1 %v13134_v33, %s12036_s22 }
0x23dd   :  { %v6194_v27 = vpop.xlane.xlu1 %6193 }
0x23de   :  { %v6198_v15 = vsub.f32 %v6110_v31, %v6194_v27 }
0x23e0   :  { %v6200_v29 = vmul.f32 1.442695, %v6198_v15 }
0x23e2   :  { %11926 = vpow2.f32 %v6200_v29 }
0x23e3   :  { %v6197_v35 = vpop.xlane.xlu0 %6196 }
0x23e4   :  { %v6199_v38 = vsub.f32 %v6188_v24, %v6197_v35 }
0x23e6   :  { %v6202_v53 = vmul.f32 1.442695, %v6199_v38 }
0x23e8   :  { %11928 = vpow2.f32 %v6202_v53 }
0x23ec   :  { %v11927_v49 = vpop.eup %11926 }
0x23ed   :  { %v6204_v34 = vsel %vm5067_vm14, %v11927_v49, 0.0 }
0x23ee   :  { %6205 = vadd.xlane.f32.xlu0 %v6204_v34 }
0x23f2   :  { %v11929_v40 = vpop.eup %11928 }
0x23f3   :  { %v6207_v41 = vsel %vm5067_vm14, %v11929_v40, 0.0 }
0x23f4   :  { %6208 = vadd.xlane.f32.xlu1 %v6207_v41 }
0x2404   :  { %6214 = vrot.lane.b32.xlu0 %v13131_v59, %s12036_s22  ;;  %v6217_v59 = vpop.permute.xlu1 %6216 }
0x2405   :  { %6316 = vrot.lane.b32.xlu1 %v13147_v6, %s12036_s22  ;;  %v6221_v52 = vrot.slane %v6217_v59, 2 }
0x2408   :  { %6314 = vrot.lane.b32.xlu0 %v13142_v36, %s12036_s22  ;;  %v6219_v60 = vpop.permute.xlu1 %6218 }
0x2409   :  { %6416 = vrot.lane.b32.xlu1 %v13275_v4, %s12035_s21  ;;  %v6222_v36 = vrot.slane %v6219_v60, 2 }
0x240c   :  { %6318 = vrot.lane.b32.xlu0 %v13154_v28, %s12036_s22  ;;  %v6237_v28 = vrot.slane %v6222_v36, %v12170_v14 }
0x240d   :  { %6418 = vrot.lane.b32.xlu1 %v13278_v11, %s12035_s21 }
0x2410   :  { %6424 = vrot.lane.b32.xlu0 %v5932_v25, %s12033_s1  ;;  %v4695_v25 = vld [vmem:[#allocation3 + $0xb0] sm:$0xff] }
0x2411   :  { %6426 = vrot.lane.b32.xlu1 %v6032_v23, %s12033_s1  ;;  %v11688_v21 = vpack.c.bf16 %v4696_v8, %v4695_v25  ;;  %v4699_v8 = vld [vmem:[%s13948_s12] sm:$0xf] }
0x247b   :  { %v6206_v33 = vpop.xlane.xlu0 %6205 }
0x247c   :  { %11930 = vrcp.f32 %v6206_v33 }
0x247f   :  { %v6215_v6 = vpop.permute.xlu0 %6214 }
0x2480   :  { %v6220_v26 = vrot.slane %v6215_v6, 2 }
0x2481   :  { %v6209_v22 = vpop.xlane.xlu1 %6208 }
0x2482   :  { %v6223_v4 = vcombine.low %v6220_v26, %v6221_v52  ;;  %11932 = vrcp.f32 %v6209_v22 }
0x2483   :  { %v6315_v50 = vpop.permute.xlu0 %6314 }
0x2484   :  { %v6230_v11 = vrot.slane %v6223_v4, %v12170_v14  ;;  %v6320_v5 = vrot.slane %v6315_v50, 2 }
0x2485   :  { %v6317_v37 = vpop.permute.xlu1 %6316 }
0x2486   :  { %v11931_v46 = vpop.eup %11930  ;;  %v6238_v55 = vcombine.low %v6230_v11, %v6237_v28  ;;  %v6321_v13 = vrot.slane %v6317_v37, 2  ;;  %v4700_v37 = vld [vmem:[%s13949_s13] sm:$0xf] }
0x2487   :  { %v6212_v62 = vmul.f32 %v11931_v46, %v11927_v49  ;;  %v6319_v57 = vpop.permute.xlu0 %6318  ;;  %6653 = vperm.xlu1 %11805, %v4700_v37   ;;  %v10474_v46 = vld [vmem:[%s13943_s7 + $0x2] ss:$0 sm:$0xff] }
0x2488   :  { %v6323_v63 = vcombine.low %v6320_v5, %v6321_v13  ;;  %v6322_v9 = vrot.slane %v6319_v57, 2  ;;  %11228 = vmatpush3.msk.msra.mxu1 %vm5113_vm13, %v6238_v55 }
0x2489   :  { %11230 = vmatmul.mubr.msk.f32.vlgmr.msra.gmra.mrb[62].mxu1 %vm5109_vm15, %v6212_v62  ;;  %11677 = vmatprep.subr.bf16.mxu1 %v11676_v51  ;;  %v6417_v24 = vpop.permute.xlu1 %6416 }
0x248a   :  { %v6330_v42 = vrot.slane %v6323_v63, %v12170_v14  ;;  %v6337_v48 = vrot.slane %v6322_v9, %v12170_v14  ;;  %11679 = vmatpush3.bf16.msra.mxu1 %v11676_v51  ;;  %v6438_v58 = vsel %vm549_vm4, %v13224_v56, %v6417_v24 }
0x248b   :  { %11681 = vmatprep.subr.bf16.mxu1 %v11680_v54  ;;  %v6425_v2 = vpop.permute.xlu0 %6424 }
0x248c   :  { %v11933_v39 = vpop.eup %11932  ;;  %v6338_v17 = vcombine.low %v6330_v42, %v6337_v48  ;;  %v6440_v15 = vsel %vm2484_vm10, %v6438_v58, %v6425_v2  ;;  %v10485_v2 = vld [vmem:[%s13940_s4 + $0x1a0] sm:$0xff]  ;;  %v10487_v58 = vld [vmem:[%s13940_s4 + $0x1b0] sm:$0xff] }
0x248d   :  { %v6213_v18 = vmul.f32 %v11933_v39, %v11929_v40  ;;  %v6419_v27 = vpop.permute.xlu1 %6418 }
0x248e   :  { %11233 = vmatpush3.msk.msra.mxu0 %vm5113_vm13, %v6338_v17  ;;  %11683 = vmatpush3.bf16.msra.mxu1 %v11680_v54  ;;  %v6439_v40 = vsel %vm549_vm4, %v13226_v12, %v6419_v27  ;;  %v11698_v27 = vpack.c.bf16 %v10487_v58, %v10485_v2 }
0x248f   :  { %11235 = vmatmul.mubr.msk.f32.vlgmr.msra.gmra.mrb[66].mxu0 %vm5109_vm15, %v6213_v18  ;;  %11256 = vmatprep.subr.mxu0 %v12026_v3 }
0x2490   :  { %11258 = vmatprep.mubr.msk.f32.mxu0 %vm12027_vm0, %v12026_v3  ;;  %11685 = vmatprep.subr.bf16.mxu1 %v11684_v20 }
0x2491   :  { %v6427_v53 = vpop.permute.xlu1 %6426 }
0x2492   :  { %11687 = vmatpush3.bf16.msra.mxu1 %v11684_v20  ;;  %v6441_v41 = vsel %vm2484_vm10, %v6439_v40, %v6427_v53  ;;  %v10491_v53 = vld [vmem:[%s13940_s4 + $0x1d0] sm:$0xff]  ;;  %v10496_v40 = vld [vmem:[%s13940_s4 + $0x1f8] sm:$0xff] }
0x2493   :  { %11689 = vmatprep.subr.bf16.mxu1 %v11688_v21 }
0x2496   :  { %11691 = vmatpush3.bf16.msra.mxu1 %v11688_v21  ;;  %v10481_v21 = vld [vmem:[%s13940_s4 + $0x180] sm:$0xff] }
0x2497   :  { %11266 = vmatprep.subr.mxu1 %v12026_v3 }
0x255c   :  { %v6310_v31 = vpop.f32.mrb[62].mxu1 }
0x255d   :  { %6432 = vrot.lane.b32.xlu0 %v6310_v31, %s12031_s0  ;;  %v11231_v16 = vpop.f32.mrb[63].mxu1  ;;  %v11692_v31 = vpack.c.bf16 %v10484_v61, %v10482_v10 }
0x255e   :  { %v10483_v16 = vld [vmem:[%s13940_s4 + $0x190] sm:$0xff] }
0x255f   :  { %v11694_v24 = vpack.c.bf16 %v10483_v16, %v10481_v21 }
0x2562   :  { %v6410_v23 = vpop.f32.mrb[66].mxu0 }
0x2563   :  { %6434 = vrot.lane.b32.xlu0 %v6410_v23, %s12031_s0  ;;  %v11236_v47 = vpop.f32.mrb[67].mxu0 }
0x2564   :  { %v10488_v47 = vld [vmem:[%s13940_s4 + $0x1b8] sm:$0xff] }
0x25cf   :  { %v6433_v29 = vpop.permute.xlu0 %6432 }
0x25d0   :  { %v6442_v35 = vsel %vm2489_vm11, %v6440_v15, %v6433_v29  ;;  %v10490_v15 = vld [vmem:[%s13940_s4 + $0x1c8] sm:$0xff]  ;;  %v10492_v29 = vld [vmem:[%s13940_s4 + $0x1d8] sm:$0xff] }
0x25d1   :  { %v6453_v38 = vrot.slane %v6442_v35, %v12170_v14  ;;  %v6446_v49 = vcombine.high %v6442_v35, %v6442_v35  ;;  %v11700_v35 = vpack.c.bf16 %v10492_v29, %v10490_v15 }
0x25d3   :  { %v6461_v34 = vcombine.high %v6453_v38, %v6453_v38  ;;  %v6460_v56 = vrot.slane %v6446_v49, %v12170_v14 }
0x25d5   :  { %v6435_v59 = vpop.permute.xlu0 %6434  ;;  %v6484_v60 = vcombine.low %v6453_v38, %v6461_v34  ;;  %v10489_v38 = vld [vmem:[%s13940_s4 + $0x1c0] sm:$0xff]  ;;  %v10494_v34 = vld [vmem:[%s13940_s4 + $0x1e8] sm:$0xff] }
0x25d6   :  { %v6443_v33 = vsel %vm2489_vm11, %v6441_v41, %v6435_v59  ;;  %v11702_v49 = vpack.c.bf16 %v10491_v53, %v10489_v38  ;;  %v11704_v41 = vpack.c.bf16 %v10496_v40, %v10494_v34  ;;  %v10493_v59 = vld [vmem:[%s13940_s4 + $0x1e0] sm:$0xff] }
0x25d7   :  { %v6462_v6 = vcombine.high %v6443_v33, %v6443_v33  ;;  %v6469_v52 = vrot.slane %v6443_v33, %v12170_v14  ;;  %v6492_v4 = vrot.slane %v6484_v60, %v12170_v14  ;;  %v10495_v33 = vld [vmem:[%s13940_s4 + $0x1f0] sm:$0xff] }
0x25d9   :  { %v6476_v36 = vrot.slane %v6462_v6, %v12170_v14  ;;  %v6477_v26 = vcombine.high %v6469_v52, %v6469_v52  ;;  %v6485_v22 = vcombine.low %v6460_v56, %v6469_v52  ;;  %v11706_v56 = vpack.c.bf16 %v10495_v33, %v10493_v59  ;;  %v6654_v6 = vpop.permute.xlu1 %6653 }
0x25db   :  { %v6499_v50 = vrot.slane %v6485_v22, %v12170_v14  ;;  %v6501_v12 = vcombine.low %v6477_v26, %v6476_v36 }
0x25dd   :  { %v6508_v28 = vrot.slane %v6501_v12, %v12170_v14  ;;  %v6500_v11 = vcombine.low %v6492_v4, %v6499_v50 }
0x25df   :  { %11253 = vmatprep.mubr.msk.f32.mxu1 %vm380_vm3, %v6500_v11  ;;  %v10497_v11 = vld [vmem:[%s13941_s5 + $0x6] sm:$0x3] }
0x25e0   :  { %11254 = vmatmul.mubr.msk.f32.vlgmr.msra.gmra.mrb[64].mxu1 %vm380_vm3, %v6508_v28  ;;  %v6843_v37 = vrot.slane %v10497_v11, %v12288_v30 }
0x25e1   :  { %11268 = vmatprep.mubr.msk.f32.mxu1 %vm12027_vm0, %v12026_v3 }
0x26b3   :  { %v11255_v55 = vpop.f32.mrb[64].mxu1 }
0x26b4   :  { %v6585_v5 = vadd.f32 %v11255_v55, %v10474_v46  ;;  %v6579_v13 = vpop.f32.mrb[65].mxu1 }
0x26b5   :  { %v6580_v62 = vadd.f32 %v10474_v46, %v6579_v13  ;;  %v6847_v46 = vrot.slane %v10497_v11, %v12294_v32 }
0x26b6   :  { %v6613_v57 = vrot.slane %v6585_v5, %v12170_v14 }
0x26b7   :  { %v6590_v63 = vcombine.high %v6580_v62, %v6580_v62  ;;  %v6597_v9 = vrot.slane %v6580_v62, %v12170_v14 }
0x26b8   :  { %v6614_v39 = vcombine.high %v6613_v57, %v6613_v57 }
0x26b9   :  { %v6604_v42 = vrot.slane %v6590_v63, %v12170_v14  ;;  %v6605_v48 = vcombine.high %v6597_v9, %v6597_v9 }
0x26ba   :  { %v6645_v0 = vrot.slane %v6614_v39, %v12170_v14 }
0x26bb   :  { %v6606_v17 = vcombine.high %v6604_v42, %v6604_v42  ;;  %v6615_v18 = vcombine.low %v6597_v9, %v6605_v48  ;;  %v6629_v43 = vrot.slane %v6604_v42, %v12170_v14 }
0x26bd   :  { %v6622_v44 = vrot.slane %v6615_v18, %v12170_v14  ;;  %v6631_v51 = vcombine.low %v6606_v17, %v6613_v57 }
0x26bf   :  { %v6630_v19 = vcombine.low %v6622_v44, %v6629_v43  ;;  %v6638_v54 = vrot.slane %v6631_v51, %v12170_v14 }
0x26c1   :  { %v6646_v20 = vcombine.low %v6638_v54, %v6645_v0  ;;  %v6649_v25 = vadd.f32 %v6630_v19, %v13103_v7  ;;  %v10486_v7 = vld [vmem:[%s13940_s4 + $0x1a8] sm:$0xff] }
0x26c3   :  { %11257 = vmatpush3.msk.msra.mxu0 %vm5113_vm13, %v6649_v25  ;;  %v6650_v23 = vadd.f32 %v6646_v20, %v13109_v45  ;;  %v11696_v45 = vpack.c.bf16 %v10488_v47, %v10486_v7 }
0x26c4   :  { %11259 = vmatmul.mubr.msk.f32.vlgmr.msra.gmra.mrb[68].mxu0 %vm5109_vm15, %v4699_v8  ;;  %11261 = vmatprep.subr.mxu0 %v12026_v3 }
0x26c5   :  { %11262 = vmatpush3.msk.msra.mxu0 %vm5113_vm13, %v6650_v23  ;;  %11263 = vmatprep.mubr.msk.f32.mxu0 %vm12027_vm0, %v12026_v3 }
0x26c6   :  { %11693 = vmatprep.subr.bf16.mxu0 %v11692_v31 }
0x26c8   :  { %11264 = vmatmul.mubr.msk.f32.vlgmr.msra.gmra.mrb[70].mxu0 %vm5109_vm15, %v4699_v8 }
0x26c9   :  { %11695 = vmatpush1.bf16.msra.mxu0 %v11694_v24  ;;  %6919 = vmatprep.mubr.f32.mxu0 %v12026_v3 }
0x26ca   :  { %11697 = vmatprep.subr.bf16.mxu0 %v11696_v45 }
0x26cd   :  { %11699 = vmatpush1.bf16.msra.mxu0 %v11698_v27 }
0x26ce   :  { %11701 = vmatprep.subr.bf16.mxu0 %v11700_v35 }
0x26d1   :  { %11703 = vmatpush1.bf16.msra.mxu0 %v11702_v49 }
0x26d2   :  { %11705 = vmatprep.subr.bf16.mxu0 %v11704_v41 }
0x26d5   :  { %11707 = vmatpush1.bf16.msra.mxu0 %v11706_v56 }
0x26d6   :  { %11281 = vmatprep.subr.mxu0 %v12026_v3 }
0x2797   :  { %v6728_v60 = vpop.f32.mrb[68].mxu0 }
0x2798   :  { %v11260_v52 = vpop.f32.mrb[69].mxu0  ;;  %v13457_v36 = vadd.f32 %v6728_v60, %v6654_v6 }
0x279a   :  { %v6805_v50 = vmax.f32 %v13457_v36, 0.0 }
0x279b   :  { %v6801_v26 = vpop.f32.mrb[70].mxu0 }
0x279c   :  { %v13459_v22 = vadd.f32 %v6801_v26, %v6654_v6  ;;  %v11265_v4 = vpop.f32.mrb[71].mxu0 }
0x279e   :  { %v6806_v12 = vmax.f32 %v13459_v22, 0.0  ;;  %v10543_v22 = vld [vmem:[%s13940_s4 + $0x228] sm:$0xff] }
0x27a0   :  { %v6852_v28 = vcombine.low %v6805_v50, %v6806_v12 }
0x27a2   :  { %10499 = vmatmul.mubr.msk.f32.vlgmr.msra.gmra.mrb[72].mxu0 %vm380_vm3, %v6852_v28 }
0x27a3   :  { %11283 = vmatprep.mubr.msk.f32.mxu0 %vm12027_vm0, %v12026_v3 }
0x2875   :  { %v6921_v55 = vpop.f32.mrb[72].mxu0 }
0x2876   :  { %v6922_v5 = vadd.f32 %v6921_v55, %v6843_v37  ;;  %v6923_v13 = vpop.f32.mrb[73].mxu0 }
0x2877   :  { %v6924_v62 = vadd.f32 %v6923_v13, %v6847_v46 }
0x2879   :  { %v13475_v57 = vcombine.low %v6922_v5, %v6924_v62  ;;  %v13477_v63 = vcombine.high %v6922_v5, %v6924_v62 }
0x287b   :  { %7006 = vrot.lane.b32.xlu1 %v13477_v63, %s12029_s23  ;;  %6930 = vrot.lane.b32.xlu0 %v13475_v57, %s12029_s23  ;;  %v7183_v9 = vrot.slane %v13477_v63, 4  ;;  %v7105_v39 = vrot.slane %v13475_v57, 4 }
0x287d   :  { %11282 = vmatpush3.msk.msra.mxu0 %vm7110_vm2, %v7183_v9 }
0x287e   :  { %11291 = vmatprep.subr.mxu0 %v12026_v3 }
0x28ed   :  { %v6931_v42 = vpop.permute.xlu0 %6930  ;;  %v7007_v48 = vpop.permute.xlu1 %7006 }
0x28ee   :  { %11267 = vmatpush3.xpose.msk.msra.mxu1 %vm549_vm4, %v6931_v42 }
0x28ef   :  { %11271 = vmatprep.subr.mxu1 %v12026_v3 }
0x28f1   :  { %11269 = vmatmul.mubr.msk.f32.vlgmr.msra.gmra.mrb[66].mxu1 %vm549_vm4, %v13475_v57 }
0x28f2   :  { %11272 = vmatpush3.xpose.msk.msra.mxu1 %vm549_vm4, %v7007_v48  ;;  %11273 = vmatprep.mubr.msk.f32.mxu1 %vm12027_vm0, %v12026_v3 }
0x28f3   :  { %11276 = vmatprep.subr.mxu1 %v12026_v3 }
0x28f5   :  { %11274 = vmatmul.mubr.msk.f32.vlgmr.msra.gmra.mrb[68].mxu1 %vm549_vm4, %v13477_v63 }
0x28f6   :  { %11277 = vmatpush3.msk.msra.mxu1 %vm7110_vm2, %v7105_v39  ;;  %11278 = vmatprep.mubr.msk.f32.mxu1 %vm12027_vm0, %v12026_v3 }
0x28f7   :  { %11286 = vmatprep.subr.mxu1 %v12026_v3 }
0x29c4   :  { %v7002_v17 = vpop.f32.mrb[66].mxu1 }
0x29c5   :  { %v11270_v18 = vpop.f32.mrb[67].mxu1  ;;  %v7083_v44 = vsel %vm7082_vm5, %v7002_v17, -inf }
0x29c6   :  { %7084 = vmax.xlane.f32.xlu0 %v7083_v44 }
0x29c8   :  { %v7078_v43 = vpop.f32.mrb[68].mxu1 }
0x29c9   :  { %v11275_v51 = vpop.f32.mrb[69].mxu1  ;;  %v7086_v0 = vsel %vm7082_vm5, %v7078_v43, -inf }
0x29ca   :  { %7087 = vmax.xlane.f32.xlu1 %v7086_v0 }
0x29db   :  { %7261 = vrot.lane.b32.xlu1 %v13475_v57, %s12031_s0 }
0x29df   :  { %7259 = vrot.lane.b32.xlu1 %v13475_v57, %s12032_s19 }
0x29e3   :  { %7337 = vrot.lane.b32.xlu1 %v13477_v63, %s12032_s19 }
0x2a53   :  { %v7085_v19 = vpop.xlane.xlu0 %7084 }
0x2a54   :  { %v7089_v54 = vsub.f32 %v7002_v17, %v7085_v19 }
0x2a56   :  { %v7091_v10 = vmul.f32 1.442695, %v7089_v54 }
0x2a57   :  { %v7088_v61 = vpop.xlane.xlu1 %7087 }
0x2a58   :  { %11934 = vpow2.f32 %v7091_v10  ;;  %v7090_v20 = vsub.f32 %v7078_v43, %v7088_v61 }
0x2a5a   :  { %v7093_v25 = vmul.f32 1.442695, %v7090_v20 }
0x2a5b   :  { %v7262_v47 = vpop.permute.xlu1 %7261 }
0x2a5c   :  { %11936 = vpow2.f32 %v7093_v25 }
0x2a5f   :  { %v7260_v45 = vpop.permute.xlu1 %7259 }
0x2a60   :  { %v7437_v15 = vrot.slane %v7260_v45, 4 }
0x2a62   :  { %v11935_v8 = vpop.eup %11934 }
0x2a63   :  { %v7095_v31 = vsel %vm7082_vm5, %v11935_v8, 0.0  ;;  %v7338_v29 = vpop.permute.xlu1 %7337 }
0x2a64   :  { %7096 = vadd.xlane.f32.xlu0 %v7095_v31  ;;  %v7513_v38 = vrot.slane %v7338_v29, 4 }
0x2a66   :  { %v11937_v21 = vpop.eup %11936 }
0x2a67   :  { %v7098_v16 = vsel %vm7082_vm5, %v11937_v21, 0.0 }
0x2a68   :  { %7099 = vadd.xlane.f32.xlu0 %v7098_v16 }
0x2a7e   :  { %7339 = vrot.lane.b32.xlu0 %v13477_v63, %s12031_s0 }
0x2af1   :  { %v7097_v23 = vpop.xlane.xlu0 %7096 }
0x2af2   :  { %11938 = vrcp.f32 %v7097_v23 }
0x2af5   :  { %v7100_v7 = vpop.xlane.xlu0 %7099 }
0x2af6   :  { %11940 = vrcp.f32 %v7100_v7 }
0x2af9   :  { %v7340_v35 = vpop.permute.xlu0 %7339 }
0x2afc   :  { %v11939_v24 = vpop.eup %11938 }
0x2afd   :  { %v7103_v2 = vmul.f32 %v11939_v24, %v11935_v8 }
0x2aff   :  { %11279 = vmatmul.mubr.msk.f32.vlgmr.msra.gmra.mrb[70].mxu1 %vm7106_vm6, %v7103_v2 }
0x2b00   :  { %v11941_v58 = vpop.eup %11940  ;;  %11287 = vmatpush3.xpose.msk.msra.mxu1 %vm549_vm4, %v7262_v47  ;;  %11288 = vmatprep.mubr.msk.f32.mxu1 %vm12027_vm0, %v12026_v3 }
0x2b01   :  { %v7104_v27 = vmul.f32 %v11941_v58, %v11937_v21  ;;  %11296 = vmatprep.subr.mxu1 %v12026_v3 }
0x2b03   :  { %11284 = vmatmul.mubr.msk.f32.vlgmr.msra.gmra.mrb[74].mxu0 %vm7106_vm6, %v7104_v27  ;;  %11289 = vmatmul.mubr.msk.f32.vlgmr.msra.gmra.mrb[72].mxu1 %vm549_vm4, %v7260_v45 }
0x2b04   :  { %11292 = vmatpush3.xpose.msk.msra.mxu0 %vm549_vm4, %v7340_v35  ;;  %11297 = vmatpush3.msk.msra.mxu1 %vm7110_vm2, %v7437_v15 }
0x2b05   :  { %11293 = vmatprep.mubr.msk.f32.mxu0 %vm12027_vm0, %v12026_v3  ;;  %11301 = vmatprep.subr.mxu0 %v12026_v3 }
0x2b06   :  { %11298 = vmatprep.mubr.msk.f32.mxu1 %vm12027_vm0, %v12026_v3  ;;  %11306 = vmatprep.subr.mxu1 %v12026_v3 }
0x2b07   :  { %11294 = vmatmul.mubr.msk.f32.vlgmr.msra.gmra.mrb[76].mxu0 %vm549_vm4, %v7338_v29 }
0x2b08   :  { %11302 = vmatpush3.msk.msra.mxu0 %vm7110_vm2, %v7513_v38  ;;  %11303 = vmatprep.mubr.msk.f32.mxu0 %vm12027_vm0, %v12026_v3 }
0x2b09   :  { %11311 = vmatprep.subr.mxu0 %v12026_v3 }
0x2bd2   :  { %v13533_v53 = vpop.f32.mrb[70].mxu1 }
0x2bd3   :  { %v11280_v49 = vpop.f32.mrb[71].mxu1 }
0x2bd6   :  { %v13535_v34 = vpop.f32.mrb[74].mxu0  ;;  %v7333_v40 = vpop.f32.mrb[72].mxu1 }
0x2bd7   :  { %v11285_v41 = vpop.f32.mrb[75].mxu0  ;;  %v11290_v59 = vpop.f32.mrb[73].mxu1  ;;  %v7415_v33 = vsel %vm7082_vm5, %v7333_v40, -inf }
0x2bd8   :  { %7416 = vmax.xlane.f32.xlu0 %v7415_v33 }
0x2bda   :  { %v7411_v56 = vpop.f32.mrb[76].mxu0 }
0x2bdb   :  { %v11295_v60 = vpop.f32.mrb[77].mxu0  ;;  %v7418_v6 = vsel %vm7082_vm5, %v7411_v56, -inf }
0x2bdc   :  { %7419 = vmax.xlane.f32.xlu1 %v7418_v6 }
0x2bed   :  { %7591 = vrot.lane.b32.xlu1 %v13475_v57, %s12033_s1 }
0x2bf1   :  { %7589 = vrot.lane.b32.xlu1 %v13475_v57, %s12034_s20 }
0x2bf5   :  { %7667 = vrot.lane.b32.xlu1 %v13477_v63, %s12034_s20 }
0x2c65   :  { %v7417_v52 = vpop.xlane.xlu0 %7416 }
0x2c66   :  { %v7421_v26 = vsub.f32 %v7333_v40, %v7417_v52 }
0x2c68   :  { %v7423_v4 = vmul.f32 1.442695, %v7421_v26 }
0x2c69   :  { %v7420_v28 = vpop.xlane.xlu1 %7419 }
0x2c6a   :  { %11942 = vpow2.f32 %v7423_v4  ;;  %v7422_v11 = vsub.f32 %v7411_v56, %v7420_v28 }
0x2c6c   :  { %v7425_v37 = vmul.f32 1.442695, %v7422_v11 }
0x2c6d   :  { %v7592_v42 = vpop.permute.xlu1 %7591 }
0x2c6e   :  { %11944 = vpow2.f32 %v7425_v37 }
0x2c71   :  { %v7590_v39 = vpop.permute.xlu1 %7589 }
0x2c72   :  { %v7767_v43 = vrot.slane %v7590_v39, 4 }
0x2c74   :  { %v11943_v46 = vpop.eup %11942 }
0x2c75   :  { %v7427_v55 = vsel %vm7082_vm5, %v11943_v46, 0.0  ;;  %v7668_v51 = vpop.permute.xlu1 %7667 }
0x2c76   :  { %7428 = vadd.xlane.f32.xlu0 %v7427_v55  ;;  %v7843_v19 = vrot.slane %v7668_v51, 4 }
0x2c78   :  { %v11945_v5 = vpop.eup %11944 }
0x2c79   :  { %v7430_v13 = vsel %vm7082_vm5, %v11945_v5, 0.0 }
0x2c7a   :  { %7431 = vadd.xlane.f32.xlu0 %v7430_v13 }
0x2c90   :  { %7669 = vrot.lane.b32.xlu0 %v13477_v63, %s12033_s1 }
0x2d03   :  { %v7429_v62 = vpop.xlane.xlu0 %7428 }
0x2d04   :  { %11946 = vrcp.f32 %v7429_v62 }
0x2d07   :  { %v7432_v9 = vpop.xlane.xlu0 %7431 }
0x2d08   :  { %11948 = vrcp.f32 %v7432_v9 }
0x2d0b   :  { %v7670_v0 = vpop.permute.xlu0 %7669 }
0x2d0e   :  { %v11947_v48 = vpop.eup %11946 }
0x2d0f   :  { %v7435_v17 = vmul.f32 %v11947_v48, %v11943_v46 }
0x2d11   :  { %11299 = vmatmul.mubr.msk.f32.vlgmr.msra.gmra.mrb[74].mxu1 %vm7106_vm6, %v7435_v17 }
0x2d12   :  { %v11949_v18 = vpop.eup %11948  ;;  %11307 = vmatpush3.xpose.msk.msra.mxu1 %vm549_vm4, %v7592_v42  ;;  %11308 = vmatprep.mubr.msk.f32.mxu1 %vm12027_vm0, %v12026_v3 }
0x2d13   :  { %v7436_v44 = vmul.f32 %v11949_v18, %v11945_v5  ;;  %11316 = vmatprep.subr.mxu1 %v12026_v3 }
0x2d15   :  { %11304 = vmatmul.mubr.msk.f32.vlgmr.msra.gmra.mrb[78].mxu0 %vm7106_vm6, %v7436_v44  ;;  %11309 = vmatmul.mubr.msk.f32.vlgmr.msra.gmra.mrb[76].mxu1 %vm549_vm4, %v7590_v39 }
0x2d16   :  { %11312 = vmatpush3.xpose.msk.msra.mxu0 %vm549_vm4, %v7670_v0  ;;  %11317 = vmatpush3.msk.msra.mxu1 %vm7110_vm2, %v7767_v43 }
0x2d17   :  { %11313 = vmatprep.mubr.msk.f32.mxu0 %vm12027_vm0, %v12026_v3  ;;  %11321 = vmatprep.subr.mxu0 %v12026_v3 }
0x2d18   :  { %11318 = vmatprep.mubr.msk.f32.mxu1 %vm12027_vm0, %v12026_v3  ;;  %11326 = vmatprep.subr.mxu1 %v12026_v3 }
0x2d19   :  { %11314 = vmatmul.mubr.msk.f32.vlgmr.msra.gmra.mrb[80].mxu0 %vm549_vm4, %v7668_v51 }
0x2d1a   :  { %11322 = vmatpush3.msk.msra.mxu0 %vm7110_vm2, %v7843_v19  ;;  %11323 = vmatprep.mubr.msk.f32.mxu0 %vm12027_vm0, %v12026_v3 }
0x2d1b   :  { %11331 = vmatprep.subr.mxu0 %v12026_v3 }
0x2de4   :  { %v13569_v54 = vpop.f32.mrb[74].mxu1 }
0x2de5   :  { %v11300_v10 = vpop.f32.mrb[75].mxu1 }
0x2de8   :  { %v13571_v61 = vpop.f32.mrb[78].mxu0  ;;  %v7663_v20 = vpop.f32.mrb[76].mxu1 }
0x2de9   :  { %v11305_v25 = vpop.f32.mrb[79].mxu0  ;;  %v11310_v8 = vpop.f32.mrb[77].mxu1  ;;  %v7745_v31 = vsel %vm7082_vm5, %v7663_v20, -inf }
0x2dea   :  { %7746 = vmax.xlane.f32.xlu0 %v7745_v31  ;;  %v6827_v31 = vld [vmem:[#allocation3 + $0xc0] sm:$0xff] }
0x2dec   :  { %v7741_v21 = vpop.f32.mrb[80].mxu0 }
0x2ded   :  { %v11315_v16 = vpop.f32.mrb[81].mxu0  ;;  %v7748_v23 = vsel %vm7082_vm5, %v7741_v21, -inf }
0x2dee   :  { %7749 = vmax.xlane.f32.xlu1 %v7748_v23  ;;  %v6829_v16 = vld [vmem:[#allocation3 + $0xd0] sm:$0xff]  ;;  %v6830_v23 = vld [vmem:[#allocation3 + $0xd8] sm:$0xff] }
0x2dff   :  { %7921 = vrot.lane.b32.xlu1 %v13475_v57, %s12035_s21 }
0x2e03   :  { %7919 = vrot.lane.b32.xlu1 %v13475_v57, %s12036_s22 }
0x2e07   :  { %7997 = vrot.lane.b32.xlu1 %v13477_v63, %s12036_s22 }
0x2e77   :  { %v7747_v7 = vpop.xlane.xlu0 %7746 }
0x2e78   :  { %v7751_v47 = vsub.f32 %v7663_v20, %v7747_v7  ;;  %v11712_v7 = vpack.c.bf16 %v6830_v23, %v6829_v16 }
0x2e7a   :  { %v7753_v24 = vmul.f32 1.442695, %v7751_v47  ;;  %v6831_v47 = vld [vmem:[#allocation3 + $0xe0] sm:$0xff] }
0x2e7b   :  { %v7750_v45 = vpop.xlane.xlu1 %7749 }
0x2e7c   :  { %11950 = vpow2.f32 %v7753_v24  ;;  %v7752_v2 = vsub.f32 %v7741_v21, %v7750_v45  ;;  %v6832_v24 = vld [vmem:[#allocation3 + $0xe8] sm:$0xff] }
0x2e7d   :  { %v11715_v45 = vpack.c.bf16 %v6832_v24, %v6831_v47 }
0x2e7e   :  { %v7755_v58 = vmul.f32 1.442695, %v7752_v2  ;;  %v6833_v2 = vld [vmem:[#allocation3 + $0xf0] sm:$0xff] }
0x2e7f   :  { %v7922_v49 = vpop.permute.xlu1 %7921 }
0x2e80   :  { %11952 = vpow2.f32 %v7755_v58  ;;  %v6834_v58 = vld [vmem:[#allocation3 + $0xf8] sm:$0xff] }
0x2e83   :  { %v7920_v41 = vpop.permute.xlu1 %7919 }
0x2e86   :  { %v11951_v27 = vpop.eup %11950 }
0x2e87   :  { %v7757_v15 = vsel %vm7082_vm5, %v11951_v27, 0.0  ;;  %v7998_v60 = vpop.permute.xlu1 %7997 }
0x2e88   :  { %7758 = vadd.xlane.f32.xlu0 %v7757_v15  ;;  %v8173_v52 = vrot.slane %v7998_v60, 4 }
0x2e8a   :  { %v11953_v29 = vpop.eup %11952 }
0x2e8b   :  { %v7760_v35 = vsel %vm7082_vm5, %v11953_v29, 0.0 }
0x2e8c   :  { %7761 = vadd.xlane.f32.xlu0 %v7760_v35  ;;  %v6838_v35 = vld [vmem:[%s13951_s15] sm:$0x3] }
0x2ea2   :  { %7999 = vrot.lane.b32.xlu0 %v13477_v63, %s12035_s21  ;;  %v8097_v63 = vrot.slane %v7920_v41, 4 }
0x2f15   :  { %v7759_v57 = vpop.xlane.xlu0 %7758 }
0x2f16   :  { %11954 = vrcp.f32 %v7759_v57 }
0x2f19   :  { %v7762_v38 = vpop.xlane.xlu0 %7761 }
0x2f1a   :  { %11956 = vrcp.f32 %v7762_v38 }
0x2f1d   :  { %v8000_v6 = vpop.permute.xlu0 %7999 }
0x2f20   :  { %v11955_v40 = vpop.eup %11954 }
0x2f21   :  { %v7765_v59 = vmul.f32 %v11955_v40, %v11951_v27  ;;  %v11718_v27 = vpack.c.bf16 %v6834_v58, %v6833_v2 }
0x2f23   :  { %11319 = vmatmul.mubr.msk.f32.vlgmr.msra.gmra.mrb[78].mxu1 %vm7106_vm6, %v7765_v59 }
0x2f24   :  { %v11957_v33 = vpop.eup %11956  ;;  %11327 = vmatpush3.xpose.msk.msra.mxu1 %vm549_vm4, %v7922_v49  ;;  %11328 = vmatprep.mubr.msk.f32.mxu1 %vm12027_vm0, %v12026_v3 }
0x2f25   :  { %v7766_v56 = vmul.f32 %v11957_v33, %v11953_v29  ;;  %11336 = vmatprep.subr.mxu1 %v12026_v3 }
0x2f27   :  { %11324 = vmatmul.mubr.msk.f32.vlgmr.msra.gmra.mrb[82].mxu0 %vm7106_vm6, %v7766_v56  ;;  %11329 = vmatmul.mubr.msk.f32.vlgmr.msra.gmra.mrb[80].mxu1 %vm549_vm4, %v7920_v41 }
0x2f28   :  { %11332 = vmatpush3.xpose.msk.msra.mxu0 %vm549_vm4, %v8000_v6  ;;  %11337 = vmatpush3.msk.msra.mxu1 %vm7110_vm2, %v8097_v63 }
0x2f29   :  { %11333 = vmatprep.mubr.msk.f32.mxu0 %vm12027_vm0, %v12026_v3  ;;  %11341 = vmatprep.subr.mxu0 %v12026_v3 }
0x2f2a   :  { %11338 = vmatprep.mubr.msk.f32.mxu1 %vm12027_vm0, %v12026_v3  ;;  %11708 = vmatprep.subr.bf16.mxu1 %v12025_v1 }
0x2f2b   :  { %11334 = vmatmul.mubr.msk.f32.vlgmr.msra.gmra.mrb[84].mxu0 %vm549_vm4, %v7998_v60 }
0x2f2c   :  { %11342 = vmatpush3.msk.msra.mxu0 %vm7110_vm2, %v8173_v52  ;;  %11343 = vmatprep.mubr.msk.f32.mxu0 %vm12027_vm0, %v12026_v3 }
0x2f2d   :  { %11365 = vmatprep.subr.mxu0 %v12026_v3 }
0x2ff6   :  { %v7839_v26 = vpop.f32.mrb[78].mxu1 }
0x2ff7   :  { %v11320_v4 = vpop.f32.mrb[79].mxu1 }
0x2ffa   :  { %v7915_v28 = vpop.f32.mrb[82].mxu0  ;;  %v7993_v11 = vpop.f32.mrb[80].mxu1 }
0x2ffb   :  { %v11325_v37 = vpop.f32.mrb[83].mxu0  ;;  %v11330_v46 = vpop.f32.mrb[81].mxu1  ;;  %v8075_v55 = vsel %vm7082_vm5, %v7993_v11, -inf }
0x2ffc   :  { %8076 = vmax.xlane.f32.xlu0 %v8075_v55  ;;  %v10539_v46 = vld [vmem:[%s13940_s4 + $0x208] sm:$0xff]  ;;  %v10541_v55 = vld [vmem:[%s13940_s4 + $0x218] sm:$0xff] }
0x2ffe   :  { %v8071_v5 = vpop.f32.mrb[84].mxu0 }
0x2fff   :  { %v11335_v13 = vpop.f32.mrb[85].mxu0  ;;  %v8078_v62 = vsel %vm7082_vm5, %v8071_v5, -inf }
0x3000   :  { %8079 = vmax.xlane.f32.xlu1 %v8078_v62  ;;  %v6837_v62 = vld [vmem:[%s13950_s14] sm:$0x3] }
0x3011   :  { %8251 = vrot.lane.b32.xlu1 %v13569_v54, %s12035_s21 }
0x3015   :  { %8259 = vrot.lane.b32.xlu1 %v7839_v26, %s12033_s1 }
0x3019   :  { %8261 = vrot.lane.b32.xlu1 %v7915_v28, %s12033_s1 }
0x3089   :  { %v8077_v9 = vpop.xlane.xlu0 %8076 }
0x308a   :  { %v8081_v42 = vsub.f32 %v7993_v11, %v8077_v9  ;;  %v11720_v9 = vpack.c.bf16 %v10541_v55, %v10539_v46 }
0x308c   :  { %v8083_v48 = vmul.f32 1.442695, %v8081_v42  ;;  %v10538_v42 = vld [vmem:[%s13940_s4 + $0x200] sm:$0xff] }
0x308d   :  { %v8080_v39 = vpop.xlane.xlu1 %8079 }
0x308e   :  { %11958 = vpow2.f32 %v8083_v48  ;;  %v8082_v17 = vsub.f32 %v8071_v5, %v8080_v39  ;;  %v10540_v48 = vld [vmem:[%s13940_s4 + $0x210] sm:$0xff] }
0x308f   :  { %v11722_v36 = vpack.c.bf16 %v10540_v48, %v10538_v42 }
0x3090   :  { %v8085_v18 = vmul.f32 1.442695, %v8082_v17  ;;  %v10542_v17 = vld [vmem:[%s13940_s4 + $0x220] sm:$0xff] }
0x3091   :  { %v8252_v49 = vpop.permute.xlu1 %8251 }
0x3092   :  { %11960 = vpow2.f32 %v8085_v18  ;;  %v8273_v63 = vsel %vm549_vm4, %v13533_v53, %v8252_v49  ;;  %v10544_v18 = vld [vmem:[%s13940_s4 + $0x230] sm:$0xff] }
0x3095   :  { %v8260_v40 = vpop.permute.xlu1 %8259 }
0x3096   :  { %v8275_v60 = vsel %vm2484_vm10, %v8273_v63, %v8260_v40 }
0x3098   :  { %v11959_v44 = vpop.eup %11958 }
0x3099   :  { %v8087_v43 = vsel %vm7082_vm5, %v11959_v44, 0.0  ;;  %v8262_v59 = vpop.permute.xlu1 %8261 }
0x309a   :  { %8088 = vadd.xlane.f32.xlu0 %v8087_v43  ;;  %v10547_v43 = vld [vmem:[%s13940_s4 + $0x248] sm:$0xff] }
0x309c   :  { %v11961_v51 = vpop.eup %11960 }
0x309d   :  { %v8090_v0 = vsel %vm7082_vm5, %v11961_v51, 0.0 }
0x309e   :  { %8091 = vadd.xlane.f32.xlu0 %v8090_v0 }
0x30b4   :  { %8253 = vrot.lane.b32.xlu0 %v13571_v61, %s12035_s21  ;;  %v6828_v61 = vld [vmem:[#allocation3 + $0xc8] sm:$0xff] }
0x30b5   :  { %v11709_v21 = vpack.c.bf16 %v6828_v61, %v6827_v31  ;;  %v10550_v31 = vld [vmem:[%s13940_s4 + $0x260] sm:$0xff]  ;;  %v10552_v61 = vld [vmem:[%s13940_s4 + $0x270] sm:$0xff] }
0x3127   :  { %v8089_v19 = vpop.xlane.xlu0 %8088 }
0x3128   :  { %11962 = vrcp.f32 %v8089_v19  ;;  %v10546_v19 = vld [vmem:[%s13940_s4 + $0x240] sm:$0xff] }
0x312b   :  { %v8092_v54 = vpop.xlane.xlu0 %8091 }
0x312c   :  { %11964 = vrcp.f32 %v8092_v54  ;;  %v10548_v54 = vld [vmem:[%s13940_s4 + $0x250] sm:$0xff] }
0x312f   :  { %v8254_v41 = vpop.permute.xlu0 %8253 }
0x3130   :  { %v8274_v33 = vsel %vm549_vm4, %v13535_v34, %v8254_v41  ;;  %v10532_v34 = vld [vmem:[%s13943_s7 + $0x3] ss:$0 sm:$0xff] }
0x3131   :  { %v8276_v52 = vsel %vm2484_vm10, %v8274_v33, %v8262_v59 }
0x3132   :  { %v11963_v10 = vpop.eup %11962 }
0x3133   :  { %v8095_v20 = vmul.f32 %v11963_v10, %v11959_v44  ;;  %v11726_v44 = vpack.c.bf16 %v10544_v18, %v10542_v17  ;;  %v11730_v10 = vpack.c.bf16 %v10548_v54, %v10546_v19 }
0x3135   :  { %11339 = vmatmul.mubr.msk.f32.vlgmr.msra.gmra.mrb[82].mxu1 %vm7106_vm6, %v8095_v20  ;;  %v10551_v20 = vld [vmem:[%s13940_s4 + $0x268] sm:$0xff] }
0x3136   :  { %v11965_v25 = vpop.eup %11964  ;;  %11362 = vmatprep.mubr.msk.f32.mxu1 %vm12027_vm0, %v12026_v3  ;;  %11710 = vmatpush3.bf16.msra.mxu1 %v11709_v21  ;;  %v11734_v21 = vpack.c.bf16 %v10552_v61, %v10550_v31 }
0x3137   :  { %v8096_v8 = vmul.f32 %v11965_v25, %v11961_v51  ;;  %11711 = vmatprep.subr.bf16.mxu1 %v12025_v1  ;;  %v10549_v51 = vld [vmem:[%s13940_s4 + $0x258] sm:$0xff] }
0x3138   :  { %v11728_v0 = vpack.c.bf16 %v10549_v51, %v10547_v43  ;;  %v10553_v25 = vld [vmem:[%s13940_s4 + $0x278] sm:$0xff] }
0x3139   :  { %11344 = vmatmul.mubr.msk.f32.vlgmr.msra.gmra.mrb[86].mxu0 %vm7106_vm6, %v8096_v8  ;;  %v11732_v8 = vpack.c.bf16 %v10553_v25, %v10551_v20 }
0x313a   :  { %11367 = vmatprep.mubr.msk.f32.mxu0 %vm12027_vm0, %v12026_v3  ;;  %11713 = vmatpush3.bf16.msra.mxu1 %v11712_v7 }
0x313b   :  { %11714 = vmatprep.subr.bf16.mxu1 %v12025_v1 }
0x313e   :  { %11716 = vmatpush3.bf16.msra.mxu1 %v11715_v45 }
0x313f   :  { %11717 = vmatprep.subr.bf16.mxu1 %v12025_v1 }
0x3142   :  { %11719 = vmatpush3.bf16.msra.mxu1 %v11718_v27 }
0x3143   :  { %11375 = vmatprep.subr.mxu1 %v12026_v3 }
0x3208   :  { %v8169_v15 = vpop.f32.mrb[82].mxu1 }
0x3209   :  { %8267 = vrot.lane.b32.xlu0 %v8169_v15, %s12031_s0  ;;  %v11340_v29 = vpop.f32.mrb[83].mxu1 }
0x320c   :  { %v8245_v57 = vpop.f32.mrb[86].mxu0 }
0x320d   :  { %8269 = vrot.lane.b32.xlu1 %v8245_v57, %s12031_s0  ;;  %v11345_v38 = vpop.f32.mrb[87].mxu0  ;;  %8367 = vperm.xlu0 %11804, %v6838_v35   ;;  %v10554_v35 = vld [vmem:[%s13941_s5 + $0x8] sm:$0x3] }
0x320e   :  { %v8557_v57 = vrot.slane %v10554_v35, %v12288_v30  ;;  %v8561_v38 = vrot.slane %v10554_v35, %v12294_v32 }
0x327b   :  { %v8268_v56 = vpop.permute.xlu0 %8267 }
0x327c   :  { %v8277_v26 = vsel %vm2489_vm11, %v8275_v60, %v8268_v56 }
0x327f   :  { %v8270_v6 = vpop.permute.xlu1 %8269 }
0x3280   :  { %v8278_v4 = vsel %vm2489_vm11, %v8276_v52, %v8270_v6 }
0x3281   :  { %v8287_v28 = vcombine.low %v8277_v26, %v8278_v4 }
0x3283   :  { %11363 = vmatmul.mubr.msk.f32.vlgmr.msra.gmra.mrb[84].mxu1 %vm380_vm3, %v8287_v28 }
0x3284   :  { %11377 = vmatprep.mubr.msk.f32.mxu1 %vm12027_vm0, %v12026_v3 }
0x328c   :  { %v8368_v7 = vpop.permute.xlu0 %8367 }
0x3356   :  { %v8356_v53 = vpop.f32.mrb[84].mxu1 }
0x3357   :  { %v8357_v11 = vadd.f32 %v10532_v34, %v8356_v53  ;;  %v11364_v37 = vpop.f32.mrb[85].mxu1 }
0x3359   :  { %v8361_v5 = vcombine.high %v8357_v11, %v8357_v11  ;;  %v8363_v13 = vadd.f32 %v8357_v11, %v6805_v50  ;;  %v10545_v50 = vld [vmem:[%s13940_s4 + $0x238] sm:$0xff] }
0x335b   :  { %v8364_v39 = vadd.f32 %v8361_v5, %v6806_v12  ;;  %11366 = vmatpush3.msk.msra.mxu0 %vm7110_vm2, %v8363_v13  ;;  %v11724_v12 = vpack.c.bf16 %v10545_v50, %v10543_v22 }
0x335c   :  { %11368 = vmatmul.mubr.msk.f32.vlgmr.msra.gmra.mrb[88].mxu0 %vm7106_vm6, %v6837_v62  ;;  %11370 = vmatprep.subr.mxu0 %v12026_v3 }
0x335d   :  { %11371 = vmatpush3.msk.msra.mxu0 %vm7110_vm2, %v8364_v39  ;;  %11372 = vmatprep.mubr.msk.f32.mxu0 %vm12027_vm0, %v12026_v3 }
0x335e   :  { %11721 = vmatprep.subr.bf16.mxu0 %v11720_v9 }
0x3360   :  { %11373 = vmatmul.mubr.msk.f32.vlgmr.msra.gmra.mrb[90].mxu0 %vm7106_vm6, %v6837_v62 }
0x3361   :  { %11723 = vmatpush1.bf16.msra.mxu0 %v11722_v36  ;;  %8640 = vmatprep.mubr.f32.mxu0 %v12026_v3 }
0x3362   :  { %11725 = vmatprep.subr.bf16.mxu0 %v11724_v12 }
0x3365   :  { %11727 = vmatpush1.bf16.msra.mxu0 %v11726_v44 }
0x3366   :  { %11729 = vmatprep.subr.bf16.mxu0 %v11728_v0 }
0x3369   :  { %11731 = vmatpush1.bf16.msra.mxu0 %v11730_v10 }
0x336a   :  { %11733 = vmatprep.subr.bf16.mxu0 %v11732_v8 }
0x336d   :  { %11735 = vmatpush1.bf16.msra.mxu0 %v11734_v21 }
0x336e   :  { %11390 = vmatprep.subr.mxu0 %v12026_v3 }
0x342f   :  { %v8442_v16 = vpop.f32.mrb[88].mxu0 }
0x3430   :  { %v11369_v23 = vpop.f32.mrb[89].mxu0  ;;  %v13708_v47 = vadd.f32 %v8442_v16, %v8368_v7 }
0x3432   :  { %v8519_v58 = vmax.f32 %v13708_v47, 0.0 }
0x3433   :  { %v8515_v24 = vpop.f32.mrb[90].mxu0 }
0x3434   :  { %v13710_v45 = vadd.f32 %v8515_v24, %v8368_v7  ;;  %v11374_v2 = vpop.f32.mrb[91].mxu0 }
0x3436   :  { %v8520_v27 = vmax.f32 %v13710_v45, 0.0 }
0x3438   :  { %v8566_v15 = vcombine.low %v8519_v58, %v8520_v27 }
0x343a   :  { %v8573_v29 = vrot.slane %v8566_v15, %v12170_v14 }
0x343c   :  { %10556 = vmatmul.mubr.msk.f32.vlgmr.msra.gmra.mrb[92].mxu0 %vm380_vm3, %v8573_v29 }
0x343d   :  { %11392 = vmatprep.mubr.msk.f32.mxu0 %vm12027_vm0, %v12026_v3 }
0x350f   :  { %v8642_v49 = vpop.f32.mrb[92].mxu0 }
0x3510   :  { %v8643_v40 = vadd.f32 %v8642_v49, %v8557_v57  ;;  %v8644_v41 = vpop.f32.mrb[93].mxu0 }
0x3511   :  { %v8645_v59 = vadd.f32 %v8644_v41, %v8561_v38 }
0x3513   :  { %v8649_v33 = vcombine.low %v8643_v40, %v8645_v59 }
0x3515   :  { %v13728_v56 = vrot.slane %v8649_v33, %v12170_v14 }
0x3517   :  { %v13732_v63 = vcombine.high %v13728_v56, %v13728_v56  ;;  %v13736_v60 = vrot.slane %v13728_v56, %v12170_v14  ;;  %v8847_v4 = vrot.slane %v13728_v56, 2 }
0x3519   :  { %8665 = vrot.lane.b32.xlu1 %v13736_v60, %s12029_s23  ;;  %v8924_v32 = vrot.slane %v13732_v63, 2  ;;  %v13743_v6 = vrot.slane %v13732_v63, %v12170_v14 }
0x351b   :  { %11391 = vmatpush3.msk.msra.mxu0 %vm202_vm1, %v8924_v32  ;;  %8748 = vrot.lane.b32.xlu0 %v13743_v6, %s12029_s23 }
0x351c   :  { %11400 = vmatprep.subr.mxu0 %v12026_v3 }
0x358b   :  { %v8666_v52 = vpop.permute.xlu1 %8665 }
0x358c   :  { %11376 = vmatpush3.xpose.msk.msra.mxu1 %vm549_vm4, %v8666_v52 }
0x358d   :  { %11380 = vmatprep.subr.mxu1 %v12026_v3  ;;  %v8749_v26 = vpop.permute.xlu0 %8748 }
0x358f   :  { %11378 = vmatmul.mubr.msk.f32.vlgmr.msra.gmra.mrb[86].mxu1 %vm549_vm4, %v13728_v56 }
0x3590   :  { %11381 = vmatpush3.xpose.msk.msra.mxu1 %vm549_vm4, %v8749_v26  ;;  %11382 = vmatprep.mubr.msk.f32.mxu1 %vm12027_vm0, %v12026_v3 }
0x3591   :  { %11385 = vmatprep.subr.mxu1 %v12026_v3 }
0x3593   :  { %11383 = vmatmul.mubr.msk.f32.vlgmr.msra.gmra.mrb[88].mxu1 %vm549_vm4, %v13732_v63 }
0x3594   :  { %11386 = vmatpush3.msk.msra.mxu1 %vm202_vm1, %v8847_v4  ;;  %11387 = vmatprep.mubr.msk.f32.mxu1 %vm12027_vm0, %v12026_v3 }
0x3595   :  { %11395 = vmatprep.subr.mxu1 %v12026_v3 }
0x3662   :  { %v8737_v28 = vpop.f32.mrb[86].mxu1 }
0x3663   :  { %v11379_v34 = vpop.f32.mrb[87].mxu1  ;;  %v8825_v53 = vsel %vm8824_vm7, %v8737_v28, -inf }
0x3664   :  { %8826 = vmax.xlane.f32.xlu1 %v8825_v53 }
0x3666   :  { %v8820_v11 = vpop.f32.mrb[88].mxu1 }
0x3667   :  { %v11384_v37 = vpop.f32.mrb[89].mxu1  ;;  %v8828_v46 = vsel %vm8824_vm7, %v8820_v11, -inf }
0x3668   :  { %8829 = vmax.xlane.f32.xlu0 %v8828_v46 }
0x3675   :  { %9080 = vrot.lane.b32.xlu1 %v13743_v6, %s12031_s0 }
0x367e   :  { %9002 = vrot.lane.b32.xlu0 %v13736_v60, %s12031_s0 }
0x36f1   :  { %v8827_v55 = vpop.xlane.xlu1 %8826 }
0x36f2   :  { %v8831_v5 = vsub.f32 %v8737_v28, %v8827_v55 }
0x36f4   :  { %v8833_v13 = vmul.f32 1.442695, %v8831_v5 }
0x36f5   :  { %v8830_v62 = vpop.xlane.xlu0 %8829  ;;  %v9081_v12 = vpop.permute.xlu1 %9080 }
0x36f6   :  { %11966 = vpow2.f32 %v8833_v13  ;;  %v8832_v9 = vsub.f32 %v8820_v11, %v8830_v62 }
0x36f8   :  { %v8835_v42 = vmul.f32 1.442695, %v8832_v9 }
0x36f9   :  { %v9003_v50 = vpop.permute.xlu0 %9002 }
0x36fa   :  { %11968 = vpow2.f32 %v8835_v42 }
0x3700   :  { %v11967_v48 = vpop.eup %11966 }
0x3701   :  { %v8837_v39 = vsel %vm8824_vm7, %v11967_v48, 0.0 }
0x3702   :  { %8838 = vadd.xlane.f32.xlu0 %v8837_v39 }
0x3704   :  { %v11969_v36 = vpop.eup %11968 }
0x3705   :  { %v8840_v22 = vsel %vm8824_vm7, %v11969_v36, 0.0 }
0x3706   :  { %8841 = vadd.xlane.f32.xlu1 %v8840_v22 }
0x3717   :  { %9000 = vrot.lane.b32.xlu1 %v13736_v60, %s12032_s19 }
0x3718   :  { %9078 = vrot.lane.b32.xlu0 %v13743_v6, %s12032_s19 }
0x378f   :  { %v8839_v17 = vpop.xlane.xlu0 %8838 }
0x3790   :  { %11970 = vrcp.f32 %v8839_v17 }
0x3793   :  { %v8842_v18 = vpop.xlane.xlu1 %8841  ;;  %v9079_v54 = vpop.permute.xlu0 %9078 }
0x3794   :  { %11972 = vrcp.f32 %v8842_v18 }
0x3797   :  { %v9001_v19 = vpop.permute.xlu1 %9000 }
0x379a   :  { %v11971_v44 = vpop.eup %11970 }
0x379b   :  { %v8845_v43 = vmul.f32 %v11971_v44, %v11967_v48 }
0x379d   :  { %11388 = vmatmul.mubr.msk.f32.vlgmr.msra.gmra.mrb[90].mxu1 %vm8848_vm8, %v8845_v43 }
0x379e   :  { %v11973_v51 = vpop.eup %11972  ;;  %11396 = vmatpush3.xpose.msk.msra.mxu1 %vm549_vm4, %v9003_v50  ;;  %11397 = vmatprep.mubr.msk.f32.mxu1 %vm12027_vm0, %v12026_v3 }
0x379f   :  { %v8846_v0 = vmul.f32 %v11973_v51, %v11969_v36  ;;  %11405 = vmatprep.subr.mxu1 %v12026_v3 }
0x37a1   :  { %11393 = vmatmul.mubr.msk.f32.vlgmr.msra.gmra.mrb[94].mxu0 %vm8848_vm8, %v8846_v0  ;;  %11398 = vmatmul.mubr.msk.f32.vlgmr.msra.gmra.mrb[92].mxu1 %vm549_vm4, %v9001_v19 }
0x37a2   :  { %11401 = vmatpush3.xpose.msk.msra.mxu0 %vm549_vm4, %v9081_v12  ;;  %11402 = vmatprep.mubr.msk.f32.mxu0 %vm12027_vm0, %v12026_v3 }
0x37a3   :  { %11410 = vmatprep.subr.mxu0 %v12026_v3  ;;  %11407 = vmatprep.mubr.msk.f32.mxu1 %vm12027_vm0, %v12026_v3 }
0x37a5   :  { %11403 = vmatmul.mubr.msk.f32.vlgmr.msra.gmra.mrb[96].mxu0 %vm549_vm4, %v9079_v54 }
0x37a6   :  { %11412 = vmatprep.mubr.msk.f32.mxu0 %vm12027_vm0, %v12026_v3 }
0x3870   :  { %v13792_v10 = vpop.f32.mrb[90].mxu1 }
0x3871   :  { %v11389_v20 = vpop.f32.mrb[91].mxu1 }
0x3874   :  { %v13794_v25 = vpop.f32.mrb[94].mxu0  ;;  %v9074_v8 = vpop.f32.mrb[92].mxu1 }
0x3875   :  { %v11394_v31 = vpop.f32.mrb[95].mxu0  ;;  %v11399_v61 = vpop.f32.mrb[93].mxu1  ;;  %v9156_v21 = vsel %vm8824_vm7, %v9074_v8, -inf }
0x3876   :  { %9157 = vmax.xlane.f32.xlu1 %v9156_v21 }
0x3878   :  { %v9152_v16 = vpop.f32.mrb[96].mxu0 }
0x3879   :  { %v11404_v23 = vpop.f32.mrb[97].mxu0  ;;  %v9159_v7 = vsel %vm8824_vm7, %v9152_v16, -inf }
0x387a   :  { %9160 = vmax.xlane.f32.xlu0 %v9159_v7 }
0x3887   :  { %9256 = vrot.lane.b32.xlu1 %v13732_v63, %s12032_s19 }
0x388b   :  { %9336 = vrot.lane.b32.xlu1 %v13736_v60, %s12033_s1 }
0x3890   :  { %9178 = vrot.lane.b32.xlu0 %v13728_v56, %s12032_s19 }
0x3894   :  { %9414 = vrot.lane.b32.xlu0 %v13743_v6, %s12033_s1 }
0x3903   :  { %v9158_v24 = vpop.xlane.xlu1 %9157 }
0x3904   :  { %v9162_v2 = vsub.f32 %v9074_v8, %v9158_v24 }
0x3906   :  { %v9164_v15 = vmul.f32 1.442695, %v9162_v2 }
0x3907   :  { %v9161_v29 = vpop.xlane.xlu0 %9160  ;;  %v9257_v35 = vpop.permute.xlu1 %9256 }
0x3908   :  { %11974 = vpow2.f32 %v9164_v15  ;;  %v9163_v57 = vsub.f32 %v9152_v16, %v9161_v29  ;;  %v9258_v38 = vrot.slane %v9257_v35, 2 }
0x390a   :  { %v9166_v49 = vmul.f32 1.442695, %v9163_v57  ;;  %11411 = vmatpush3.msk.msra.mxu0 %vm202_vm1, %v9258_v38 }
0x390b   :  { %v9179_v40 = vpop.permute.xlu0 %9178  ;;  %11420 = vmatprep.subr.mxu0 %v12026_v3  ;;  %v9337_v4 = vpop.permute.xlu1 %9336 }
0x390c   :  { %11976 = vpow2.f32 %v9166_v49  ;;  %v9180_v41 = vrot.slane %v9179_v40, 2 }
0x390e   :  { %11406 = vmatpush3.msk.msra.mxu1 %vm202_vm1, %v9180_v41 }
0x390f   :  { %11415 = vmatprep.subr.mxu1 %v12026_v3  ;;  %v9415_v26 = vpop.permute.xlu0 %9414 }
0x3912   :  { %v11975_v59 = vpop.eup %11974 }
0x3913   :  { %v9168_v33 = vsel %vm8824_vm7, %v11975_v59, 0.0 }
0x3914   :  { %9169 = vadd.xlane.f32.xlu0 %v9168_v33 }
0x3916   :  { %v11977_v32 = vpop.eup %11976 }
0x3917   :  { %v9171_v52 = vsel %vm8824_vm7, %v11977_v32, 0.0 }
0x3918   :  { %9172 = vadd.xlane.f32.xlu1 %v9171_v52 }
0x3929   :  { %9334 = vrot.lane.b32.xlu1 %v13736_v60, %s12034_s20 }
0x392a   :  { %9412 = vrot.lane.b32.xlu0 %v13743_v6, %s12034_s20 }
0x39a1   :  { %v9170_v28 = vpop.xlane.xlu0 %9169 }
0x39a2   :  { %11978 = vrcp.f32 %v9170_v28 }
0x39a5   :  { %v9173_v34 = vpop.xlane.xlu1 %9172  ;;  %v9413_v5 = vpop.permute.xlu0 %9412 }
0x39a6   :  { %11980 = vrcp.f32 %v9173_v34 }
0x39a9   :  { %v9335_v55 = vpop.permute.xlu1 %9334 }
0x39ac   :  { %v11979_v53 = vpop.eup %11978 }
0x39ad   :  { %v9176_v11 = vmul.f32 %v11979_v53, %v11975_v59 }
0x39af   :  { %11408 = vmatmul.mubr.msk.f32.vlgmr.msra.gmra.mrb[94].mxu1 %vm8848_vm8, %v9176_v11 }
0x39b0   :  { %v11981_v37 = vpop.eup %11980  ;;  %11416 = vmatpush3.xpose.msk.msra.mxu1 %vm549_vm4, %v9337_v4  ;;  %11417 = vmatprep.mubr.msk.f32.mxu1 %vm12027_vm0, %v12026_v3 }
0x39b1   :  { %v9177_v46 = vmul.f32 %v11981_v37, %v11977_v32  ;;  %11425 = vmatprep.subr.mxu1 %v12026_v3 }
0x39b3   :  { %11413 = vmatmul.mubr.msk.f32.vlgmr.msra.gmra.mrb[98].mxu0 %vm8848_vm8, %v9177_v46  ;;  %11418 = vmatmul.mubr.msk.f32.vlgmr.msra.gmra.mrb[96].mxu1 %vm549_vm4, %v9335_v55 }
0x39b4   :  { %11421 = vmatpush3.xpose.msk.msra.mxu0 %vm549_vm4, %v9415_v26  ;;  %11422 = vmatprep.mubr.msk.f32.mxu0 %vm12027_vm0, %v12026_v3 }
0x39b5   :  { %11430 = vmatprep.subr.mxu0 %v12026_v3  ;;  %11427 = vmatprep.mubr.msk.f32.mxu1 %vm12027_vm0, %v12026_v3 }
0x39b7   :  { %11423 = vmatmul.mubr.msk.f32.vlgmr.msra.gmra.mrb[100].mxu0 %vm549_vm4, %v9413_v5 }
0x39b8   :  { %11432 = vmatprep.mubr.msk.f32.mxu0 %vm12027_vm0, %v12026_v3 }
0x3a82   :  { %v13832_v13 = vpop.f32.mrb[94].mxu1 }
0x3a83   :  { %v11409_v62 = vpop.f32.mrb[95].mxu1 }
0x3a86   :  { %v13834_v9 = vpop.f32.mrb[98].mxu0  ;;  %v9408_v42 = vpop.f32.mrb[96].mxu1 }
0x3a87   :  { %v11414_v48 = vpop.f32.mrb[99].mxu0  ;;  %v11419_v39 = vpop.f32.mrb[97].mxu1  ;;  %v9490_v36 = vsel %vm8824_vm7, %v9408_v42, -inf }
0x3a88   :  { %9491 = vmax.xlane.f32.xlu1 %v9490_v36 }
0x3a8a   :  { %v9486_v22 = vpop.f32.mrb[100].mxu0 }
0x3a8b   :  { %v11424_v50 = vpop.f32.mrb[101].mxu0  ;;  %v9493_v12 = vsel %vm8824_vm7, %v9486_v22, -inf }
0x3a8c   :  { %9494 = vmax.xlane.f32.xlu0 %v9493_v12 }
0x3a99   :  { %9590 = vrot.lane.b32.xlu1 %v13732_v63, %s12034_s20 }
0x3a9d   :  { %9670 = vrot.lane.b32.xlu1 %v13736_v60, %s12035_s21 }
0x3aa2   :  { %9512 = vrot.lane.b32.xlu0 %v13728_v56, %s12034_s20 }
0x3aa6   :  { %9748 = vrot.lane.b32.xlu0 %v13743_v6, %s12035_s21 }
0x3b15   :  { %v9492_v17 = vpop.xlane.xlu1 %9491 }
0x3b16   :  { %v9496_v18 = vsub.f32 %v9408_v42, %v9492_v17  ;;  %v8541_v17 = vld [vmem:[#allocation3 + $0x100] sm:$0xff] }
0x3b18   :  { %v9498_v44 = vmul.f32 1.442695, %v9496_v18  ;;  %v8542_v18 = vld [vmem:[#allocation3 + $0x108] sm:$0xff] }
0x3b19   :  { %v9495_v43 = vpop.xlane.xlu0 %9494  ;;  %v9591_v51 = vpop.permute.xlu1 %9590 }
0x3b1a   :  { %11982 = vpow2.f32 %v9498_v44  ;;  %v9497_v0 = vsub.f32 %v9486_v22, %v9495_v43  ;;  %v9592_v19 = vrot.slane %v9591_v51, 2  ;;  %v11737_v44 = vpack.c.bf16 %v8542_v18, %v8541_v17  ;;  %v8543_v43 = vld [vmem:[#allocation3 + $0x110] sm:$0xff]  ;;  %v8544_v51 = vld [vmem:[#allocation3 + $0x118] sm:$0xff] }
0x3b1c   :  { %v9500_v54 = vmul.f32 1.442695, %v9497_v0  ;;  %11431 = vmatpush3.msk.msra.mxu0 %vm202_vm1, %v9592_v19  ;;  %v11740_v0 = vpack.c.bf16 %v8544_v51, %v8543_v43  ;;  %v8545_v19 = vld [vmem:[#allocation3 + $0x120] sm:$0xff] }
0x3b1d   :  { %v9513_v20 = vpop.permute.xlu0 %9512  ;;  %11440 = vmatprep.subr.mxu0 %v12026_v3  ;;  %v9671_v7 = vpop.permute.xlu1 %9670 }
0x3b1e   :  { %11984 = vpow2.f32 %v9500_v54  ;;  %v9514_v8 = vrot.slane %v9513_v20, 2  ;;  %v8546_v54 = vld [vmem:[#allocation3 + $0x128] sm:$0xff] }
0x3b1f   :  { %v11743_v20 = vpack.c.bf16 %v8546_v54, %v8545_v19 }
0x3b20   :  { %11426 = vmatpush3.msk.msra.mxu1 %vm202_vm1, %v9514_v8  ;;  %v8547_v8 = vld [vmem:[#allocation3 + $0x130] sm:$0xff] }
0x3b21   :  { %11435 = vmatprep.subr.mxu1 %v12026_v3  ;;  %v9749_v23 = vpop.permute.xlu0 %9748 }
0x3b24   :  { %v11983_v31 = vpop.eup %11982 }
0x3b25   :  { %v9502_v61 = vsel %vm8824_vm7, %v11983_v31, 0.0 }
0x3b26   :  { %9503 = vadd.xlane.f32.xlu0 %v9502_v61 }
0x3b28   :  { %v11985_v21 = vpop.eup %11984 }
0x3b29   :  { %v9505_v16 = vsel %vm8824_vm7, %v11985_v21, 0.0 }
0x3b2a   :  { %9506 = vadd.xlane.f32.xlu1 %v9505_v16 }
0x3b3b   :  { %9668 = vrot.lane.b32.xlu1 %v13736_v60, %s12036_s22 }
0x3b3c   :  { %9746 = vrot.lane.b32.xlu0 %v13743_v6, %s12036_s22 }
0x3bb3   :  { %v9504_v24 = vpop.xlane.xlu0 %9503 }
0x3bb4   :  { %11986 = vrcp.f32 %v9504_v24 }
0x3bb7   :  { %v9507_v2 = vpop.xlane.xlu1 %9506  ;;  %v9747_v57 = vpop.permute.xlu0 %9746 }
0x3bb8   :  { %11988 = vrcp.f32 %v9507_v2 }
0x3bbb   :  { %v9669_v6 = vpop.permute.xlu1 %9668 }
0x3bbe   :  { %v11987_v15 = vpop.eup %11986 }
0x3bbf   :  { %v9510_v29 = vmul.f32 %v11987_v15, %v11983_v31  ;;  %v8548_v31 = vld [vmem:[#allocation3 + $0x138] sm:$0xff] }
0x3bc0   :  { %v11746_v61 = vpack.c.bf16 %v8548_v31, %v8547_v8 }
0x3bc1   :  { %11428 = vmatmul.mubr.msk.f32.vlgmr.msra.gmra.mrb[98].mxu1 %vm8848_vm8, %v9510_v29 }
0x3bc2   :  { %v11989_v35 = vpop.eup %11988  ;;  %11436 = vmatpush3.xpose.msk.msra.mxu1 %vm549_vm4, %v9671_v7  ;;  %11437 = vmatprep.mubr.msk.f32.mxu1 %vm12027_vm0, %v12026_v3 }
0x3bc3   :  { %v9511_v60 = vmul.f32 %v11989_v35, %v11985_v21  ;;  %11445 = vmatprep.subr.mxu1 %v12026_v3 }
0x3bc5   :  { %11433 = vmatmul.mubr.msk.f32.vlgmr.msra.gmra.mrb[102].mxu0 %vm8848_vm8, %v9511_v60  ;;  %11438 = vmatmul.mubr.msk.f32.vlgmr.msra.gmra.mrb[100].mxu1 %vm549_vm4, %v9669_v6 }
0x3bc6   :  { %11441 = vmatpush3.xpose.msk.msra.mxu0 %vm549_vm4, %v9749_v23  ;;  %11442 = vmatprep.mubr.msk.f32.mxu0 %vm12027_vm0, %v12026_v3  ;;  %v8552_v23 = vld [vmem:[#allocation2] sm:$0x1] }
0x3bc7   :  { %11450 = vmatprep.subr.mxu0 %v12026_v3  ;;  %11447 = vmatprep.mubr.msk.f32.mxu1 %vm12027_vm0, %v12026_v3 }
0x3bc9   :  { %11443 = vmatmul.mubr.msk.f32.vlgmr.msra.gmra.mrb[104].mxu0 %vm549_vm4, %v9747_v57 }
0x3bca   :  { %11452 = vmatprep.mubr.msk.f32.mxu0 %vm12027_vm0, %v12026_v3 }
0x3c94   :  { %v9586_v38 = vpop.f32.mrb[98].mxu1 }
0x3c95   :  { %v11429_v49 = vpop.f32.mrb[99].mxu1 }
0x3c98   :  { %v9664_v40 = vpop.f32.mrb[102].mxu0  ;;  %v9742_v41 = vpop.f32.mrb[100].mxu1 }
0x3c99   :  { %v11434_v59 = vpop.f32.mrb[103].mxu0  ;;  %v11439_v33 = vpop.f32.mrb[101].mxu1  ;;  %v9824_v32 = vsel %vm8824_vm7, %v9742_v41, -inf }
0x3c9a   :  { %9825 = vmax.xlane.f32.xlu1 %v9824_v32 }
0x3c9c   :  { %v9820_v52 = vpop.f32.mrb[104].mxu0 }
0x3c9d   :  { %v11444_v26 = vpop.f32.mrb[105].mxu0  ;;  %v9827_v4 = vsel %vm8824_vm7, %v9820_v52, -inf }
0x3c9e   :  { %9828 = vmax.xlane.f32.xlu0 %v9827_v4 }
0x3d27   :  { %v9826_v28 = vpop.xlane.xlu1 %9825 }
0x3d28   :  { %v9830_v34 = vsub.f32 %v9742_v41, %v9826_v28 }
0x3d2a   :  { %v9832_v53 = vmul.f32 1.442695, %v9830_v34  ;;  %v8551_v34 = vld [vmem:[%s13952_s16] sm:$0x1] }
0x3d2b   :  { %v9829_v11 = vpop.xlane.xlu0 %9828 }
0x3d2c   :  { %11990 = vpow2.f32 %v9832_v53  ;;  %v9831_v37 = vsub.f32 %v9820_v52, %v9829_v11 }
0x3d2e   :  { %v9834_v46 = vmul.f32 1.442695, %v9831_v37 }
0x3d30   :  { %11992 = vpow2.f32 %v9834_v46 }
0x3d36   :  { %v11991_v55 = vpop.eup %11990 }
0x3d37   :  { %v9836_v5 = vsel %vm8824_vm7, %v11991_v55, 0.0 }
0x3d38   :  { %9837 = vadd.xlane.f32.xlu0 %v9836_v5 }
0x3d3a   :  { %v11993_v62 = vpop.eup %11992 }
0x3d3b   :  { %v9839_v42 = vsel %vm8824_vm7, %v11993_v62, 0.0 }
0x3d3c   :  { %9840 = vadd.xlane.f32.xlu1 %v9839_v42 }
0x3d4d   :  { %9924 = vrot.lane.b32.xlu1 %v13732_v63, %s12036_s22 }
0x3d4e   :  { %9846 = vrot.lane.b32.xlu0 %v13728_v56, %s12036_s22 }
0x3d51   :  { %10004 = vrot.lane.b32.xlu1 %v13832_v13, %s12035_s21 }
0x3d52   :  { %10006 = vrot.lane.b32.xlu0 %v13834_v9, %s12035_s21 }
0x3d55   :  { %10012 = vrot.lane.b32.xlu1 %v9586_v38, %s12033_s1 }
0x3d56   :  { %10014 = vrot.lane.b32.xlu0 %v9664_v40, %s12033_s1 }
0x3dc5   :  { %v9838_v48 = vpop.xlane.xlu0 %9837 }
0x3dc6   :  { %11994 = vrcp.f32 %v9838_v48 }
0x3dc9   :  { %v9847_v39 = vpop.permute.xlu0 %9846  ;;  %v9841_v36 = vpop.xlane.xlu1 %9840 }
0x3dca   :  { %v9848_v22 = vrot.slane %v9847_v39, 2  ;;  %11996 = vrcp.f32 %v9841_v36 }
0x3dcc   :  { %11446 = vmatpush3.msk.msra.mxu1 %vm202_vm1, %v9848_v22 }
0x3dcd   :  { %v9925_v63 = vpop.permute.xlu1 %9924  ;;  %11736 = vmatprep.subr.bf16.mxu1 %v12025_v1  ;;  %v10007_v15 = vpop.permute.xlu0 %10006 }
0x3dce   :  { %v9926_v56 = vrot.slane %v9925_v63, 2 }
0x3dd0   :  { %v11995_v13 = vpop.eup %11994  ;;  %11451 = vmatpush3.msk.msra.mxu0 %vm202_vm1, %v9926_v56 }
0x3dd1   :  { %v9844_v9 = vmul.f32 %v11995_v13, %v11991_v55  ;;  %11474 = vmatprep.subr.mxu0 %v12026_v3  ;;  %v10005_v2 = vpop.permute.xlu1 %10004  ;;  %v10015_v35 = vpop.permute.xlu0 %10014 }
0x3dd2   :  { %v10026_v6 = vsel %vm549_vm4, %v13792_v10, %v10005_v2 }
0x3dd3   :  { %11448 = vmatmul.mubr.msk.f32.vlgmr.msra.gmra.mrb[102].mxu1 %vm8848_vm8, %v9844_v9 }
0x3dd4   :  { %v11997_v50 = vpop.eup %11996  ;;  %11471 = vmatprep.mubr.msk.f32.mxu1 %vm12027_vm0, %v12026_v3  ;;  %11738 = vmatpush3.bf16.msra.mxu1 %v11737_v44 }
0x3dd5   :  { %v9845_v12 = vmul.f32 %v11997_v50, %v11993_v62  ;;  %11739 = vmatprep.subr.bf16.mxu1 %v12025_v1  ;;  %v10013_v29 = vpop.permute.xlu1 %10012 }
0x3dd6   :  { %v10028_v38 = vsel %vm2484_vm10, %v10026_v6, %v10013_v29 }
0x3dd7   :  { %11453 = vmatmul.mubr.msk.f32.vlgmr.msra.gmra.mrb[106].mxu0 %vm8848_vm8, %v9845_v12 }
0x3dd8   :  { %11476 = vmatprep.mubr.msk.f32.mxu0 %vm12027_vm0, %v12026_v3  ;;  %11741 = vmatpush3.bf16.msra.mxu1 %v11740_v0 }
0x3dd9   :  { %11742 = vmatprep.subr.bf16.mxu1 %v12025_v1 }
0x3ddc   :  { %11744 = vmatpush3.bf16.msra.mxu1 %v11743_v20 }
0x3ddd   :  { %11745 = vmatprep.subr.bf16.mxu1 %v12025_v1  ;;  %v10027_v1 = vsel %vm549_vm4, %v13794_v25, %v10007_v15  ;;  %v10589_v25 = vld [vmem:[%s13943_s7 + $0x4] ss:$0 sm:$0xff] }
0x3dde   :  { %v10029_v57 = vsel %vm2484_vm10, %v10027_v1, %v10015_v35 }
0x3de0   :  { %11747 = vmatpush3.bf16.msra.mxu1 %v11746_v61 }
0x3ea6   :  { %v9920_v21 = vpop.f32.mrb[102].mxu1 }
0x3ea7   :  { %10020 = vrot.lane.b32.xlu1 %v9920_v21, %s12031_s0  ;;  %v11449_v16 = vpop.f32.mrb[103].mxu1 }
0x3eaa   :  { %v9998_v7 = vpop.f32.mrb[106].mxu0 }
0x3eab   :  { %10022 = vrot.lane.b32.xlu0 %v9998_v7, %s12031_s0  ;;  %v11454_v24 = vpop.f32.mrb[107].mxu0  ;;  %10135 = vperm.xlu1 %11805, %v8552_v23  }
0x3f19   :  { %v10021_v60 = vpop.permute.xlu1 %10020 }
0x3f1a   :  { %v10030_v40 = vsel %vm2489_vm11, %v10028_v38, %v10021_v60 }
0x3f1d   :  { %v10023_v49 = vpop.permute.xlu0 %10022 }
0x3f1e   :  { %v10031_v41 = vsel %vm2489_vm11, %v10029_v57, %v10023_v49 }
0x3f1f   :  { %v10040_v59 = vcombine.low %v10030_v40, %v10031_v41 }
0x3f21   :  { %v10047_v33 = vrot.slane %v10040_v59, %v12170_v14 }
0x3f23   :  { %11472 = vmatmul.mubr.msk.f32.vlgmr.msra.gmra.mrb[104].mxu1 %vm380_vm3, %v10047_v33  ;;  %vm10293_vm3 = vcmask 516096  }
0x3ff6   :  { %v10116_v32 = vpop.f32.mrb[104].mxu1 }
0x3ff7   :  { %v10117_v10 = vadd.f32 %v10589_v25, %v10116_v32  ;;  %v11473_v52 = vpop.f32.mrb[105].mxu1 }
0x3ff9   :  { %v10127_v26 = vrot.slane %v10117_v10, %v12170_v14  ;;  %v10136_v14 = vpop.permute.xlu1 %10135 }
0x3ffa   :  { %v10141_v47 = vrot.slane %v10136_v14, %v12288_v30 }
0x3ffb   :  { %v10128_v4 = vcombine.high %v10127_v26, %v10127_v26  ;;  %v10131_v28 = vadd.f32 %v10127_v26, %v8519_v58 }
0x3ffd   :  { %v10132_v53 = vadd.f32 %v10128_v4, %v8520_v27  ;;  %11475 = vmatpush3.msk.msra.mxu0 %vm202_vm1, %v10131_v28 }
0x3ffe   :  { %11477 = vmatmul.mubr.msk.f32.vlgmr.msra.gmra.mrb[108].mxu0 %vm8848_vm8, %v8551_v34  ;;  %11479 = vmatprep.subr.mxu0 %v12026_v3 }
0x3fff   :  { %11480 = vmatpush3.msk.msra.mxu0 %vm202_vm1, %v10132_v53  ;;  %11481 = vmatprep.mubr.msk.f32.mxu0 %vm12027_vm0, %v12026_v3 }
0x4002   :  { %11482 = vmatmul.mubr.msk.f32.vlgmr.msra.gmra.mrb[110].mxu0 %vm8848_vm8, %v8551_v34 }
0x40d1   :  { %v10214_v58 = vpop.f32.mrb[108].mxu0 }
0x40d2   :  { %v10215_v11 = vadd.f32 %v10214_v58, %v10141_v47  ;;  %v11478_v45 = vpop.f32.mrb[109].mxu0 }
0x40d4   :  { %v10291_v27 = vmax.f32 %v10215_v11, 0.0 }
0x40d5   :  { %v10287_v37 = vpop.f32.mrb[110].mxu0 }
0x40d6   :  { %10294 = vst.msk [vmem:[%s13954_s18] sm:$0x1] %vm10293_vm3, %v10291_v27  ;;  %v10288_v46 = vadd.f32 %v10287_v37, %v10141_v47  ;;  %v11483_v55 = vpop.f32.mrb[111].mxu0 }
0x40d8   :  { %v10292_v5 = vmax.f32 %v10288_v46, 0.0 }
0x40da   :  { %10295 = vst.msk [vmem:[%s13954_s18 + $0x1] sm:$0x1] %vm10293_vm3, %v10292_v5 }
0x40db   :  { %10300 = vsyncpa [#allocation4], 1 }

</bundles_post_ra>
